<compile_context>
chip_gen: v5e
topology: v5e:2x2
jax: 0.10.0
libtpu: 0.0.40
codegen_flags: <defaults>
</compile_context>

<pallas_src>
import functools

import numpy as np
import jax
import jax.numpy as jnp
from jax import lax
from jax.experimental import pallas as pl
from jax.experimental.pallas import tpu as pltpu

BN_EPS = 1e-5
LEAKY_SLOPE = 0.01
OUT_PAD = 128          # lane-dense combined head output width
BATCH_ALIGN = 16       # bf16 sublane packing -> pad batch to a multiple of 16


def _conv_out(v, k, s):
    return (v - k) // s + 1


def build_dims(input_shape, n_actions):
    c, h, w = input_shape
    oh1, ow1 = _conv_out(h, 8, 4), _conv_out(w, 8, 4)
    oh2, ow2 = _conv_out(oh1, 4, 2), _conv_out(ow1, 4, 2)
    oh3, ow3 = _conv_out(oh2, 3, 1), _conv_out(ow2, 3, 1)
    assert min(oh1, ow1, oh2, ow2, oh3, ow3) >= 1, "input too small for conv stack"
    assert n_actions + 1 <= OUT_PAD, "n_actions too large for single output slab"
    return dict(C=c, H=h, W=w, OH1=oh1, OW1=ow1, OH2=oh2, OW2=ow2,
                OH3=oh3, OW3=ow3, CONV=64 * oh3 * ow3, HID=516, A=n_actions)


# ---------------------------------------------------------------------------
# In-kernel helper: conv (kh-shifted banded matmul) + training-mode BN + ReLU
# ---------------------------------------------------------------------------
def _conv_bn_relu(y, bw_ref, gamma, beta, *, k, s, oh_out, ow_out, oc,
                  npad, n_real):
    """One conv + BatchNorm(train) + ReLU layer on a layout-A activation.

    y:      (H_in*npad, W_in*C_in) bf16, rows ordered (h, n), lanes (w, c).
    bw_ref: (k, W_in*C_in, ow_out*oc) bf16 block-banded weight, one slab per kh.
    Returns (oh_out*npad, ow_out*oc) f32, same layout convention.
    """
    m_out = oh_out * npad
    acc = jnp.zeros((m_out, ow_out * oc), jnp.float32)
    for kh in range(k):
        if s == 1:
            band = y[kh * npad:(kh + oh_out) * npad, :]          # contiguous
        else:
            band = jnp.concatenate(
                [y[(s * oh + kh) * npad:(s * oh + kh + 1) * npad, :]
                 for oh in range(oh_out)], axis=0)               # tile-aligned blocks
        acc = acc + jnp.dot(band, bw_ref[kh], preferred_element_type=jnp.float32)

    # BatchNorm batch statistics on the MXU: masked ones-row matmul (mask
    # zeroes the batch-padding rows), then a tiny per-channel fold over the
    # ow lane blocks.  All statistics math stays in f32.
    lane = lax.broadcasted_iota(jnp.int32, (1, m_out), 1)
    mask = ((lane % npad) < n_real).astype(jnp.float32)
    s1 = jnp.dot(mask, acc, preferred_element_type=jnp.float32)          # (1, ow*oc)
    s2 = jnp.dot(mask, acc * acc, preferred_element_type=jnp.float32)    # (1, ow*oc)
    s1c, s2c = s1[:, :oc], s2[:, :oc]
    for i in range(1, ow_out):
        s1c = s1c + s1[:, i * oc:(i + 1) * oc]
        s2c = s2c + s2[:, i * oc:(i + 1) * oc]
    cnt = jnp.float32(n_real * oh_out * ow_out)
    mean = s1c / cnt
    var = s2c / cnt - mean * mean                  # biased variance (BN training)
    scale = gamma * lax.rsqrt(var + BN_EPS)        # (1, oc)
    shift = beta - mean * scale
    if ow_out > 1:
        scale = jnp.concatenate([scale] * ow_out, axis=1)
        shift = jnp.concatenate([shift] * ow_out, axis=1)
    return jnp.maximum(acc * scale + shift, 0.0)


# ---------------------------------------------------------------------------
# The fused kernel
# ---------------------------------------------------------------------------
def _a2c_fused_kernel(x_ref, b1_ref, g1_ref, be1_ref,
                      b2_ref, g2_ref, be2_ref,
                      b3_ref, g3_ref, be3_ref,
                      whc_ref, bh1_ref, w2_ref, b2h_ref,
                      out_ref, *, dims):
    n, npad = dims["N"], dims["NPAD"]

    # conv1 (k=8, s=4) + BN + ReLU, directly from the layout-A input.
    y1 = _conv_bn_relu(x_ref[...], b1_ref, g1_ref[...], be1_ref[...],
                       k=8, s=4, oh_out=dims["OH1"], ow_out=dims["OW1"], oc=32,
                       npad=npad, n_real=n)
    # conv2 (k=4, s=2) + BN + ReLU.  Cast to bf16 once per layer.
    y2 = _conv_bn_relu(y1.astype(jnp.bfloat16), b2_ref, g2_ref[...], be2_ref[...],
                       k=4, s=2, oh_out=dims["OH2"], ow_out=dims["OW2"], oc=64,
                       npad=npad, n_real=n)
    # conv3 (k=3, s=1) + BN + ReLU.
    y3 = _conv_bn_relu(y2.astype(jnp.bfloat16), b3_ref, g3_ref[...], be3_ref[...],
                       k=3, s=1, oh_out=dims["OH3"], ow_out=dims["OW3"], oc=64,
                       npad=npad, n_real=n)

    # Heads: the NCHW flatten + joint [policy|value] first Linear is realized
    # as a sum over the OH3 row bands of y3 (whc rows pre-permuted in glue).
    y3b = y3.astype(jnp.bfloat16)
    hid2 = 2 * dims["HID"]
    h = jnp.zeros((npad, hid2), jnp.float32)
    for oh in range(dims["OH3"]):
        h = h + jnp.dot(y3b[oh * npad:(oh + 1) * npad, :], whc_ref[oh],
                        preferred_element_type=jnp.float32)
    h = h + bh1_ref[...]
    h = jnp.where(h >= 0.0, h, LEAKY_SLOPE * h)              # LeakyReLU(0.01)

    # Second Linear of both heads fused into one block-diagonal matmul; one
    # lane-dense (npad, 128) f32 store: cols [0,A) = policy, col A = value.
    out = jnp.dot(h.astype(jnp.bfloat16), w2_ref[...],
                  preferred_element_type=jnp.float32) + b2h_ref[...]
    out_ref[...] = out


# ---------------------------------------------------------------------------
# Parameter re-layout (one-time, numpy) and input re-layout (XLA glue)
# ---------------------------------------------------------------------------
def _banded_conv_weight(w, win, stride):
    """(OC, Cin, k, k) PyTorch conv weight -> (k, win*Cin, wout*OC) bf16 banded."""
    w = np.asarray(w, dtype=np.float32)
    oc, cin, k, _ = w.shape
    wout = _conv_out(win, k, stride)
    b = np.zeros((k, win * cin, wout * oc), np.float32)
    for kh in range(k):
        for kw in range(k):
            wt = w[:, :, kh, kw].T                            # (cin, oc)
            for ow in range(wout):
                wi = stride * ow + kw
                b[kh, wi * cin:(wi + 1) * cin, ow * oc:(ow + 1) * oc] = wt
    return jnp.asarray(b, dtype=jnp.bfloat16)


def _head1_weight(p_w1, v_w1, oh3, ow3, oc=64):
    """Joint [policy|value] first Linear, rows re-permuted to layout A."""
    wcat = np.concatenate([np.asarray(p_w1), np.asarray(v_w1)], axis=0)  # (2*hid, conv)
    hid2 = wcat.shape[0]
    w = wcat.reshape(hid2, oc, oh3, ow3)        # flatten columns were (c, oh, ow)
    w = np.transpose(w, (2, 3, 1, 0)).reshape(oh3, ow3 * oc, hid2)
    return jnp.asarray(w, dtype=jnp.bfloat16)


def _head2_weight(p_w2, p_b2, v_w2, v_b2, hid, a):
    """Block-diagonal [policy|value] second Linear -> lane-dense (2*hid, 128)."""
    w = np.zeros((2 * hid, OUT_PAD), np.float32)
    w[:hid, :a] = np.asarray(p_w2).T
    w[hid:, a] = np.asarray(v_w2)[0, :]
    b = np.zeros((1, OUT_PAD), np.float32)
    b[0, :a] = np.asarray(p_b2)
    b[0, a] = np.asarray(v_b2)[0]
    return jnp.asarray(w, jnp.bfloat16), jnp.asarray(b, jnp.float32)


def prepare_kernel_params(p, dims):
    hid, a = dims["HID"], dims["A"]
    w2bd, b2h = _head2_weight(p["p_w2"], p["p_b2"], p["v_w2"], p["v_b2"], hid, a)
    return {
        "b1": _banded_conv_weight(p["c1_w"], dims["W"], 4),
        "g1": p["c1_g"].reshape(1, -1).astype(jnp.float32),
        "be1": p["c1_be"].reshape(1, -1).astype(jnp.float32),
        "b2": _banded_conv_weight(p["c2_w"], dims["OW1"], 2),
        "g2": p["c2_g"].reshape(1, -1).astype(jnp.float32),
        "be2": p["c2_be"].reshape(1, -1).astype(jnp.float32),
        "b3": _banded_conv_weight(p["c3_w"], dims["OW2"], 1),
        "g3": p["c3_g"].reshape(1, -1).astype(jnp.float32),
        "be3": p["c3_be"].reshape(1, -1).astype(jnp.float32),
        "whc": _head1_weight(p["p_w1"], p["v_w1"], dims["OH3"], dims["OW3"]),
        "bh1": jnp.concatenate([p["p_b1"], p["v_b1"]]).reshape(1, -1).astype(jnp.float32),
        "w2bd": w2bd, "b2h": b2h,
    }


def _to_layout_a(x, npad):
    """(N, C, H, W) f32 -> (H*npad, W*C) bf16: rows (h, n), lanes (w, c)."""
    n, c, h, w = x.shape
    xp = jnp.pad(x, ((0, npad - n), (0, 0), (0, 0), (0, 0)))
    return xp.transpose(2, 0, 3, 1).reshape(h * npad, w * c).astype(jnp.bfloat16)


def init_params(key, input_shape, n_actions):
    """Parameters in PyTorch layout (conv: (OC, Cin, k, k), linear: (out, in))."""
    dims = build_dims(input_shape, n_actions)
    c, conv, hid = input_shape[0], dims["CONV"], dims["HID"]
    ks = iter(jax.random.split(key, 20))

    def w(shape, scale=0.05):
        return scale * jax.random.normal(next(ks), shape, dtype=jnp.float32)

    params = {
        # Conv2d biases omitted: exactly cancelled by training-mode BatchNorm.
        "c1_w": w((32, c, 8, 8)),  "c1_g": 1.0 + w((32,)), "c1_be": w((32,)),
        "c2_w": w((64, 32, 4, 4)), "c2_g": 1.0 + w((64,)), "c2_be": w((64,)),
        "c3_w": w((64, 64, 3, 3)), "c3_g": 1.0 + w((64,)), "c3_be": w((64,)),
        "p_w1": w((hid, conv)), "p_b1": w((hid,)),
        "p_w2": w((n_actions, hid)), "p_b2": w((n_actions,)),
        "v_w1": w((hid, conv)), "v_b1": w((hid,)),
        "v_w2": w((1, hid)), "v_b2": w((1,)),
    }
    return params, dims


# ---------------------------------------------------------------------------
# Forward: one pallas_call, no grid, whole-array VMEM residency
# ---------------------------------------------------------------------------
def a2c_forward(kp, x, dims):
    """x: (N, C, H, W) f32 -> (act_v (N, n_actions), value (N, 1))."""
    n = x.shape[0]
    npad = ((n + BATCH_ALIGN - 1) // BATCH_ALIGN) * BATCH_ALIGN
    xa = _to_layout_a(x, npad)

    kernel = functools.partial(_a2c_fused_kernel, dims={**dims, "N": n, "NPAD": npad})
    operands = (xa, kp["b1"], kp["g1"], kp["be1"],
                kp["b2"], kp["g2"], kp["be2"],
                kp["b3"], kp["g3"], kp["be3"],
                kp["whc"], kp["bh1"], kp["w2bd"], kp["b2h"])

    vmem_spec = pl.BlockSpec(memory_space=pltpu.MemorySpace.VMEM)
    out = pl.pallas_call(
        kernel,
        out_shape=jax.ShapeDtypeStruct((npad, OUT_PAD), jnp.float32),
        in_specs=[vmem_spec] * len(operands),
        out_specs=vmem_spec,
        compiler_params=pltpu.CompilerParams(vmem_limit_bytes=64 * 1024 * 1024),
    )(*operands)

    a = dims["A"]
    return out[:n, :a], out[:n, a:a + 1]


# ---------------------------------------------------------------------------
# Pure-JAX reference (same bf16 operand rounding, f32 math) for a tolerance check
# ---------------------------------------------------------------------------
def _bf(v):
    return v.astype(jnp.bfloat16).astype(jnp.float32)


def a2c_reference(p, x):
    def conv(v, w, s):
        return lax.conv_general_dilated(_bf(v), _bf(w), (s, s), "VALID",
                                        dimension_numbers=("NCHW", "OIHW", "NCHW"),
                                        precision=lax.Precision.HIGHEST)

    def bn_relu(y, g, b):
        mean = jnp.mean(y, axis=(0, 2, 3), keepdims=True)
        var = jnp.var(y, axis=(0, 2, 3), keepdims=True)      # biased (training mode)
        yn = (y - mean) * lax.rsqrt(var + BN_EPS)
        return jnp.maximum(g.reshape(1, -1, 1, 1) * yn + b.reshape(1, -1, 1, 1), 0.0)

    y = bn_relu(conv(x, p["c1_w"], 4), p["c1_g"], p["c1_be"])
    y = bn_relu(conv(y, p["c2_w"], 2), p["c2_g"], p["c2_be"])
    y = bn_relu(conv(y, p["c3_w"], 1), p["c3_g"], p["c3_be"])
    flat = y.reshape(y.shape[0], -1)

    def head(w1, b1, w2, b2):
        h = jnp.dot(_bf(flat), _bf(w1).T, precision=lax.Precision.HIGHEST) + b1
        h = jnp.where(h >= 0.0, h, LEAKY_SLOPE * h)
        return jnp.dot(_bf(h), _bf(w2).T, precision=lax.Precision.HIGHEST) + b2

    return (head(p["p_w1"], p["p_b1"], p["p_w2"], p["p_b2"]),
            head(p["v_w1"], p["v_b1"], p["v_w2"], p["v_b2"]))


if __name__ == "__main__":
    # Smallest spatial size that survives the 8/4 -> 4/2 -> 3/1 conv stack.
    N, C, H, W = 2, 4, 36, 36
    n_actions = 6

    key = jax.random.PRNGKey(0)
    k_params, k_x = jax.random.split(key)
    params, dims = init_params(k_params, (C, H, W), n_actions)
    kparams = prepare_kernel_params(params, dims)
    x = jax.random.normal(k_x, (N, C, H, W), dtype=jnp.float32)

    fwd = jax.jit(functools.partial(a2c_forward, dims=dims))
    act_v, value = fwd(kparams, x)
    jax.block_until_ready((act_v, value))

    assert act_v.shape == (N, n_actions) and value.shape == (N, 1)
    assert bool(jnp.all(jnp.isfinite(act_v))) and bool(jnp.all(jnp.isfinite(value)))

    ref_act, ref_val = a2c_reference(params, x)
    np.testing.assert_allclose(np.asarray(act_v), np.asarray(ref_act), rtol=5e-2, atol=5e-3)
    np.testing.assert_allclose(np.asarray(value), np.asarray(ref_val), rtol=5e-2, atol=5e-3)

    print("KERNEL_OK")
</pallas_src>

<mosaic_0001>
module attributes {stable_mosaic.version = 11 : i64} {
  func.func @_a2c_fused_kernel(%arg0: memref<576x144xbf16, #tpu.memory_space<vmem>>, %arg1: memref<8x144x256xbf16, #tpu.memory_space<vmem>>, %arg2: memref<1x32xf32, #tpu.memory_space<vmem>>, %arg3: memref<1x32xf32, #tpu.memory_space<vmem>>, %arg4: memref<4x256x192xbf16, #tpu.memory_space<vmem>>, %arg5: memref<1x64xf32, #tpu.memory_space<vmem>>, %arg6: memref<1x64xf32, #tpu.memory_space<vmem>>, %arg7: memref<3x192x64xbf16, #tpu.memory_space<vmem>>, %arg8: memref<1x64xf32, #tpu.memory_space<vmem>>, %arg9: memref<1x64xf32, #tpu.memory_space<vmem>>, %arg10: memref<1x64x1032xbf16, #tpu.memory_space<vmem>>, %arg11: memref<1x1032xf32, #tpu.memory_space<vmem>>, %arg12: memref<1032x128xbf16, #tpu.memory_space<vmem>>, %arg13: memref<1x128xf32, #tpu.memory_space<vmem>>, %arg14: memref<16x128xf32, #tpu.memory_space<vmem>>) attributes {dimension_semantics = [], scalar_prefetch = 0 : i64, scratch_operands = 0 : i64, tpu.core_type = #tpu.core_type<tc>} {
    %c0 = arith.constant 0 : index
    %c0_0 = arith.constant 0 : index
    %0 = vector.load %arg0[%c0, %c0_0] : memref<576x144xbf16, #tpu.memory_space<vmem>>, vector<576x144xbf16>
    %c0_1 = arith.constant 0 : index
    %c0_2 = arith.constant 0 : index
    %1 = vector.load %arg2[%c0_1, %c0_2] : memref<1x32xf32, #tpu.memory_space<vmem>>, vector<1x32xf32>
    %c0_3 = arith.constant 0 : index
    %c0_4 = arith.constant 0 : index
    %2 = vector.load %arg3[%c0_3, %c0_4] : memref<1x32xf32, #tpu.memory_space<vmem>>, vector<1x32xf32>
    %cst = arith.constant 0.000000e+00 : f32
    %3 = vector.broadcast %cst : f32 to vector<128x256xf32>
    %4 = vector.extract_strided_slice %0 {offsets = [0, 0], sizes = [16, 144], strides = [1, 1]} : vector<576x144xbf16> to vector<16x144xbf16>
    %5 = vector.extract_strided_slice %0 {offsets = [64, 0], sizes = [16, 144], strides = [1, 1]} : vector<576x144xbf16> to vector<16x144xbf16>
    %6 = vector.extract_strided_slice %0 {offsets = [128, 0], sizes = [16, 144], strides = [1, 1]} : vector<576x144xbf16> to vector<16x144xbf16>
    %7 = vector.extract_strided_slice %0 {offsets = [192, 0], sizes = [16, 144], strides = [1, 1]} : vector<576x144xbf16> to vector<16x144xbf16>
    %8 = vector.extract_strided_slice %0 {offsets = [256, 0], sizes = [16, 144], strides = [1, 1]} : vector<576x144xbf16> to vector<16x144xbf16>
    %9 = vector.extract_strided_slice %0 {offsets = [320, 0], sizes = [16, 144], strides = [1, 1]} : vector<576x144xbf16> to vector<16x144xbf16>
    %10 = vector.extract_strided_slice %0 {offsets = [384, 0], sizes = [16, 144], strides = [1, 1]} : vector<576x144xbf16> to vector<16x144xbf16>
    %11 = vector.extract_strided_slice %0 {offsets = [448, 0], sizes = [16, 144], strides = [1, 1]} : vector<576x144xbf16> to vector<16x144xbf16>
    %12 = tpu.concatenate %4, %5, %6, %7, %8, %9, %10, %11 in 0 : vector<16x144xbf16>, vector<16x144xbf16>, vector<16x144xbf16>, vector<16x144xbf16>, vector<16x144xbf16>, vector<16x144xbf16>, vector<16x144xbf16>, vector<16x144xbf16> -> vector<128x144xbf16>
    %c0_5 = arith.constant 0 : index
    %c0_6 = arith.constant 0 : index
    %c0_7 = arith.constant 0 : index
    %13 = vector.load %arg1[%c0_5, %c0_6, %c0_7] : memref<8x144x256xbf16, #tpu.memory_space<vmem>>, vector<1x144x256xbf16>
    %14 = vector.shape_cast %13 : vector<1x144x256xbf16> to vector<144x256xbf16>
    %cst_8 = arith.constant dense<0.000000e+00> : vector<128x256xf32>
    %15 = tpu.matmul %12, %14, %cst_8 {dimension_numbers = #tpu.dot_dimension_numbers<[1], [0], [0], [1], [0, 0, 1, 1], [], []>} : vector<128x144xbf16>, vector<144x256xbf16>, vector<128x256xf32> -> vector<128x256xf32>
    %16 = arith.addf %3, %15 : vector<128x256xf32>
    %17 = vector.extract_strided_slice %0 {offsets = [16, 0], sizes = [16, 144], strides = [1, 1]} : vector<576x144xbf16> to vector<16x144xbf16>
    %18 = vector.extract_strided_slice %0 {offsets = [80, 0], sizes = [16, 144], strides = [1, 1]} : vector<576x144xbf16> to vector<16x144xbf16>
    %19 = vector.extract_strided_slice %0 {offsets = [144, 0], sizes = [16, 144], strides = [1, 1]} : vector<576x144xbf16> to vector<16x144xbf16>
    %20 = vector.extract_strided_slice %0 {offsets = [208, 0], sizes = [16, 144], strides = [1, 1]} : vector<576x144xbf16> to vector<16x144xbf16>
    %21 = vector.extract_strided_slice %0 {offsets = [272, 0], sizes = [16, 144], strides = [1, 1]} : vector<576x144xbf16> to vector<16x144xbf16>
    %22 = vector.extract_strided_slice %0 {offsets = [336, 0], sizes = [16, 144], strides = [1, 1]} : vector<576x144xbf16> to vector<16x144xbf16>
    %23 = vector.extract_strided_slice %0 {offsets = [400, 0], sizes = [16, 144], strides = [1, 1]} : vector<576x144xbf16> to vector<16x144xbf16>
    %24 = vector.extract_strided_slice %0 {offsets = [464, 0], sizes = [16, 144], strides = [1, 1]} : vector<576x144xbf16> to vector<16x144xbf16>
    %25 = tpu.concatenate %17, %18, %19, %20, %21, %22, %23, %24 in 0 : vector<16x144xbf16>, vector<16x144xbf16>, vector<16x144xbf16>, vector<16x144xbf16>, vector<16x144xbf16>, vector<16x144xbf16>, vector<16x144xbf16>, vector<16x144xbf16> -> vector<128x144xbf16>
    %c1 = arith.constant 1 : index
    %c0_9 = arith.constant 0 : index
    %c0_10 = arith.constant 0 : index
    %26 = vector.load %arg1[%c1, %c0_9, %c0_10] : memref<8x144x256xbf16, #tpu.memory_space<vmem>>, vector<1x144x256xbf16>
    %27 = vector.shape_cast %26 : vector<1x144x256xbf16> to vector<144x256xbf16>
    %cst_11 = arith.constant dense<0.000000e+00> : vector<128x256xf32>
    %28 = tpu.matmul %25, %27, %cst_11 {dimension_numbers = #tpu.dot_dimension_numbers<[1], [0], [0], [1], [0, 0, 1, 1], [], []>} : vector<128x144xbf16>, vector<144x256xbf16>, vector<128x256xf32> -> vector<128x256xf32>
    %29 = arith.addf %16, %28 : vector<128x256xf32>
    %30 = vector.extract_strided_slice %0 {offsets = [32, 0], sizes = [16, 144], strides = [1, 1]} : vector<576x144xbf16> to vector<16x144xbf16>
    %31 = vector.extract_strided_slice %0 {offsets = [96, 0], sizes = [16, 144], strides = [1, 1]} : vector<576x144xbf16> to vector<16x144xbf16>
    %32 = vector.extract_strided_slice %0 {offsets = [160, 0], sizes = [16, 144], strides = [1, 1]} : vector<576x144xbf16> to vector<16x144xbf16>
    %33 = vector.extract_strided_slice %0 {offsets = [224, 0], sizes = [16, 144], strides = [1, 1]} : vector<576x144xbf16> to vector<16x144xbf16>
    %34 = vector.extract_strided_slice %0 {offsets = [288, 0], sizes = [16, 144], strides = [1, 1]} : vector<576x144xbf16> to vector<16x144xbf16>
    %35 = vector.extract_strided_slice %0 {offsets = [352, 0], sizes = [16, 144], strides = [1, 1]} : vector<576x144xbf16> to vector<16x144xbf16>
    %36 = vector.extract_strided_slice %0 {offsets = [416, 0], sizes = [16, 144], strides = [1, 1]} : vector<576x144xbf16> to vector<16x144xbf16>
    %37 = vector.extract_strided_slice %0 {offsets = [480, 0], sizes = [16, 144], strides = [1, 1]} : vector<576x144xbf16> to vector<16x144xbf16>
    %38 = tpu.concatenate %30, %31, %32, %33, %34, %35, %36, %37 in 0 : vector<16x144xbf16>, vector<16x144xbf16>, vector<16x144xbf16>, vector<16x144xbf16>, vector<16x144xbf16>, vector<16x144xbf16>, vector<16x144xbf16>, vector<16x144xbf16> -> vector<128x144xbf16>
    %c2 = arith.constant 2 : index
    %c0_12 = arith.constant 0 : index
    %c0_13 = arith.constant 0 : index
    %39 = vector.load %arg1[%c2, %c0_12, %c0_13] : memref<8x144x256xbf16, #tpu.memory_space<vmem>>, vector<1x144x256xbf16>
    %40 = vector.shape_cast %39 : vector<1x144x256xbf16> to vector<144x256xbf16>
    %cst_14 = arith.constant dense<0.000000e+00> : vector<128x256xf32>
    %41 = tpu.matmul %38, %40, %cst_14 {dimension_numbers = #tpu.dot_dimension_numbers<[1], [0], [0], [1], [0, 0, 1, 1], [], []>} : vector<128x144xbf16>, vector<144x256xbf16>, vector<128x256xf32> -> vector<128x256xf32>
    %42 = arith.addf %29, %41 : vector<128x256xf32>
    %43 = vector.extract_strided_slice %0 {offsets = [48, 0], sizes = [16, 144], strides = [1, 1]} : vector<576x144xbf16> to vector<16x144xbf16>
    %44 = vector.extract_strided_slice %0 {offsets = [112, 0], sizes = [16, 144], strides = [1, 1]} : vector<576x144xbf16> to vector<16x144xbf16>
    %45 = vector.extract_strided_slice %0 {offsets = [176, 0], sizes = [16, 144], strides = [1, 1]} : vector<576x144xbf16> to vector<16x144xbf16>
    %46 = vector.extract_strided_slice %0 {offsets = [240, 0], sizes = [16, 144], strides = [1, 1]} : vector<576x144xbf16> to vector<16x144xbf16>
    %47 = vector.extract_strided_slice %0 {offsets = [304, 0], sizes = [16, 144], strides = [1, 1]} : vector<576x144xbf16> to vector<16x144xbf16>
    %48 = vector.extract_strided_slice %0 {offsets = [368, 0], sizes = [16, 144], strides = [1, 1]} : vector<576x144xbf16> to vector<16x144xbf16>
    %49 = vector.extract_strided_slice %0 {offsets = [432, 0], sizes = [16, 144], strides = [1, 1]} : vector<576x144xbf16> to vector<16x144xbf16>
    %50 = vector.extract_strided_slice %0 {offsets = [496, 0], sizes = [16, 144], strides = [1, 1]} : vector<576x144xbf16> to vector<16x144xbf16>
    %51 = tpu.concatenate %43, %44, %45, %46, %47, %48, %49, %50 in 0 : vector<16x144xbf16>, vector<16x144xbf16>, vector<16x144xbf16>, vector<16x144xbf16>, vector<16x144xbf16>, vector<16x144xbf16>, vector<16x144xbf16>, vector<16x144xbf16> -> vector<128x144xbf16>
    %c3 = arith.constant 3 : index
    %c0_15 = arith.constant 0 : index
    %c0_16 = arith.constant 0 : index
    %52 = vector.load %arg1[%c3, %c0_15, %c0_16] : memref<8x144x256xbf16, #tpu.memory_space<vmem>>, vector<1x144x256xbf16>
    %53 = vector.shape_cast %52 : vector<1x144x256xbf16> to vector<144x256xbf16>
    %cst_17 = arith.constant dense<0.000000e+00> : vector<128x256xf32>
    %54 = tpu.matmul %51, %53, %cst_17 {dimension_numbers = #tpu.dot_dimension_numbers<[1], [0], [0], [1], [0, 0, 1, 1], [], []>} : vector<128x144xbf16>, vector<144x256xbf16>, vector<128x256xf32> -> vector<128x256xf32>
    %55 = arith.addf %42, %54 : vector<128x256xf32>
    %56 = vector.extract_strided_slice %0 {offsets = [64, 0], sizes = [16, 144], strides = [1, 1]} : vector<576x144xbf16> to vector<16x144xbf16>
    %57 = vector.extract_strided_slice %0 {offsets = [128, 0], sizes = [16, 144], strides = [1, 1]} : vector<576x144xbf16> to vector<16x144xbf16>
    %58 = vector.extract_strided_slice %0 {offsets = [192, 0], sizes = [16, 144], strides = [1, 1]} : vector<576x144xbf16> to vector<16x144xbf16>
    %59 = vector.extract_strided_slice %0 {offsets = [256, 0], sizes = [16, 144], strides = [1, 1]} : vector<576x144xbf16> to vector<16x144xbf16>
    %60 = vector.extract_strided_slice %0 {offsets = [320, 0], sizes = [16, 144], strides = [1, 1]} : vector<576x144xbf16> to vector<16x144xbf16>
    %61 = vector.extract_strided_slice %0 {offsets = [384, 0], sizes = [16, 144], strides = [1, 1]} : vector<576x144xbf16> to vector<16x144xbf16>
    %62 = vector.extract_strided_slice %0 {offsets = [448, 0], sizes = [16, 144], strides = [1, 1]} : vector<576x144xbf16> to vector<16x144xbf16>
    %63 = vector.extract_strided_slice %0 {offsets = [512, 0], sizes = [16, 144], strides = [1, 1]} : vector<576x144xbf16> to vector<16x144xbf16>
    %64 = tpu.concatenate %56, %57, %58, %59, %60, %61, %62, %63 in 0 : vector<16x144xbf16>, vector<16x144xbf16>, vector<16x144xbf16>, vector<16x144xbf16>, vector<16x144xbf16>, vector<16x144xbf16>, vector<16x144xbf16>, vector<16x144xbf16> -> vector<128x144xbf16>
    %c4 = arith.constant 4 : index
    %c0_18 = arith.constant 0 : index
    %c0_19 = arith.constant 0 : index
    %65 = vector.load %arg1[%c4, %c0_18, %c0_19] : memref<8x144x256xbf16, #tpu.memory_space<vmem>>, vector<1x144x256xbf16>
    %66 = vector.shape_cast %65 : vector<1x144x256xbf16> to vector<144x256xbf16>
    %cst_20 = arith.constant dense<0.000000e+00> : vector<128x256xf32>
    %67 = tpu.matmul %64, %66, %cst_20 {dimension_numbers = #tpu.dot_dimension_numbers<[1], [0], [0], [1], [0, 0, 1, 1], [], []>} : vector<128x144xbf16>, vector<144x256xbf16>, vector<128x256xf32> -> vector<128x256xf32>
    %68 = arith.addf %55, %67 : vector<128x256xf32>
    %69 = vector.extract_strided_slice %0 {offsets = [80, 0], sizes = [16, 144], strides = [1, 1]} : vector<576x144xbf16> to vector<16x144xbf16>
    %70 = vector.extract_strided_slice %0 {offsets = [144, 0], sizes = [16, 144], strides = [1, 1]} : vector<576x144xbf16> to vector<16x144xbf16>
    %71 = vector.extract_strided_slice %0 {offsets = [208, 0], sizes = [16, 144], strides = [1, 1]} : vector<576x144xbf16> to vector<16x144xbf16>
    %72 = vector.extract_strided_slice %0 {offsets = [272, 0], sizes = [16, 144], strides = [1, 1]} : vector<576x144xbf16> to vector<16x144xbf16>
    %73 = vector.extract_strided_slice %0 {offsets = [336, 0], sizes = [16, 144], strides = [1, 1]} : vector<576x144xbf16> to vector<16x144xbf16>
    %74 = vector.extract_strided_slice %0 {offsets = [400, 0], sizes = [16, 144], strides = [1, 1]} : vector<576x144xbf16> to vector<16x144xbf16>
    %75 = vector.extract_strided_slice %0 {offsets = [464, 0], sizes = [16, 144], strides = [1, 1]} : vector<576x144xbf16> to vector<16x144xbf16>
    %76 = vector.extract_strided_slice %0 {offsets = [528, 0], sizes = [16, 144], strides = [1, 1]} : vector<576x144xbf16> to vector<16x144xbf16>
    %77 = tpu.concatenate %69, %70, %71, %72, %73, %74, %75, %76 in 0 : vector<16x144xbf16>, vector<16x144xbf16>, vector<16x144xbf16>, vector<16x144xbf16>, vector<16x144xbf16>, vector<16x144xbf16>, vector<16x144xbf16>, vector<16x144xbf16> -> vector<128x144xbf16>
    %c5 = arith.constant 5 : index
    %c0_21 = arith.constant 0 : index
    %c0_22 = arith.constant 0 : index
    %78 = vector.load %arg1[%c5, %c0_21, %c0_22] : memref<8x144x256xbf16, #tpu.memory_space<vmem>>, vector<1x144x256xbf16>
    %79 = vector.shape_cast %78 : vector<1x144x256xbf16> to vector<144x256xbf16>
    %cst_23 = arith.constant dense<0.000000e+00> : vector<128x256xf32>
    %80 = tpu.matmul %77, %79, %cst_23 {dimension_numbers = #tpu.dot_dimension_numbers<[1], [0], [0], [1], [0, 0, 1, 1], [], []>} : vector<128x144xbf16>, vector<144x256xbf16>, vector<128x256xf32> -> vector<128x256xf32>
    %81 = arith.addf %68, %80 : vector<128x256xf32>
    %82 = vector.extract_strided_slice %0 {offsets = [96, 0], sizes = [16, 144], strides = [1, 1]} : vector<576x144xbf16> to vector<16x144xbf16>
    %83 = vector.extract_strided_slice %0 {offsets = [160, 0], sizes = [16, 144], strides = [1, 1]} : vector<576x144xbf16> to vector<16x144xbf16>
    %84 = vector.extract_strided_slice %0 {offsets = [224, 0], sizes = [16, 144], strides = [1, 1]} : vector<576x144xbf16> to vector<16x144xbf16>
    %85 = vector.extract_strided_slice %0 {offsets = [288, 0], sizes = [16, 144], strides = [1, 1]} : vector<576x144xbf16> to vector<16x144xbf16>
    %86 = vector.extract_strided_slice %0 {offsets = [352, 0], sizes = [16, 144], strides = [1, 1]} : vector<576x144xbf16> to vector<16x144xbf16>
    %87 = vector.extract_strided_slice %0 {offsets = [416, 0], sizes = [16, 144], strides = [1, 1]} : vector<576x144xbf16> to vector<16x144xbf16>
    %88 = vector.extract_strided_slice %0 {offsets = [480, 0], sizes = [16, 144], strides = [1, 1]} : vector<576x144xbf16> to vector<16x144xbf16>
    %89 = vector.extract_strided_slice %0 {offsets = [544, 0], sizes = [16, 144], strides = [1, 1]} : vector<576x144xbf16> to vector<16x144xbf16>
    %90 = tpu.concatenate %82, %83, %84, %85, %86, %87, %88, %89 in 0 : vector<16x144xbf16>, vector<16x144xbf16>, vector<16x144xbf16>, vector<16x144xbf16>, vector<16x144xbf16>, vector<16x144xbf16>, vector<16x144xbf16>, vector<16x144xbf16> -> vector<128x144xbf16>
    %c6 = arith.constant 6 : index
    %c0_24 = arith.constant 0 : index
    %c0_25 = arith.constant 0 : index
    %91 = vector.load %arg1[%c6, %c0_24, %c0_25] : memref<8x144x256xbf16, #tpu.memory_space<vmem>>, vector<1x144x256xbf16>
    %92 = vector.shape_cast %91 : vector<1x144x256xbf16> to vector<144x256xbf16>
    %cst_26 = arith.constant dense<0.000000e+00> : vector<128x256xf32>
    %93 = tpu.matmul %90, %92, %cst_26 {dimension_numbers = #tpu.dot_dimension_numbers<[1], [0], [0], [1], [0, 0, 1, 1], [], []>} : vector<128x144xbf16>, vector<144x256xbf16>, vector<128x256xf32> -> vector<128x256xf32>
    %94 = arith.addf %81, %93 : vector<128x256xf32>
    %95 = vector.extract_strided_slice %0 {offsets = [112, 0], sizes = [16, 144], strides = [1, 1]} : vector<576x144xbf16> to vector<16x144xbf16>
    %96 = vector.extract_strided_slice %0 {offsets = [176, 0], sizes = [16, 144], strides = [1, 1]} : vector<576x144xbf16> to vector<16x144xbf16>
    %97 = vector.extract_strided_slice %0 {offsets = [240, 0], sizes = [16, 144], strides = [1, 1]} : vector<576x144xbf16> to vector<16x144xbf16>
    %98 = vector.extract_strided_slice %0 {offsets = [304, 0], sizes = [16, 144], strides = [1, 1]} : vector<576x144xbf16> to vector<16x144xbf16>
    %99 = vector.extract_strided_slice %0 {offsets = [368, 0], sizes = [16, 144], strides = [1, 1]} : vector<576x144xbf16> to vector<16x144xbf16>
    %100 = vector.extract_strided_slice %0 {offsets = [432, 0], sizes = [16, 144], strides = [1, 1]} : vector<576x144xbf16> to vector<16x144xbf16>
    %101 = vector.extract_strided_slice %0 {offsets = [496, 0], sizes = [16, 144], strides = [1, 1]} : vector<576x144xbf16> to vector<16x144xbf16>
    %102 = vector.extract_strided_slice %0 {offsets = [560, 0], sizes = [16, 144], strides = [1, 1]} : vector<576x144xbf16> to vector<16x144xbf16>
    %103 = tpu.concatenate %95, %96, %97, %98, %99, %100, %101, %102 in 0 : vector<16x144xbf16>, vector<16x144xbf16>, vector<16x144xbf16>, vector<16x144xbf16>, vector<16x144xbf16>, vector<16x144xbf16>, vector<16x144xbf16>, vector<16x144xbf16> -> vector<128x144xbf16>
    %c7 = arith.constant 7 : index
    %c0_27 = arith.constant 0 : index
    %c0_28 = arith.constant 0 : index
    %104 = vector.load %arg1[%c7, %c0_27, %c0_28] : memref<8x144x256xbf16, #tpu.memory_space<vmem>>, vector<1x144x256xbf16>
    %105 = vector.shape_cast %104 : vector<1x144x256xbf16> to vector<144x256xbf16>
    %cst_29 = arith.constant dense<0.000000e+00> : vector<128x256xf32>
    %106 = tpu.matmul %103, %105, %cst_29 {dimension_numbers = #tpu.dot_dimension_numbers<[1], [0], [0], [1], [0, 0, 1, 1], [], []>} : vector<128x144xbf16>, vector<144x256xbf16>, vector<128x256xf32> -> vector<128x256xf32>
    %107 = arith.addf %94, %106 : vector<128x256xf32>
    %108 = tpu.iota {dimensions = array<i32: 1>} : vector<1x128xi32>
    %c16_i32 = arith.constant 16 : i32
    %c0_i32 = arith.constant 0 : i32
    %109 = arith.cmpi eq, %c16_i32, %c0_i32 : i32
    %c1_i32 = arith.constant 1 : i32
    %110 = arith.select %109, %c1_i32, %c16_i32 : i32
    %111 = vector.broadcast %110 : i32 to vector<1x128xi32>
    %112 = arith.remsi %108, %111 : vector<1x128xi32>
    %c0_i32_30 = arith.constant 0 : i32
    %113 = vector.broadcast %c0_i32_30 : i32 to vector<1x128xi32>
    %114 = arith.cmpi ne, %112, %113 : vector<1x128xi32>
    %c0_i32_31 = arith.constant 0 : i32
    %115 = vector.broadcast %c0_i32_31 : i32 to vector<1x128xi32>
    %116 = arith.cmpi slt, %112, %115 : vector<1x128xi32>
    %c0_i32_32 = arith.constant 0 : i32
    %117 = arith.cmpi slt, %110, %c0_i32_32 : i32
    %118 = vector.broadcast %117 : i1 to vector<1x128xi1>
    %119 = vector.broadcast %118 : vector<1x128xi1> to vector<1x128xi1>
    %120 = arith.xori %116, %119 : vector<1x128xi1>
    %121 = arith.andi %120, %114 : vector<1x128xi1>
    %122 = vector.broadcast %110 : i32 to vector<1x128xi32>
    %123 = arith.addi %112, %122 : vector<1x128xi32>
    %124 = arith.select %121, %123, %112 : vector<1x128xi1>, vector<1x128xi32>
    %c2_i32 = arith.constant 2 : i32
    %125 = vector.broadcast %c2_i32 : i32 to vector<1x128xi32>
    %126 = arith.cmpi slt, %124, %125 : vector<1x128xi32>
    %127 = arith.extui %126 : vector<1x128xi1> to vector<1x128xi32>
    %128 = arith.sitofp %127 : vector<1x128xi32> to vector<1x128xf32>
    %cst_33 = arith.constant dense<0.000000e+00> : vector<1x256xf32>
    %129 = tpu.matmul %128, %107, %cst_33 {dimension_numbers = #tpu.dot_dimension_numbers<[1], [0], [0], [1], [0, 0, 1, 1], [], []>} : vector<1x128xf32>, vector<128x256xf32>, vector<1x256xf32> -> vector<1x256xf32>
    %130 = arith.mulf %107, %107 : vector<128x256xf32>
    %cst_34 = arith.constant dense<0.000000e+00> : vector<1x256xf32>
    %131 = tpu.matmul %128, %130, %cst_34 {dimension_numbers = #tpu.dot_dimension_numbers<[1], [0], [0], [1], [0, 0, 1, 1], [], []>} : vector<1x128xf32>, vector<128x256xf32>, vector<1x256xf32> -> vector<1x256xf32>
    %132 = vector.extract_strided_slice %129 {offsets = [0, 0], sizes = [1, 32], strides = [1, 1]} : vector<1x256xf32> to vector<1x32xf32>
    %133 = vector.extract_strided_slice %131 {offsets = [0, 0], sizes = [1, 32], strides = [1, 1]} : vector<1x256xf32> to vector<1x32xf32>
    %134 = vector.extract_strided_slice %129 {offsets = [0, 32], sizes = [1, 32], strides = [1, 1]} : vector<1x256xf32> to vector<1x32xf32>
    %135 = arith.addf %132, %134 : vector<1x32xf32>
    %136 = vector.extract_strided_slice %131 {offsets = [0, 32], sizes = [1, 32], strides = [1, 1]} : vector<1x256xf32> to vector<1x32xf32>
    %137 = arith.addf %133, %136 : vector<1x32xf32>
    %138 = vector.extract_strided_slice %129 {offsets = [0, 64], sizes = [1, 32], strides = [1, 1]} : vector<1x256xf32> to vector<1x32xf32>
    %139 = arith.addf %135, %138 : vector<1x32xf32>
    %140 = vector.extract_strided_slice %131 {offsets = [0, 64], sizes = [1, 32], strides = [1, 1]} : vector<1x256xf32> to vector<1x32xf32>
    %141 = arith.addf %137, %140 : vector<1x32xf32>
    %142 = vector.extract_strided_slice %129 {offsets = [0, 96], sizes = [1, 32], strides = [1, 1]} : vector<1x256xf32> to vector<1x32xf32>
    %143 = arith.addf %139, %142 : vector<1x32xf32>
    %144 = vector.extract_strided_slice %131 {offsets = [0, 96], sizes = [1, 32], strides = [1, 1]} : vector<1x256xf32> to vector<1x32xf32>
    %145 = arith.addf %141, %144 : vector<1x32xf32>
    %146 = vector.extract_strided_slice %129 {offsets = [0, 128], sizes = [1, 32], strides = [1, 1]} : vector<1x256xf32> to vector<1x32xf32>
    %147 = arith.addf %143, %146 : vector<1x32xf32>
    %148 = vector.extract_strided_slice %131 {offsets = [0, 128], sizes = [1, 32], strides = [1, 1]} : vector<1x256xf32> to vector<1x32xf32>
    %149 = arith.addf %145, %148 : vector<1x32xf32>
    %150 = vector.extract_strided_slice %129 {offsets = [0, 160], sizes = [1, 32], strides = [1, 1]} : vector<1x256xf32> to vector<1x32xf32>
    %151 = arith.addf %147, %150 : vector<1x32xf32>
    %152 = vector.extract_strided_slice %131 {offsets = [0, 160], sizes = [1, 32], strides = [1, 1]} : vector<1x256xf32> to vector<1x32xf32>
    %153 = arith.addf %149, %152 : vector<1x32xf32>
    %154 = vector.extract_strided_slice %129 {offsets = [0, 192], sizes = [1, 32], strides = [1, 1]} : vector<1x256xf32> to vector<1x32xf32>
    %155 = arith.addf %151, %154 : vector<1x32xf32>
    %156 = vector.extract_strided_slice %131 {offsets = [0, 192], sizes = [1, 32], strides = [1, 1]} : vector<1x256xf32> to vector<1x32xf32>
    %157 = arith.addf %153, %156 : vector<1x32xf32>
    %158 = vector.extract_strided_slice %129 {offsets = [0, 224], sizes = [1, 32], strides = [1, 1]} : vector<1x256xf32> to vector<1x32xf32>
    %159 = arith.addf %155, %158 : vector<1x32xf32>
    %160 = vector.extract_strided_slice %131 {offsets = [0, 224], sizes = [1, 32], strides = [1, 1]} : vector<1x256xf32> to vector<1x32xf32>
    %161 = arith.addf %157, %160 : vector<1x32xf32>
    %cst_35 = arith.constant 1.280000e+02 : f32
    %162 = vector.broadcast %cst_35 : f32 to vector<1x32xf32>
    %163 = arith.divf %159, %162 : vector<1x32xf32>
    %cst_36 = arith.constant 1.280000e+02 : f32
    %164 = vector.broadcast %cst_36 : f32 to vector<1x32xf32>
    %165 = arith.divf %161, %164 : vector<1x32xf32>
    %166 = arith.mulf %163, %163 : vector<1x32xf32>
    %167 = arith.subf %165, %166 : vector<1x32xf32>
    %cst_37 = arith.constant 9.99999974E-6 : f32
    %168 = vector.broadcast %cst_37 : f32 to vector<1x32xf32>
    %169 = arith.addf %167, %168 : vector<1x32xf32>
    %170 = math.rsqrt %169 : vector<1x32xf32>
    %171 = arith.mulf %1, %170 : vector<1x32xf32>
    %172 = arith.mulf %163, %171 : vector<1x32xf32>
    %173 = arith.subf %2, %172 : vector<1x32xf32>
    %174 = tpu.concatenate %171, %171, %171, %171, %171, %171, %171, %171 in 1 : vector<1x32xf32>, vector<1x32xf32>, vector<1x32xf32>, vector<1x32xf32>, vector<1x32xf32>, vector<1x32xf32>, vector<1x32xf32>, vector<1x32xf32> -> vector<1x256xf32>
    %175 = tpu.concatenate %173, %173, %173, %173, %173, %173, %173, %173 in 1 : vector<1x32xf32>, vector<1x32xf32>, vector<1x32xf32>, vector<1x32xf32>, vector<1x32xf32>, vector<1x32xf32>, vector<1x32xf32>, vector<1x32xf32> -> vector<1x256xf32>
    %176 = vector.broadcast %174 : vector<1x256xf32> to vector<128x256xf32>
    %177 = arith.mulf %107, %176 : vector<128x256xf32>
    %178 = vector.broadcast %175 : vector<1x256xf32> to vector<128x256xf32>
    %179 = arith.addf %177, %178 : vector<128x256xf32>
    %cst_38 = arith.constant 0.000000e+00 : f32
    %180 = vector.broadcast %cst_38 : f32 to vector<128x256xf32>
    %181 = arith.maximumf %179, %180 : vector<128x256xf32>
    %182 = arith.truncf %181 : vector<128x256xf32> to vector<128x256xbf16>
    %c0_39 = arith.constant 0 : index
    %c0_40 = arith.constant 0 : index
    %183 = vector.load %arg5[%c0_39, %c0_40] : memref<1x64xf32, #tpu.memory_space<vmem>>, vector<1x64xf32>
    %c0_41 = arith.constant 0 : index
    %c0_42 = arith.constant 0 : index
    %184 = vector.load %arg6[%c0_41, %c0_42] : memref<1x64xf32, #tpu.memory_space<vmem>>, vector<1x64xf32>
    %cst_43 = arith.constant 0.000000e+00 : f32
    %185 = vector.broadcast %cst_43 : f32 to vector<48x192xf32>
    %186 = vector.extract_strided_slice %182 {offsets = [0, 0], sizes = [16, 256], strides = [1, 1]} : vector<128x256xbf16> to vector<16x256xbf16>
    %187 = vector.extract_strided_slice %182 {offsets = [32, 0], sizes = [16, 256], strides = [1, 1]} : vector<128x256xbf16> to vector<16x256xbf16>
    %188 = vector.extract_strided_slice %182 {offsets = [64, 0], sizes = [16, 256], strides = [1, 1]} : vector<128x256xbf16> to vector<16x256xbf16>
    %189 = tpu.concatenate %186, %187, %188 in 0 : vector<16x256xbf16>, vector<16x256xbf16>, vector<16x256xbf16> -> vector<48x256xbf16>
    %c0_44 = arith.constant 0 : index
    %c0_45 = arith.constant 0 : index
    %c0_46 = arith.constant 0 : index
    %190 = vector.load %arg4[%c0_44, %c0_45, %c0_46] : memref<4x256x192xbf16, #tpu.memory_space<vmem>>, vector<1x256x192xbf16>
    %191 = vector.shape_cast %190 : vector<1x256x192xbf16> to vector<256x192xbf16>
    %cst_47 = arith.constant dense<0.000000e+00> : vector<48x192xf32>
    %192 = tpu.matmul %189, %191, %cst_47 {dimension_numbers = #tpu.dot_dimension_numbers<[1], [0], [0], [1], [0, 0, 1, 1], [], []>} : vector<48x256xbf16>, vector<256x192xbf16>, vector<48x192xf32> -> vector<48x192xf32>
    %193 = arith.addf %185, %192 : vector<48x192xf32>
    %194 = vector.extract_strided_slice %182 {offsets = [16, 0], sizes = [16, 256], strides = [1, 1]} : vector<128x256xbf16> to vector<16x256xbf16>
    %195 = vector.extract_strided_slice %182 {offsets = [48, 0], sizes = [16, 256], strides = [1, 1]} : vector<128x256xbf16> to vector<16x256xbf16>
    %196 = vector.extract_strided_slice %182 {offsets = [80, 0], sizes = [16, 256], strides = [1, 1]} : vector<128x256xbf16> to vector<16x256xbf16>
    %197 = tpu.concatenate %194, %195, %196 in 0 : vector<16x256xbf16>, vector<16x256xbf16>, vector<16x256xbf16> -> vector<48x256xbf16>
    %c1_48 = arith.constant 1 : index
    %c0_49 = arith.constant 0 : index
    %c0_50 = arith.constant 0 : index
    %198 = vector.load %arg4[%c1_48, %c0_49, %c0_50] : memref<4x256x192xbf16, #tpu.memory_space<vmem>>, vector<1x256x192xbf16>
    %199 = vector.shape_cast %198 : vector<1x256x192xbf16> to vector<256x192xbf16>
    %cst_51 = arith.constant dense<0.000000e+00> : vector<48x192xf32>
    %200 = tpu.matmul %197, %199, %cst_51 {dimension_numbers = #tpu.dot_dimension_numbers<[1], [0], [0], [1], [0, 0, 1, 1], [], []>} : vector<48x256xbf16>, vector<256x192xbf16>, vector<48x192xf32> -> vector<48x192xf32>
    %201 = arith.addf %193, %200 : vector<48x192xf32>
    %202 = vector.extract_strided_slice %182 {offsets = [32, 0], sizes = [16, 256], strides = [1, 1]} : vector<128x256xbf16> to vector<16x256xbf16>
    %203 = vector.extract_strided_slice %182 {offsets = [64, 0], sizes = [16, 256], strides = [1, 1]} : vector<128x256xbf16> to vector<16x256xbf16>
    %204 = vector.extract_strided_slice %182 {offsets = [96, 0], sizes = [16, 256], strides = [1, 1]} : vector<128x256xbf16> to vector<16x256xbf16>
    %205 = tpu.concatenate %202, %203, %204 in 0 : vector<16x256xbf16>, vector<16x256xbf16>, vector<16x256xbf16> -> vector<48x256xbf16>
    %c2_52 = arith.constant 2 : index
    %c0_53 = arith.constant 0 : index
    %c0_54 = arith.constant 0 : index
    %206 = vector.load %arg4[%c2_52, %c0_53, %c0_54] : memref<4x256x192xbf16, #tpu.memory_space<vmem>>, vector<1x256x192xbf16>
    %207 = vector.shape_cast %206 : vector<1x256x192xbf16> to vector<256x192xbf16>
    %cst_55 = arith.constant dense<0.000000e+00> : vector<48x192xf32>
    %208 = tpu.matmul %205, %207, %cst_55 {dimension_numbers = #tpu.dot_dimension_numbers<[1], [0], [0], [1], [0, 0, 1, 1], [], []>} : vector<48x256xbf16>, vector<256x192xbf16>, vector<48x192xf32> -> vector<48x192xf32>
    %209 = arith.addf %201, %208 : vector<48x192xf32>
    %210 = vector.extract_strided_slice %182 {offsets = [48, 0], sizes = [16, 256], strides = [1, 1]} : vector<128x256xbf16> to vector<16x256xbf16>
    %211 = vector.extract_strided_slice %182 {offsets = [80, 0], sizes = [16, 256], strides = [1, 1]} : vector<128x256xbf16> to vector<16x256xbf16>
    %212 = vector.extract_strided_slice %182 {offsets = [112, 0], sizes = [16, 256], strides = [1, 1]} : vector<128x256xbf16> to vector<16x256xbf16>
    %213 = tpu.concatenate %210, %211, %212 in 0 : vector<16x256xbf16>, vector<16x256xbf16>, vector<16x256xbf16> -> vector<48x256xbf16>
    %c3_56 = arith.constant 3 : index
    %c0_57 = arith.constant 0 : index
    %c0_58 = arith.constant 0 : index
    %214 = vector.load %arg4[%c3_56, %c0_57, %c0_58] : memref<4x256x192xbf16, #tpu.memory_space<vmem>>, vector<1x256x192xbf16>
    %215 = vector.shape_cast %214 : vector<1x256x192xbf16> to vector<256x192xbf16>
    %cst_59 = arith.constant dense<0.000000e+00> : vector<48x192xf32>
    %216 = tpu.matmul %213, %215, %cst_59 {dimension_numbers = #tpu.dot_dimension_numbers<[1], [0], [0], [1], [0, 0, 1, 1], [], []>} : vector<48x256xbf16>, vector<256x192xbf16>, vector<48x192xf32> -> vector<48x192xf32>
    %217 = arith.addf %209, %216 : vector<48x192xf32>
    %218 = tpu.iota {dimensions = array<i32: 1>} : vector<1x48xi32>
    %c16_i32_60 = arith.constant 16 : i32
    %c0_i32_61 = arith.constant 0 : i32
    %219 = arith.cmpi eq, %c16_i32_60, %c0_i32_61 : i32
    %c1_i32_62 = arith.constant 1 : i32
    %220 = arith.select %219, %c1_i32_62, %c16_i32_60 : i32
    %221 = vector.broadcast %220 : i32 to vector<1x48xi32>
    %222 = arith.remsi %218, %221 : vector<1x48xi32>
    %c0_i32_63 = arith.constant 0 : i32
    %223 = vector.broadcast %c0_i32_63 : i32 to vector<1x48xi32>
    %224 = arith.cmpi ne, %222, %223 : vector<1x48xi32>
    %c0_i32_64 = arith.constant 0 : i32
    %225 = vector.broadcast %c0_i32_64 : i32 to vector<1x48xi32>
    %226 = arith.cmpi slt, %222, %225 : vector<1x48xi32>
    %c0_i32_65 = arith.constant 0 : i32
    %227 = arith.cmpi slt, %220, %c0_i32_65 : i32
    %228 = vector.broadcast %227 : i1 to vector<1x48xi1>
    %229 = vector.broadcast %228 : vector<1x48xi1> to vector<1x48xi1>
    %230 = arith.xori %226, %229 : vector<1x48xi1>
    %231 = arith.andi %230, %224 : vector<1x48xi1>
    %232 = vector.broadcast %220 : i32 to vector<1x48xi32>
    %233 = arith.addi %222, %232 : vector<1x48xi32>
    %234 = arith.select %231, %233, %222 : vector<1x48xi1>, vector<1x48xi32>
    %c2_i32_66 = arith.constant 2 : i32
    %235 = vector.broadcast %c2_i32_66 : i32 to vector<1x48xi32>
    %236 = arith.cmpi slt, %234, %235 : vector<1x48xi32>
    %237 = arith.extui %236 : vector<1x48xi1> to vector<1x48xi32>
    %238 = arith.sitofp %237 : vector<1x48xi32> to vector<1x48xf32>
    %cst_67 = arith.constant dense<0.000000e+00> : vector<1x192xf32>
    %239 = tpu.matmul %238, %217, %cst_67 {dimension_numbers = #tpu.dot_dimension_numbers<[1], [0], [0], [1], [0, 0, 1, 1], [], []>} : vector<1x48xf32>, vector<48x192xf32>, vector<1x192xf32> -> vector<1x192xf32>
    %240 = arith.mulf %217, %217 : vector<48x192xf32>
    %cst_68 = arith.constant dense<0.000000e+00> : vector<1x192xf32>
    %241 = tpu.matmul %238, %240, %cst_68 {dimension_numbers = #tpu.dot_dimension_numbers<[1], [0], [0], [1], [0, 0, 1, 1], [], []>} : vector<1x48xf32>, vector<48x192xf32>, vector<1x192xf32> -> vector<1x192xf32>
    %242 = vector.extract_strided_slice %239 {offsets = [0, 0], sizes = [1, 64], strides = [1, 1]} : vector<1x192xf32> to vector<1x64xf32>
    %243 = vector.extract_strided_slice %241 {offsets = [0, 0], sizes = [1, 64], strides = [1, 1]} : vector<1x192xf32> to vector<1x64xf32>
    %244 = vector.extract_strided_slice %239 {offsets = [0, 64], sizes = [1, 64], strides = [1, 1]} : vector<1x192xf32> to vector<1x64xf32>
    %245 = arith.addf %242, %244 : vector<1x64xf32>
    %246 = vector.extract_strided_slice %241 {offsets = [0, 64], sizes = [1, 64], strides = [1, 1]} : vector<1x192xf32> to vector<1x64xf32>
    %247 = arith.addf %243, %246 : vector<1x64xf32>
    %248 = vector.extract_strided_slice %239 {offsets = [0, 128], sizes = [1, 64], strides = [1, 1]} : vector<1x192xf32> to vector<1x64xf32>
    %249 = arith.addf %245, %248 : vector<1x64xf32>
    %250 = vector.extract_strided_slice %241 {offsets = [0, 128], sizes = [1, 64], strides = [1, 1]} : vector<1x192xf32> to vector<1x64xf32>
    %251 = arith.addf %247, %250 : vector<1x64xf32>
    %cst_69 = arith.constant 1.800000e+01 : f32
    %252 = vector.broadcast %cst_69 : f32 to vector<1x64xf32>
    %253 = arith.divf %249, %252 : vector<1x64xf32>
    %cst_70 = arith.constant 1.800000e+01 : f32
    %254 = vector.broadcast %cst_70 : f32 to vector<1x64xf32>
    %255 = arith.divf %251, %254 : vector<1x64xf32>
    %256 = arith.mulf %253, %253 : vector<1x64xf32>
    %257 = arith.subf %255, %256 : vector<1x64xf32>
    %cst_71 = arith.constant 9.99999974E-6 : f32
    %258 = vector.broadcast %cst_71 : f32 to vector<1x64xf32>
    %259 = arith.addf %257, %258 : vector<1x64xf32>
    %260 = math.rsqrt %259 : vector<1x64xf32>
    %261 = arith.mulf %183, %260 : vector<1x64xf32>
    %262 = arith.mulf %253, %261 : vector<1x64xf32>
    %263 = arith.subf %184, %262 : vector<1x64xf32>
    %264 = tpu.concatenate %261, %261, %261 in 1 : vector<1x64xf32>, vector<1x64xf32>, vector<1x64xf32> -> vector<1x192xf32>
    %265 = tpu.concatenate %263, %263, %263 in 1 : vector<1x64xf32>, vector<1x64xf32>, vector<1x64xf32> -> vector<1x192xf32>
    %266 = vector.broadcast %264 : vector<1x192xf32> to vector<48x192xf32>
    %267 = arith.mulf %217, %266 : vector<48x192xf32>
    %268 = vector.broadcast %265 : vector<1x192xf32> to vector<48x192xf32>
    %269 = arith.addf %267, %268 : vector<48x192xf32>
    %cst_72 = arith.constant 0.000000e+00 : f32
    %270 = vector.broadcast %cst_72 : f32 to vector<48x192xf32>
    %271 = arith.maximumf %269, %270 : vector<48x192xf32>
    %272 = arith.truncf %271 : vector<48x192xf32> to vector<48x192xbf16>
    %c0_73 = arith.constant 0 : index
    %c0_74 = arith.constant 0 : index
    %273 = vector.load %arg8[%c0_73, %c0_74] : memref<1x64xf32, #tpu.memory_space<vmem>>, vector<1x64xf32>
    %c0_75 = arith.constant 0 : index
    %c0_76 = arith.constant 0 : index
    %274 = vector.load %arg9[%c0_75, %c0_76] : memref<1x64xf32, #tpu.memory_space<vmem>>, vector<1x64xf32>
    %cst_77 = arith.constant 0.000000e+00 : f32
    %275 = vector.broadcast %cst_77 : f32 to vector<16x64xf32>
    %276 = vector.extract_strided_slice %272 {offsets = [0, 0], sizes = [16, 192], strides = [1, 1]} : vector<48x192xbf16> to vector<16x192xbf16>
    %c0_78 = arith.constant 0 : index
    %c0_79 = arith.constant 0 : index
    %c0_80 = arith.constant 0 : index
    %277 = vector.load %arg7[%c0_78, %c0_79, %c0_80] : memref<3x192x64xbf16, #tpu.memory_space<vmem>>, vector<1x192x64xbf16>
    %278 = vector.shape_cast %277 : vector<1x192x64xbf16> to vector<192x64xbf16>
    %cst_81 = arith.constant dense<0.000000e+00> : vector<16x64xf32>
    %279 = tpu.matmul %276, %278, %cst_81 {dimension_numbers = #tpu.dot_dimension_numbers<[1], [0], [0], [1], [0, 0, 1, 1], [], []>} : vector<16x192xbf16>, vector<192x64xbf16>, vector<16x64xf32> -> vector<16x64xf32>
    %280 = arith.addf %275, %279 : vector<16x64xf32>
    %281 = vector.extract_strided_slice %272 {offsets = [16, 0], sizes = [16, 192], strides = [1, 1]} : vector<48x192xbf16> to vector<16x192xbf16>
    %c1_82 = arith.constant 1 : index
    %c0_83 = arith.constant 0 : index
    %c0_84 = arith.constant 0 : index
    %282 = vector.load %arg7[%c1_82, %c0_83, %c0_84] : memref<3x192x64xbf16, #tpu.memory_space<vmem>>, vector<1x192x64xbf16>
    %283 = vector.shape_cast %282 : vector<1x192x64xbf16> to vector<192x64xbf16>
    %cst_85 = arith.constant dense<0.000000e+00> : vector<16x64xf32>
    %284 = tpu.matmul %281, %283, %cst_85 {dimension_numbers = #tpu.dot_dimension_numbers<[1], [0], [0], [1], [0, 0, 1, 1], [], []>} : vector<16x192xbf16>, vector<192x64xbf16>, vector<16x64xf32> -> vector<16x64xf32>
    %285 = arith.addf %280, %284 : vector<16x64xf32>
    %286 = vector.extract_strided_slice %272 {offsets = [32, 0], sizes = [16, 192], strides = [1, 1]} : vector<48x192xbf16> to vector<16x192xbf16>
    %c2_86 = arith.constant 2 : index
    %c0_87 = arith.constant 0 : index
    %c0_88 = arith.constant 0 : index
    %287 = vector.load %arg7[%c2_86, %c0_87, %c0_88] : memref<3x192x64xbf16, #tpu.memory_space<vmem>>, vector<1x192x64xbf16>
    %288 = vector.shape_cast %287 : vector<1x192x64xbf16> to vector<192x64xbf16>
    %cst_89 = arith.constant dense<0.000000e+00> : vector<16x64xf32>
    %289 = tpu.matmul %286, %288, %cst_89 {dimension_numbers = #tpu.dot_dimension_numbers<[1], [0], [0], [1], [0, 0, 1, 1], [], []>} : vector<16x192xbf16>, vector<192x64xbf16>, vector<16x64xf32> -> vector<16x64xf32>
    %290 = arith.addf %285, %289 : vector<16x64xf32>
    %291 = tpu.iota {dimensions = array<i32: 1>} : vector<1x16xi32>
    %c16_i32_90 = arith.constant 16 : i32
    %c0_i32_91 = arith.constant 0 : i32
    %292 = arith.cmpi eq, %c16_i32_90, %c0_i32_91 : i32
    %c1_i32_92 = arith.constant 1 : i32
    %293 = arith.select %292, %c1_i32_92, %c16_i32_90 : i32
    %294 = vector.broadcast %293 : i32 to vector<1x16xi32>
    %295 = arith.remsi %291, %294 : vector<1x16xi32>
    %c0_i32_93 = arith.constant 0 : i32
    %296 = vector.broadcast %c0_i32_93 : i32 to vector<1x16xi32>
    %297 = arith.cmpi ne, %295, %296 : vector<1x16xi32>
    %c0_i32_94 = arith.constant 0 : i32
    %298 = vector.broadcast %c0_i32_94 : i32 to vector<1x16xi32>
    %299 = arith.cmpi slt, %295, %298 : vector<1x16xi32>
    %c0_i32_95 = arith.constant 0 : i32
    %300 = arith.cmpi slt, %293, %c0_i32_95 : i32
    %301 = vector.broadcast %300 : i1 to vector<1x16xi1>
    %302 = vector.broadcast %301 : vector<1x16xi1> to vector<1x16xi1>
    %303 = arith.xori %299, %302 : vector<1x16xi1>
    %304 = arith.andi %303, %297 : vector<1x16xi1>
    %305 = vector.broadcast %293 : i32 to vector<1x16xi32>
    %306 = arith.addi %295, %305 : vector<1x16xi32>
    %307 = arith.select %304, %306, %295 : vector<1x16xi1>, vector<1x16xi32>
    %c2_i32_96 = arith.constant 2 : i32
    %308 = vector.broadcast %c2_i32_96 : i32 to vector<1x16xi32>
    %309 = arith.cmpi slt, %307, %308 : vector<1x16xi32>
    %310 = arith.extui %309 : vector<1x16xi1> to vector<1x16xi32>
    %311 = arith.sitofp %310 : vector<1x16xi32> to vector<1x16xf32>
    %cst_97 = arith.constant dense<0.000000e+00> : vector<1x64xf32>
    %312 = tpu.matmul %311, %290, %cst_97 {dimension_numbers = #tpu.dot_dimension_numbers<[1], [0], [0], [1], [0, 0, 1, 1], [], []>} : vector<1x16xf32>, vector<16x64xf32>, vector<1x64xf32> -> vector<1x64xf32>
    %313 = arith.mulf %290, %290 : vector<16x64xf32>
    %cst_98 = arith.constant dense<0.000000e+00> : vector<1x64xf32>
    %314 = tpu.matmul %311, %313, %cst_98 {dimension_numbers = #tpu.dot_dimension_numbers<[1], [0], [0], [1], [0, 0, 1, 1], [], []>} : vector<1x16xf32>, vector<16x64xf32>, vector<1x64xf32> -> vector<1x64xf32>
    %cst_99 = arith.constant 2.000000e+00 : f32
    %315 = vector.broadcast %cst_99 : f32 to vector<1x64xf32>
    %316 = arith.divf %312, %315 : vector<1x64xf32>
    %cst_100 = arith.constant 2.000000e+00 : f32
    %317 = vector.broadcast %cst_100 : f32 to vector<1x64xf32>
    %318 = arith.divf %314, %317 : vector<1x64xf32>
    %319 = arith.mulf %316, %316 : vector<1x64xf32>
    %320 = arith.subf %318, %319 : vector<1x64xf32>
    %cst_101 = arith.constant 9.99999974E-6 : f32
    %321 = vector.broadcast %cst_101 : f32 to vector<1x64xf32>
    %322 = arith.addf %320, %321 : vector<1x64xf32>
    %323 = math.rsqrt %322 : vector<1x64xf32>
    %324 = arith.mulf %273, %323 : vector<1x64xf32>
    %325 = arith.mulf %316, %324 : vector<1x64xf32>
    %326 = arith.subf %274, %325 : vector<1x64xf32>
    %327 = vector.broadcast %324 : vector<1x64xf32> to vector<16x64xf32>
    %328 = arith.mulf %290, %327 : vector<16x64xf32>
    %329 = vector.broadcast %326 : vector<1x64xf32> to vector<16x64xf32>
    %330 = arith.addf %328, %329 : vector<16x64xf32>
    %cst_102 = arith.constant 0.000000e+00 : f32
    %331 = vector.broadcast %cst_102 : f32 to vector<16x64xf32>
    %332 = arith.maximumf %330, %331 : vector<16x64xf32>
    %333 = arith.truncf %332 : vector<16x64xf32> to vector<16x64xbf16>
    %cst_103 = arith.constant 0.000000e+00 : f32
    %334 = vector.broadcast %cst_103 : f32 to vector<16x1032xf32>
    %c0_104 = arith.constant 0 : index
    %c0_105 = arith.constant 0 : index
    %c0_106 = arith.constant 0 : index
    %335 = vector.load %arg10[%c0_104, %c0_105, %c0_106] : memref<1x64x1032xbf16, #tpu.memory_space<vmem>>, vector<1x64x1032xbf16>
    %336 = vector.shape_cast %335 : vector<1x64x1032xbf16> to vector<64x1032xbf16>
    %cst_107 = arith.constant dense<0.000000e+00> : vector<16x1032xf32>
    %337 = tpu.matmul %333, %336, %cst_107 {dimension_numbers = #tpu.dot_dimension_numbers<[1], [0], [0], [1], [0, 0, 1, 1], [], []>} : vector<16x64xbf16>, vector<64x1032xbf16>, vector<16x1032xf32> -> vector<16x1032xf32>
    %338 = arith.addf %334, %337 : vector<16x1032xf32>
    %c0_108 = arith.constant 0 : index
    %c0_109 = arith.constant 0 : index
    %339 = vector.load %arg11[%c0_108, %c0_109] : memref<1x1032xf32, #tpu.memory_space<vmem>>, vector<1x1032xf32>
    %340 = vector.broadcast %339 : vector<1x1032xf32> to vector<16x1032xf32>
    %341 = arith.addf %338, %340 : vector<16x1032xf32>
    %cst_110 = arith.constant 0.000000e+00 : f32
    %342 = vector.broadcast %cst_110 : f32 to vector<16x1032xf32>
    %343 = arith.cmpf oge, %341, %342 : vector<16x1032xf32>
    %cst_111 = arith.constant 0.00999999977 : f32
    %344 = vector.broadcast %cst_111 : f32 to vector<16x1032xf32>
    %345 = arith.mulf %344, %341 : vector<16x1032xf32>
    %346 = arith.select %343, %341, %345 : vector<16x1032xi1>, vector<16x1032xf32>
    %347 = arith.truncf %346 : vector<16x1032xf32> to vector<16x1032xbf16>
    %c0_112 = arith.constant 0 : index
    %c0_113 = arith.constant 0 : index
    %348 = vector.load %arg12[%c0_112, %c0_113] : memref<1032x128xbf16, #tpu.memory_space<vmem>>, vector<1032x128xbf16>
    %cst_114 = arith.constant dense<0.000000e+00> : vector<16x128xf32>
    %349 = tpu.matmul %347, %348, %cst_114 {dimension_numbers = #tpu.dot_dimension_numbers<[1], [0], [0], [1], [0, 0, 1, 1], [], []>} : vector<16x1032xbf16>, vector<1032x128xbf16>, vector<16x128xf32> -> vector<16x128xf32>
    %c0_115 = arith.constant 0 : index
    %c0_116 = arith.constant 0 : index
    %350 = vector.load %arg13[%c0_115, %c0_116] : memref<1x128xf32, #tpu.memory_space<vmem>>, vector<1x128xf32>
    %351 = vector.broadcast %350 : vector<1x128xf32> to vector<16x128xf32>
    %352 = arith.addf %349, %351 : vector<16x128xf32>
    %c0_117 = arith.constant 0 : index
    %c0_118 = arith.constant 0 : index
    %353 = vector.load %arg14[%c0_117, %c0_118] : memref<16x128xf32, #tpu.memory_space<vmem>>, vector<16x128xf32>
    tpu.vector_store %arg14[%c0_117, %c0_118], %352 {strides = array<i32>} : memref<16x128xf32, #tpu.memory_space<vmem>>, vector<16x128xf32>,
    return
  }
}

</mosaic_0001>

<bundles_post_ra>
// kernel: a2c_forward.1
= control target key start
LH: loop header
LB: loop body
LE: loop exit
PB: predicated region body
PF: predicated region fallthrough
CT: control target
= control target key end

     0   :  { %vm393_vm0 = vcmask 130048   ;;  %s9431_s28 = smov 64   ;;  %s9432_s29 = smov 32   ;;  %vm3405_vm6 = vcmask 261120   ;;  %vm3407_vm7 = vcmask 523264   ;;  %vm3409_vm8 = vcmask 785408   ;;  %s14131_s1 = inlined_call_operand.vmem [shape: bf16[8,144,256], index: 1, kind: input, shape index: {}]   ;;  %s14132_s0 = inlined_call_operand.vmem [shape: bf16[576,144], index: 0, kind: input, shape index: {}]   ;;  %s14133_s2 = inlined_call_operand.vmem [shape: f32[1,32], index: 2, kind: input, shape index: {}]   ;;  %s14134_s3 = inlined_call_operand.vmem [shape: f32[1,32], index: 3, kind: input, shape index: {}]   ;;  %s14135_s4 = inlined_call_operand.vmem [shape: bf16[4,256,192], index: 4, kind: input, shape index: {}]   ;;  %s14136_s7 = inlined_call_operand.vmem [shape: bf16[3,192,64], index: 7, kind: input, shape index: {}]   ;;  %s14137_s5 = inlined_call_operand.vmem [shape: f32[1,64], index: 5, kind: input, shape index: {}]   ;;  %s14138_s6 = inlined_call_operand.vmem [shape: f32[1,64], index: 6, kind: input, shape index: {}]   ;;  %s14139_s11 = inlined_call_operand.vmem [shape: f32[1,1032], index: 11, kind: input, shape index: {}]   ;;  %s14140_s10 = inlined_call_operand.vmem [shape: bf16[1,64,1032], index: 10, kind: input, shape index: {}]   ;;  %s14141_s8 = inlined_call_operand.vmem [shape: f32[1,64], index: 8, kind: input, shape index: {}]   ;;  %s14142_s9 = inlined_call_operand.vmem [shape: f32[1,64], index: 9, kind: input, shape index: {}]   ;;  %s14143_s12 = inlined_call_operand.vmem [shape: bf16[1032,128], index: 12, kind: input, shape index: {}]   ;;  %s14144_s13 = inlined_call_operand.vmem [shape: f32[1,128], index: 13, kind: input, shape index: {}]   ;;  %s14145_s14 = inlined_call_operand.vmem [shape: f32[16,128], index: 14, kind: output, shape index: {}]  }
   0x1   :  { %v6789_v0 = vld [vmem:[%s14131_s1 + $0x100] sm:$0xf]  ;;  %v9032_v1 = vld [vmem:[%s14131_s1 + $0x104] sm:$0xf0]  ;;  %v6797_v2 = vld [vmem:[%s14131_s1 + $0x110] sm:$0xf] }
   0x2   :  { %v6790_v3 = vor.u32 %v9032_v1, %v6789_v0  ;;  %v9034_v4 = vld [vmem:[%s14131_s1 + $0x114] sm:$0xf0]  ;;  %v9031_v5 = vld [vmem:[%s14131_s1 + $0x104] sm:$0xf]  ;;  %v6791_v6 = vld [vmem:[%s14131_s1 + $0x108] sm:$0xf0] }
   0x3   :  { %v6798_v7 = vor.u32 %v9034_v4, %v6797_v2  ;;  %v6794_v8 = vor.u32 %v9031_v5, %v6791_v6  ;;  %v9033_v9 = vld [vmem:[%s14131_s1 + $0x114] sm:$0xf]  ;;  %v6799_v10 = vld [vmem:[%s14131_s1 + $0x118] sm:$0xf0]  ;;  %v6781_v14 = vld [vmem:[%s14131_s1 + $0xf0] sm:$0xf] }
   0x4   :  { %v8929_v11 = vld [vmem:[%s14132_s0 + $0x14] sm:$0xf]  ;;  %418 = vmatpush.bf16.msra.mxu0 %v6790_v3  ;;  %v6802_v12 = vor.u32 %v9033_v9, %v6799_v10  ;;  %v6653_v13 = vld [vmem:[%s14132_s0 + $0x18] sm:$0xf0]  ;;  %v9030_v15 = vld [vmem:[%s14131_s1 + $0xf4] sm:$0xf0] }
   0x5   :  { %474 = vmatpush.bf16.msra.mxu1 %v6798_v7  ;;  %516 = vmatpush.bf16.msra.mxu2 %v6794_v8  ;;  %v6656_v16 = vor.u32 %v8929_v11, %v6653_v13  ;;  %v6782_v17 = vor.u32 %v9030_v15, %v6781_v14  ;;  %v9029_v18 = vld [vmem:[%s14131_s1 + $0xf4] sm:$0xf]  ;;  %v6783_v19 = vld [vmem:[%s14131_s1 + $0xf8] sm:$0xf0]  ;;  %v6773_v20 = vld [vmem:[%s14131_s1 + $0xe0] sm:$0xf] }
   0x6   :  { %572 = vmatpush.bf16.msra.mxu3 %v6802_v12  ;;  %v6786_v21 = vor.u32 %v9029_v18, %v6783_v19  ;;  %v9028_v22 = vld [vmem:[%s14131_s1 + $0xe4] sm:$0xf0]  ;;  %v9027_v23 = vld [vmem:[%s14131_s1 + $0xe4] sm:$0xf]  ;;  %v6775_v24 = vld [vmem:[%s14131_s1 + $0xe8] sm:$0xf0] }
   0x7   :  { %v6774_v25 = vor.u32 %v9028_v22, %v6773_v20  ;;  %v6778_v26 = vor.u32 %v9027_v23, %v6775_v24  ;;  %v6765_v27 = vld [vmem:[%s14131_s1 + $0xd0] sm:$0xf]  ;;  %v9026_v28 = vld [vmem:[%s14131_s1 + $0xd4] sm:$0xf0]  ;;  %v9025_v29 = vld [vmem:[%s14131_s1 + $0xd4] sm:$0xf] }
   0x8   :  { %6803 = vmatmul.msk.bf16.vlgmr.msra.gmra.mxu1 %vm393_vm0, %v6656_v16  ;;  %419 = vmatpush.bf16.msra.mxu0 %v6782_v17  ;;  %v6767_v30 = vld [vmem:[%s14131_s1 + $0xd8] sm:$0xf0]  ;;  %v6766_v31 = vor.u32 %v9026_v28, %v6765_v27  ;;  %v6757_v33 = vld [vmem:[%s14131_s1 + $0xc0] sm:$0xf]  ;;  %v9024_v34 = vld [vmem:[%s14131_s1 + $0xc4] sm:$0xf0] }
   0x9   :  { %6811 = vmatmul.msk.bf16.vlgmr.msra.gmra.mxu3 %vm393_vm0, %v6656_v16  ;;  %517 = vmatpush.bf16.msra.mxu2 %v6786_v21  ;;  %v6770_v32 = vor.u32 %v9025_v29, %v6767_v30  ;;  %v9023_v35 = vld [vmem:[%s14131_s1 + $0xc4] sm:$0xf]  ;;  %v6759_v36 = vld [vmem:[%s14131_s1 + $0xc8] sm:$0xf0]  ;;  %v6758_v37 = vor.u32 %v9024_v34, %v6757_v33  ;;  %v8937_v38 = vld [vmem:[%s14132_s0 + $0x54] sm:$0xf] }
   0xa   :  { %v6762_v39 = vor.u32 %v9023_v35, %v6759_v36  ;;  %v6661_v40 = vld [vmem:[%s14132_s0 + $0x58] sm:$0xf0]  ;;  %v6749_v41 = vld [vmem:[%s14131_s1 + $0xb0] sm:$0xf]  ;;  %v9022_v42 = vld [vmem:[%s14131_s1 + $0xb4] sm:$0xf0] }
   0xb   :  { %v9021_v43 = vld [vmem:[%s14131_s1 + $0xb4] sm:$0xf]  ;;  %v6751_v44 = vld [vmem:[%s14131_s1 + $0xb8] sm:$0xf0]  ;;  %v9610_v45 = vor.u32 %v8937_v38, %v6661_v40  ;;  %v6750_v46 = vor.u32 %v9022_v42, %v6749_v41  ;;  %v6741_v48 = vld [vmem:[%s14131_s1 + $0xa0] sm:$0xf] }
   0xc   :  { %420 = vmatpush.bf16.msra.mxu0 %v6774_v25  ;;  %v6754_v47 = vor.u32 %v9021_v43, %v6751_v44  ;;  %v9020_v49 = vld [vmem:[%s14131_s1 + $0xa4] sm:$0xf0]  ;;  %v9019_v50 = vld [vmem:[%s14131_s1 + $0xa4] sm:$0xf]  ;;  %v6743_v51 = vld [vmem:[%s14131_s1 + $0xa8] sm:$0xf0] }
   0xd   :  { %518 = vmatpush.bf16.msra.mxu2 %v6778_v26  ;;  %14231 = vst [vmem:[#allocation2_spill] sm:$0xff] %v9610_v45  ;;  %v6742_v52 = vor.u32 %v9020_v49, %v6741_v48  ;;  %v6746_v53 = vor.u32 %v9019_v50, %v6743_v51  ;;  %v6733_v54 = vld [vmem:[%s14131_s1 + $0x90] sm:$0xf]  ;;  %v9018_v55 = vld [vmem:[%s14131_s1 + $0x94] sm:$0xf0]  ;;  %vm4800_vm9 = vcmask 392192  }
   0xe   :  { %v9017_v56 = vld [vmem:[%s14131_s1 + $0x94] sm:$0xf]  ;;  %v6735_v57 = vld [vmem:[%s14131_s1 + $0x98] sm:$0xf0]  ;;  %v6734_v58 = vor.u32 %v9018_v55, %v6733_v54  ;;  %v6651_v59 = vld [vmem:[%s14132_s0 + $0x10] sm:$0xf] }
   0xf   :  { %v8930_v60 = vld [vmem:[%s14132_s0 + $0x14] sm:$0xf0]  ;;  %v6738_v61 = vor.u32 %v9017_v56, %v6735_v57  ;;  %v8945_v63 = vld [vmem:[%s14132_s0 + $0x94] sm:$0xf]  ;;  %v6669_v0 = vld [vmem:[%s14132_s0 + $0x98] sm:$0xf0] }
  0x10   :  { %421 = vmatpush.bf16.msra.mxu0 %v6766_v31  ;;  %v6652_v62 = vor.u32 %v8930_v60, %v6651_v59  ;;  %v9652_v1 = vor.u32 %v8945_v63, %v6669_v0  ;;  %v6659_v2 = vld [vmem:[%s14132_s0 + $0x50] sm:$0xf]  ;;  %v8938_v3 = vld [vmem:[%s14132_s0 + $0x54] sm:$0xf0]  ;;  %v8953_v5 = vld [vmem:[%s14132_s0 + $0xd4] sm:$0xf] }
  0x11   :  { %519 = vmatpush.bf16.msra.mxu2 %v6770_v32  ;;  %v9664_v4 = vor.u32 %v8938_v3, %v6659_v2  ;;  %v6677_v6 = vld [vmem:[%s14132_s0 + $0xd8] sm:$0xf0]  ;;  %v6667_v8 = vld [vmem:[%s14132_s0 + $0x90] sm:$0xf]  ;;  %v8946_v9 = vld [vmem:[%s14132_s0 + $0x94] sm:$0xf0] }
  0x12   :  { %14232 = vst [vmem:[#allocation3_spill] sm:$0xff] %v9652_v1  ;;  %v9674_v7 = vor.u32 %v8953_v5, %v6677_v6  ;;  %v9686_v10 = vor.u32 %v8946_v9, %v6667_v8  ;;  %v8961_v11 = vld [vmem:[%s14132_s0 + $0x114] sm:$0xf]  ;;  %v6685_v12 = vld [vmem:[%s14132_s0 + $0x118] sm:$0xf0] }
  0x13   :  { %14233 = vst [vmem:[#allocation4_spill] sm:$0xff] %v9664_v4  ;;  %v9696_v13 = vor.u32 %v8961_v11, %v6685_v12  ;;  %v6877_v14 = vld [vmem:[%s14131_s1 + $0x70] sm:$0xf]  ;;  %v9014_v15 = vld [vmem:[%s14131_s1 + $0x74] sm:$0xf0] }
  0x14   :  { %422 = vmatpush.bf16.msra.mxu0 %v6758_v37  ;;  %14234 = vst [vmem:[#allocation5_spill] sm:$0xff] %v9674_v7  ;;  %v6878_v16 = vor.u32 %v9014_v15, %v6877_v14  ;;  %v6869_v17 = vld [vmem:[%s14131_s1 + $0x60] sm:$0xf]  ;;  %v9012_v18 = vld [vmem:[%s14131_s1 + $0x64] sm:$0xf0] }
  0x15   :  { %520 = vmatpush.bf16.msra.mxu2 %v6762_v39  ;;  %14235 = vst [vmem:[#allocation6_spill] sm:$0xff] %v9686_v10  ;;  %v6870_v19 = vor.u32 %v9012_v18, %v6869_v17  ;;  %v6861_v20 = vld [vmem:[%s14131_s1 + $0x50] sm:$0xf]  ;;  %v9010_v21 = vld [vmem:[%s14131_s1 + $0x54] sm:$0xf0] }
  0x16   :  { %14236 = vst [vmem:[#allocation7_spill] sm:$0xff] %v9696_v13  ;;  %728 = vmatpush.bf16.msrb.mxu1 %v6878_v16  ;;  %v6675_v22 = vld [vmem:[%s14132_s0 + $0xd0] sm:$0xf]  ;;  %v8954_v23 = vld [vmem:[%s14132_s0 + $0xd4] sm:$0xf0]  ;;  %v6862_v24 = vor.u32 %v9010_v21, %v6861_v20 }
  0x17   :  { %v9726_v25 = vor.u32 %v8954_v23, %v6675_v22  ;;  %v8969_v26 = vld [vmem:[%s14132_s0 + $0x154] sm:$0xf]  ;;  %v6693_v27 = vld [vmem:[%s14132_s0 + $0x158] sm:$0xf0]  ;;  %v6853_v28 = vld [vmem:[%s14131_s1 + $0x40] sm:$0xf] }
  0x18   :  { %6804 = vmatmul.msk.bf16.gmra.mxu1 %vm393_vm0, %v9610_v45  ;;  %423 = vmatpush.bf16.msra.mxu0 %v6750_v46  ;;  %v9008_v29 = vld [vmem:[%s14131_s1 + $0x44] sm:$0xf0]  ;;  %v9742_v30 = vor.u32 %v8969_v26, %v6693_v27  ;;  %v6845_v32 = vld [vmem:[%s14131_s1 + $0x30] sm:$0xf]  ;;  %v9006_v33 = vld [vmem:[%s14131_s1 + $0x34] sm:$0xf0] }
  0x19   :  { %6812 = vmatmul.msk.bf16.gmra.mxu3 %vm393_vm0, %v9610_v45  ;;  %521 = vmatpush.bf16.msra.mxu2 %v6754_v47  ;;  %14237 = vst [vmem:[#allocation8_spill] sm:$0xff] %v9726_v25  ;;  %v6854_v31 = vor.u32 %v9008_v29, %v6853_v28  ;;  %v6846_v34 = vor.u32 %v9006_v33, %v6845_v32  ;;  %v6837_v35 = vld [vmem:[%s14131_s1 + $0x20] sm:$0xf]  ;;  %v9004_v36 = vld [vmem:[%s14131_s1 + $0x24] sm:$0xf0] }
  0x1a   :  { %729 = vmatpush.bf16.msrb.mxu1 %v6870_v19  ;;  %14238 = vst [vmem:[#allocation9_spill] sm:$0xff] %v9742_v30  ;;  %v6885_v37 = vld [vmem:[%s14131_s1 + $0x80] sm:$0xf]  ;;  %v6838_v38 = vor.u32 %v9004_v36, %v6837_v35  ;;  %v9016_v39 = vld [vmem:[%s14131_s1 + $0x84] sm:$0xf0] }
  0x1b   :  { %v6886_v40 = vor.u32 %v9016_v39, %v6885_v37  ;;  %v6829_v41 = vld [vmem:[%s14131_s1 + $0x10] sm:$0xf]  ;;  %v9002_v42 = vld [vmem:[%s14131_s1 + $0x14] sm:$0xf0]  ;;  %v8977_v48 = vld [vmem:[%s14132_s0 + $0x194] sm:$0xf] }
  0x1c   :  { %424 = vmatpush.bf16.msra.mxu0 %v6742_v52  ;;  %v6683_v43 = vld [vmem:[%s14132_s0 + $0x110] sm:$0xf]  ;;  %v8962_v44 = vld [vmem:[%s14132_s0 + $0x114] sm:$0xf0]  ;;  %v6830_v46 = vor.u32 %v9002_v42, %v6829_v41  ;;  %v6701_v49 = vld [vmem:[%s14132_s0 + $0x198] sm:$0xf0] }
  0x1d   :  { %522 = vmatpush.bf16.msra.mxu2 %v6746_v53  ;;  %784 = vmatpush.bf16.msrb.mxu3 %v6886_v40  ;;  %v9778_v47 = vor.u32 %v8962_v44, %v6683_v43  ;;  %v6821_v50 = vld [vmem:[%s14131_s1] sm:$0xf]  ;;  %v9000_v51 = vld [vmem:[%s14131_s1 + $0x4] sm:$0xf0]  ;;  %v9013_v52 = vld [vmem:[%s14131_s1 + $0x74] sm:$0xf]  ;;  %v9797_v53 = vor.u32 %v8977_v48, %v6701_v49 }
  0x1e   :  { %730 = vmatpush.bf16.msrb.mxu1 %v6862_v24  ;;  %v6822_v54 = vor.u32 %v9000_v51, %v6821_v50  ;;  %v6879_v55 = vld [vmem:[%s14131_s1 + $0x78] sm:$0xf0]  ;;  %v9015_v57 = vld [vmem:[%s14131_s1 + $0x84] sm:$0xf]  ;;  %v9009_v63 = vld [vmem:[%s14131_s1 + $0x54] sm:$0xf] }
  0x1f   :  { %14239 = vst [vmem:[#allocation10_spill] sm:$0xff] %v9778_v47  ;;  %v6882_v56 = vor.u32 %v9013_v52, %v6879_v55  ;;  %v9011_v60 = vld [vmem:[%s14131_s1 + $0x64] sm:$0xf]  ;;  %v6863_v0 = vld [vmem:[%s14131_s1 + $0x58] sm:$0xf0] }
  0x20   :  { %425 = vmatpush.bf16.msra.mxu0 %v6734_v58  ;;  %14240 = vst [vmem:[#allocation11_spill] sm:$0xff] %v9797_v53  ;;  %v6887_v58 = vld [vmem:[%s14131_s1 + $0x88] sm:$0xf0]  ;;  %v6691_v2 = vld [vmem:[%s14132_s0 + $0x150] sm:$0xf]  ;;  %v6866_v5 = vor.u32 %v9009_v63, %v6863_v0 }
  0x21   :  { %523 = vmatpush.bf16.msra.mxu2 %v6738_v61  ;;  %v6890_v59 = vor.u32 %v9015_v57, %v6887_v58  ;;  %v6871_v61 = vld [vmem:[%s14131_s1 + $0x68] sm:$0xf0]  ;;  %v8970_v3 = vld [vmem:[%s14132_s0 + $0x154] sm:$0xf0]  ;;  %v9007_v6 = vld [vmem:[%s14131_s1 + $0x44] sm:$0xf] }
  0x22   :  { %731 = vmatpush.bf16.msrb.mxu1 %v6854_v31  ;;  %v6855_v8 = vld [vmem:[%s14131_s1 + $0x48] sm:$0xf0]  ;;  %v9836_v9 = vor.u32 %v8970_v3, %v6691_v2  ;;  %v8985_v12 = vld [vmem:[%s14132_s0 + $0x1d4] sm:$0xf]  ;;  %v6709_v14 = vld [vmem:[%s14132_s0 + $0x1d8] sm:$0xf0] }
  0x23   :  { %426 = vmatmul.bf16.vlgmr.msra.gmra.mxu0 %v6652_v62  ;;  %v6858_v11 = vor.u32 %v9007_v6, %v6855_v8  ;;  %v9005_v15 = vld [vmem:[%s14131_s1 + $0x34] sm:$0xf]  ;;  %v6847_v16 = vld [vmem:[%s14131_s1 + $0x38] sm:$0xf0]  ;;  %v9852_v17 = vor.u32 %v8985_v12, %v6709_v14  ;;  %v9003_v19 = vld [vmem:[%s14131_s1 + $0x24] sm:$0xf] }
  0x24   :  { %524 = vmatmul.bf16.vlgmr.msra.gmra.mxu2 %v6652_v62  ;;  %826 = vmatpush.bf16.msrb.mxu0 %v6882_v56  ;;  %v6874_v62 = vor.u32 %v9011_v60, %v6871_v61  ;;  %14241 = vst [vmem:[#allocation12_spill] sm:$0xff] %v9836_v9  ;;  %v6850_v18 = vor.u32 %v9005_v15, %v6847_v16  ;;  %v6839_v20 = vld [vmem:[%s14131_s1 + $0x28] sm:$0xf0]  ;;  %v9001_v22 = vld [vmem:[%s14131_s1 + $0x14] sm:$0xf] }
  0x25   :  { %882 = vmatpush.bf16.msrb.mxu2 %v6890_v59  ;;  %14242 = vst [vmem:[#allocation13_spill] sm:$0xff] %v9852_v17  ;;  %v6842_v21 = vor.u32 %v9003_v19, %v6839_v20  ;;  %v6831_v23 = vld [vmem:[%s14131_s1 + $0x18] sm:$0xf0]  ;;  %v6699_v24 = vld [vmem:[%s14132_s0 + $0x190] sm:$0xf] }
  0x26   :  { %732 = vmatpush.bf16.msrb.mxu1 %v6846_v34  ;;  %v8978_v26 = vld [vmem:[%s14132_s0 + $0x194] sm:$0xf0]  ;;  %v6834_v27 = vor.u32 %v9001_v22, %v6831_v23  ;;  %v8999_v29 = vld [vmem:[%s14131_s1 + $0x4] sm:$0xf]  ;;  %v6823_v31 = vld [vmem:[%s14131_s1 + $0x8] sm:$0xf0] }
  0x27   :  { %v9876_v28 = vor.u32 %v8978_v26, %v6699_v24  ;;  %v6826_v32 = vor.u32 %v8999_v29, %v6823_v31  ;;  %v6587_v33 = vld [vmem:[%s14132_s0] sm:$0xf]  ;;  %v8928_v34 = vld [vmem:[%s14132_s0 + $0x4] sm:$0xf0]  ;;  %v8927_v35 = vld [vmem:[%s14132_s0 + $0x4] sm:$0xf] }
  0x28   :  { %6805 = vmatmul.msk.bf16.gmra.mxu1 %vm393_vm0, %v9652_v1  ;;  %827 = vmatpush.bf16.msrb.mxu0 %v6874_v62  ;;  %v6589_v36 = vld [vmem:[%s14132_s0 + $0x8] sm:$0xf0]  ;;  %v6588_v37 = vor.u32 %v8928_v34, %v6587_v33  ;;  %v6707_v41 = vld [vmem:[%s14132_s0 + $0x1d0] sm:$0xf]  ;;  %v8986_v42 = vld [vmem:[%s14132_s0 + $0x1d4] sm:$0xf0] }
  0x29   :  { %6813 = vmatmul.msk.bf16.gmra.mxu3 %vm393_vm0, %v9652_v1  ;;  %14243 = vst [vmem:[#allocation14_spill] sm:$0xff] %v9876_v28  ;;  %v6592_v39 = vor.u32 %v8927_v35, %v6589_v36  ;;  %v9905_v44 = vor.u32 %v8986_v42, %v6707_v41  ;;  %v8936_v48 = vld [vmem:[%s14132_s0 + $0x44] sm:$0xf0]  ;;  %v8935_v49 = vld [vmem:[%s14132_s0 + $0x44] sm:$0xf] }
  0x2a   :  { %733 = vmatpush.bf16.msrb.mxu1 %v6838_v38  ;;  %v6597_v50 = vld [vmem:[%s14132_s0 + $0x48] sm:$0xf0]  ;;  %v6603_v60 = vld [vmem:[%s14132_s0 + $0x80] sm:$0xf]  ;;  %v8944_v61 = vld [vmem:[%s14132_s0 + $0x84] sm:$0xf0] }
  0x2b   :  { %14244 = vst [vmem:[#allocation15_spill] sm:$0xff] %v9905_v44  ;;  %v9923_v55 = vor.u32 %v8935_v49, %v6597_v50  ;;  %v8943_v62 = vld [vmem:[%s14132_s0 + $0x84] sm:$0xf]  ;;  %v6605_v63 = vld [vmem:[%s14132_s0 + $0x88] sm:$0xf0]  ;;  %v9943_v2 = vor.u32 %v8944_v61, %v6603_v60 }
  0x2c   :  { %828 = vmatpush.bf16.msrb.mxu0 %v6866_v5  ;;  %v9945_v5 = vor.u32 %v8943_v62, %v6605_v63  ;;  %v8952_v22 = vld [vmem:[%s14132_s0 + $0xc4] sm:$0xf0]  ;;  %v8951_v23 = vld [vmem:[%s14132_s0 + $0xc4] sm:$0xf]  ;;  %v6613_v24 = vld [vmem:[%s14132_s0 + $0xc8] sm:$0xf0] }
  0x2d   :  { %v9975_v31 = vor.u32 %v8951_v23, %v6613_v24  ;;  %v6619_v42 = vld [vmem:[%s14132_s0 + $0x100] sm:$0xf]  ;;  %v7047_v63 = vld [vmem:[%s14131_s1 + $0x190] sm:$0xf]  ;;  %v8967_v23 = vld [vmem:[%s14132_s0 + $0x144] sm:$0xf] }
  0x2e   :  { %734 = vmatpush.bf16.msrb.mxu1 %v6830_v46  ;;  %v6595_v46 = vld [vmem:[%s14132_s0 + $0x40] sm:$0xf]  ;;  %v6629_v24 = vld [vmem:[%s14132_s0 + $0x148] sm:$0xf0] }
  0x2f   :  { %v9921_v52 = vor.u32 %v8936_v48, %v6595_v46  ;;  %v8959_v46 = vld [vmem:[%s14132_s0 + $0x104] sm:$0xf]  ;;  %v6621_v48 = vld [vmem:[%s14132_s0 + $0x108] sm:$0xf0] }
  0x30   :  { %829 = vmatpush.bf16.msrb.mxu0 %v6858_v11 }
  0x32   :  { %735 = vmatpush.bf16.msrb.mxu1 %v6822_v54 }
  0x33   :  { %431 = vmatmul.bf16.gmra.mxu0 %v9664_v4 }
  0x34   :  { %529 = vmatmul.bf16.gmra.mxu2 %v9664_v4  ;;  %830 = vmatpush.bf16.msrb.mxu0 %v6850_v18  ;;  %v7227_v4 = vld [vmem:[%s14131_s1 + $0x238] sm:$0xf0] }
  0x38   :  { %6806 = vmatmul.msk.bf16.gmra.mxu1 %vm393_vm0, %v9674_v7  ;;  %831 = vmatpush.bf16.msrb.mxu0 %v6842_v21  ;;  %v6611_v21 = vld [vmem:[%s14132_s0 + $0xc0] sm:$0xf] }
  0x39   :  { %6814 = vmatmul.msk.bf16.gmra.mxu3 %vm393_vm0, %v9674_v7 }
  0x3c   :  { %832 = vmatpush.bf16.msrb.mxu0 %v6834_v27  ;;  %v9973_v27 = vor.u32 %v8952_v22, %v6611_v21  ;;  %v7039_v21 = vld [vmem:[%s14131_s1 + $0x180] sm:$0xf]  ;;  %v9048_v22 = vld [vmem:[%s14131_s1 + $0x184] sm:$0xf0] }
  0x40   :  { %833 = vmatpush.bf16.msrb.mxu0 %v6826_v32 }
  0x43   :  { %436 = vmatmul.bf16.gmra.mxu0 %v9686_v10 }
  0x44   :  { %534 = vmatmul.bf16.gmra.mxu2 %v9686_v10 }
  0x48   :  { %6807 = vmatmul.msk.bf16.gmra.mxu1 %vm393_vm0, %v9696_v13 }
  0x49   :  { %6815 = vmatmul.msk.bf16.gmra.mxu3 %vm393_vm0, %v9696_v13 }
  0x53   :  { %441 = vmatmul.bf16.gmra.mxu0 %v9726_v25 }
  0x54   :  { %539 = vmatmul.bf16.gmra.mxu2 %v9726_v25 }
  0x58   :  { %6808 = vmatmul.msk.bf16.gmra.mxu1 %vm393_vm0, %v9742_v30 }
  0x59   :  { %6816 = vmatmul.msk.bf16.gmra.mxu3 %vm393_vm0, %v9742_v30 }
  0x63   :  { %446 = vmatmul.bf16.gmra.mxu0 %v9778_v47 }
  0x64   :  { %544 = vmatmul.bf16.gmra.mxu2 %v9778_v47 }
  0x68   :  { %6809 = vmatmul.msk.bf16.gmra.mxu1 %vm393_vm0, %v9797_v53 }
  0x69   :  { %6817 = vmatmul.msk.bf16.gmra.mxu3 %vm393_vm0, %v9797_v53  ;;  %v7009_v53 = vld [vmem:[%s14131_s1 + $0x148] sm:$0xf0] }
  0x73   :  { %451 = vmatmul.bf16.gmra.mxu0 %v9836_v9 }
  0x74   :  { %549 = vmatmul.bf16.gmra.mxu2 %v9836_v9 }
  0x78   :  { %6810 = vmatmul.msk.bf16.gmra.mxu1 %vm393_vm0, %v9852_v17 }
  0x79   :  { %6818 = vmatmul.msk.bf16.gmra.mxu3 %vm393_vm0, %v9852_v17 }
  0x83   :  { %456 = vmatmul.bf16.gmra.mxu0 %v9876_v28 }
  0x84   :  { %554 = vmatmul.bf16.gmra.mxu2 %v9876_v28 }
  0x85   :  { %v476_v38 = vpop.f32.mrf.mxu1 }
  0x88   :  { %736 = vmatmul.bf16.vlgmr.msrb.gmra.mxu1 %v6588_v37 }
  0x89   :  { %6891 = vmatmul.msk.bf16.vlgmr.msrb.gmra.mxu3 %vm393_vm0, %v6592_v39 }
  0x8c   :  { %v574_v40 = vpop.f32.mrf.mxu3 }
  0x8d   :  { %v478_v43 = vpop.f32.mrf.mxu1 }
  0x93   :  { %461 = vmatmul.bf16.gmra.mxu0 %v9905_v44 }
  0x94   :  { %v576_v51 = vpop.f32.mrf.mxu3  ;;  %559 = vmatmul.bf16.gmra.mxu2 %v9905_v44  ;;  %v9039_v44 = vld [vmem:[%s14131_s1 + $0x144] sm:$0xf] }
  0x95   :  { %v481_v54 = vpop.f32.mrf.mxu1 }
  0x98   :  { %741 = vmatmul.bf16.gmra.mxu1 %v9921_v52 }
  0x99   :  { %6892 = vmatmul.msk.bf16.gmra.mxu3 %vm393_vm0, %v9923_v55 }
  0x9c   :  { %v579_v56 = vpop.f32.mrf.mxu3 }
  0x9d   :  { %v483_v57 = vpop.f32.mrf.mxu1 }
  0xa0   :  { %v427_v58 = vpop.f32.mrf.mxu0 }
  0xa1   :  { %v9928_v59 = vadd.f32 %v476_v38, %v427_v58 }
  0xa3   :  { %834 = vmatmul.bf16.vlgmr.msrb.gmra.mxu0 %v6588_v37 }
  0xa4   :  { %v581_v0 = vpop.f32.mrf.mxu3  ;;  %6899 = vmatmul.msk.bf16.vlgmr.msrb.gmra.mxu2 %vm393_vm0, %v6592_v39 }
  0xa5   :  { %v486_v3 = vpop.f32.mrf.mxu1 }
  0xa7   :  { %v525_v6 = vpop.f32.mrf.mxu2 }
  0xa8   :  { %v9947_v8 = vadd.f32 %v574_v40, %v525_v6  ;;  %746 = vmatmul.bf16.gmra.mxu1 %v9943_v2  ;;  %v429_v11 = vpop.f32.mrf.mxu0 }
  0xa9   :  { %6893 = vmatmul.msk.bf16.gmra.mxu3 %vm393_vm0, %v9945_v5  ;;  %v9952_v12 = vadd.f32 %v478_v43, %v429_v11  ;;  %v8960_v43 = vld [vmem:[%s14132_s0 + $0x104] sm:$0xf0] }
  0xaa   :  { %v10003_v50 = vor.u32 %v8960_v43, %v6619_v42  ;;  %v9046_v42 = vld [vmem:[%s14131_s1 + $0x174] sm:$0xf0] }
  0xac   :  { %v584_v14 = vpop.f32.mrf.mxu3 }
  0xad   :  { %v488_v15 = vpop.f32.mrf.mxu1 }
  0xaf   :  { %v527_v16 = vpop.f32.mrf.mxu2 }
  0xb0   :  { %v9954_v18 = vadd.f32 %v576_v51, %v527_v16  ;;  %v432_v19 = vpop.f32.mrf.mxu0 }
  0xb1   :  { %v9956_v20 = vadd.f32 %v481_v54, %v432_v19  ;;  %v10005_v54 = vor.u32 %v8959_v46, %v6621_v48  ;;  %v8968_v19 = vld [vmem:[%s14132_s0 + $0x144] sm:$0xf0] }
  0xb3   :  { %839 = vmatmul.bf16.gmra.mxu0 %v9921_v52 }
  0xb4   :  { %v586_v26 = vpop.f32.mrf.mxu3  ;;  %6900 = vmatmul.msk.bf16.gmra.mxu2 %vm393_vm0, %v9923_v55 }
  0xb5   :  { %v491_v29 = vpop.f32.mrf.mxu1 }
  0xb7   :  { %v530_v32 = vpop.f32.mrf.mxu2 }
  0xb8   :  { %v9977_v33 = vadd.f32 %v579_v56, %v530_v32  ;;  %751 = vmatmul.bf16.gmra.mxu1 %v9973_v27  ;;  %v434_v34 = vpop.f32.mrf.mxu0 }
  0xb9   :  { %6894 = vmatmul.msk.bf16.gmra.mxu3 %vm393_vm0, %v9975_v31  ;;  %v9982_v35 = vadd.f32 %v483_v57, %v434_v34 }
  0xbc   :  { %v589_v36 = vpop.f32.mrf.mxu3 }
  0xbd   :  { %v493_v37 = vpop.f32.mrf.mxu1 }
  0xbf   :  { %v532_v38 = vpop.f32.mrf.mxu2 }
  0xc0   :  { %v9984_v39 = vadd.f32 %v581_v0, %v532_v38  ;;  %v437_v40 = vpop.f32.mrf.mxu0  ;;  %v9050_v0 = vld [vmem:[%s14131_s1 + $0x194] sm:$0xf0]  ;;  %v10055_v38 = vor.u32 %v8967_v23, %v6629_v24 }
  0xc1   :  { %v9986_v41 = vadd.f32 %v486_v3, %v437_v40  ;;  %v7048_v3 = vor.u32 %v9050_v0, %v7047_v63  ;;  %v7031_v40 = vld [vmem:[%s14131_s1 + $0x170] sm:$0xf]  ;;  %v7023_v63 = vld [vmem:[%s14131_s1 + $0x160] sm:$0xf]  ;;  %v9044_v0 = vld [vmem:[%s14131_s1 + $0x164] sm:$0xf0] }
  0xc2   :  { %v7032_v43 = vor.u32 %v9046_v42, %v7031_v40  ;;  %v6635_v40 = vld [vmem:[%s14132_s0 + $0x180] sm:$0xf] }
  0xc3   :  { %844 = vmatmul.bf16.gmra.mxu0 %v9943_v2  ;;  %1129 = vmatpush.bf16.msra.mxu1 %v7048_v3  ;;  %v7024_v3 = vor.u32 %v9044_v0, %v7023_v63  ;;  %v9049_v0 = vld [vmem:[%s14131_s1 + $0x194] sm:$0xf] }
  0xc4   :  { %v591_v49 = vpop.f32.mrf.mxu3  ;;  %6901 = vmatmul.msk.bf16.gmra.mxu2 %vm393_vm0, %v9945_v5 }
  0xc5   :  { %v496_v51 = vpop.f32.mrf.mxu1 }
  0xc7   :  { %v535_v56 = vpop.f32.mrf.mxu2 }
  0xc8   :  { %v10007_v57 = vadd.f32 %v584_v14, %v535_v56  ;;  %756 = vmatmul.bf16.gmra.mxu1 %v10003_v50  ;;  %v439_v58 = vpop.f32.mrf.mxu0 }
  0xc9   :  { %6895 = vmatmul.msk.bf16.gmra.mxu3 %vm393_vm0, %v10005_v54  ;;  %v10012_v60 = vadd.f32 %v488_v15, %v439_v58  ;;  %v6627_v15 = vld [vmem:[%s14132_s0 + $0x140] sm:$0xf] }
  0xca   :  { %v10051_v32 = vor.u32 %v8968_v19, %v6627_v15  ;;  %v7015_v15 = vld [vmem:[%s14131_s1 + $0x150] sm:$0xf] }
  0xcc   :  { %v10014_v61 = vpop.f32.mrf.mxu3 }
  0xcd   :  { %v10016_v62 = vpop.f32.mrf.mxu1 }
  0xcf   :  { %v537_v6 = vpop.f32.mrf.mxu2 }
  0xd0   :  { %v10024_v11 = vadd.f32 %v586_v26, %v537_v6  ;;  %v442_v14 = vpop.f32.mrf.mxu0  ;;  %v7040_v26 = vor.u32 %v9048_v22, %v7039_v21  ;;  %v9042_v21 = vld [vmem:[%s14131_s1 + $0x154] sm:$0xf0] }
  0xd1   :  { %v10029_v16 = vadd.f32 %v491_v29, %v442_v14  ;;  %v9052_v14 = vld [vmem:[%s14131_s1 + $0x1a4] sm:$0xf0]  ;;  %v7016_v23 = vor.u32 %v9042_v21, %v7015_v15 }
  0xd2   :  { %1130 = vmatpush.bf16.msra.mxu1 %v7040_v26 }
  0xd3   :  { %849 = vmatmul.bf16.gmra.mxu0 %v9973_v27 }
  0xd4   :  { %v10047_v29 = vpop.f32.mrf.mxu3  ;;  %6902 = vmatmul.msk.bf16.gmra.mxu2 %vm393_vm0, %v9975_v31 }
  0xd5   :  { %v10053_v34 = vpop.f32.mrf.mxu1 }
  0xd6   :  { %1131 = vmatpush.bf16.msra.mxu1 %v7032_v43  ;;  %v8976_v43 = vld [vmem:[%s14132_s0 + $0x184] sm:$0xf0] }
  0xd7   :  { %v540_v46 = vpop.f32.mrf.mxu2 }
  0xd8   :  { %v10063_v48 = vadd.f32 %v589_v36, %v540_v46  ;;  %761 = vmatmul.bf16.gmra.mxu1 %v10051_v32  ;;  %v444_v56 = vpop.f32.mrf.mxu0  ;;  %v7007_v46 = vld [vmem:[%s14131_s1 + $0x140] sm:$0xf] }
  0xd9   :  { %6896 = vmatmul.msk.bf16.gmra.mxu3 %vm393_vm0, %v10055_v38  ;;  %v10068_v58 = vadd.f32 %v493_v37, %v444_v56  ;;  %v7055_v37 = vld [vmem:[%s14131_s1 + $0x1a0] sm:$0xf]  ;;  %v8975_v56 = vld [vmem:[%s14132_s0 + $0x184] sm:$0xf] }
  0xda   :  { %1132 = vmatpush.bf16.msra.mxu1 %v7024_v3  ;;  %v7056_v19 = vor.u32 %v9052_v14, %v7055_v37  ;;  %v7049_v3 = vld [vmem:[%s14131_s1 + $0x198] sm:$0xf0]  ;;  %v10125_v14 = vor.u32 %v8976_v43, %v6635_v40  ;;  %v7057_v40 = vld [vmem:[%s14131_s1 + $0x1a8] sm:$0xf0] }
  0xdb   :  { %v7052_v15 = vor.u32 %v9049_v0, %v7049_v3 }
  0xdc   :  { %v10076_v36 = vpop.f32.mrf.mxu3  ;;  %1185 = vmatpush.bf16.msra.mxu3 %v7056_v19 }
  0xdd   :  { %v10078_v6 = vpop.f32.mrf.mxu1  ;;  %1227 = vmatpush.bf16.msra.mxu0 %v7052_v15 }
  0xde   :  { %1133 = vmatpush.bf16.msra.mxu1 %v7016_v23  ;;  %v9038_v23 = vld [vmem:[%s14131_s1 + $0x134] sm:$0xf0] }
  0xdf   :  { %v542_v22 = vpop.f32.mrf.mxu2 }
  0xe0   :  { %v10092_v24 = vadd.f32 %v591_v49, %v542_v22  ;;  %v447_v26 = vpop.f32.mrf.mxu0  ;;  %v9040_v49 = vld [vmem:[%s14131_s1 + $0x144] sm:$0xf0]  ;;  %v6999_v22 = vld [vmem:[%s14131_s1 + $0x130] sm:$0xf] }
  0xe1   :  { %v10097_v42 = vadd.f32 %v496_v51, %v447_v26  ;;  %v6637_v51 = vld [vmem:[%s14132_s0 + $0x188] sm:$0xf0]  ;;  %v7008_v63 = vor.u32 %v9040_v49, %v7007_v46  ;;  %v9051_v26 = vld [vmem:[%s14131_s1 + $0x1a4] sm:$0xf]  ;;  %v7000_v43 = vor.u32 %v9038_v23, %v6999_v22  ;;  %v6991_v22 = vld [vmem:[%s14131_s1 + $0x120] sm:$0xf] }
  0xe2   :  { %v10129_v21 = vor.u32 %v8975_v56, %v6637_v51  ;;  %v7060_v49 = vor.u32 %v9051_v26, %v7057_v40  ;;  %v9047_v56 = vld [vmem:[%s14131_s1 + $0x184] sm:$0xf]  ;;  %v7041_v51 = vld [vmem:[%s14131_s1 + $0x188] sm:$0xf0]  ;;  %v9045_v26 = vld [vmem:[%s14131_s1 + $0x174] sm:$0xf] }
  0xe3   :  { %854 = vmatmul.bf16.gmra.mxu0 %v10003_v50  ;;  %1134 = vmatpush.bf16.msra.mxu1 %v7008_v63  ;;  %v7044_v3 = vor.u32 %v9047_v56, %v7041_v51  ;;  %v7025_v51 = vld [vmem:[%s14131_s1 + $0x168] sm:$0xf0] }
  0xe4   :  { %v10121_v37 = vpop.f32.mrf.mxu3  ;;  %6903 = vmatmul.msk.bf16.gmra.mxu2 %vm393_vm0, %v10005_v54 }
  0xe5   :  { %v10127_v19 = vpop.f32.mrf.mxu1  ;;  %1283 = vmatpush.bf16.msra.mxu2 %v7060_v49  ;;  %1228 = vmatpush.bf16.msra.mxu0 %v7044_v3 }
  0xe7   :  { %v545_v46 = vpop.f32.mrf.mxu2  ;;  %1135 = vmatpush.bf16.msra.mxu1 %v7000_v43  ;;  %v9043_v43 = vld [vmem:[%s14131_s1 + $0x164] sm:$0xf] }
  0xe8   :  { %v10150_v63 = vadd.f32 %v10014_v61, %v545_v46  ;;  %766 = vmatmul.bf16.gmra.mxu1 %v10125_v14  ;;  %v449_v0 = vpop.f32.mrf.mxu0  ;;  %v9036_v61 = vld [vmem:[%s14131_s1 + $0x124] sm:$0xf0] }
  0xe9   :  { %6897 = vmatmul.msk.bf16.gmra.mxu3 %vm393_vm0, %v10129_v21  ;;  %v10156_v15 = vadd.f32 %v10016_v62, %v449_v0  ;;  %v6992_v23 = vor.u32 %v9036_v61, %v6991_v22  ;;  %v7033_v62 = vld [vmem:[%s14131_s1 + $0x178] sm:$0xf0]  ;;  %v7028_v22 = vor.u32 %v9043_v43, %v7025_v51 }
  0xea   :  { %v7036_v46 = vor.u32 %v9045_v26, %v7033_v62  ;;  %v8984_v26 = vld [vmem:[%s14132_s0 + $0x1c4] sm:$0xf0]  ;;  %v8983_v62 = vld [vmem:[%s14132_s0 + $0x1c4] sm:$0xf] }
  0xeb   :  { %1136 = vmatpush.bf16.msra.mxu1 %v6992_v23  ;;  %v6643_v23 = vld [vmem:[%s14132_s0 + $0x1c0] sm:$0xf] }
  0xec   :  { %v10170_v40 = vpop.f32.mrf.mxu3  ;;  %1229 = vmatpush.bf16.msra.mxu0 %v7036_v46  ;;  %v7017_v46 = vld [vmem:[%s14131_s1 + $0x158] sm:$0xf0]  ;;  %v10207_v43 = vor.u32 %v8984_v26, %v6643_v23  ;;  %v7012_v26 = vor.u32 %v9039_v44, %v7009_v53  ;;  %v9035_v44 = vld [vmem:[%s14131_s1 + $0x124] sm:$0xf] }
  0xed   :  { %v10172_v49 = vpop.f32.mrf.mxu1 }
  0xee   :  { %14245 = vst [vmem:[#allocation16_spill] sm:$0xff] %v10207_v43 }
  0xef   :  { %v547_v56 = vpop.f32.mrf.mxu2 }
  0xf0   :  { %v10181_v0 = vadd.f32 %v10047_v29, %v547_v56  ;;  %v452_v3 = vpop.f32.mrf.mxu0  ;;  %v6645_v29 = vld [vmem:[%s14132_s0 + $0x1c8] sm:$0xf0]  ;;  %1230 = vmatpush.bf16.msra.mxu0 %v7028_v22 }
  0xf1   :  { %v10184_v61 = vadd.f32 %v10053_v34, %v452_v3  ;;  %v9041_v34 = vld [vmem:[%s14131_s1 + $0x154] sm:$0xf]  ;;  %v10209_v17 = vor.u32 %v8983_v62, %v6645_v29 }
  0xf2   :  { %v7020_v51 = vor.u32 %v9041_v34, %v7017_v46  ;;  %v9037_v29 = vld [vmem:[%s14131_s1 + $0x134] sm:$0xf] }
  0xf3   :  { %859 = vmatmul.bf16.gmra.mxu0 %v10051_v32  ;;  %14246 = vst [vmem:[#allocation17_spill] sm:$0xff] %v10209_v17 }
  0xf4   :  { %v606_v56 = vpop.f32.mrf.mxu3  ;;  %6904 = vmatmul.msk.bf16.gmra.mxu2 %vm393_vm0, %v10055_v38  ;;  %1231 = vmatpush.bf16.msra.mxu0 %v7020_v51 }
  0xf5   :  { %v511_v3 = vpop.f32.mrf.mxu1 }
  0xf7   :  { %v550_v22 = vpop.f32.mrf.mxu2 }
  0xf8   :  { %v10218_v28 = vadd.f32 %v10076_v36, %v550_v22  ;;  %771 = vmatmul.bf16.gmra.mxu1 %v10207_v43  ;;  %v454_v23 = vpop.f32.mrf.mxu0  ;;  %1232 = vmatpush.bf16.msra.mxu0 %v7012_v26  ;;  %v7001_v36 = vld [vmem:[%s14131_s1 + $0x138] sm:$0xf0] }
  0xf9   :  { %6898 = vmatmul.msk.bf16.gmra.mxu3 %vm393_vm0, %v10209_v17  ;;  %v10224_v62 = vadd.f32 %v10078_v6, %v454_v23  ;;  %v7004_v46 = vor.u32 %v9037_v29, %v7001_v36  ;;  %v6993_v6 = vld [vmem:[%s14131_s1 + $0x128] sm:$0xf0]  ;;  %v6909_v29 = vld [vmem:[%s14132_s0 + $0x20] sm:$0xf]  ;;  %v8932_v36 = vld [vmem:[%s14132_s0 + $0x24] sm:$0xf0] }
  0xfa   :  { %v6996_v26 = vor.u32 %v9035_v44, %v6993_v6 }
  0xfc   :  { %v609_v34 = vpop.f32.mrf.mxu3  ;;  %1233 = vmatpush.bf16.msra.mxu0 %v7004_v46  ;;  %v8931_v46 = vld [vmem:[%s14132_s0 + $0x24] sm:$0xf] }
  0xfd   :  { %v513_v51 = vpop.f32.mrf.mxu1 }
  0xff   :  { %v552_v53 = vpop.f32.mrf.mxu2 }
 0x100   :  { %v10239_v22 = vadd.f32 %v10121_v37, %v552_v53  ;;  %v457_v23 = vpop.f32.mrf.mxu0  ;;  %v6911_v37 = vld [vmem:[%s14132_s0 + $0x28] sm:$0xf0]  ;;  %1234 = vmatpush.bf16.msra.mxu0 %v6996_v26  ;;  %v6910_v53 = vor.u32 %v8932_v36, %v6909_v29 }
 0x101   :  { %v10242_v30 = vadd.f32 %v10127_v19, %v457_v23  ;;  %v6914_v6 = vor.u32 %v8931_v46, %v6911_v37 }
 0x103   :  { %864 = vmatmul.bf16.gmra.mxu0 %v10125_v14 }
 0x104   :  { %v611_v19 = vpop.f32.mrf.mxu3  ;;  %6905 = vmatmul.msk.bf16.gmra.mxu2 %vm393_vm0, %v10129_v21 }
 0x105   :  { %v737_v44 = vpop.f32.mrf.mxu1 }
 0x106   :  { %v738_v23 = vadd.f32 %v737_v44, %v9928_v59 }
 0x107   :  { %v555_v9 = vpop.f32.mrf.mxu2 }
 0x108   :  { %v10261_v13 = vadd.f32 %v10170_v40, %v555_v9  ;;  %v459_v47 = vpop.f32.mrf.mxu0  ;;  %1137 = vmatmul.bf16.vlgmr.msra.gmra.mxu1 %v6910_v53  ;;  %v6917_v9 = vld [vmem:[%s14132_s0 + $0x60] sm:$0xf] }
 0x109   :  { %7061 = vmatmul.msk.bf16.vlgmr.msra.gmra.mxu3 %vm393_vm0, %v6914_v6  ;;  %v10265_v26 = vadd.f32 %v10172_v49, %v459_v47  ;;  %v8940_v47 = vld [vmem:[%s14132_s0 + $0x64] sm:$0xf0] }
 0x10a   :  { %v10289_v40 = vor.u32 %v8940_v47, %v6917_v9 }
 0x10c   :  { %v786_v7 = vpop.f32.mrf.mxu3  ;;  %14247 = vst [vmem:[#allocation18_spill] sm:$0xff] %v10289_v40 }
 0x10d   :  { %v10267_v25 = vadd.f32 %v786_v7, %v738_v23  ;;  %v739_v1 = vpop.f32.mrf.mxu1  ;;  %v8939_v7 = vld [vmem:[%s14132_s0 + $0x64] sm:$0xf] }
 0x10e   :  { %v740_v29 = vadd.f32 %v739_v1, %v9952_v12  ;;  %v6919_v1 = vld [vmem:[%s14132_s0 + $0x68] sm:$0xf0] }
 0x10f   :  { %v557_v36 = vpop.f32.mrf.mxu2 }
 0x110   :  { %v10270_v46 = vadd.f32 %v606_v56, %v557_v36  ;;  %v462_v59 = vpop.f32.mrf.mxu0 }
 0x111   :  { %v10272_v37 = vadd.f32 %v511_v3, %v462_v59  ;;  %v10293_v3 = vor.u32 %v8939_v7, %v6919_v1 }
 0x113   :  { %869 = vmatmul.bf16.gmra.mxu0 %v10207_v43  ;;  %14248 = vst [vmem:[#allocation19_spill] sm:$0xff] %v10293_v3 }
 0x114   :  { %v788_v12 = vpop.f32.mrf.mxu3  ;;  %6906 = vmatmul.msk.bf16.gmra.mxu2 %vm393_vm0, %v10209_v17 }
 0x115   :  { %v10291_v49 = vadd.f32 %v788_v12, %v740_v29  ;;  %v742_v56 = vpop.f32.mrf.mxu1 }
 0x116   :  { %v743_v44 = vadd.f32 %v742_v56, %v9956_v20  ;;  %v6925_v56 = vld [vmem:[%s14132_s0 + $0xa0] sm:$0xf] }
 0x117   :  { %v560_v23 = vpop.f32.mrf.mxu2 }
 0x118   :  { %v10296_v36 = vadd.f32 %v609_v34, %v560_v23  ;;  %v464_v59 = vpop.f32.mrf.mxu0  ;;  %1142 = vmatmul.bf16.gmra.mxu1 %v10289_v40 }
 0x119   :  { %7062 = vmatmul.msk.bf16.gmra.mxu3 %vm393_vm0, %v10293_v3  ;;  %v10301_v10 = vadd.f32 %v513_v51, %v464_v59  ;;  %v8948_v51 = vld [vmem:[%s14132_s0 + $0xa4] sm:$0xf0] }
 0x11c   :  { %v791_v9 = vpop.f32.mrf.mxu3 }
 0x11d   :  { %v10303_v47 = vadd.f32 %v791_v9, %v743_v44  ;;  %v744_v29 = vpop.f32.mrf.mxu1  ;;  %v8947_v44 = vld [vmem:[%s14132_s0 + $0xa4] sm:$0xf] }
 0x11e   :  { %v745_v7 = vadd.f32 %v744_v29, %v9982_v35  ;;  %v6927_v35 = vld [vmem:[%s14132_s0 + $0xa8] sm:$0xf0] }
 0x11f   :  { %v562_v1 = vpop.f32.mrf.mxu2  ;;  %v10326_v9 = vor.u32 %v8947_v44, %v6927_v35 }
 0x120   :  { %v10306_v12 = vadd.f32 %v611_v19, %v562_v1  ;;  %v835_v20 = vpop.f32.mrf.mxu0 }
 0x121   :  { %v836_v34 = vadd.f32 %v835_v20, %v9947_v8  ;;  %v10322_v8 = vor.u32 %v8948_v51, %v6925_v56  ;;  %14250 = vst [vmem:[#allocation21_spill] sm:$0xff] %v10326_v9 }
 0x123   :  { %1235 = vmatmul.bf16.vlgmr.msra.gmra.mxu0 %v6910_v53  ;;  %14249 = vst [vmem:[#allocation20_spill] sm:$0xff] %v10322_v8 }
 0x124   :  { %v793_v19 = vpop.f32.mrf.mxu3  ;;  %7069 = vmatmul.msk.bf16.vlgmr.msra.gmra.mxu2 %vm393_vm0, %v6914_v6 }
 0x125   :  { %v10324_v23 = vadd.f32 %v793_v19, %v745_v7  ;;  %v747_v59 = vpop.f32.mrf.mxu1  ;;  %v6933_v19 = vld [vmem:[%s14132_s0 + $0xe0] sm:$0xf] }
 0x126   :  { %v748_v29 = vadd.f32 %v747_v59, %v9986_v41 }
 0x127   :  { %v884_v1 = vpop.f32.mrf.mxu2 }
 0x128   :  { %v10329_v20 = vadd.f32 %v884_v1, %v836_v34  ;;  %v837_v45 = vpop.f32.mrf.mxu0  ;;  %1147 = vmatmul.bf16.gmra.mxu1 %v10322_v8 }
 0x129   :  { %7063 = vmatmul.msk.bf16.gmra.mxu3 %vm393_vm0, %v10326_v9  ;;  %v838_v53 = vadd.f32 %v837_v45, %v9954_v18  ;;  %v8956_v45 = vld [vmem:[%s14132_s0 + $0xe4] sm:$0xf0]  ;;  %v8955_v18 = vld [vmem:[%s14132_s0 + $0xe4] sm:$0xf] }
 0x12c   :  { %v796_v6 = vpop.f32.mrf.mxu3 }
 0x12d   :  { %v10335_v56 = vadd.f32 %v796_v6, %v748_v29  ;;  %v749_v7 = vpop.f32.mrf.mxu1 }
 0x12e   :  { %v750_v51 = vadd.f32 %v749_v7, %v10012_v60  ;;  %v6935_v60 = vld [vmem:[%s14132_s0 + $0xe8] sm:$0xf0] }
 0x12f   :  { %v886_v44 = vpop.f32.mrf.mxu2 }
 0x130   :  { %v10338_v35 = vadd.f32 %v886_v44, %v838_v53  ;;  %v840_v41 = vpop.f32.mrf.mxu0  ;;  %v10360_v53 = vor.u32 %v8955_v18, %v6935_v60 }
 0x131   :  { %v841_v34 = vadd.f32 %v840_v41, %v9977_v33  ;;  %v10356_v33 = vor.u32 %v8956_v45, %v6933_v19 }
 0x132   :  { %14252 = vst [vmem:[#allocation23_spill] sm:$0xff] %v10360_v53 }
 0x133   :  { %1240 = vmatmul.bf16.gmra.mxu0 %v10289_v40  ;;  %14251 = vst [vmem:[#allocation22_spill] sm:$0xff] %v10356_v33 }
 0x134   :  { %v798_v59 = vpop.f32.mrf.mxu3  ;;  %7070 = vmatmul.msk.bf16.gmra.mxu2 %vm393_vm0, %v10293_v3 }
 0x135   :  { %v10358_v29 = vadd.f32 %v798_v59, %v750_v51  ;;  %v752_v1 = vpop.f32.mrf.mxu1 }
 0x136   :  { %v753_v6 = vadd.f32 %v752_v1, %v10029_v16  ;;  %v6941_v1 = vld [vmem:[%s14132_s0 + $0x120] sm:$0xf] }
 0x137   :  { %v889_v7 = vpop.f32.mrf.mxu2 }
 0x138   :  { %v10363_v44 = vadd.f32 %v889_v7, %v841_v34  ;;  %v842_v41 = vpop.f32.mrf.mxu0  ;;  %1152 = vmatmul.bf16.gmra.mxu1 %v10356_v33 }
 0x139   :  { %7064 = vmatmul.msk.bf16.gmra.mxu3 %vm393_vm0, %v10360_v53  ;;  %v843_v3 = vadd.f32 %v842_v41, %v9984_v39  ;;  %v8964_v39 = vld [vmem:[%s14132_s0 + $0x124] sm:$0xf0] }
 0x13c   :  { %v801_v19 = vpop.f32.mrf.mxu3 }
 0x13d   :  { %v10369_v45 = vadd.f32 %v801_v19, %v753_v6  ;;  %v754_v51 = vpop.f32.mrf.mxu1  ;;  %v8963_v6 = vld [vmem:[%s14132_s0 + $0x124] sm:$0xf] }
 0x13e   :  { %v755_v18 = vadd.f32 %v754_v51, %v10068_v58  ;;  %v6943_v58 = vld [vmem:[%s14132_s0 + $0x128] sm:$0xf0] }
 0x13f   :  { %v891_v60 = vpop.f32.mrf.mxu2  ;;  %v10394_v19 = vor.u32 %v8963_v6, %v6943_v58  ;;  %v7217_v6 = vld [vmem:[%s14131_s1 + $0x220] sm:$0xf] }
 0x140   :  { %v10372_v59 = vadd.f32 %v891_v60, %v843_v3  ;;  %v845_v16 = vpop.f32.mrf.mxu0 }
 0x141   :  { %v846_v34 = vadd.f32 %v845_v16, %v10007_v57  ;;  %v10390_v57 = vor.u32 %v8964_v39, %v6941_v1  ;;  %14254 = vst [vmem:[#allocation25_spill] sm:$0xff] %v10394_v19 }
 0x143   :  { %1245 = vmatmul.bf16.gmra.mxu0 %v10322_v8  ;;  %14253 = vst [vmem:[#allocation24_spill] sm:$0xff] %v10390_v57  ;;  %v7201_v8 = vld [vmem:[%s14131_s1 + $0x200] sm:$0xf] }
 0x144   :  { %v803_v3 = vpop.f32.mrf.mxu3  ;;  %7071 = vmatmul.msk.bf16.gmra.mxu2 %vm393_vm0, %v10326_v9 }
 0x145   :  { %v10392_v7 = vadd.f32 %v803_v3, %v755_v18  ;;  %v757_v41 = vpop.f32.mrf.mxu1 }
 0x146   :  { %v758_v51 = vadd.f32 %v757_v41, %v10097_v42  ;;  %v9068_v42 = vld [vmem:[%s14131_s1 + $0x224] sm:$0xf0] }
 0x147   :  { %v894_v60 = vpop.f32.mrf.mxu2  ;;  %v7218_v58 = vor.u32 %v9068_v42, %v7217_v6 }
 0x148   :  { %v10397_v16 = vadd.f32 %v894_v60, %v846_v34  ;;  %v847_v40 = vpop.f32.mrf.mxu0  ;;  %1157 = vmatmul.bf16.gmra.mxu1 %v10390_v57 }
 0x149   :  { %7065 = vmatmul.msk.bf16.gmra.mxu3 %vm393_vm0, %v10394_v19  ;;  %v848_v9 = vadd.f32 %v847_v40, %v10024_v11  ;;  %v6949_v11 = vld [vmem:[%s14132_s0 + $0x160] sm:$0xf]  ;;  %1562 = vmatpush.bf16.msrb.mxu1 %v7218_v58 }
 0x14c   :  { %v806_v1 = vpop.f32.mrf.mxu3 }
 0x14d   :  { %v10403_v39 = vadd.f32 %v806_v1, %v758_v51  ;;  %v759_v18 = vpop.f32.mrf.mxu1  ;;  %v8972_v51 = vld [vmem:[%s14132_s0 + $0x164] sm:$0xf0]  ;;  %v8971_v1 = vld [vmem:[%s14132_s0 + $0x164] sm:$0xf] }
 0x14e   :  { %v760_v34 = vadd.f32 %v759_v18, %v10156_v15  ;;  %v7209_v15 = vld [vmem:[%s14131_s1 + $0x210] sm:$0xf]  ;;  %v10436_v42 = vor.u32 %v8972_v51, %v6949_v11 }
 0x14f   :  { %v896_v3 = vpop.f32.mrf.mxu2 }
 0x150   :  { %v10412_v41 = vadd.f32 %v896_v3, %v848_v9  ;;  %v850_v60 = vpop.f32.mrf.mxu0  ;;  %v9066_v9 = vld [vmem:[%s14131_s1 + $0x214] sm:$0xf0]  ;;  %14255 = vst [vmem:[#allocation26_spill] sm:$0xff] %v10436_v42 }
 0x151   :  { %v851_v40 = vadd.f32 %v850_v60, %v10063_v48  ;;  %v6951_v48 = vld [vmem:[%s14132_s0 + $0x168] sm:$0xf0]  ;;  %v7210_v18 = vor.u32 %v9066_v9, %v7209_v15  ;;  %v9064_v15 = vld [vmem:[%s14131_s1 + $0x204] sm:$0xf0] }
 0x152   :  { %v10440_v60 = vor.u32 %v8971_v1, %v6951_v48  ;;  %v7193_v1 = vld [vmem:[%s14131_s1 + $0x1f0] sm:$0xf] }
 0x153   :  { %1250 = vmatmul.bf16.gmra.mxu0 %v10356_v33  ;;  %1563 = vmatpush.bf16.msrb.mxu1 %v7210_v18  ;;  %v7202_v33 = vor.u32 %v9064_v15, %v7201_v8  ;;  %v7185_v18 = vld [vmem:[%s14131_s1 + $0x1e0] sm:$0xf] }
 0x154   :  { %v808_v6 = vpop.f32.mrf.mxu3  ;;  %7072 = vmatmul.msk.bf16.gmra.mxu2 %vm393_vm0, %v10360_v53  ;;  %14256 = vst [vmem:[#allocation27_spill] sm:$0xff] %v10440_v60 }
 0x155   :  { %v10438_v58 = vadd.f32 %v808_v6, %v760_v34  ;;  %v762_v3 = vpop.f32.mrf.mxu1  ;;  %v7225_v6 = vld [vmem:[%s14131_s1 + $0x230] sm:$0xf] }
 0x156   :  { %v763_v9 = vadd.f32 %v762_v3, %v10184_v61  ;;  %v9062_v61 = vld [vmem:[%s14131_s1 + $0x1f4] sm:$0xf0] }
 0x157   :  { %v899_v53 = vpop.f32.mrf.mxu2  ;;  %1564 = vmatpush.bf16.msrb.mxu1 %v7202_v33  ;;  %v7194_v8 = vor.u32 %v9062_v61, %v7193_v1  ;;  %v9070_v3 = vld [vmem:[%s14131_s1 + $0x234] sm:$0xf0] }
 0x158   :  { %v10449_v11 = vadd.f32 %v899_v53, %v851_v40  ;;  %v852_v51 = vpop.f32.mrf.mxu0  ;;  %1162 = vmatmul.bf16.gmra.mxu1 %v10436_v42 }
 0x159   :  { %7066 = vmatmul.msk.bf16.gmra.mxu3 %vm393_vm0, %v10440_v60  ;;  %v853_v34 = vadd.f32 %v852_v51, %v10092_v24  ;;  %v9060_v24 = vld [vmem:[%s14131_s1 + $0x1e4] sm:$0xf0]  ;;  %v7226_v51 = vor.u32 %v9070_v3, %v7225_v6  ;;  %v9067_v6 = vld [vmem:[%s14131_s1 + $0x224] sm:$0xf]  ;;  %v7219_v3 = vld [vmem:[%s14131_s1 + $0x228] sm:$0xf0] }
 0x15a   :  { %v7186_v15 = vor.u32 %v9060_v24, %v7185_v18  ;;  %v8979_v18 = vld [vmem:[%s14132_s0 + $0x1a4] sm:$0xf] }
 0x15b   :  { %1565 = vmatpush.bf16.msrb.mxu1 %v7194_v8  ;;  %v6957_v8 = vld [vmem:[%s14132_s0 + $0x1a0] sm:$0xf]  ;;  %1618 = vmatpush.bf16.msrb.mxu3 %v7226_v51  ;;  %v7222_v51 = vor.u32 %v9067_v6, %v7219_v3  ;;  %v9065_v6 = vld [vmem:[%s14131_s1 + $0x214] sm:$0xf]  ;;  %v7211_v3 = vld [vmem:[%s14131_s1 + $0x218] sm:$0xf0] }
 0x15c   :  { %v811_v53 = vpop.f32.mrf.mxu3 }
 0x15d   :  { %v10461_v40 = vadd.f32 %v811_v53, %v763_v9  ;;  %v764_v48 = vpop.f32.mrf.mxu1  ;;  %v8980_v53 = vld [vmem:[%s14132_s0 + $0x1a4] sm:$0xf0]  ;;  %1660 = vmatpush.bf16.msrb.mxu0 %v7222_v51 }
 0x15e   :  { %v765_v33 = vadd.f32 %v764_v48, %v10224_v62  ;;  %v7177_v48 = vld [vmem:[%s14131_s1 + $0x1d0] sm:$0xf] }
 0x15f   :  { %v901_v9 = vpop.f32.mrf.mxu2  ;;  %1566 = vmatpush.bf16.msrb.mxu1 %v7186_v15 }
 0x160   :  { %v10476_v1 = vadd.f32 %v901_v9, %v853_v34  ;;  %v855_v61 = vpop.f32.mrf.mxu0  ;;  %v9058_v34 = vld [vmem:[%s14131_s1 + $0x1d4] sm:$0xf0]  ;;  %v10506_v9 = vor.u32 %v8980_v53, %v6957_v8  ;;  %v7169_v8 = vld [vmem:[%s14131_s1 + $0x1c0] sm:$0xf] }
 0x161   :  { %v856_v62 = vadd.f32 %v855_v61, %v10150_v63  ;;  %v6959_v63 = vld [vmem:[%s14132_s0 + $0x1a8] sm:$0xf0]  ;;  %v7178_v24 = vor.u32 %v9058_v34, %v7177_v48 }
 0x162   :  { %14257 = vst [vmem:[#allocation28_spill] sm:$0xff] %v10506_v9  ;;  %v10510_v34 = vor.u32 %v8979_v18, %v6959_v63  ;;  %v9056_v18 = vld [vmem:[%s14131_s1 + $0x1c4] sm:$0xf0] }
 0x163   :  { %1255 = vmatmul.bf16.gmra.mxu0 %v10390_v57  ;;  %1567 = vmatpush.bf16.msrb.mxu1 %v7178_v24  ;;  %v9069_v57 = vld [vmem:[%s14131_s1 + $0x234] sm:$0xf]  ;;  %v7170_v24 = vor.u32 %v9056_v18, %v7169_v8  ;;  %v7203_v8 = vld [vmem:[%s14131_s1 + $0x208] sm:$0xf0] }
 0x164   :  { %v813_v15 = vpop.f32.mrf.mxu3  ;;  %7073 = vmatmul.msk.bf16.gmra.mxu2 %vm393_vm0, %v10394_v19  ;;  %14258 = vst [vmem:[#allocation29_spill] sm:$0xff] %v10510_v34 }
 0x165   :  { %v10508_v61 = vadd.f32 %v813_v15, %v765_v33  ;;  %v767_v48 = vpop.f32.mrf.mxu1  ;;  %v7230_v33 = vor.u32 %v9069_v57, %v7227_v4  ;;  %v7214_v4 = vor.u32 %v9065_v6, %v7211_v3  ;;  %v7161_v57 = vld [vmem:[%s14131_s1 + $0x1b0] sm:$0xf]  ;;  %v9061_v6 = vld [vmem:[%s14131_s1 + $0x1f4] sm:$0xf]  ;;  %v7195_v3 = vld [vmem:[%s14131_s1 + $0x1f8] sm:$0xf0] }
 0x166   :  { %v768_v53 = vadd.f32 %v767_v48, %v10242_v30  ;;  %v9063_v48 = vld [vmem:[%s14131_s1 + $0x204] sm:$0xf] }
 0x167   :  { %v904_v63 = vpop.f32.mrf.mxu2  ;;  %1716 = vmatpush.bf16.msrb.mxu2 %v7230_v33  ;;  %1568 = vmatpush.bf16.msrb.mxu1 %v7170_v24 }
 0x168   :  { %v10531_v15 = vadd.f32 %v904_v63, %v856_v62  ;;  %v857_v19 = vpop.f32.mrf.mxu0  ;;  %1167 = vmatmul.bf16.gmra.mxu1 %v10506_v9  ;;  %v9054_v62 = vld [vmem:[%s14131_s1 + $0x1b4] sm:$0xf0]  ;;  %1661 = vmatpush.bf16.msrb.mxu0 %v7214_v4 }
 0x169   :  { %7067 = vmatmul.msk.bf16.gmra.mxu3 %vm393_vm0, %v10510_v34  ;;  %v858_v30 = vadd.f32 %v857_v19, %v10181_v0  ;;  %v7162_v51 = vor.u32 %v9054_v62, %v7161_v57  ;;  %v7206_v19 = vor.u32 %v9063_v48, %v7203_v8  ;;  %v7198_v62 = vor.u32 %v9061_v6, %v7195_v3  ;;  %v8987_v48 = vld [vmem:[%s14132_s0 + $0x1e4] sm:$0xf]  ;;  %v7187_v8 = vld [vmem:[%s14131_s1 + $0x1e8] sm:$0xf0] }
 0x16b   :  { %1569 = vmatpush.bf16.msrb.mxu1 %v7162_v51  ;;  %v8988_v51 = vld [vmem:[%s14132_s0 + $0x1e4] sm:$0xf0] }
 0x16c   :  { %v816_v0 = vpop.f32.mrf.mxu3  ;;  %1662 = vmatpush.bf16.msrb.mxu0 %v7206_v19 }
 0x16d   :  { %v10549_v33 = vadd.f32 %v816_v0, %v768_v53  ;;  %v769_v18 = vpop.f32.mrf.mxu1 }
 0x16e   :  { %v770_v63 = vadd.f32 %v769_v18, %v10265_v26  ;;  %v6965_v26 = vld [vmem:[%s14132_s0 + $0x1e0] sm:$0xf] }
 0x16f   :  { %v906_v24 = vpop.f32.mrf.mxu2  ;;  %v10582_v19 = vor.u32 %v8988_v51, %v6965_v26 }
 0x170   :  { %v10558_v4 = vadd.f32 %v906_v24, %v858_v30  ;;  %v860_v57 = vpop.f32.mrf.mxu0  ;;  %v6967_v30 = vld [vmem:[%s14132_s0 + $0x1e8] sm:$0xf0]  ;;  %1663 = vmatpush.bf16.msrb.mxu0 %v7198_v62 }
 0x171   :  { %v861_v53 = vadd.f32 %v860_v57, %v10218_v28  ;;  %v9059_v28 = vld [vmem:[%s14131_s1 + $0x1e4] sm:$0xf]  ;;  %14259 = vst [vmem:[#allocation30_spill] sm:$0xff] %v10582_v19  ;;  %v10586_v3 = vor.u32 %v8987_v48, %v6967_v30  ;;  %v7171_v30 = vld [vmem:[%s14131_s1 + $0x1c8] sm:$0xf0] }
 0x172   :  { %v7190_v18 = vor.u32 %v9059_v28, %v7187_v8  ;;  %v9055_v48 = vld [vmem:[%s14131_s1 + $0x1c4] sm:$0xf] }
 0x173   :  { %1260 = vmatmul.bf16.gmra.mxu0 %v10436_v42  ;;  %14260 = vst [vmem:[#allocation31_spill] sm:$0xff] %v10586_v3  ;;  %v9057_v42 = vld [vmem:[%s14131_s1 + $0x1d4] sm:$0xf]  ;;  %v7174_v28 = vor.u32 %v9055_v48, %v7171_v30 }
 0x174   :  { %v818_v0 = vpop.f32.mrf.mxu3  ;;  %7074 = vmatmul.msk.bf16.gmra.mxu2 %vm393_vm0, %v10440_v60  ;;  %1664 = vmatpush.bf16.msrb.mxu0 %v7190_v18  ;;  %v7179_v60 = vld [vmem:[%s14131_s1 + $0x1d8] sm:$0xf0]  ;;  %v8933_v48 = vld [vmem:[%s14132_s0 + $0x34] sm:$0xf] }
 0x175   :  { %v10584_v24 = vadd.f32 %v818_v0, %v770_v63  ;;  %v772_v6 = vpop.f32.mrf.mxu1  ;;  %v7182_v63 = vor.u32 %v9057_v42, %v7179_v60  ;;  %v7163_v18 = vld [vmem:[%s14131_s1 + $0x1b8] sm:$0xf0] }
 0x176   :  { %v773_v57 = vadd.f32 %v772_v6, %v10272_v37 }
 0x177   :  { %v909_v62 = vpop.f32.mrf.mxu2 }
 0x178   :  { %v10595_v26 = vadd.f32 %v909_v62, %v861_v53  ;;  %v862_v51 = vpop.f32.mrf.mxu0  ;;  %1172 = vmatmul.bf16.gmra.mxu1 %v10582_v19  ;;  %1665 = vmatpush.bf16.msrb.mxu0 %v7182_v63  ;;  %v8934_v63 = vld [vmem:[%s14132_s0 + $0x34] sm:$0xf0] }
 0x179   :  { %7068 = vmatmul.msk.bf16.gmra.mxu3 %vm393_vm0, %v10586_v3  ;;  %v863_v37 = vadd.f32 %v862_v51, %v10239_v22  ;;  %v9053_v22 = vld [vmem:[%s14131_s1 + $0x1b4] sm:$0xf] }
 0x17a   :  { %v7166_v51 = vor.u32 %v9053_v22, %v7163_v18 }
 0x17c   :  { %v821_v53 = vpop.f32.mrf.mxu3  ;;  %1666 = vmatpush.bf16.msrb.mxu0 %v7174_v28 }
 0x17d   :  { %v10607_v8 = vadd.f32 %v821_v53, %v773_v57  ;;  %v774_v0 = vpop.f32.mrf.mxu1 }
 0x17e   :  { %v775_v42 = vadd.f32 %v774_v0, %v10301_v10  ;;  %v7079_v10 = vld [vmem:[%s14132_s0 + $0x30] sm:$0xf] }
 0x17f   :  { %v911_v60 = vpop.f32.mrf.mxu2  ;;  %v7080_v30 = vor.u32 %v8934_v63, %v7079_v10 }
 0x180   :  { %v10616_v6 = vadd.f32 %v911_v60, %v863_v37  ;;  %v865_v62 = vpop.f32.mrf.mxu0  ;;  %v7081_v37 = vld [vmem:[%s14132_s0 + $0x38] sm:$0xf0]  ;;  %1667 = vmatpush.bf16.msrb.mxu0 %v7166_v51 }
 0x181   :  { %v866_v57 = vadd.f32 %v865_v62, %v10261_v13  ;;  %v7084_v28 = vor.u32 %v8933_v48, %v7081_v37  ;;  %v8941_v37 = vld [vmem:[%s14132_s0 + $0x74] sm:$0xf] }
 0x183   :  { %1265 = vmatmul.bf16.gmra.mxu0 %v10506_v9 }
 0x184   :  { %v823_v13 = vpop.f32.mrf.mxu3  ;;  %7075 = vmatmul.msk.bf16.gmra.mxu2 %vm393_vm0, %v10510_v34 }
 0x185   :  { %v10634_v53 = vadd.f32 %v823_v13, %v775_v42  ;;  %v1138_v0 = vpop.f32.mrf.mxu1 }
 0x187   :  { %v914_v60 = vpop.f32.mrf.mxu2 }
 0x188   :  { %v10636_v22 = vadd.f32 %v914_v60, %v866_v57  ;;  %v867_v18 = vpop.f32.mrf.mxu0  ;;  %1570 = vmatmul.bf16.vlgmr.msrb.gmra.mxu1 %v7080_v30  ;;  %v7087_v57 = vld [vmem:[%s14132_s0 + $0x70] sm:$0xf] }
 0x189   :  { %7231 = vmatmul.msk.bf16.vlgmr.msrb.gmra.mxu3 %vm393_vm0, %v7084_v28  ;;  %v868_v62 = vadd.f32 %v867_v18, %v10270_v46  ;;  %v8942_v46 = vld [vmem:[%s14132_s0 + $0x74] sm:$0xf0] }
 0x18c   :  { %v1187_v51 = vpop.f32.mrf.mxu3 }
 0x18d   :  { %v1188_v9 = vadd.f32 %v1187_v51, %v1138_v0  ;;  %v1140_v17 = vpop.f32.mrf.mxu1 }
 0x18f   :  { %v10641_v43 = vadd.f32 %v1188_v9, %v10267_v25  ;;  %v916_v10 = vpop.f32.mrf.mxu2  ;;  %v7089_v25 = vld [vmem:[%s14132_s0 + $0x78] sm:$0xf0] }
 0x190   :  { %v10643_v42 = vadd.f32 %v916_v10, %v868_v62  ;;  %v870_v63 = vpop.f32.mrf.mxu0  ;;  %v10663_v0 = vor.u32 %v8941_v37, %v7089_v25 }
 0x191   :  { %v871_v48 = vadd.f32 %v870_v63, %v10296_v36  ;;  %v10661_v36 = vor.u32 %v8942_v46, %v7087_v57 }
 0x192   :  { %14262 = vst [vmem:[#allocation33_spill] sm:$0xff] %v10663_v0 }
 0x193   :  { %1270 = vmatmul.bf16.gmra.mxu0 %v10582_v19  ;;  %14261 = vst [vmem:[#allocation32_spill] sm:$0xff] %v10661_v36 }
 0x194   :  { %v1189_v9 = vpop.f32.mrf.mxu3  ;;  %7076 = vmatmul.msk.bf16.gmra.mxu2 %vm393_vm0, %v10586_v3 }
 0x195   :  { %v1190_v13 = vadd.f32 %v1189_v9, %v1140_v17  ;;  %v1143_v60 = vpop.f32.mrf.mxu1 }
 0x197   :  { %v10666_v18 = vadd.f32 %v1190_v13, %v10291_v49  ;;  %v919_v62 = vpop.f32.mrf.mxu2  ;;  %v8950_v13 = vld [vmem:[%s14132_s0 + $0xb4] sm:$0xf0] }
 0x198   :  { %v10668_v51 = vadd.f32 %v919_v62, %v871_v48  ;;  %v872_v10 = vpop.f32.mrf.mxu0  ;;  %1575 = vmatmul.bf16.gmra.mxu1 %v10661_v36  ;;  %v7095_v48 = vld [vmem:[%s14132_s0 + $0xb0] sm:$0xf] }
 0x199   :  { %7232 = vmatmul.msk.bf16.gmra.mxu3 %vm393_vm0, %v10663_v0  ;;  %v873_v63 = vadd.f32 %v872_v10, %v10306_v12  ;;  %v8949_v12 = vld [vmem:[%s14132_s0 + $0xb4] sm:$0xf]  ;;  %v10692_v62 = vor.u32 %v8950_v13, %v7095_v48 }
 0x19b   :  { %14263 = vst [vmem:[#allocation34_spill] sm:$0xff] %v10692_v62 }
 0x19c   :  { %v1192_v57 = vpop.f32.mrf.mxu3 }
 0x19d   :  { %v1193_v46 = vadd.f32 %v1192_v57, %v1143_v60  ;;  %v1145_v17 = vpop.f32.mrf.mxu1 }
 0x19f   :  { %v10675_v37 = vadd.f32 %v1193_v46, %v10303_v47  ;;  %v921_v25 = vpop.f32.mrf.mxu2  ;;  %v7097_v47 = vld [vmem:[%s14132_s0 + $0xb8] sm:$0xf0] }
 0x1a0   :  { %v10677_v49 = vadd.f32 %v921_v25, %v873_v63  ;;  %v1236_v9 = vpop.f32.mrf.mxu0  ;;  %v10694_v63 = vor.u32 %v8949_v12, %v7097_v47 }
 0x1a2   :  { %14264 = vst [vmem:[#allocation35_spill] sm:$0xff] %v10694_v63 }
 0x1a3   :  { %1668 = vmatmul.bf16.vlgmr.msrb.gmra.mxu0 %v7080_v30 }
 0x1a4   :  { %v1194_v60 = vpop.f32.mrf.mxu3  ;;  %7239 = vmatmul.msk.bf16.vlgmr.msrb.gmra.mxu2 %vm393_vm0, %v7084_v28 }
 0x1a5   :  { %v1195_v10 = vadd.f32 %v1194_v60, %v1145_v17  ;;  %v1148_v57 = vpop.f32.mrf.mxu1  ;;  %v8958_v60 = vld [vmem:[%s14132_s0 + $0xf4] sm:$0xf0] }
 0x1a7   :  { %v10697_v46 = vadd.f32 %v1195_v10, %v10324_v23  ;;  %v1285_v25 = vpop.f32.mrf.mxu2 }
 0x1a8   :  { %v1286_v3 = vadd.f32 %v1285_v25, %v1236_v9  ;;  %v1238_v19 = vpop.f32.mrf.mxu0  ;;  %1580 = vmatmul.bf16.gmra.mxu1 %v10692_v62  ;;  %v7103_v9 = vld [vmem:[%s14132_s0 + $0xf0] sm:$0xf] }
 0x1a9   :  { %7233 = vmatmul.msk.bf16.gmra.mxu3 %vm393_vm0, %v10694_v63  ;;  %v10726_v10 = vor.u32 %v8958_v60, %v7103_v9 }
 0x1aa   :  { %v10703_v30 = vadd.f32 %v1286_v3, %v10329_v20  ;;  %v8957_v3 = vld [vmem:[%s14132_s0 + $0xf4] sm:$0xf] }
 0x1ab   :  { %14265 = vst [vmem:[#allocation36_spill] sm:$0xff] %v10726_v10 }
 0x1ac   :  { %v1197_v28 = vpop.f32.mrf.mxu3 }
 0x1ad   :  { %v1198_v48 = vadd.f32 %v1197_v28, %v1148_v57  ;;  %v1150_v17 = vpop.f32.mrf.mxu1 }
 0x1af   :  { %v10706_v13 = vadd.f32 %v1198_v48, %v10335_v56  ;;  %v1287_v12 = vpop.f32.mrf.mxu2  ;;  %v7105_v56 = vld [vmem:[%s14132_s0 + $0xf8] sm:$0xf0] }
 0x1b0   :  { %v1288_v23 = vadd.f32 %v1287_v12, %v1238_v19  ;;  %v1241_v47 = vpop.f32.mrf.mxu0  ;;  %v10728_v25 = vor.u32 %v8957_v3, %v7105_v56 }
 0x1b2   :  { %v10715_v20 = vadd.f32 %v1288_v23, %v10338_v35  ;;  %14266 = vst [vmem:[#allocation37_spill] sm:$0xff] %v10728_v25 }
 0x1b3   :  { %1673 = vmatmul.bf16.gmra.mxu0 %v10661_v36 }
 0x1b4   :  { %v1199_v19 = vpop.f32.mrf.mxu3  ;;  %7240 = vmatmul.msk.bf16.gmra.mxu2 %vm393_vm0, %v10663_v0 }
 0x1b5   :  { %v1200_v57 = vadd.f32 %v1199_v19, %v1150_v17  ;;  %v1153_v35 = vpop.f32.mrf.mxu1 }
 0x1b7   :  { %v10731_v28 = vadd.f32 %v1200_v57, %v10358_v29  ;;  %v1290_v48 = vpop.f32.mrf.mxu2  ;;  %v8966_v57 = vld [vmem:[%s14132_s0 + $0x134] sm:$0xf0] }
 0x1b8   :  { %v1291_v12 = vadd.f32 %v1290_v48, %v1241_v47  ;;  %v1243_v23 = vpop.f32.mrf.mxu0  ;;  %1585 = vmatmul.bf16.gmra.mxu1 %v10726_v10  ;;  %v7111_v47 = vld [vmem:[%s14132_s0 + $0x130] sm:$0xf] }
 0x1b9   :  { %7234 = vmatmul.msk.bf16.gmra.mxu3 %vm393_vm0, %v10728_v25 }
 0x1ba   :  { %v10737_v36 = vadd.f32 %v1291_v12, %v10363_v44  ;;  %v10760_v12 = vor.u32 %v8966_v57, %v7111_v47 }
 0x1bc   :  { %v1202_v9 = vpop.f32.mrf.mxu3  ;;  %14267 = vst [vmem:[#allocation38_spill] sm:$0xff] %v10760_v12 }
 0x1bd   :  { %v1203_v60 = vadd.f32 %v1202_v9, %v1153_v35  ;;  %v1155_v17 = vpop.f32.mrf.mxu1  ;;  %v8965_v35 = vld [vmem:[%s14132_s0 + $0x134] sm:$0xf] }
 0x1bf   :  { %v10740_v3 = vadd.f32 %v1203_v60, %v10369_v45  ;;  %v1292_v56 = vpop.f32.mrf.mxu2  ;;  %v7113_v45 = vld [vmem:[%s14132_s0 + $0x138] sm:$0xf0] }
 0x1c0   :  { %v1293_v29 = vadd.f32 %v1292_v56, %v1243_v23  ;;  %v1246_v19 = vpop.f32.mrf.mxu0  ;;  %v10762_v9 = vor.u32 %v8965_v35, %v7113_v45  ;;  %v7331_v35 = vld [vmem:[%s14131_s1 + $0x2b0] sm:$0xf] }
 0x1c2   :  { %v10749_v44 = vadd.f32 %v1293_v29, %v10372_v59  ;;  %14268 = vst [vmem:[#allocation39_spill] sm:$0xff] %v10762_v9 }
 0x1c3   :  { %1678 = vmatmul.bf16.gmra.mxu0 %v10692_v62 }
 0x1c4   :  { %v1204_v48 = vpop.f32.mrf.mxu3  ;;  %7241 = vmatmul.msk.bf16.gmra.mxu2 %vm393_vm0, %v10694_v63  ;;  %v7315_v63 = vld [vmem:[%s14131_s1 + $0x290] sm:$0xf] }
 0x1c5   :  { %v1205_v23 = vadd.f32 %v1204_v48, %v1155_v17  ;;  %v1158_v59 = vpop.f32.mrf.mxu1 }
 0x1c7   :  { %v10765_v60 = vadd.f32 %v1205_v23, %v10392_v7  ;;  %v1295_v56 = vpop.f32.mrf.mxu2  ;;  %v9086_v7 = vld [vmem:[%s14131_s1 + $0x2b4] sm:$0xf0] }
 0x1c8   :  { %v1296_v29 = vadd.f32 %v1295_v56, %v1246_v19  ;;  %v1248_v0 = vpop.f32.mrf.mxu0  ;;  %1590 = vmatmul.bf16.gmra.mxu1 %v10760_v12  ;;  %v7332_v19 = vor.u32 %v9086_v7, %v7331_v35 }
 0x1c9   :  { %7235 = vmatmul.msk.bf16.gmra.mxu3 %vm393_vm0, %v10762_v9 }
 0x1ca   :  { %v10771_v62 = vadd.f32 %v1296_v29, %v10397_v16  ;;  %v7119_v16 = vld [vmem:[%s14132_s0 + $0x170] sm:$0xf]  ;;  %1911 = vmatpush.bf16.msra.mxu1 %v7332_v19  ;;  %v7323_v29 = vld [vmem:[%s14131_s1 + $0x2a0] sm:$0xf] }
 0x1cc   :  { %v1207_v47 = vpop.f32.mrf.mxu3 }
 0x1cd   :  { %v1208_v57 = vadd.f32 %v1207_v47, %v1158_v59  ;;  %v1160_v17 = vpop.f32.mrf.mxu1  ;;  %v8974_v59 = vld [vmem:[%s14132_s0 + $0x174] sm:$0xf0]  ;;  %v8973_v47 = vld [vmem:[%s14132_s0 + $0x174] sm:$0xf] }
 0x1ce   :  { %v10806_v19 = vor.u32 %v8974_v59, %v7119_v16 }
 0x1cf   :  { %v10780_v45 = vadd.f32 %v1208_v57, %v10403_v39  ;;  %v1297_v48 = vpop.f32.mrf.mxu2  ;;  %v9084_v39 = vld [vmem:[%s14131_s1 + $0x2a4] sm:$0xf0]  ;;  %v7121_v57 = vld [vmem:[%s14132_s0 + $0x178] sm:$0xf0] }
 0x1d0   :  { %v1298_v23 = vadd.f32 %v1297_v48, %v1248_v0  ;;  %v1251_v56 = vpop.f32.mrf.mxu0  ;;  %v7324_v35 = vor.u32 %v9084_v39, %v7323_v29  ;;  %14269 = vst [vmem:[#allocation40_spill] sm:$0xff] %v10806_v19  ;;  %v10808_v48 = vor.u32 %v8973_v47, %v7121_v57  ;;  %v9082_v29 = vld [vmem:[%s14131_s1 + $0x294] sm:$0xf0] }
 0x1d1   :  { %v7316_v39 = vor.u32 %v9082_v29, %v7315_v63  ;;  %v9080_v63 = vld [vmem:[%s14131_s1 + $0x284] sm:$0xf0] }
 0x1d2   :  { %v10795_v0 = vadd.f32 %v1298_v23, %v10412_v41  ;;  %1912 = vmatpush.bf16.msra.mxu1 %v7324_v35  ;;  %14270 = vst [vmem:[#allocation41_spill] sm:$0xff] %v10808_v48  ;;  %v7299_v35 = vld [vmem:[%s14131_s1 + $0x270] sm:$0xf] }
 0x1d3   :  { %1683 = vmatmul.bf16.gmra.mxu0 %v10726_v10 }
 0x1d4   :  { %v1209_v7 = vpop.f32.mrf.mxu3  ;;  %7242 = vmatmul.msk.bf16.gmra.mxu2 %vm393_vm0, %v10728_v25 }
 0x1d5   :  { %v1210_v41 = vadd.f32 %v1209_v7, %v1160_v17  ;;  %v1163_v23 = vpop.f32.mrf.mxu1  ;;  %v7307_v17 = vld [vmem:[%s14131_s1 + $0x280] sm:$0xf]  ;;  %v9078_v7 = vld [vmem:[%s14131_s1 + $0x274] sm:$0xf0] }
 0x1d6   :  { %1913 = vmatpush.bf16.msra.mxu1 %v7316_v39  ;;  %v7308_v47 = vor.u32 %v9080_v63, %v7307_v17  ;;  %v7127_v63 = vld [vmem:[%s14132_s0 + $0x1b0] sm:$0xf] }
 0x1d7   :  { %v10817_v10 = vadd.f32 %v1210_v41, %v10438_v58  ;;  %v1300_v25 = vpop.f32.mrf.mxu2  ;;  %v7300_v41 = vor.u32 %v9078_v7, %v7299_v35  ;;  %v8981_v35 = vld [vmem:[%s14132_s0 + $0x1b4] sm:$0xf]  ;;  %v7129_v7 = vld [vmem:[%s14132_s0 + $0x1b8] sm:$0xf0] }
 0x1d8   :  { %v1301_v16 = vadd.f32 %v1300_v25, %v1251_v56  ;;  %v1253_v59 = vpop.f32.mrf.mxu0  ;;  %1595 = vmatmul.bf16.gmra.mxu1 %v10806_v19 }
 0x1d9   :  { %7236 = vmatmul.msk.bf16.gmra.mxu3 %vm393_vm0, %v10808_v48 }
 0x1da   :  { %v10829_v58 = vadd.f32 %v1301_v16, %v10449_v11  ;;  %1914 = vmatpush.bf16.msra.mxu1 %v7308_v47  ;;  %v7339_v11 = vld [vmem:[%s14131_s1 + $0x2c0] sm:$0xf] }
 0x1dc   :  { %v1212_v25 = vpop.f32.mrf.mxu3 }
 0x1dd   :  { %v1213_v56 = vadd.f32 %v1212_v25, %v1163_v23  ;;  %v1165_v57 = vpop.f32.mrf.mxu1  ;;  %v9088_v23 = vld [vmem:[%s14131_s1 + $0x2c4] sm:$0xf0]  ;;  %v7291_v25 = vld [vmem:[%s14131_s1 + $0x260] sm:$0xf] }
 0x1de   :  { %v7340_v47 = vor.u32 %v9088_v23, %v7339_v11  ;;  %1915 = vmatpush.bf16.msra.mxu1 %v7300_v41 }
 0x1df   :  { %v10838_v29 = vadd.f32 %v1213_v56, %v10461_v40  ;;  %v1302_v39 = vpop.f32.mrf.mxu2  ;;  %v8982_v40 = vld [vmem:[%s14132_s0 + $0x1b4] sm:$0xf0]  ;;  %v9076_v56 = vld [vmem:[%s14131_s1 + $0x264] sm:$0xf0] }
 0x1e0   :  { %v1303_v16 = vadd.f32 %v1302_v39, %v1253_v59  ;;  %v1256_v17 = vpop.f32.mrf.mxu0  ;;  %1967 = vmatpush.bf16.msra.mxu3 %v7340_v47  ;;  %v7292_v41 = vor.u32 %v9076_v56, %v7291_v25  ;;  %v9085_v39 = vld [vmem:[%s14131_s1 + $0x2b4] sm:$0xf]  ;;  %v10876_v23 = vor.u32 %v8982_v40, %v7127_v63  ;;  %v10878_v47 = vor.u32 %v8981_v35, %v7129_v7  ;;  %v7283_v56 = vld [vmem:[%s14131_s1 + $0x250] sm:$0xf]  ;;  %v7341_v40 = vld [vmem:[%s14131_s1 + $0x2c8] sm:$0xf0] }
 0x1e1   :  { %v9083_v35 = vld [vmem:[%s14131_s1 + $0x2a4] sm:$0xf] }
 0x1e2   :  { %v10859_v59 = vadd.f32 %v1303_v16, %v10476_v1  ;;  %v7333_v1 = vld [vmem:[%s14131_s1 + $0x2b8] sm:$0xf0]  ;;  %1916 = vmatpush.bf16.msra.mxu1 %v7292_v41 }
 0x1e3   :  { %1688 = vmatmul.bf16.gmra.mxu0 %v10760_v12  ;;  %v7336_v16 = vor.u32 %v9085_v39, %v7333_v1  ;;  %v9074_v12 = vld [vmem:[%s14131_s1 + $0x254] sm:$0xf0]  ;;  %v7275_v39 = vld [vmem:[%s14131_s1 + $0x240] sm:$0xf] }
 0x1e4   :  { %14271 = vst [vmem:[#allocation42_spill] sm:$0xff] %v10859_v59  ;;  %v1214_v11 = vpop.f32.mrf.mxu3  ;;  %7243 = vmatmul.msk.bf16.gmra.mxu2 %vm393_vm0, %v10762_v9  ;;  %v7284_v59 = vor.u32 %v9074_v12, %v7283_v56 }
 0x1e5   :  { %v1215_v34 = vadd.f32 %v1214_v11, %v1165_v57  ;;  %v1168_v25 = vpop.f32.mrf.mxu1  ;;  %2009 = vmatpush.bf16.msra.mxu0 %v7336_v16  ;;  %v9087_v57 = vld [vmem:[%s14131_s1 + $0x2c4] sm:$0xf]  ;;  %v9081_v16 = vld [vmem:[%s14131_s1 + $0x294] sm:$0xf] }
 0x1e6   :  { %v7344_v12 = vor.u32 %v9087_v57, %v7341_v40  ;;  %1917 = vmatpush.bf16.msra.mxu1 %v7284_v59  ;;  %v7317_v59 = vld [vmem:[%s14131_s1 + $0x298] sm:$0xf0] }
 0x1e7   :  { %v10887_v9 = vadd.f32 %v1215_v34, %v10508_v61  ;;  %v1305_v63 = vpop.f32.mrf.mxu2  ;;  %v7325_v61 = vld [vmem:[%s14131_s1 + $0x2a8] sm:$0xf0] }
 0x1e8   :  { %v1306_v7 = vadd.f32 %v1305_v63, %v1256_v17  ;;  %v1258_v41 = vpop.f32.mrf.mxu0  ;;  %1600 = vmatmul.bf16.gmra.mxu1 %v10876_v23  ;;  %v7328_v34 = vor.u32 %v9083_v35, %v7325_v61  ;;  %v9072_v17 = vld [vmem:[%s14131_s1 + $0x244] sm:$0xf0]  ;;  %2065 = vmatpush.bf16.msra.mxu2 %v7344_v12  ;;  %v7320_v63 = vor.u32 %v9081_v16, %v7317_v59  ;;  %v7309_v12 = vld [vmem:[%s14131_s1 + $0x288] sm:$0xf0]  ;;  %v9077_v16 = vld [vmem:[%s14131_s1 + $0x274] sm:$0xf] }
 0x1e9   :  { %7237 = vmatmul.msk.bf16.gmra.mxu3 %vm393_vm0, %v10878_v47  ;;  %v7276_v11 = vor.u32 %v9072_v17, %v7275_v39  ;;  %v7301_v59 = vld [vmem:[%s14131_s1 + $0x278] sm:$0xf0] }
 0x1ea   :  { %v10911_v1 = vadd.f32 %v1306_v7, %v10531_v15  ;;  %2010 = vmatpush.bf16.msra.mxu0 %v7328_v34  ;;  %v9079_v7 = vld [vmem:[%s14131_s1 + $0x284] sm:$0xf] }
 0x1eb   :  { %1918 = vmatpush.bf16.msra.mxu1 %v7276_v11  ;;  %v7312_v39 = vor.u32 %v9079_v7, %v7309_v12  ;;  %v8989_v11 = vld [vmem:[%s14132_s0 + $0x1f4] sm:$0xf] }
 0x1ec   :  { %v1217_v56 = vpop.f32.mrf.mxu3 }
 0x1ed   :  { %v1218_v57 = vadd.f32 %v1217_v56, %v1168_v25  ;;  %v1170_v40 = vpop.f32.mrf.mxu1  ;;  %v7135_v25 = vld [vmem:[%s14132_s0 + $0x1f0] sm:$0xf] }
 0x1ee   :  { %2011 = vmatpush.bf16.msra.mxu0 %v7320_v63  ;;  %v7304_v63 = vor.u32 %v9077_v16, %v7301_v59 }
 0x1ef   :  { %v10920_v35 = vadd.f32 %v1218_v57, %v10549_v33  ;;  %v1307_v15 = vpop.f32.mrf.mxu2  ;;  %v8990_v33 = vld [vmem:[%s14132_s0 + $0x1f4] sm:$0xf0] }
 0x1f0   :  { %v1308_v61 = vadd.f32 %v1307_v15, %v1258_v41  ;;  %v1261_v34 = vpop.f32.mrf.mxu0  ;;  %v7137_v41 = vld [vmem:[%s14132_s0 + $0x1f8] sm:$0xf0]  ;;  %v10952_v56 = vor.u32 %v8990_v33, %v7135_v25 }
 0x1f1   :  { %v10954_v15 = vor.u32 %v8989_v11, %v7137_v41  ;;  %v7285_v11 = vld [vmem:[%s14131_s1 + $0x258] sm:$0xf0] }
 0x1f2   :  { %v10935_v17 = vadd.f32 %v1308_v61, %v10558_v4  ;;  %2012 = vmatpush.bf16.msra.mxu0 %v7312_v39  ;;  %v9073_v39 = vld [vmem:[%s14131_s1 + $0x254] sm:$0xf] }
 0x1f3   :  { %1693 = vmatmul.bf16.gmra.mxu0 %v10806_v19  ;;  %v9075_v19 = vld [vmem:[%s14131_s1 + $0x264] sm:$0xf]  ;;  %v7288_v41 = vor.u32 %v9073_v39, %v7285_v11 }
 0x1f4   :  { %v1219_v4 = vpop.f32.mrf.mxu3  ;;  %7244 = vmatmul.msk.bf16.gmra.mxu2 %vm393_vm0, %v10808_v48  ;;  %v7293_v48 = vld [vmem:[%s14131_s1 + $0x268] sm:$0xf0] }
 0x1f5   :  { %v1220_v57 = vadd.f32 %v1219_v4, %v1170_v40  ;;  %v1173_v7 = vpop.f32.mrf.mxu1  ;;  %v7296_v40 = vor.u32 %v9075_v19, %v7293_v48  ;;  %v7277_v4 = vld [vmem:[%s14131_s1 + $0x248] sm:$0xf0] }
 0x1f6   :  { %2013 = vmatpush.bf16.msra.mxu0 %v7304_v63 }
 0x1f7   :  { %v10957_v12 = vadd.f32 %v1220_v57, %v10584_v24  ;;  %v1310_v61 = vpop.f32.mrf.mxu2 }
 0x1f8   :  { %v1311_v25 = vadd.f32 %v1310_v61, %v1261_v34  ;;  %v1263_v33 = vpop.f32.mrf.mxu0  ;;  %1605 = vmatmul.bf16.gmra.mxu1 %v10952_v56 }
 0x1f9   :  { %7238 = vmatmul.msk.bf16.gmra.mxu3 %vm393_vm0, %v10954_v15 }
 0x1fa   :  { %v10969_v24 = vadd.f32 %v1311_v25, %v10595_v26  ;;  %2014 = vmatpush.bf16.msra.mxu0 %v7296_v40  ;;  %v9071_v26 = vld [vmem:[%s14131_s1 + $0x244] sm:$0xf] }
 0x1fb   :  { %v7280_v61 = vor.u32 %v9071_v26, %v7277_v4 }
 0x1fc   :  { %v1222_v34 = vpop.f32.mrf.mxu3 }
 0x1fd   :  { %v1223_v16 = vadd.f32 %v1222_v34, %v1173_v7  ;;  %v1175_v59 = vpop.f32.mrf.mxu1 }
 0x1fe   :  { %2015 = vmatpush.bf16.msra.mxu0 %v7288_v41 }
 0x1ff   :  { %v10978_v19 = vadd.f32 %v1223_v16, %v10607_v8  ;;  %v1312_v48 = vpop.f32.mrf.mxu2 }
 0x200   :  { %v1313_v63 = vadd.f32 %v1312_v48, %v1263_v33  ;;  %v1266_v57 = vpop.f32.mrf.mxu0 }
 0x202   :  { %v10987_v25 = vadd.f32 %v1313_v63, %v10616_v6  ;;  %2016 = vmatpush.bf16.msra.mxu0 %v7280_v61 }
 0x203   :  { %1698 = vmatmul.bf16.gmra.mxu0 %v10876_v23 }
 0x204   :  { %v1224_v8 = vpop.f32.mrf.mxu3  ;;  %7245 = vmatmul.msk.bf16.gmra.mxu2 %vm393_vm0, %v10878_v47 }
 0x205   :  { %v1225_v7 = vadd.f32 %v1224_v8, %v1175_v59  ;;  %v1571_v40 = vpop.f32.mrf.mxu1 }
 0x207   :  { %v10993_v39 = vadd.f32 %v1225_v7, %v10634_v53  ;;  %v1315_v11 = vpop.f32.mrf.mxu2 }
 0x208   :  { %v1316_v33 = vadd.f32 %v1315_v11, %v1266_v57  ;;  %v1268_v34 = vpop.f32.mrf.mxu0  ;;  %1919 = vmatmul.bf16.vlgmr.msra.gmra.mxu1 %v9921_v52 }
 0x209   :  { %7345 = vmatmul.msk.bf16.vlgmr.msra.gmra.mxu3 %vm393_vm0, %v9923_v55 }
 0x20a   :  { %v10999_v6 = vadd.f32 %v1316_v33, %v10636_v22 }
 0x20c   :  { %v1620_v41 = vpop.f32.mrf.mxu3 }
 0x20d   :  { %v1621_v16 = vadd.f32 %v1620_v41, %v1571_v40  ;;  %v1573_v48 = vpop.f32.mrf.mxu1 }
 0x20f   :  { %v11002_v59 = vadd.f32 %v1621_v16, %v10641_v43  ;;  %v1317_v26 = vpop.f32.mrf.mxu2 }
 0x210   :  { %v1318_v53 = vadd.f32 %v1317_v26, %v1268_v34  ;;  %v1271_v4 = vpop.f32.mrf.mxu0 }
 0x212   :  { %v11005_v63 = vadd.f32 %v1318_v53, %v10643_v42 }
 0x213   :  { %1703 = vmatmul.bf16.gmra.mxu0 %v10952_v56 }
 0x214   :  { %v1622_v57 = vpop.f32.mrf.mxu3  ;;  %7246 = vmatmul.msk.bf16.gmra.mxu2 %vm393_vm0, %v10954_v15 }
 0x215   :  { %v1623_v22 = vadd.f32 %v1622_v57, %v1573_v48  ;;  %v1576_v61 = vpop.f32.mrf.mxu1 }
 0x217   :  { %v11011_v8 = vadd.f32 %v1623_v22, %v10666_v18  ;;  %v1320_v7 = vpop.f32.mrf.mxu2 }
 0x218   :  { %v1321_v43 = vadd.f32 %v1320_v7, %v1271_v4  ;;  %v1273_v40 = vpop.f32.mrf.mxu0  ;;  %1924 = vmatmul.bf16.gmra.mxu1 %v9943_v2 }
 0x219   :  { %7346 = vmatmul.msk.bf16.gmra.mxu3 %vm393_vm0, %v9945_v5 }
 0x21a   :  { %v11017_v42 = vadd.f32 %v1321_v43, %v10668_v51 }
 0x21c   :  { %v1625_v11 = vpop.f32.mrf.mxu3 }
 0x21d   :  { %v1626_v33 = vadd.f32 %v1625_v11, %v1576_v61  ;;  %v1578_v34 = vpop.f32.mrf.mxu1 }
 0x21f   :  { %v11020_v41 = vadd.f32 %v1626_v33, %v10675_v37  ;;  %v1322_v16 = vpop.f32.mrf.mxu2 }
 0x220   :  { %v1323_v18 = vadd.f32 %v1322_v16, %v1273_v40  ;;  %v1669_v48 = vpop.f32.mrf.mxu0 }
 0x222   :  { %v11023_v26 = vadd.f32 %v1323_v18, %v10677_v49 }
 0x223   :  { %2017 = vmatmul.bf16.vlgmr.msra.gmra.mxu0 %v9921_v52 }
 0x224   :  { %v1627_v53 = vpop.f32.mrf.mxu3  ;;  %7353 = vmatmul.msk.bf16.vlgmr.msra.gmra.mxu2 %vm393_vm0, %v9923_v55 }
 0x225   :  { %v1628_v51 = vadd.f32 %v1627_v53, %v1578_v34  ;;  %v1581_v4 = vpop.f32.mrf.mxu1 }
 0x227   :  { %v11029_v57 = vadd.f32 %v1628_v51, %v10697_v46  ;;  %v1718_v22 = vpop.f32.mrf.mxu2 }
 0x228   :  { %v1719_v37 = vadd.f32 %v1718_v22, %v1669_v48  ;;  %v1671_v61 = vpop.f32.mrf.mxu0  ;;  %1929 = vmatmul.bf16.gmra.mxu1 %v9973_v27 }
 0x229   :  { %7347 = vmatmul.msk.bf16.gmra.mxu3 %vm393_vm0, %v9975_v31 }
 0x22a   :  { %v11035_v49 = vadd.f32 %v1719_v37, %v10703_v30 }
 0x22c   :  { %v1630_v52 = vpop.f32.mrf.mxu3 }
 0x22d   :  { %v1631_v7 = vadd.f32 %v1630_v52, %v1581_v4  ;;  %v1583_v43 = vpop.f32.mrf.mxu1 }
 0x22f   :  { %v11038_v55 = vadd.f32 %v1631_v7, %v10706_v13  ;;  %v1720_v40 = vpop.f32.mrf.mxu2 }
 0x230   :  { %v1721_v46 = vadd.f32 %v1720_v40, %v1671_v61  ;;  %v1674_v11 = vpop.f32.mrf.mxu0 }
 0x232   :  { %v11041_v33 = vadd.f32 %v1721_v46, %v10715_v20 }
 0x233   :  { %2022 = vmatmul.bf16.gmra.mxu0 %v9943_v2 }
 0x234   :  { %v1632_v34 = vpop.f32.mrf.mxu3  ;;  %7354 = vmatmul.msk.bf16.gmra.mxu2 %vm393_vm0, %v9945_v5 }
 0x235   :  { %v1633_v30 = vadd.f32 %v1632_v34, %v1583_v43  ;;  %v1586_v16 = vpop.f32.mrf.mxu1 }
 0x237   :  { %v11047_v18 = vadd.f32 %v1633_v30, %v10731_v28  ;;  %v1723_v48 = vpop.f32.mrf.mxu2 }
 0x238   :  { %v1724_v13 = vadd.f32 %v1723_v48, %v1674_v11  ;;  %v1676_v53 = vpop.f32.mrf.mxu0  ;;  %1934 = vmatmul.bf16.gmra.mxu1 %v10003_v50 }
 0x239   :  { %7348 = vmatmul.msk.bf16.gmra.mxu3 %vm393_vm0, %v10005_v54 }
 0x23a   :  { %v11053_v20 = vadd.f32 %v1724_v13, %v10737_v36 }
 0x23c   :  { %v1635_v2 = vpop.f32.mrf.mxu3 }
 0x23d   :  { %v1636_v51 = vadd.f32 %v1635_v2, %v1586_v16  ;;  %v1588_v4 = vpop.f32.mrf.mxu1  ;;  %v9102_v2 = vld [vmem:[%s14131_s1 + $0x334] sm:$0xf0] }
 0x23f   :  { %v11056_v5 = vadd.f32 %v1636_v51, %v10740_v3  ;;  %v1725_v22 = vpop.f32.mrf.mxu2 }
 0x240   :  { %v1726_v28 = vadd.f32 %v1725_v22, %v1676_v53  ;;  %v1679_v37 = vpop.f32.mrf.mxu0 }
 0x242   :  { %v11059_v61 = vadd.f32 %v1726_v28, %v10749_v44 }
 0x243   :  { %2027 = vmatmul.bf16.gmra.mxu0 %v9973_v27 }
 0x244   :  { %v1637_v52 = vpop.f32.mrf.mxu3  ;;  %7355 = vmatmul.msk.bf16.gmra.mxu2 %vm393_vm0, %v9975_v31  ;;  %v7445_v31 = vld [vmem:[%s14131_s1 + $0x340] sm:$0xf] }
 0x245   :  { %v1638_v36 = vadd.f32 %v1637_v52, %v1588_v4  ;;  %v1591_v7 = vpop.f32.mrf.mxu1  ;;  %v9100_v52 = vld [vmem:[%s14131_s1 + $0x324] sm:$0xf0] }
 0x247   :  { %v11065_v43 = vadd.f32 %v1638_v36, %v10765_v60  ;;  %v1728_v40 = vpop.f32.mrf.mxu2  ;;  %v9104_v60 = vld [vmem:[%s14131_s1 + $0x344] sm:$0xf0] }
 0x248   :  { %v1729_v3 = vadd.f32 %v1728_v40, %v1679_v37  ;;  %v1681_v46 = vpop.f32.mrf.mxu0  ;;  %1939 = vmatmul.bf16.gmra.mxu1 %v10051_v32  ;;  %v7446_v30 = vor.u32 %v9104_v60, %v7445_v31  ;;  %v7429_v37 = vld [vmem:[%s14131_s1 + $0x320] sm:$0xf]  ;;  %v9096_v60 = vld [vmem:[%s14131_s1 + $0x304] sm:$0xf0] }
 0x249   :  { %7349 = vmatmul.msk.bf16.gmra.mxu3 %vm393_vm0, %v10055_v38  ;;  %v7413_v31 = vld [vmem:[%s14131_s1 + $0x300] sm:$0xf] }
 0x24a   :  { %v11071_v44 = vadd.f32 %v1729_v3, %v10771_v62  ;;  %2260 = vmatpush.bf16.msrb.mxu1 %v7446_v30  ;;  %v7437_v62 = vld [vmem:[%s14131_s1 + $0x330] sm:$0xf]  ;;  %v9098_v3 = vld [vmem:[%s14131_s1 + $0x314] sm:$0xf0]  ;;  %v7414_v30 = vor.u32 %v9096_v60, %v7413_v31  ;;  %v9101_v31 = vld [vmem:[%s14131_s1 + $0x334] sm:$0xf] }
 0x24b   :  { %v7438_v4 = vor.u32 %v9102_v2, %v7437_v62 }
 0x24c   :  { %v1640_v27 = vpop.f32.mrf.mxu3 }
 0x24d   :  { %v1641_v11 = vadd.f32 %v1640_v27, %v1591_v7  ;;  %v1593_v34 = vpop.f32.mrf.mxu1 }
 0x24e   :  { %2261 = vmatpush.bf16.msrb.mxu1 %v7438_v4 }
 0x24f   :  { %v11080_v16 = vadd.f32 %v1641_v11, %v10780_v45  ;;  %v1730_v48 = vpop.f32.mrf.mxu2 }
 0x250   :  { %v1731_v13 = vadd.f32 %v1730_v48, %v1681_v46  ;;  %v1684_v53 = vpop.f32.mrf.mxu0 }
 0x252   :  { %v11089_v51 = vadd.f32 %v1731_v13, %v10795_v0  ;;  %v7430_v0 = vor.u32 %v9100_v52, %v7429_v37  ;;  %v9103_v52 = vld [vmem:[%s14131_s1 + $0x344] sm:$0xf] }
 0x253   :  { %2032 = vmatmul.bf16.gmra.mxu0 %v10003_v50 }
 0x254   :  { %v1642_v45 = vpop.f32.mrf.mxu3  ;;  %7356 = vmatmul.msk.bf16.gmra.mxu2 %vm393_vm0, %v10005_v54  ;;  %2262 = vmatpush.bf16.msrb.mxu1 %v7430_v0  ;;  %v7421_v54 = vld [vmem:[%s14131_s1 + $0x310] sm:$0xf]  ;;  %v7447_v0 = vld [vmem:[%s14131_s1 + $0x348] sm:$0xf0] }
 0x255   :  { %v1643_v22 = vadd.f32 %v1642_v45, %v1593_v34  ;;  %v1596_v28 = vpop.f32.mrf.mxu1  ;;  %v7422_v46 = vor.u32 %v9098_v3, %v7421_v54  ;;  %v7405_v45 = vld [vmem:[%s14131_s1 + $0x2f0] sm:$0xf]  ;;  %v9092_v3 = vld [vmem:[%s14131_s1 + $0x2e4] sm:$0xf0] }
 0x257   :  { %v11101_v36 = vadd.f32 %v1643_v22, %v10817_v10  ;;  %v1733_v50 = vpop.f32.mrf.mxu2  ;;  %v14272_v22 = vld [vmem:[#allocation42_spill] sm:$0xff] }
 0x258   :  { %v1734_v7 = vadd.f32 %v1733_v50, %v1684_v53  ;;  %v1686_v40 = vpop.f32.mrf.mxu0  ;;  %1944 = vmatmul.bf16.gmra.mxu1 %v10125_v14  ;;  %v9106_v53 = vld [vmem:[%s14131_s1 + $0x354] sm:$0xf0] }
 0x259   :  { %7350 = vmatmul.msk.bf16.gmra.mxu3 %vm393_vm0, %v10129_v21  ;;  %2263 = vmatpush.bf16.msrb.mxu1 %v7422_v46 }
 0x25a   :  { %v11113_v10 = vadd.f32 %v1734_v7, %v10829_v58  ;;  %v7453_v58 = vld [vmem:[%s14131_s1 + $0x350] sm:$0xf]  ;;  %v7450_v7 = vor.u32 %v9103_v52, %v7447_v0 }
 0x25b   :  { %v7454_v4 = vor.u32 %v9106_v53, %v7453_v58  ;;  %v14274_v53 = vld [vmem:[#allocation17_spill] sm:$0xff] }
 0x25c   :  { %v1645_v27 = vpop.f32.mrf.mxu3  ;;  %2358 = vmatpush.bf16.msrb.mxu0 %v7450_v7 }
 0x25d   :  { %v1646_v11 = vadd.f32 %v1645_v27, %v1596_v28  ;;  %v1598_v34 = vpop.f32.mrf.mxu1  ;;  %2264 = vmatpush.bf16.msrb.mxu1 %v7414_v30  ;;  %2316 = vmatpush.bf16.msrb.mxu3 %v7454_v4  ;;  %v7389_v4 = vld [vmem:[%s14131_s1 + $0x2d0] sm:$0xf] }
 0x25f   :  { %v11122_v48 = vadd.f32 %v1646_v11, %v10838_v29  ;;  %v1735_v13 = vpop.f32.mrf.mxu2  ;;  %v9094_v29 = vld [vmem:[%s14131_s1 + $0x2f4] sm:$0xf0] }
 0x260   :  { %v1736_v62 = vadd.f32 %v1735_v13, %v1686_v40  ;;  %v1689_v2 = vpop.f32.mrf.mxu0  ;;  %v7406_v37 = vor.u32 %v9094_v29, %v7405_v45  ;;  %v14273_v13 = vld [vmem:[#allocation16_spill] sm:$0xff] }
 0x262   :  { %v11137_v28 = vadd.f32 %v1736_v62, %v14272_v22  ;;  %2265 = vmatpush.bf16.msrb.mxu1 %v7406_v37  ;;  %v9099_v22 = vld [vmem:[%s14131_s1 + $0x324] sm:$0xf]  ;;  %v7431_v37 = vld [vmem:[%s14131_s1 + $0x328] sm:$0xf0] }
 0x263   :  { %2037 = vmatmul.bf16.gmra.mxu0 %v10051_v32  ;;  %v7397_v32 = vld [vmem:[%s14131_s1 + $0x2e0] sm:$0xf]  ;;  %v7434_v0 = vor.u32 %v9099_v22, %v7431_v37  ;;  %v9093_v37 = vld [vmem:[%s14131_s1 + $0x2f4] sm:$0xf] }
 0x264   :  { %v1647_v50 = vpop.f32.mrf.mxu3  ;;  %7357 = vmatmul.msk.bf16.gmra.mxu2 %vm393_vm0, %v10055_v38  ;;  %v7398_v46 = vor.u32 %v9092_v3, %v7397_v32  ;;  %v9105_v38 = vld [vmem:[%s14131_s1 + $0x354] sm:$0xf]  ;;  %v7423_v3 = vld [vmem:[%s14131_s1 + $0x318] sm:$0xf0] }
 0x265   :  { %v1648_v40 = vadd.f32 %v1647_v50, %v1598_v34  ;;  %v1601_v54 = vpop.f32.mrf.mxu1  ;;  %v7455_v34 = vld [vmem:[%s14131_s1 + $0x358] sm:$0xf0]  ;;  %v9097_v32 = vld [vmem:[%s14131_s1 + $0x314] sm:$0xf] }
 0x266   :  { %v7458_v58 = vor.u32 %v9105_v38, %v7455_v34  ;;  %2266 = vmatpush.bf16.msrb.mxu1 %v7398_v46  ;;  %v7426_v38 = vor.u32 %v9097_v32, %v7423_v3 }
 0x267   :  { %v11155_v27 = vadd.f32 %v1648_v40, %v10887_v9  ;;  %v1738_v11 = vpop.f32.mrf.mxu2  ;;  %v7439_v9 = vld [vmem:[%s14131_s1 + $0x338] sm:$0xf0] }
 0x268   :  { %v1739_v60 = vadd.f32 %v1738_v11, %v1689_v2  ;;  %v1691_v30 = vpop.f32.mrf.mxu0  ;;  %1949 = vmatmul.bf16.gmra.mxu1 %v14273_v13  ;;  %v7442_v62 = vor.u32 %v9101_v31, %v7439_v9  ;;  %v9090_v2 = vld [vmem:[%s14131_s1 + $0x2d4] sm:$0xf0]  ;;  %2414 = vmatpush.bf16.msrb.mxu2 %v7458_v58  ;;  %v8991_v31 = vld [vmem:[%s14132_s0 + $0x204] sm:$0xf]  ;;  %v7415_v58 = vld [vmem:[%s14131_s1 + $0x308] sm:$0xf0] }
 0x269   :  { %7351 = vmatmul.msk.bf16.gmra.mxu3 %vm393_vm0, %v14274_v53  ;;  %v7390_v29 = vor.u32 %v9090_v2, %v7389_v4 }
 0x26a   :  { %v11179_v45 = vadd.f32 %v1739_v60, %v10911_v1  ;;  %2359 = vmatpush.bf16.msrb.mxu0 %v7442_v62  ;;  %v7251_v60 = vld [vmem:[%s14132_s0 + $0x208] sm:$0xf0] }
 0x26b   :  { %2267 = vmatpush.bf16.msrb.mxu1 %v7390_v29  ;;  %v7254_v2 = vor.u32 %v8991_v31, %v7251_v60 }
 0x26c   :  { %v1650_v52 = vpop.f32.mrf.mxu3 }
 0x26d   :  { %v1651_v50 = vadd.f32 %v1650_v52, %v1601_v54  ;;  %v1603_v7 = vpop.f32.mrf.mxu1  ;;  %v7249_v54 = vld [vmem:[%s14132_s0 + $0x200] sm:$0xf]  ;;  %v7407_v52 = vld [vmem:[%s14131_s1 + $0x2f8] sm:$0xf0] }
 0x26e   :  { %2360 = vmatpush.bf16.msrb.mxu0 %v7434_v0 }
 0x26f   :  { %v11188_v40 = vadd.f32 %v1651_v50, %v10920_v35  ;;  %v1740_v1 = vpop.f32.mrf.mxu2  ;;  %v8992_v35 = vld [vmem:[%s14132_s0 + $0x204] sm:$0xf0]  ;;  %v7410_v50 = vor.u32 %v9093_v37, %v7407_v52  ;;  %v14275_v52 = vld [vmem:[#allocation4_spill] sm:$0xff] }
 0x270   :  { %v1741_v46 = vadd.f32 %v1740_v1, %v1691_v30  ;;  %v1694_v11 = vpop.f32.mrf.mxu0  ;;  %v9095_v30 = vld [vmem:[%s14131_s1 + $0x304] sm:$0xf]  ;;  %v7250_v9 = vor.u32 %v8992_v35, %v7249_v54  ;;  %v7399_v1 = vld [vmem:[%s14131_s1 + $0x2e8] sm:$0xf0]  ;;  %v7391_v35 = vld [vmem:[%s14131_s1 + $0x2d8] sm:$0xf0] }
 0x271   :  { %v7418_v62 = vor.u32 %v9095_v30, %v7415_v58 }
 0x272   :  { %v11203_v34 = vadd.f32 %v1741_v46, %v10935_v17  ;;  %2361 = vmatpush.bf16.msrb.mxu0 %v7426_v38 }
 0x273   :  { %2042 = vmatmul.bf16.gmra.mxu0 %v10125_v14 }
 0x274   :  { %v1652_v17 = vpop.f32.mrf.mxu3  ;;  %7358 = vmatmul.msk.bf16.gmra.mxu2 %vm393_vm0, %v10129_v21 }
 0x275   :  { %v1653_v4 = vadd.f32 %v1652_v17, %v1603_v7  ;;  %v1606_v29 = vpop.f32.mrf.mxu1 }
 0x276   :  { %2362 = vmatpush.bf16.msrb.mxu0 %v7418_v62 }
 0x277   :  { %v11221_v14 = vadd.f32 %v1653_v4, %v10957_v12  ;;  %v1743_v22 = vpop.f32.mrf.mxu2  ;;  %v9091_v12 = vld [vmem:[%s14131_s1 + $0x2e4] sm:$0xf] }
 0x278   :  { %v1744_v0 = vadd.f32 %v1743_v22, %v1694_v11  ;;  %v1696_v21 = vpop.f32.mrf.mxu0  ;;  %1954 = vmatmul.bf16.gmra.mxu1 %v7250_v9  ;;  %v7402_v3 = vor.u32 %v9091_v12, %v7399_v1 }
 0x279   :  { %7352 = vmatmul.msk.bf16.gmra.mxu3 %vm393_vm0, %v7254_v2 }
 0x27a   :  { %v11231_v7 = vadd.f32 %v1744_v0, %v10969_v24  ;;  %2363 = vmatpush.bf16.msrb.mxu0 %v7410_v50  ;;  %v9089_v24 = vld [vmem:[%s14131_s1 + $0x2d4] sm:$0xf]  ;;  %v14276_v0 = vld [vmem:[#allocation2_spill] sm:$0xff] }
 0x27b   :  { %v7394_v30 = vor.u32 %v9089_v24, %v7391_v35 }
 0x27c   :  { %v1655_v32 = vpop.f32.mrf.mxu3 }
 0x27d   :  { %v1656_v46 = vadd.f32 %v1655_v32, %v1606_v29  ;;  %v1608_v11 = vpop.f32.mrf.mxu1 }
 0x27e   :  { %2364 = vmatpush.bf16.msrb.mxu0 %v7402_v3 }
 0x27f   :  { %v11240_v38 = vadd.f32 %v1656_v46, %v10978_v19  ;;  %v1745_v54 = vpop.f32.mrf.mxu2 }
 0x280   :  { %v1746_v31 = vadd.f32 %v1745_v54, %v1696_v21  ;;  %v1699_v60 = vpop.f32.mrf.mxu0 }
 0x282   :  { %v11249_v58 = vadd.f32 %v1746_v31, %v10987_v25  ;;  %2365 = vmatpush.bf16.msrb.mxu0 %v7394_v30  ;;  %v14278_v31 = vld [vmem:[#allocation3_spill] sm:$0xff] }
 0x283   :  { %2047 = vmatmul.bf16.gmra.mxu0 %v14273_v13 }
 0x284   :  { %v1657_v19 = vpop.f32.mrf.mxu3  ;;  %7359 = vmatmul.msk.bf16.gmra.mxu2 %vm393_vm0, %v14274_v53 }
 0x285   :  { %v1658_v17 = vadd.f32 %v1657_v19, %v1608_v11  ;;  %v1920_v62 = vpop.f32.mrf.mxu1 }
 0x287   :  { %v11255_v4 = vadd.f32 %v1658_v17, %v10993_v39  ;;  %v1748_v29 = vpop.f32.mrf.mxu2 }
 0x288   :  { %v1749_v22 = vadd.f32 %v1748_v29, %v1699_v60  ;;  %v1701_v37 = vpop.f32.mrf.mxu0  ;;  %2268 = vmatmul.bf16.vlgmr.msrb.gmra.mxu1 %v14275_v52 }
 0x289   :  { %7459 = vmatmul.msk.bf16.vlgmr.msrb.gmra.mxu3 %vm393_vm0, %v14276_v0 }
 0x28a   :  { %v11261_v25 = vadd.f32 %v1749_v22, %v10999_v6 }
 0x28c   :  { %v1969_v13 = vpop.f32.mrf.mxu3 }
 0x28d   :  { %v1970_v21 = vadd.f32 %v1969_v13, %v1920_v62  ;;  %v1922_v53 = vpop.f32.mrf.mxu1 }
 0x28f   :  { %v11264_v50 = vadd.f32 %v1970_v21, %v11002_v59  ;;  %v1750_v12 = vpop.f32.mrf.mxu2  ;;  %v14277_v59 = vld [vmem:[#allocation6_spill] sm:$0xff] }
 0x290   :  { %v1751_v39 = vadd.f32 %v1750_v12, %v1701_v37  ;;  %v1704_v1 = vpop.f32.mrf.mxu0  ;;  %v14280_v12 = vld [vmem:[#allocation5_spill] sm:$0xff] }
 0x292   :  { %v11267_v32 = vadd.f32 %v1751_v39, %v11005_v63 }
 0x293   :  { %2052 = vmatmul.bf16.gmra.mxu0 %v7250_v9 }
 0x294   :  { %v1971_v3 = vpop.f32.mrf.mxu3  ;;  %7360 = vmatmul.msk.bf16.gmra.mxu2 %vm393_vm0, %v7254_v2 }
 0x295   :  { %v1972_v46 = vadd.f32 %v1971_v3, %v1922_v53  ;;  %v1925_v11 = vpop.f32.mrf.mxu1  ;;  %v14279_v53 = vld [vmem:[#allocation8_spill] sm:$0xff] }
 0x297   :  { %v11271_v6 = vadd.f32 %v1972_v46, %v11011_v8  ;;  %v1753_v54 = vpop.f32.mrf.mxu2 }
 0x298   :  { %v1754_v24 = vadd.f32 %v1753_v54, %v1704_v1  ;;  %v1706_v35 = vpop.f32.mrf.mxu0  ;;  %2273 = vmatmul.bf16.gmra.mxu1 %v14277_v59 }
 0x299   :  { %7460 = vmatmul.msk.bf16.gmra.mxu3 %vm393_vm0, %v14278_v31 }
 0x29a   :  { %v11277_v63 = vadd.f32 %v1754_v24, %v11017_v42 }
 0x29c   :  { %v1974_v9 = vpop.f32.mrf.mxu3 }
 0x29d   :  { %v1975_v60 = vadd.f32 %v1974_v9, %v1925_v11  ;;  %v1927_v30 = vpop.f32.mrf.mxu1 }
 0x29f   :  { %v11280_v2 = vadd.f32 %v1975_v60, %v11020_v41  ;;  %v1755_v19 = vpop.f32.mrf.mxu2 }
 0x2a0   :  { %v1756_v8 = vadd.f32 %v1755_v19, %v1706_v35  ;;  %v2018_v17 = vpop.f32.mrf.mxu0  ;;  %v14282_v19 = vld [vmem:[#allocation7_spill] sm:$0xff] }
 0x2a2   :  { %v11283_v62 = vadd.f32 %v1756_v8, %v11023_v26 }
 0x2a3   :  { %2366 = vmatmul.bf16.vlgmr.msrb.gmra.mxu0 %v14275_v52 }
 0x2a4   :  { %v1976_v29 = vpop.f32.mrf.mxu3  ;;  %7467 = vmatmul.msk.bf16.vlgmr.msrb.gmra.mxu2 %vm393_vm0, %v14276_v0 }
 0x2a5   :  { %v1977_v42 = vadd.f32 %v1976_v29, %v1927_v30  ;;  %v1930_v22 = vpop.f32.mrf.mxu1  ;;  %v14281_v30 = vld [vmem:[#allocation10_spill] sm:$0xff] }
 0x2a7   :  { %v11289_v37 = vadd.f32 %v1977_v42, %v11029_v57  ;;  %v2067_v13 = vpop.f32.mrf.mxu2 }
 0x2a8   :  { %v2068_v41 = vadd.f32 %v2067_v13, %v2018_v17  ;;  %v2020_v21 = vpop.f32.mrf.mxu0  ;;  %2278 = vmatmul.bf16.gmra.mxu1 %v14279_v53 }
 0x2a9   :  { %7461 = vmatmul.msk.bf16.gmra.mxu3 %vm393_vm0, %v14280_v12 }
 0x2aa   :  { %v11295_v26 = vadd.f32 %v2068_v41, %v11035_v49 }
 0x2ac   :  { %v1979_v52 = vpop.f32.mrf.mxu3 }
 0x2ad   :  { %v1980_v39 = vadd.f32 %v1979_v52, %v1930_v22  ;;  %v1932_v1 = vpop.f32.mrf.mxu1 }
 0x2af   :  { %v11298_v0 = vadd.f32 %v1980_v39, %v11038_v55  ;;  %v2069_v3 = vpop.f32.mrf.mxu2 }
 0x2b0   :  { %v2070_v57 = vadd.f32 %v2069_v3, %v2020_v21  ;;  %v2023_v46 = vpop.f32.mrf.mxu0  ;;  %v14284_v3 = vld [vmem:[#allocation9_spill] sm:$0xff] }
 0x2b2   :  { %v11301_v11 = vadd.f32 %v2070_v57, %v11041_v33 }
 0x2b3   :  { %2371 = vmatmul.bf16.gmra.mxu0 %v14277_v59 }
 0x2b4   :  { %v1981_v54 = vpop.f32.mrf.mxu3  ;;  %7468 = vmatmul.msk.bf16.gmra.mxu2 %vm393_vm0, %v14278_v31 }
 0x2b5   :  { %v1982_v49 = vadd.f32 %v1981_v54, %v1932_v1  ;;  %v1935_v24 = vpop.f32.mrf.mxu1  ;;  %v14283_v1 = vld [vmem:[#allocation12_spill] sm:$0xff] }
 0x2b7   :  { %v11307_v35 = vadd.f32 %v1982_v49, %v11047_v18  ;;  %v2072_v9 = vpop.f32.mrf.mxu2 }
 0x2b8   :  { %v2073_v55 = vadd.f32 %v2072_v9, %v2023_v46  ;;  %v2025_v60 = vpop.f32.mrf.mxu0  ;;  %2283 = vmatmul.bf16.gmra.mxu1 %v14281_v30 }
 0x2b9   :  { %7462 = vmatmul.msk.bf16.gmra.mxu3 %vm393_vm0, %v14282_v19 }
 0x2ba   :  { %v11313_v33 = vadd.f32 %v2073_v55, %v11053_v20 }
 0x2bc   :  { %v1984_v59 = vpop.f32.mrf.mxu3 }
 0x2bd   :  { %v1985_v8 = vadd.f32 %v1984_v59, %v1935_v24  ;;  %v1937_v17 = vpop.f32.mrf.mxu1 }
 0x2bf   :  { %v11316_v31 = vadd.f32 %v1985_v8, %v11056_v5  ;;  %v2074_v29 = vpop.f32.mrf.mxu2 }
 0x2c0   :  { %v2075_v18 = vadd.f32 %v2074_v29, %v2025_v60  ;;  %v2028_v42 = vpop.f32.mrf.mxu0  ;;  %v9120_v60 = vld [vmem:[%s14131_s1 + $0x3c4] sm:$0xf0] }
 0x2c2   :  { %v11319_v22 = vadd.f32 %v2075_v18, %v11059_v61  ;;  %v7543_v18 = vld [vmem:[%s14131_s1 + $0x3b0] sm:$0xf] }
 0x2c3   :  { %2376 = vmatmul.bf16.gmra.mxu0 %v14279_v53 }
 0x2c4   :  { %v1986_v13 = vpop.f32.mrf.mxu3  ;;  %7469 = vmatmul.msk.bf16.gmra.mxu2 %vm393_vm0, %v14280_v12  ;;  %v7559_v12 = vld [vmem:[%s14131_s1 + $0x3d0] sm:$0xf] }
 0x2c5   :  { %v1987_v20 = vadd.f32 %v1986_v13, %v1937_v17  ;;  %v1940_v41 = vpop.f32.mrf.mxu1 }
 0x2c7   :  { %v11325_v21 = vadd.f32 %v1987_v20, %v11065_v43  ;;  %v2077_v52 = vpop.f32.mrf.mxu2  ;;  %v9122_v43 = vld [vmem:[%s14131_s1 + $0x3d4] sm:$0xf0] }
 0x2c8   :  { %v2078_v5 = vadd.f32 %v2077_v52, %v2028_v42  ;;  %v2030_v39 = vpop.f32.mrf.mxu0  ;;  %2288 = vmatmul.bf16.gmra.mxu1 %v14283_v1  ;;  %v7560_v54 = vor.u32 %v9122_v43, %v7559_v12  ;;  %v9118_v42 = vld [vmem:[%s14131_s1 + $0x3b4] sm:$0xf0]  ;;  %v14285_v52 = vld [vmem:[#allocation14_spill] sm:$0xff]  ;;  %v7527_v43 = vld [vmem:[%s14131_s1 + $0x390] sm:$0xf] }
 0x2c9   :  { %7463 = vmatmul.msk.bf16.gmra.mxu3 %vm393_vm0, %v14284_v3 }
 0x2ca   :  { %v11331_v61 = vadd.f32 %v2078_v5, %v11071_v44  ;;  %2609 = vmatpush.bf16.msra.mxu1 %v7560_v54  ;;  %v7551_v44 = vld [vmem:[%s14131_s1 + $0x3c0] sm:$0xf]  ;;  %v9114_v54 = vld [vmem:[%s14131_s1 + $0x394] sm:$0xf0] }
 0x2cb   :  { %v7552_v8 = vor.u32 %v9120_v60, %v7551_v44  ;;  %v7535_v5 = vld [vmem:[%s14131_s1 + $0x3a0] sm:$0xf]  ;;  %v9124_v44 = vld [vmem:[%s14131_s1 + $0x3e4] sm:$0xf0] }
 0x2cc   :  { %v1989_v53 = vpop.f32.mrf.mxu3 }
 0x2cd   :  { %v1990_v57 = vadd.f32 %v1989_v53, %v1940_v41  ;;  %v1942_v46 = vpop.f32.mrf.mxu1 }
 0x2ce   :  { %2610 = vmatpush.bf16.msra.mxu1 %v7552_v8 }
 0x2cf   :  { %v11340_v49 = vadd.f32 %v1990_v57, %v11080_v16  ;;  %v2079_v24 = vpop.f32.mrf.mxu2 }
 0x2d0   :  { %v2080_v9 = vadd.f32 %v2079_v24, %v2030_v39  ;;  %v2033_v55 = vpop.f32.mrf.mxu0  ;;  %v9116_v39 = vld [vmem:[%s14131_s1 + $0x3a4] sm:$0xf0]  ;;  %v7528_v24 = vor.u32 %v9114_v54, %v7527_v43 }
 0x2d1   :  { %v7536_v53 = vor.u32 %v9116_v39, %v7535_v5  ;;  %v9110_v5 = vld [vmem:[%s14131_s1 + $0x374] sm:$0xf0] }
 0x2d2   :  { %v11349_v59 = vadd.f32 %v2080_v9, %v11089_v51  ;;  %v7544_v51 = vor.u32 %v9118_v42, %v7543_v18  ;;  %v9121_v42 = vld [vmem:[%s14131_s1 + $0x3d4] sm:$0xf] }
 0x2d3   :  { %2381 = vmatmul.bf16.gmra.mxu0 %v14281_v30 }
 0x2d4   :  { %v1991_v16 = vpop.f32.mrf.mxu3  ;;  %7470 = vmatmul.msk.bf16.gmra.mxu2 %vm393_vm0, %v14282_v19  ;;  %v14286_v19 = vld [vmem:[#allocation11_spill] sm:$0xff]  ;;  %2611 = vmatpush.bf16.msra.mxu1 %v7544_v51  ;;  %v7561_v51 = vld [vmem:[%s14131_s1 + $0x3d8] sm:$0xf0] }
 0x2d5   :  { %v1992_v17 = vadd.f32 %v1991_v16, %v1942_v46  ;;  %v1945_v29 = vpop.f32.mrf.mxu1 }
 0x2d7   :  { %v11361_v13 = vadd.f32 %v1992_v17, %v11101_v36  ;;  %v2082_v30 = vpop.f32.mrf.mxu2  ;;  %v7519_v17 = vld [vmem:[%s14131_s1 + $0x380] sm:$0xf] }
 0x2d8   :  { %v2083_v20 = vadd.f32 %v2082_v30, %v2033_v55  ;;  %v2035_v41 = vpop.f32.mrf.mxu0  ;;  %2293 = vmatmul.bf16.gmra.mxu1 %v14285_v52 }
 0x2d9   :  { %7464 = vmatmul.msk.bf16.gmra.mxu3 %vm393_vm0, %v14286_v19  ;;  %2612 = vmatpush.bf16.msra.mxu1 %v7536_v53 }
 0x2da   :  { %v11373_v36 = vadd.f32 %v2083_v20, %v11113_v10  ;;  %v7567_v10 = vld [vmem:[%s14131_s1 + $0x3e0] sm:$0xf]  ;;  %v7564_v20 = vor.u32 %v9121_v42, %v7561_v51 }
 0x2db   :  { %v7568_v16 = vor.u32 %v9124_v44, %v7567_v10  ;;  %v14288_v10 = vld [vmem:[#allocation13_spill] sm:$0xff] }
 0x2dc   :  { %v1994_v57 = vpop.f32.mrf.mxu3  ;;  %2707 = vmatpush.bf16.msra.mxu0 %v7564_v20 }
 0x2dd   :  { %v1995_v46 = vadd.f32 %v1994_v57, %v1945_v29  ;;  %v1947_v12 = vpop.f32.mrf.mxu1  ;;  %2613 = vmatpush.bf16.msra.mxu1 %v7528_v24  ;;  %2665 = vmatpush.bf16.msra.mxu3 %v7568_v16  ;;  %v14287_v24 = vld [vmem:[#allocation15_spill] sm:$0xff] }
 0x2df   :  { %v11382_v9 = vadd.f32 %v1995_v46, %v11122_v48  ;;  %v2084_v55 = vpop.f32.mrf.mxu2  ;;  %v9112_v48 = vld [vmem:[%s14131_s1 + $0x384] sm:$0xf0]  ;;  %v7569_v46 = vld [vmem:[%s14131_s1 + $0x3e8] sm:$0xf0] }
 0x2e0   :  { %v2085_v60 = vadd.f32 %v2084_v55, %v2035_v41  ;;  %v2038_v8 = vpop.f32.mrf.mxu0  ;;  %v7520_v18 = vor.u32 %v9112_v48, %v7519_v17  ;;  %v9117_v48 = vld [vmem:[%s14131_s1 + $0x3b4] sm:$0xf] }
 0x2e2   :  { %v11397_v29 = vadd.f32 %v2085_v60, %v11137_v28  ;;  %2614 = vmatpush.bf16.msra.mxu1 %v7520_v18  ;;  %v7503_v60 = vld [vmem:[%s14131_s1 + $0x360] sm:$0xf]  ;;  %v7545_v18 = vld [vmem:[%s14131_s1 + $0x3b8] sm:$0xf0] }
 0x2e3   :  { %2386 = vmatmul.bf16.gmra.mxu0 %v14283_v1  ;;  %v7511_v1 = vld [vmem:[%s14131_s1 + $0x370] sm:$0xf]  ;;  %v7548_v51 = vor.u32 %v9117_v48, %v7545_v18  ;;  %v9111_v18 = vld [vmem:[%s14131_s1 + $0x384] sm:$0xf] }
 0x2e4   :  { %v1996_v30 = vpop.f32.mrf.mxu3  ;;  %7471 = vmatmul.msk.bf16.gmra.mxu2 %vm393_vm0, %v14284_v3  ;;  %v7512_v39 = vor.u32 %v9110_v5, %v7511_v1  ;;  %v9123_v3 = vld [vmem:[%s14131_s1 + $0x3e4] sm:$0xf]  ;;  %v7537_v5 = vld [vmem:[%s14131_s1 + $0x3a8] sm:$0xf0] }
 0x2e5   :  { %v1997_v41 = vadd.f32 %v1996_v30, %v1947_v12  ;;  %v1950_v28 = vpop.f32.mrf.mxu1  ;;  %v9119_v12 = vld [vmem:[%s14131_s1 + $0x3c4] sm:$0xf]  ;;  %v7572_v55 = vor.u32 %v9123_v3, %v7569_v46 }
 0x2e6   :  { %2615 = vmatpush.bf16.msra.mxu1 %v7512_v39  ;;  %v9115_v1 = vld [vmem:[%s14131_s1 + $0x3a4] sm:$0xf] }
 0x2e7   :  { %v11415_v53 = vadd.f32 %v1997_v41, %v11155_v27  ;;  %v2087_v57 = vpop.f32.mrf.mxu2  ;;  %v7553_v27 = vld [vmem:[%s14131_s1 + $0x3c8] sm:$0xf0]  ;;  %2763 = vmatpush.bf16.msra.mxu2 %v7572_v55  ;;  %v7540_v3 = vor.u32 %v9115_v1, %v7537_v5  ;;  %v7529_v55 = vld [vmem:[%s14131_s1 + $0x398] sm:$0xf0] }
 0x2e8   :  { %v2088_v43 = vadd.f32 %v2087_v57, %v2038_v8  ;;  %v2040_v54 = vpop.f32.mrf.mxu0  ;;  %2298 = vmatmul.bf16.gmra.mxu1 %v14287_v24  ;;  %v7556_v44 = vor.u32 %v9119_v12, %v7553_v27  ;;  %v9108_v8 = vld [vmem:[%s14131_s1 + $0x364] sm:$0xf0]  ;;  %v8993_v12 = vld [vmem:[%s14132_s0 + $0x214] sm:$0xf] }
 0x2e9   :  { %7465 = vmatmul.msk.bf16.gmra.mxu3 %vm393_vm0, %v14288_v10  ;;  %v7504_v17 = vor.u32 %v9108_v8, %v7503_v60 }
 0x2ea   :  { %v11439_v16 = vadd.f32 %v2088_v43, %v11179_v45  ;;  %2708 = vmatpush.bf16.msra.mxu0 %v7556_v44  ;;  %v7365_v43 = vld [vmem:[%s14132_s0 + $0x218] sm:$0xf0] }
 0x2eb   :  { %2616 = vmatpush.bf16.msra.mxu1 %v7504_v17  ;;  %v7368_v8 = vor.u32 %v8993_v12, %v7365_v43 }
 0x2ec   :  { %v1999_v42 = vpop.f32.mrf.mxu3 }
 0x2ed   :  { %v2000_v30 = vadd.f32 %v1999_v42, %v1950_v28  ;;  %v1952_v20 = vpop.f32.mrf.mxu1  ;;  %v7363_v28 = vld [vmem:[%s14132_s0 + $0x210] sm:$0xf]  ;;  %v7521_v42 = vld [vmem:[%s14131_s1 + $0x388] sm:$0xf0] }
 0x2ee   :  { %2709 = vmatpush.bf16.msra.mxu0 %v7548_v51 }
 0x2ef   :  { %v11448_v41 = vadd.f32 %v2000_v30, %v11188_v40  ;;  %v2089_v45 = vpop.f32.mrf.mxu2  ;;  %v8994_v40 = vld [vmem:[%s14132_s0 + $0x214] sm:$0xf0]  ;;  %v7524_v30 = vor.u32 %v9111_v18, %v7521_v42  ;;  %v14289_v42 = vld [vmem:[#allocation18_spill] sm:$0xff] }
 0x2f0   :  { %v2090_v39 = vadd.f32 %v2089_v45, %v2040_v54  ;;  %v2043_v57 = vpop.f32.mrf.mxu0  ;;  %v9113_v54 = vld [vmem:[%s14131_s1 + $0x394] sm:$0xf]  ;;  %v7364_v27 = vor.u32 %v8994_v40, %v7363_v28  ;;  %v7513_v45 = vld [vmem:[%s14131_s1 + $0x378] sm:$0xf0]  ;;  %v7505_v40 = vld [vmem:[%s14131_s1 + $0x368] sm:$0xf0] }
 0x2f1   :  { %v7532_v44 = vor.u32 %v9113_v54, %v7529_v55 }
 0x2f2   :  { %v11463_v46 = vadd.f32 %v2090_v39, %v11203_v34  ;;  %2710 = vmatpush.bf16.msra.mxu0 %v7540_v3 }
 0x2f3   :  { %2391 = vmatmul.bf16.gmra.mxu0 %v14285_v52 }
 0x2f4   :  { %v2001_v34 = vpop.f32.mrf.mxu3  ;;  %7472 = vmatmul.msk.bf16.gmra.mxu2 %vm393_vm0, %v14286_v19 }
 0x2f5   :  { %v2002_v60 = vadd.f32 %v2001_v34, %v1952_v20  ;;  %v1955_v17 = vpop.f32.mrf.mxu1 }
 0x2f6   :  { %2711 = vmatpush.bf16.msra.mxu0 %v7532_v44 }
 0x2f7   :  { %v11481_v52 = vadd.f32 %v2002_v60, %v11221_v14  ;;  %v2092_v48 = vpop.f32.mrf.mxu2  ;;  %v9109_v14 = vld [vmem:[%s14131_s1 + $0x374] sm:$0xf] }
 0x2f8   :  { %v2093_v51 = vadd.f32 %v2092_v48, %v2043_v57  ;;  %v2045_v19 = vpop.f32.mrf.mxu0  ;;  %2303 = vmatmul.bf16.gmra.mxu1 %v7364_v27  ;;  %v7516_v5 = vor.u32 %v9109_v14, %v7513_v45 }
 0x2f9   :  { %7466 = vmatmul.msk.bf16.gmra.mxu3 %vm393_vm0, %v7368_v8 }
 0x2fa   :  { %v11491_v20 = vadd.f32 %v2093_v51, %v11231_v7  ;;  %2712 = vmatpush.bf16.msra.mxu0 %v7524_v30  ;;  %v9107_v7 = vld [vmem:[%s14131_s1 + $0x364] sm:$0xf]  ;;  %v14290_v51 = vld [vmem:[#allocation19_spill] sm:$0xff] }
 0x2fb   :  { %v7508_v54 = vor.u32 %v9107_v7, %v7505_v40 }
 0x2fc   :  { %v2004_v1 = vpop.f32.mrf.mxu3 }
 0x2fd   :  { %v2005_v39 = vadd.f32 %v2004_v1, %v1955_v17  ;;  %v1957_v57 = vpop.f32.mrf.mxu1 }
 0x2fe   :  { %2713 = vmatpush.bf16.msra.mxu0 %v7516_v5 }
 0x2ff   :  { %v11500_v3 = vadd.f32 %v2005_v39, %v11240_v38  ;;  %v2094_v28 = vpop.f32.mrf.mxu2 }
 0x300   :  { %v2095_v12 = vadd.f32 %v2094_v28, %v2045_v19  ;;  %v2048_v43 = vpop.f32.mrf.mxu0 }
 0x302   :  { %v11509_v55 = vadd.f32 %v2095_v12, %v11249_v58  ;;  %2714 = vmatpush.bf16.msra.mxu0 %v7508_v54  ;;  %v14292_v12 = vld [vmem:[#allocation21_spill] sm:$0xff] }
 0x303   :  { %2396 = vmatmul.bf16.gmra.mxu0 %v14287_v24 }
 0x304   :  { %v2006_v38 = vpop.f32.mrf.mxu3  ;;  %7473 = vmatmul.msk.bf16.gmra.mxu2 %vm393_vm0, %v14288_v10 }
 0x305   :  { %v2007_v34 = vadd.f32 %v2006_v38, %v1957_v57  ;;  %v2269_v44 = vpop.f32.mrf.mxu1 }
 0x307   :  { %v11515_v60 = vadd.f32 %v2007_v34, %v11255_v4  ;;  %v2097_v17 = vpop.f32.mrf.mxu2 }
 0x308   :  { %v2098_v48 = vadd.f32 %v2097_v17, %v2048_v43  ;;  %v2050_v18 = vpop.f32.mrf.mxu0  ;;  %2617 = vmatmul.bf16.vlgmr.msra.gmra.mxu1 %v14289_v42 }
 0x309   :  { %7573 = vmatmul.msk.bf16.vlgmr.msra.gmra.mxu3 %vm393_vm0, %v14290_v51 }
 0x30a   :  { %v11521_v58 = vadd.f32 %v2098_v48, %v11261_v25 }
 0x30c   :  { %v2318_v24 = vpop.f32.mrf.mxu3 }
 0x30d   :  { %v2319_v19 = vadd.f32 %v2318_v24, %v2269_v44  ;;  %v2271_v10 = vpop.f32.mrf.mxu1 }
 0x30f   :  { %v11524_v30 = vadd.f32 %v2319_v19, %v11264_v50  ;;  %v2099_v14 = vpop.f32.mrf.mxu2  ;;  %v14291_v50 = vld [vmem:[#allocation20_spill] sm:$0xff] }
 0x310   :  { %v2100_v4 = vadd.f32 %v2099_v14, %v2050_v18  ;;  %v2053_v45 = vpop.f32.mrf.mxu0  ;;  %v14294_v14 = vld [vmem:[#allocation23_spill] sm:$0xff] }
 0x312   :  { %v11527_v1 = vadd.f32 %v2100_v4, %v11267_v32 }
 0x313   :  { %2401 = vmatmul.bf16.gmra.mxu0 %v7364_v27 }
 0x314   :  { %v2320_v5 = vpop.f32.mrf.mxu3  ;;  %7474 = vmatmul.msk.bf16.gmra.mxu2 %vm393_vm0, %v7368_v8 }
 0x315   :  { %v2321_v39 = vadd.f32 %v2320_v5, %v2271_v10  ;;  %v2274_v57 = vpop.f32.mrf.mxu1  ;;  %v14293_v10 = vld [vmem:[#allocation22_spill] sm:$0xff] }
 0x317   :  { %v11531_v25 = vadd.f32 %v2321_v39, %v11271_v6  ;;  %v2102_v28 = vpop.f32.mrf.mxu2 }
 0x318   :  { %v2103_v7 = vadd.f32 %v2102_v28, %v2053_v45  ;;  %v2055_v40 = vpop.f32.mrf.mxu0  ;;  %2622 = vmatmul.bf16.gmra.mxu1 %v14291_v50 }
 0x319   :  { %7574 = vmatmul.msk.bf16.gmra.mxu3 %vm393_vm0, %v14292_v12 }
 0x31a   :  { %v11537_v32 = vadd.f32 %v2103_v7, %v11277_v63 }
 0x31c   :  { %v2323_v27 = vpop.f32.mrf.mxu3 }
 0x31d   :  { %v2324_v43 = vadd.f32 %v2323_v27, %v2274_v57  ;;  %v2276_v54 = vpop.f32.mrf.mxu1 }
 0x31f   :  { %v11540_v8 = vadd.f32 %v2324_v43, %v11280_v2  ;;  %v2104_v38 = vpop.f32.mrf.mxu2 }
 0x320   :  { %v2105_v6 = vadd.f32 %v2104_v38, %v2055_v40  ;;  %v2367_v34 = vpop.f32.mrf.mxu0  ;;  %v14296_v38 = vld [vmem:[#allocation25_spill] sm:$0xff] }
 0x322   :  { %v11543_v44 = vadd.f32 %v2105_v6, %v11283_v62 }
 0x323   :  { %2715 = vmatmul.bf16.vlgmr.msra.gmra.mxu0 %v14289_v42 }
 0x324   :  { %v2325_v17 = vpop.f32.mrf.mxu3  ;;  %7581 = vmatmul.msk.bf16.vlgmr.msra.gmra.mxu2 %vm393_vm0, %v14290_v51 }
 0x325   :  { %v2326_v63 = vadd.f32 %v2325_v17, %v2276_v54  ;;  %v2279_v48 = vpop.f32.mrf.mxu1  ;;  %v14295_v54 = vld [vmem:[#allocation24_spill] sm:$0xff] }
 0x327   :  { %v11549_v18 = vadd.f32 %v2326_v63, %v11289_v37  ;;  %v2416_v24 = vpop.f32.mrf.mxu2 }
 0x328   :  { %v2417_v2 = vadd.f32 %v2416_v24, %v2367_v34  ;;  %v2369_v19 = vpop.f32.mrf.mxu0  ;;  %2627 = vmatmul.bf16.gmra.mxu1 %v14293_v10 }
 0x329   :  { %7575 = vmatmul.msk.bf16.gmra.mxu3 %vm393_vm0, %v14294_v14 }
 0x32a   :  { %v11555_v62 = vadd.f32 %v2417_v2, %v11295_v26 }
 0x32c   :  { %v2328_v42 = vpop.f32.mrf.mxu3 }
 0x32d   :  { %v2329_v4 = vadd.f32 %v2328_v42, %v2279_v48  ;;  %v2281_v45 = vpop.f32.mrf.mxu1 }
 0x32f   :  { %v11558_v51 = vadd.f32 %v2329_v4, %v11298_v0  ;;  %v2418_v5 = vpop.f32.mrf.mxu2 }
 0x330   :  { %v2419_v37 = vadd.f32 %v2418_v5, %v2369_v19  ;;  %v2372_v39 = vpop.f32.mrf.mxu0  ;;  %v14298_v5 = vld [vmem:[#allocation27_spill] sm:$0xff] }
 0x332   :  { %v11561_v57 = vadd.f32 %v2419_v37, %v11301_v11 }
 0x333   :  { %2720 = vmatmul.bf16.gmra.mxu0 %v14291_v50 }
 0x334   :  { %v2330_v28 = vpop.f32.mrf.mxu3  ;;  %7582 = vmatmul.msk.bf16.gmra.mxu2 %vm393_vm0, %v14292_v12 }
 0x335   :  { %v2331_v26 = vadd.f32 %v2330_v28, %v2281_v45  ;;  %v2284_v7 = vpop.f32.mrf.mxu1  ;;  %v14297_v45 = vld [vmem:[#allocation26_spill] sm:$0xff] }
 0x337   :  { %v11567_v40 = vadd.f32 %v2331_v26, %v11307_v35  ;;  %v2421_v27 = vpop.f32.mrf.mxu2 }
 0x338   :  { %v2422_v0 = vadd.f32 %v2421_v27, %v2372_v39  ;;  %v2374_v43 = vpop.f32.mrf.mxu0  ;;  %2632 = vmatmul.bf16.gmra.mxu1 %v14295_v54 }
 0x339   :  { %7576 = vmatmul.msk.bf16.gmra.mxu3 %vm393_vm0, %v14296_v38 }
 0x33a   :  { %v11573_v11 = vadd.f32 %v2422_v0, %v11313_v33 }
 0x33c   :  { %v2333_v50 = vpop.f32.mrf.mxu3 }
 0x33d   :  { %v2334_v6 = vadd.f32 %v2333_v50, %v2284_v7  ;;  %v2286_v34 = vpop.f32.mrf.mxu1 }
 0x33f   :  { %v11576_v12 = vadd.f32 %v2334_v6, %v11316_v31  ;;  %v2423_v17 = vpop.f32.mrf.mxu2 }
 0x340   :  { %v2424_v35 = vadd.f32 %v2423_v17, %v2374_v43  ;;  %v2377_v63 = vpop.f32.mrf.mxu0  ;;  %v9138_v43 = vld [vmem:[%s14131_s1 + $0x454] sm:$0xf0] }
 0x342   :  { %v11579_v48 = vadd.f32 %v2424_v35, %v11319_v22  ;;  %v7657_v35 = vld [vmem:[%s14131_s1 + $0x440] sm:$0xf] }
 0x343   :  { %2725 = vmatmul.bf16.gmra.mxu0 %v14293_v10 }
 0x344   :  { %v2335_v24 = vpop.f32.mrf.mxu3  ;;  %7583 = vmatmul.msk.bf16.gmra.mxu2 %vm393_vm0, %v14294_v14  ;;  %v7673_v14 = vld [vmem:[%s14131_s1 + $0x460] sm:$0xf] }
 0x345   :  { %v2336_v33 = vadd.f32 %v2335_v24, %v2286_v34  ;;  %v2289_v2 = vpop.f32.mrf.mxu1 }
 0x347   :  { %v11585_v19 = vadd.f32 %v2336_v33, %v11325_v21  ;;  %v2426_v42 = vpop.f32.mrf.mxu2  ;;  %v9140_v21 = vld [vmem:[%s14131_s1 + $0x464] sm:$0xf0] }
 0x348   :  { %v2427_v31 = vadd.f32 %v2426_v42, %v2377_v63  ;;  %v2379_v4 = vpop.f32.mrf.mxu0  ;;  %2637 = vmatmul.bf16.gmra.mxu1 %v14297_v45  ;;  %v7674_v28 = vor.u32 %v9140_v21, %v7673_v14  ;;  %v9136_v63 = vld [vmem:[%s14131_s1 + $0x444] sm:$0xf0]  ;;  %v14299_v42 = vld [vmem:[#allocation28_spill] sm:$0xff]  ;;  %v7641_v21 = vld [vmem:[%s14131_s1 + $0x420] sm:$0xf] }
 0x349   :  { %7577 = vmatmul.msk.bf16.gmra.mxu3 %vm393_vm0, %v14298_v5 }
 0x34a   :  { %v11591_v22 = vadd.f32 %v2427_v31, %v11331_v61  ;;  %2958 = vmatpush.bf16.msrb.mxu1 %v7674_v28  ;;  %v7665_v61 = vld [vmem:[%s14131_s1 + $0x450] sm:$0xf]  ;;  %v9132_v28 = vld [vmem:[%s14131_s1 + $0x424] sm:$0xf0] }
 0x34b   :  { %v7666_v6 = vor.u32 %v9138_v43, %v7665_v61  ;;  %v7649_v31 = vld [vmem:[%s14131_s1 + $0x430] sm:$0xf]  ;;  %v9142_v61 = vld [vmem:[%s14131_s1 + $0x474] sm:$0xf0] }
 0x34c   :  { %v2338_v10 = vpop.f32.mrf.mxu3 }
 0x34d   :  { %v2339_v37 = vadd.f32 %v2338_v10, %v2289_v2  ;;  %v2291_v39 = vpop.f32.mrf.mxu1 }
 0x34e   :  { %2959 = vmatpush.bf16.msrb.mxu1 %v7666_v6 }
 0x34f   :  { %v11600_v26 = vadd.f32 %v2339_v37, %v11340_v49  ;;  %v2428_v7 = vpop.f32.mrf.mxu2 }
 0x350   :  { %v2429_v27 = vadd.f32 %v2428_v7, %v2379_v4  ;;  %v2382_v0 = vpop.f32.mrf.mxu0  ;;  %v9134_v4 = vld [vmem:[%s14131_s1 + $0x434] sm:$0xf0]  ;;  %v7642_v7 = vor.u32 %v9132_v28, %v7641_v21 }
 0x351   :  { %v7650_v10 = vor.u32 %v9134_v4, %v7649_v31  ;;  %v9128_v31 = vld [vmem:[%s14131_s1 + $0x404] sm:$0xf0] }
 0x352   :  { %v11609_v50 = vadd.f32 %v2429_v27, %v11349_v59  ;;  %v7658_v59 = vor.u32 %v9136_v63, %v7657_v35  ;;  %v9139_v63 = vld [vmem:[%s14131_s1 + $0x464] sm:$0xf] }
 0x353   :  { %2730 = vmatmul.bf16.gmra.mxu0 %v14295_v54 }
 0x354   :  { %v2340_v49 = vpop.f32.mrf.mxu3  ;;  %7584 = vmatmul.msk.bf16.gmra.mxu2 %vm393_vm0, %v14296_v38  ;;  %v14300_v38 = vld [vmem:[#allocation29_spill] sm:$0xff]  ;;  %2960 = vmatpush.bf16.msrb.mxu1 %v7658_v59  ;;  %v7675_v59 = vld [vmem:[%s14131_s1 + $0x468] sm:$0xf0] }
 0x355   :  { %v2341_v34 = vadd.f32 %v2340_v49, %v2291_v39  ;;  %v2294_v17 = vpop.f32.mrf.mxu1 }
 0x357   :  { %v11621_v24 = vadd.f32 %v2341_v34, %v11361_v13  ;;  %v2431_v54 = vpop.f32.mrf.mxu2  ;;  %v7633_v34 = vld [vmem:[%s14131_s1 + $0x410] sm:$0xf] }
 0x358   :  { %v2432_v33 = vadd.f32 %v2431_v54, %v2382_v0  ;;  %v2384_v2 = vpop.f32.mrf.mxu0  ;;  %2642 = vmatmul.bf16.gmra.mxu1 %v14299_v42 }
 0x359   :  { %7578 = vmatmul.msk.bf16.gmra.mxu3 %vm393_vm0, %v14300_v38  ;;  %2961 = vmatpush.bf16.msrb.mxu1 %v7650_v10 }
 0x35a   :  { %v11633_v13 = vadd.f32 %v2432_v33, %v11373_v36  ;;  %v7681_v36 = vld [vmem:[%s14131_s1 + $0x470] sm:$0xf]  ;;  %v7678_v33 = vor.u32 %v9139_v63, %v7675_v59 }
 0x35b   :  { %v7682_v49 = vor.u32 %v9142_v61, %v7681_v36  ;;  %v14302_v36 = vld [vmem:[#allocation31_spill] sm:$0xff] }
 0x35c   :  { %v2343_v37 = vpop.f32.mrf.mxu3  ;;  %3056 = vmatpush.bf16.msrb.mxu0 %v7678_v33 }
 0x35d   :  { %v2344_v39 = vadd.f32 %v2343_v37, %v2294_v17  ;;  %v2296_v14 = vpop.f32.mrf.mxu1  ;;  %2962 = vmatpush.bf16.msrb.mxu1 %v7642_v7  ;;  %3014 = vmatpush.bf16.msrb.mxu3 %v7682_v49  ;;  %v14301_v7 = vld [vmem:[#allocation30_spill] sm:$0xff] }
 0x35f   :  { %v11642_v27 = vadd.f32 %v2344_v39, %v11382_v9  ;;  %v2433_v0 = vpop.f32.mrf.mxu2  ;;  %v9130_v9 = vld [vmem:[%s14131_s1 + $0x414] sm:$0xf0]  ;;  %v7683_v39 = vld [vmem:[%s14131_s1 + $0x478] sm:$0xf0] }
 0x360   :  { %v2434_v43 = vadd.f32 %v2433_v0, %v2384_v2  ;;  %v2387_v6 = vpop.f32.mrf.mxu0  ;;  %v7634_v35 = vor.u32 %v9130_v9, %v7633_v34  ;;  %v9135_v9 = vld [vmem:[%s14131_s1 + $0x444] sm:$0xf] }
 0x362   :  { %v11657_v17 = vadd.f32 %v2434_v43, %v11397_v29  ;;  %2963 = vmatpush.bf16.msrb.mxu1 %v7634_v35  ;;  %v7617_v43 = vld [vmem:[%s14131_s1 + $0x3f0] sm:$0xf]  ;;  %v7659_v35 = vld [vmem:[%s14131_s1 + $0x448] sm:$0xf0] }
 0x363   :  { %2735 = vmatmul.bf16.gmra.mxu0 %v14297_v45  ;;  %v7625_v45 = vld [vmem:[%s14131_s1 + $0x400] sm:$0xf]  ;;  %v7662_v59 = vor.u32 %v9135_v9, %v7659_v35  ;;  %v9129_v35 = vld [vmem:[%s14131_s1 + $0x414] sm:$0xf] }
 0x364   :  { %v2345_v54 = vpop.f32.mrf.mxu3  ;;  %7585 = vmatmul.msk.bf16.gmra.mxu2 %vm393_vm0, %v14298_v5  ;;  %v7626_v4 = vor.u32 %v9128_v31, %v7625_v45  ;;  %v9141_v5 = vld [vmem:[%s14131_s1 + $0x474] sm:$0xf]  ;;  %v7651_v31 = vld [vmem:[%s14131_s1 + $0x438] sm:$0xf0] }
 0x365   :  { %v2346_v2 = vadd.f32 %v2345_v54, %v2296_v14  ;;  %v2299_v29 = vpop.f32.mrf.mxu1  ;;  %v9137_v14 = vld [vmem:[%s14131_s1 + $0x454] sm:$0xf]  ;;  %v7686_v0 = vor.u32 %v9141_v5, %v7683_v39 }
 0x366   :  { %2964 = vmatpush.bf16.msrb.mxu1 %v7626_v4  ;;  %v9133_v45 = vld [vmem:[%s14131_s1 + $0x434] sm:$0xf] }
 0x367   :  { %v11675_v10 = vadd.f32 %v2346_v2, %v11415_v53  ;;  %v2436_v37 = vpop.f32.mrf.mxu2  ;;  %v7667_v53 = vld [vmem:[%s14131_s1 + $0x458] sm:$0xf0]  ;;  %3112 = vmatpush.bf16.msrb.mxu2 %v7686_v0  ;;  %v7654_v5 = vor.u32 %v9133_v45, %v7651_v31  ;;  %v7643_v0 = vld [vmem:[%s14131_s1 + $0x428] sm:$0xf0] }
 0x368   :  { %v2437_v21 = vadd.f32 %v2436_v37, %v2387_v6  ;;  %v2389_v28 = vpop.f32.mrf.mxu0  ;;  %2647 = vmatmul.bf16.gmra.mxu1 %v14301_v7  ;;  %v7670_v61 = vor.u32 %v9137_v14, %v7667_v53  ;;  %v9126_v6 = vld [vmem:[%s14131_s1 + $0x3f4] sm:$0xf0]  ;;  %v8995_v14 = vld [vmem:[%s14132_s0 + $0x224] sm:$0xf] }
 0x369   :  { %7579 = vmatmul.msk.bf16.gmra.mxu3 %vm393_vm0, %v14302_v36  ;;  %v7618_v34 = vor.u32 %v9126_v6, %v7617_v43 }
 0x36a   :  { %v11699_v49 = vadd.f32 %v2437_v21, %v11439_v16  ;;  %3057 = vmatpush.bf16.msrb.mxu0 %v7670_v61  ;;  %v7479_v21 = vld [vmem:[%s14132_s0 + $0x228] sm:$0xf0] }
 0x36b   :  { %2965 = vmatpush.bf16.msrb.mxu1 %v7618_v34  ;;  %v7482_v6 = vor.u32 %v8995_v14, %v7479_v21 }
 0x36c   :  { %14303 = vst [vmem:[#allocation42_spill] sm:$0xff] %v11699_v49  ;;  %v2348_v63 = vpop.f32.mrf.mxu3 }
 0x36d   :  { %v2349_v54 = vadd.f32 %v2348_v63, %v2299_v29  ;;  %v2301_v33 = vpop.f32.mrf.mxu1  ;;  %v7477_v29 = vld [vmem:[%s14132_s0 + $0x220] sm:$0xf]  ;;  %v7635_v63 = vld [vmem:[%s14131_s1 + $0x418] sm:$0xf0] }
 0x36e   :  { %3058 = vmatpush.bf16.msrb.mxu0 %v7662_v59 }
 0x36f   :  { %v11708_v2 = vadd.f32 %v2349_v54, %v11448_v41  ;;  %v2438_v16 = vpop.f32.mrf.mxu2  ;;  %v8996_v41 = vld [vmem:[%s14132_s0 + $0x224] sm:$0xf0]  ;;  %v7638_v54 = vor.u32 %v9129_v35, %v7635_v63  ;;  %v14305_v63 = vld [vmem:[#allocation32_spill] sm:$0xff] }
 0x370   :  { %v2439_v4 = vadd.f32 %v2438_v16, %v2389_v28  ;;  %v2392_v37 = vpop.f32.mrf.mxu0  ;;  %v9131_v28 = vld [vmem:[%s14131_s1 + $0x424] sm:$0xf]  ;;  %v7478_v53 = vor.u32 %v8996_v41, %v7477_v29  ;;  %v7627_v16 = vld [vmem:[%s14131_s1 + $0x408] sm:$0xf0]  ;;  %v7619_v41 = vld [vmem:[%s14131_s1 + $0x3f8] sm:$0xf0] }
 0x371   :  { %v7646_v61 = vor.u32 %v9131_v28, %v7643_v0 }
 0x372   :  { %v11723_v39 = vadd.f32 %v2439_v4, %v11463_v46  ;;  %3059 = vmatpush.bf16.msrb.mxu0 %v7654_v5 }
 0x373   :  { %2740 = vmatmul.bf16.gmra.mxu0 %v14299_v42 }
 0x374   :  { %v2350_v46 = vpop.f32.mrf.mxu3  ;;  %7586 = vmatmul.msk.bf16.gmra.mxu2 %vm393_vm0, %v14300_v38 }
 0x375   :  { %v2351_v43 = vadd.f32 %v2350_v46, %v2301_v33  ;;  %v2304_v34 = vpop.f32.mrf.mxu1 }
 0x376   :  { %3060 = vmatpush.bf16.msrb.mxu0 %v7646_v61 }
 0x377   :  { %v11741_v42 = vadd.f32 %v2351_v43, %v11481_v52  ;;  %v2441_v9 = vpop.f32.mrf.mxu2  ;;  %v9127_v52 = vld [vmem:[%s14131_s1 + $0x404] sm:$0xf] }
 0x378   :  { %v2442_v59 = vadd.f32 %v2441_v9, %v2392_v37  ;;  %v2394_v38 = vpop.f32.mrf.mxu0  ;;  %2652 = vmatmul.bf16.gmra.mxu1 %v7478_v53  ;;  %v7630_v31 = vor.u32 %v9127_v52, %v7627_v16 }
 0x379   :  { %7580 = vmatmul.msk.bf16.gmra.mxu3 %vm393_vm0, %v7482_v6 }
 0x37a   :  { %v11751_v33 = vadd.f32 %v2442_v59, %v11491_v20  ;;  %3061 = vmatpush.bf16.msrb.mxu0 %v7638_v54  ;;  %v9125_v20 = vld [vmem:[%s14131_s1 + $0x3f4] sm:$0xf]  ;;  %v14306_v59 = vld [vmem:[#allocation33_spill] sm:$0xff] }
 0x37b   :  { %v7622_v28 = vor.u32 %v9125_v20, %v7619_v41 }
 0x37c   :  { %14304 = vst [vmem:[#allocation16_spill] sm:$0xff] %v11751_v33  ;;  %v2353_v45 = vpop.f32.mrf.mxu3 }
 0x37d   :  { %v2354_v4 = vadd.f32 %v2353_v45, %v2304_v34  ;;  %v2306_v37 = vpop.f32.mrf.mxu1 }
 0x37e   :  { %3062 = vmatpush.bf16.msrb.mxu0 %v7630_v31 }
 0x37f   :  { %v11760_v5 = vadd.f32 %v2354_v4, %v11500_v3  ;;  %v2443_v29 = vpop.f32.mrf.mxu2 }
 0x380   :  { %v2444_v14 = vadd.f32 %v2443_v29, %v2394_v38  ;;  %v2397_v21 = vpop.f32.mrf.mxu0 }
 0x382   :  { %v11769_v0 = vadd.f32 %v2444_v14, %v11509_v55  ;;  %3063 = vmatpush.bf16.msrb.mxu0 %v7622_v28  ;;  %v14309_v14 = vld [vmem:[#allocation35_spill] sm:$0xff] }
 0x383   :  { %2745 = vmatmul.bf16.gmra.mxu0 %v14301_v7 }
 0x384   :  { %v2355_v3 = vpop.f32.mrf.mxu3  ;;  %7587 = vmatmul.msk.bf16.gmra.mxu2 %vm393_vm0, %v14302_v36 }
 0x385   :  { %v2356_v46 = vadd.f32 %v2355_v3, %v2306_v37  ;;  %v2618_v61 = vpop.f32.mrf.mxu1 }
 0x387   :  { %v11775_v43 = vadd.f32 %v2356_v46, %v11515_v60  ;;  %v2446_v34 = vpop.f32.mrf.mxu2 }
 0x388   :  { %v2447_v9 = vadd.f32 %v2446_v34, %v2397_v21  ;;  %v2399_v35 = vpop.f32.mrf.mxu0  ;;  %2966 = vmatmul.bf16.vlgmr.msrb.gmra.mxu1 %v14305_v63 }
 0x389   :  { %7687 = vmatmul.msk.bf16.vlgmr.msrb.gmra.mxu3 %vm393_vm0, %v14306_v59 }
 0x38a   :  { %v11781_v55 = vadd.f32 %v2447_v9, %v11521_v58 }
 0x38c   :  { %14307 = vst [vmem:[#allocation17_spill] sm:$0xff] %v11781_v55  ;;  %v2667_v7 = vpop.f32.mrf.mxu3 }
 0x38d   :  { %v2668_v38 = vadd.f32 %v2667_v7, %v2618_v61  ;;  %v2620_v36 = vpop.f32.mrf.mxu1 }
 0x38f   :  { %v11784_v54 = vadd.f32 %v2668_v38, %v11524_v30  ;;  %v2448_v52 = vpop.f32.mrf.mxu2  ;;  %v14308_v30 = vld [vmem:[#allocation34_spill] sm:$0xff] }
 0x390   :  { %v2449_v60 = vadd.f32 %v2448_v52, %v2399_v35  ;;  %v2402_v16 = vpop.f32.mrf.mxu0  ;;  %v14311_v52 = vld [vmem:[#allocation37_spill] sm:$0xff] }
 0x392   :  { %v11787_v45 = vadd.f32 %v2449_v60, %v11527_v1 }
 0x393   :  { %2750 = vmatmul.bf16.gmra.mxu0 %v7478_v53 }
 0x394   :  { %v2669_v31 = vpop.f32.mrf.mxu3  ;;  %7588 = vmatmul.msk.bf16.gmra.mxu2 %vm393_vm0, %v7482_v6 }
 0x395   :  { %v2670_v4 = vadd.f32 %v2669_v31, %v2620_v36  ;;  %v2623_v37 = vpop.f32.mrf.mxu1  ;;  %v14310_v36 = vld [vmem:[#allocation36_spill] sm:$0xff] }
 0x397   :  { %v11791_v58 = vadd.f32 %v2670_v4, %v11531_v25  ;;  %v2451_v29 = vpop.f32.mrf.mxu2 }
 0x398   :  { %v2452_v20 = vadd.f32 %v2451_v29, %v2402_v16  ;;  %v2404_v41 = vpop.f32.mrf.mxu0  ;;  %2971 = vmatmul.bf16.gmra.mxu1 %v14308_v30 }
 0x399   :  { %7688 = vmatmul.msk.bf16.gmra.mxu3 %vm393_vm0, %v14309_v14 }
 0x39a   :  { %v11797_v1 = vadd.f32 %v2452_v20, %v11537_v32 }
 0x39c   :  { %v2672_v53 = vpop.f32.mrf.mxu3 }
 0x39d   :  { %v2673_v21 = vadd.f32 %v2672_v53, %v2623_v37  ;;  %v2625_v28 = vpop.f32.mrf.mxu1 }
 0x39f   :  { %v11800_v6 = vadd.f32 %v2673_v21, %v11540_v8  ;;  %v2453_v3 = vpop.f32.mrf.mxu2 }
 0x3a0   :  { %v2454_v25 = vadd.f32 %v2453_v3, %v2404_v41  ;;  %v2716_v46 = vpop.f32.mrf.mxu0  ;;  %v14314_v3 = vld [vmem:[#allocation39_spill] sm:$0xff] }
 0x3a2   :  { %v11803_v61 = vadd.f32 %v2454_v25, %v11543_v44 }
 0x3a3   :  { %3064 = vmatmul.bf16.vlgmr.msrb.gmra.mxu0 %v14305_v63 }
 0x3a4   :  { %v2674_v34 = vpop.f32.mrf.mxu3  ;;  %7695 = vmatmul.msk.bf16.vlgmr.msrb.gmra.mxu2 %vm393_vm0, %v14306_v59 }
 0x3a5   :  { %v2675_v32 = vadd.f32 %v2674_v34, %v2625_v28  ;;  %v2628_v9 = vpop.f32.mrf.mxu1  ;;  %v14313_v28 = vld [vmem:[#allocation38_spill] sm:$0xff] }
 0x3a7   :  { %v11809_v35 = vadd.f32 %v2675_v32, %v11549_v18  ;;  %v2765_v7 = vpop.f32.mrf.mxu2 }
 0x3a8   :  { %v2766_v8 = vadd.f32 %v2765_v7, %v2716_v46  ;;  %v2718_v38 = vpop.f32.mrf.mxu0  ;;  %2976 = vmatmul.bf16.gmra.mxu1 %v14310_v36 }
 0x3a9   :  { %7689 = vmatmul.msk.bf16.gmra.mxu3 %vm393_vm0, %v14311_v52 }
 0x3aa   :  { %v11815_v44 = vadd.f32 %v2766_v8, %v11555_v62 }
 0x3ac   :  { %14312 = vst [vmem:[#allocation4_spill] sm:$0xff] %v11815_v44  ;;  %v2677_v63 = vpop.f32.mrf.mxu3 }
 0x3ad   :  { %v2678_v60 = vadd.f32 %v2677_v63, %v2628_v9  ;;  %v2630_v16 = vpop.f32.mrf.mxu1 }
 0x3af   :  { %v11818_v59 = vadd.f32 %v2678_v60, %v11558_v51  ;;  %v2767_v31 = vpop.f32.mrf.mxu2 }
 0x3b0   :  { %v2768_v18 = vadd.f32 %v2767_v31, %v2718_v38  ;;  %v2721_v4 = vpop.f32.mrf.mxu0  ;;  %v14317_v31 = vld [vmem:[#allocation41_spill] sm:$0xff] }
 0x3b2   :  { %v11821_v37 = vadd.f32 %v2768_v18, %v11561_v57 }
 0x3b3   :  { %3069 = vmatmul.bf16.gmra.mxu0 %v14308_v30 }
 0x3b4   :  { %v2679_v29 = vpop.f32.mrf.mxu3  ;;  %7696 = vmatmul.msk.bf16.gmra.mxu2 %vm393_vm0, %v14309_v14 }
 0x3b5   :  { %v2680_v62 = vadd.f32 %v2679_v29, %v2630_v16  ;;  %v2633_v20 = vpop.f32.mrf.mxu1  ;;  %v14316_v16 = vld [vmem:[#allocation40_spill] sm:$0xff] }
 0x3b7   :  { %v11827_v41 = vadd.f32 %v2680_v62, %v11567_v40  ;;  %v2770_v53 = vpop.f32.mrf.mxu2 }
 0x3b8   :  { %v2771_v51 = vadd.f32 %v2770_v53, %v2721_v4  ;;  %v2723_v21 = vpop.f32.mrf.mxu0  ;;  %2981 = vmatmul.bf16.gmra.mxu1 %v14313_v28 }
 0x3b9   :  { %7690 = vmatmul.msk.bf16.gmra.mxu3 %vm393_vm0, %v14314_v3 }
 0x3ba   :  { %v11833_v57 = vadd.f32 %v2771_v51, %v11573_v11 }
 0x3bc   :  { %14315 = vst [vmem:[#allocation2_spill] sm:$0xff] %v11833_v57  ;;  %v2682_v30 = vpop.f32.mrf.mxu3 }
 0x3bd   :  { %v2683_v25 = vadd.f32 %v2682_v30, %v2633_v20  ;;  %v2635_v46 = vpop.f32.mrf.mxu1 }
 0x3bf   :  { %v11836_v14 = vadd.f32 %v2683_v25, %v11576_v12  ;;  %v2772_v34 = vpop.f32.mrf.mxu2 }
 0x3c0   :  { %v2773_v40 = vadd.f32 %v2772_v34, %v2723_v21  ;;  %v2726_v32 = vpop.f32.mrf.mxu0 }
 0x3c2   :  { %v11839_v9 = vadd.f32 %v2773_v40, %v11579_v48 }
 0x3c3   :  { %3074 = vmatmul.bf16.gmra.mxu0 %v14310_v36 }
 0x3c4   :  { %v2684_v7 = vpop.f32.mrf.mxu3  ;;  %7697 = vmatmul.msk.bf16.gmra.mxu2 %vm393_vm0, %v14311_v52 }
 0x3c5   :  { %v2685_v11 = vadd.f32 %v2684_v7, %v2635_v46  ;;  %v11844_v8 = vpop.f32.mrf.mxu1 }
 0x3c7   :  { %v11847_v38 = vadd.f32 %v2685_v11, %v11585_v19  ;;  %v2775_v12 = vpop.f32.mrf.mxu2 }
 0x3c8   :  { %v2776_v63 = vadd.f32 %v2775_v12, %v2726_v32  ;;  %v2728_v60 = vpop.f32.mrf.mxu0  ;;  %2986 = vmatmul.bf16.gmra.mxu1 %v14316_v16 }
 0x3c9   :  { %7691 = vmatmul.msk.bf16.gmra.mxu3 %vm393_vm0, %v14317_v31 }
 0x3ca   :  { %v11853_v48 = vadd.f32 %v2776_v63, %v11591_v22 }
 0x3cc   :  { %14318 = vst [vmem:[#allocation6_spill] sm:$0xff] %v11853_v48  ;;  %v11855_v36 = vpop.f32.mrf.mxu3 }
 0x3cd   :  { %v2640_v52 = vpop.f32.mrf.mxu1 }
 0x3cf   :  { %v2777_v18 = vpop.f32.mrf.mxu2 }
 0x3d0   :  { %v2778_v4 = vadd.f32 %v2777_v18, %v2728_v60  ;;  %v2731_v29 = vpop.f32.mrf.mxu0 }
 0x3d2   :  { %v11858_v19 = vadd.f32 %v2778_v4, %v11609_v50  ;;  %v8997_v4 = vld [vmem:[%s14132_s0 + $0x234] sm:$0xf] }
 0x3d3   :  { %3079 = vmatmul.bf16.gmra.mxu0 %v14313_v28 }
 0x3d4   :  { %v2689_v62 = vpop.f32.mrf.mxu3  ;;  %7698 = vmatmul.msk.bf16.gmra.mxu2 %vm393_vm0, %v14314_v3 }
 0x3d5   :  { %v2690_v20 = vadd.f32 %v2689_v62, %v2640_v52  ;;  %v11863_v53 = vpop.f32.mrf.mxu1  ;;  %v8998_v52 = vld [vmem:[%s14132_s0 + $0x234] sm:$0xf0] }
 0x3d7   :  { %v11866_v22 = vadd.f32 %v2690_v20, %v11621_v24  ;;  %v2780_v51 = vpop.f32.mrf.mxu2 }
 0x3d8   :  { %v2781_v21 = vadd.f32 %v2780_v51, %v2731_v29  ;;  %v2733_v30 = vpop.f32.mrf.mxu0  ;;  %2991 = vmatmul.bf16.gmra.mxu1 %v10876_v23  ;;  %v7593_v29 = vld [vmem:[%s14132_s0 + $0x238] sm:$0xf0] }
 0x3d9   :  { %7692 = vmatmul.msk.bf16.gmra.mxu3 %vm393_vm0, %v10878_v47 }
 0x3da   :  { %v11872_v50 = vadd.f32 %v2781_v21, %v11633_v13  ;;  %v7596_v21 = vor.u32 %v8997_v4, %v7593_v29 }
 0x3dc   :  { %14319 = vst [vmem:[#allocation3_spill] sm:$0xff] %v11872_v50  ;;  %v11874_v28 = vpop.f32.mrf.mxu3 }
 0x3dd   :  { %v2645_v3 = vpop.f32.mrf.mxu1 }
 0x3df   :  { %v2782_v25 = vpop.f32.mrf.mxu2 }
 0x3e0   :  { %v2783_v46 = vadd.f32 %v2782_v25, %v2733_v30  ;;  %v11876_v34 = vpop.f32.mrf.mxu0 }
 0x3e1   :  { %14320 = vst [vmem:[#allocation8_spill] sm:$0xff] %v11876_v34 }
 0x3e2   :  { %v11879_v24 = vadd.f32 %v2783_v46, %v11657_v17 }
 0x3e3   :  { %3084 = vmatmul.bf16.gmra.mxu0 %v14316_v16 }
 0x3e4   :  { %v2694_v40 = vpop.f32.mrf.mxu3  ;;  %7699 = vmatmul.msk.bf16.gmra.mxu2 %vm393_vm0, %v14317_v31 }
 0x3e5   :  { %v2695_v32 = vadd.f32 %v2694_v40, %v2645_v3  ;;  %v11884_v7 = vpop.f32.mrf.mxu1 }
 0x3e7   :  { %v11887_v13 = vadd.f32 %v2695_v32, %v11675_v10  ;;  %v11889_v11 = vpop.f32.mrf.mxu2  ;;  %v7591_v10 = vld [vmem:[%s14132_s0 + $0x230] sm:$0xf]  ;;  %s9430_s0 = smov 96  }
 0x3e8   :  { %14321 = vst [vmem:[#allocation5_spill] sm:$0xff] %v11889_v11  ;;  %v2738_v12 = vpop.f32.mrf.mxu0  ;;  %2996 = vmatmul.bf16.gmra.mxu1 %v10952_v56  ;;  %v7592_v20 = vor.u32 %v8998_v52, %v7591_v10 }
 0x3e9   :  { %7693 = vmatmul.msk.bf16.gmra.mxu3 %vm393_vm0, %v10954_v15 }
 0x3ec   :  { %v11894_v17 = vpop.f32.mrf.mxu3 }
 0x3ed   :  { %v2650_v63 = vpop.f32.mrf.mxu1 }
 0x3ef   :  { %v2787_v60 = vpop.f32.mrf.mxu2 }
 0x3f0   :  { %v2788_v16 = vadd.f32 %v2787_v60, %v2738_v12  ;;  %v11896_v31 = vpop.f32.mrf.mxu0 }
 0x3f1   :  { %14322 = vst [vmem:[#allocation10_spill] sm:$0xff] %v11896_v31 }
 0x3f2   :  { %v11905_v18 = vadd.f32 %v2788_v16, %v11723_v39 }
 0x3f3   :  { %3089 = vmatmul.bf16.gmra.mxu0 %v10876_v23 }
 0x3f4   :  { %14323 = vst [vmem:[#allocation7_spill] sm:$0xff] %v11905_v18  ;;  %v2699_v62 = vpop.f32.mrf.mxu3  ;;  %7700 = vmatmul.msk.bf16.gmra.mxu2 %vm393_vm0, %v10878_v47 }
 0x3f5   :  { %v2700_v51 = vadd.f32 %v2699_v62, %v2650_v63  ;;  %v11916_v30 = vpop.f32.mrf.mxu1 }
 0x3f7   :  { %v11919_v39 = vadd.f32 %v2700_v51, %v11741_v42  ;;  %v11921_v3 = vpop.f32.mrf.mxu2 }
 0x3f8   :  { %14324 = vst [vmem:[#allocation12_spill] sm:$0xff] %v11921_v3  ;;  %v2743_v25 = vpop.f32.mrf.mxu0  ;;  %3001 = vmatmul.bf16.gmra.mxu1 %v7592_v20 }
 0x3f9   :  { %7694 = vmatmul.msk.bf16.gmra.mxu3 %vm393_vm0, %v7596_v21 }
 0x3fc   :  { %v11924_v46 = vpop.f32.mrf.mxu3 }
 0x3fd   :  { %v2655_v23 = vpop.f32.mrf.mxu1 }
 0x3ff   :  { %v2792_v40 = vpop.f32.mrf.mxu2 }
 0x400   :  { %v2793_v32 = vadd.f32 %v2792_v40, %v2743_v25  ;;  %v11926_v47 = vpop.f32.mrf.mxu0 }
 0x402   :  { %v11929_v12 = vadd.f32 %v2793_v32, %v11769_v0 }
 0x403   :  { %3094 = vmatmul.bf16.gmra.mxu0 %v10952_v56 }
 0x404   :  { %14325 = vst [vmem:[#allocation9_spill] sm:$0xff] %v11929_v12  ;;  %v2704_v42 = vpop.f32.mrf.mxu3  ;;  %7701 = vmatmul.msk.bf16.gmra.mxu2 %vm393_vm0, %v10954_v15 }
 0x405   :  { %v2705_v63 = vadd.f32 %v2704_v42, %v2655_v23  ;;  %v11934_v60 = vpop.f32.mrf.mxu1 }
 0x407   :  { %v11937_v16 = vadd.f32 %v2705_v63, %v11775_v43  ;;  %v11939_v10 = vpop.f32.mrf.mxu2 }
 0x408   :  { %v2748_v52 = vpop.f32.mrf.mxu0 }
 0x40c   :  { %v11941_v4 = vpop.f32.mrf.mxu3 }
 0x40d   :  { %v2969_v29 = vpop.f32.mrf.mxu1 }
 0x40f   :  { %v2797_v0 = vpop.f32.mrf.mxu2 }
 0x410   :  { %v2798_v62 = vadd.f32 %v2797_v0, %v2748_v52  ;;  %v11943_v51 = vpop.f32.mrf.mxu0 }
 0x412   :  { %v11946_v56 = vadd.f32 %v2798_v62, %v11787_v45 }
 0x413   :  { %3099 = vmatmul.bf16.gmra.mxu0 %v7592_v20 }
 0x414   :  { %14326 = vst [vmem:[#allocation14_spill] sm:$0xff] %v11946_v56  ;;  %v3018_v15 = vpop.f32.mrf.mxu3  ;;  %7702 = vmatmul.msk.bf16.gmra.mxu2 %vm393_vm0, %v7596_v21 }
 0x415   :  { %v3019_v25 = vadd.f32 %v3018_v15, %v2969_v29  ;;  %v11949_v43 = vpop.f32.mrf.mxu1 }
 0x417   :  { %v11952_v23 = vadd.f32 %v3019_v25, %v11791_v58  ;;  %v11954_v40 = vpop.f32.mrf.mxu2 }
 0x418   :  { %v2753_v32 = vpop.f32.mrf.mxu0 }
 0x419   :  { %14327 = vst [vmem:[#allocation11_spill] sm:$0xff] %v11952_v23 }
 0x41c   :  { %v11956_v42 = vpop.f32.mrf.mxu3 }
 0x41d   :  { %v2974_v63 = vpop.f32.mrf.mxu1 }
 0x41f   :  { %v2802_v52 = vpop.f32.mrf.mxu2 }
 0x420   :  { %v2803_v0 = vadd.f32 %v2802_v52, %v2753_v32  ;;  %v11958_v45 = vpop.f32.mrf.mxu0 }
 0x421   :  { %14328 = vst [vmem:[#allocation15_spill] sm:$0xff] %v11958_v45 }
 0x422   :  { %v11961_v20 = vadd.f32 %v2803_v0, %v11803_v61 }
 0x424   :  { %v3023_v21 = vpop.f32.mrf.mxu3 }
 0x425   :  { %v3024_v29 = vadd.f32 %v3023_v21, %v2974_v63  ;;  %v11963_v62 = vpop.f32.mrf.mxu1 }
 0x427   :  { %v11966_v58 = vadd.f32 %v3024_v29, %v11809_v35  ;;  %v11968_v15 = vpop.f32.mrf.mxu2 }
 0x428   :  { %14329 = vst [vmem:[#allocation13_spill] sm:$0xff] %v11968_v15  ;;  %v3067_v25 = vpop.f32.mrf.mxu0 }
 0x42c   :  { %v11970_v44 = vpop.f32.mrf.mxu3 }
 0x42d   :  { %v2979_v57 = vpop.f32.mrf.mxu1 }
 0x42f   :  { %v3116_v48 = vpop.f32.mrf.mxu2 }
 0x430   :  { %v3117_v32 = vadd.f32 %v3116_v48, %v3067_v25  ;;  %v11972_v52 = vpop.f32.mrf.mxu0 }
 0x431   :  { %14330 = vst [vmem:[#allocation18_spill] sm:$0xff] %v11972_v52 }
 0x432   :  { %v11975_v61 = vadd.f32 %v3117_v32, %v11821_v37 }
 0x434   :  { %14331 = vst [vmem:[#allocation19_spill] sm:$0xff] %v11975_v61  ;;  %v3028_v0 = vpop.f32.mrf.mxu3 }
 0x435   :  { %v3029_v63 = vadd.f32 %v3028_v0, %v2979_v57  ;;  %v11977_v21 = vpop.f32.mrf.mxu1 }
 0x437   :  { %v11980_v35 = vadd.f32 %v3029_v63, %v11827_v41  ;;  %v11982_v29 = vpop.f32.mrf.mxu2 }
 0x438   :  { %14332 = vst [vmem:[#allocation20_spill] sm:$0xff] %v11982_v29  ;;  %v3072_v15 = vpop.f32.mrf.mxu0 }
 0x43c   :  { %v11984_v45 = vpop.f32.mrf.mxu3 }
 0x43d   :  { %v2984_v50 = vpop.f32.mrf.mxu1 }
 0x43f   :  { %v3121_v18 = vpop.f32.mrf.mxu2 }
 0x440   :  { %v3122_v48 = vadd.f32 %v3121_v18, %v3072_v15  ;;  %v11986_v25 = vpop.f32.mrf.mxu0 }
 0x441   :  { %14333 = vst [vmem:[#allocation21_spill] sm:$0xff] %v11986_v25 }
 0x442   :  { %v11989_v37 = vadd.f32 %v3122_v48, %v11839_v9 }
 0x444   :  { %14334 = vst [vmem:[#allocation22_spill] sm:$0xff] %v11989_v37  ;;  %v3033_v32 = vpop.f32.mrf.mxu3 }
 0x445   :  { %v3034_v57 = vadd.f32 %v3033_v32, %v2984_v50  ;;  %v11991_v0 = vpop.f32.mrf.mxu1 }
 0x447   :  { %v11994_v41 = vadd.f32 %v3034_v57, %v11847_v38  ;;  %v11996_v63 = vpop.f32.mrf.mxu2 }
 0x448   :  { %14335 = vst [vmem:[#allocation23_spill] sm:$0xff] %v11996_v63  ;;  %v3077_v61 = vpop.f32.mrf.mxu0 }
 0x44c   :  { %v3036_v29 = vpop.f32.mrf.mxu3 }
 0x44d   :  { %v2989_v52 = vpop.f32.mrf.mxu1 }
 0x44f   :  { %v3126_v49 = vpop.f32.mrf.mxu2 }
 0x450   :  { %v3127_v12 = vadd.f32 %v3126_v49, %v3077_v61  ;;  %v11998_v18 = vpop.f32.mrf.mxu0 }
 0x451   :  { %14336 = vst [vmem:[#allocation24_spill] sm:$0xff] %v11998_v18 }
 0x452   :  { %v12001_v15 = vadd.f32 %v3127_v12, %v11858_v19 }
 0x454   :  { %14337 = vst [vmem:[#allocation25_spill] sm:$0xff] %v12001_v15  ;;  %v3038_v9 = vpop.f32.mrf.mxu3 }
 0x455   :  { %v2992_v48 = vpop.f32.mrf.mxu1 }
 0x457   :  { %v12003_v50 = vpop.f32.mrf.mxu2 }
 0x458   :  { %14338 = vst [vmem:[#allocation26_spill] sm:$0xff] %v12003_v50  ;;  %v3082_v32 = vpop.f32.mrf.mxu0 }
 0x45c   :  { %v3041_v37 = vpop.f32.mrf.mxu3 }
 0x45d   :  { %v2994_v38 = vpop.f32.mrf.mxu1 }
 0x45f   :  { %v3131_v57 = vpop.f32.mrf.mxu2 }
 0x460   :  { %v3132_v25 = vadd.f32 %v3131_v57, %v3082_v32  ;;  %v12005_v63 = vpop.f32.mrf.mxu0 }
 0x461   :  { %14339 = vst [vmem:[#allocation27_spill] sm:$0xff] %v12005_v63 }
 0x462   :  { %v12008_v33 = vadd.f32 %v3132_v25, %v11879_v24 }
 0x464   :  { %14340 = vst [vmem:[#allocation28_spill] sm:$0xff] %v12008_v33  ;;  %v3043_v49 = vpop.f32.mrf.mxu3  ;;  %v2703_v33 = vadd.f32 %v11924_v46, %v11916_v30  ;;  %v2693_v30 = vadd.f32 %v11874_v28, %v11863_v53 }
 0x465   :  { %v2997_v61 = vpop.f32.mrf.mxu1 }
 0x466   :  { %v2825_v28 = vadd.f32 %v2693_v30, %v11642_v27  ;;  %v14348_v30 = vld [vmem:[#allocation10_spill] sm:$0xff] }
 0x467   :  { %v12010_v18 = vpop.f32.mrf.mxu2 }
 0x468   :  { %14341 = vst [vmem:[#allocation29_spill] sm:$0xff] %v12010_v18  ;;  %v12012_v19 = vpop.f32.mrf.mxu0 }
 0x469   :  { %14342 = vst [vmem:[#allocation30_spill] sm:$0xff] %v12012_v19 }
 0x46c   :  { %v3046_v12 = vpop.f32.mrf.mxu3 }
 0x46d   :  { %v2999_v15 = vpop.f32.mrf.mxu1 }
 0x46f   :  { %v12014_v11 = vpop.f32.mrf.mxu2 }
 0x470   :  { %14343 = vst [vmem:[#allocation31_spill] sm:$0xff] %v12014_v11  ;;  %v12016_v50 = vpop.f32.mrf.mxu0  ;;  %v2698_v11 = vadd.f32 %v11894_v17, %v11884_v7 }
 0x471   :  { %14344 = vst [vmem:[#allocation32_spill] sm:$0xff] %v12016_v50  ;;  %v2833_v50 = vadd.f32 %v2703_v33, %v11760_v5  ;;  %v3042_v5 = vadd.f32 %v3041_v37, %v2992_v48  ;;  %v2801_v48 = vadd.f32 %v11954_v40, %v11943_v51  ;;  %v2796_v40 = vadd.f32 %v11939_v10, %v11926_v47 }
 0x472   :  { %v2829_v46 = vadd.f32 %v2698_v11, %v11708_v2  ;;  %v2688_v2 = vadd.f32 %v11855_v36, %v11844_v8  ;;  %v3039_v11 = vadd.f32 %v3038_v9, %v2989_v52  ;;  %v3032_v52 = vadd.f32 %v11984_v45, %v11977_v21 }
 0x473   :  { %v3186_v9 = vlaneseq }
 0x474   :  { %v3048_v34 = vpop.f32.mrf.mxu3  ;;  %v2821_v36 = vadd.f32 %v2688_v2, %v11600_v26  ;;  %v12087_v45 = vadd.f32 %v3032_v52, %v11836_v14  ;;  %v14354_v2 = vld [vmem:[#allocation14_spill] sm:$0xff]  ;;  %v14359_v52 = vld [vmem:[#allocation8_spill] sm:$0xff] }
 0x475   :  { %v3002_v57 = vpop.f32.mrf.mxu1 }
 0x477   :  { %v12018_v56 = vpop.f32.mrf.mxu2 }
 0x478   :  { %14345 = vst [vmem:[#allocation33_spill] sm:$0xff] %v12018_v56  ;;  %v12020_v32 = vpop.f32.mrf.mxu0  ;;  %v3049_v56 = vadd.f32 %v3048_v34, %v2999_v15  ;;  %v3257_v15 = vmul.f32 %v11994_v41, %v11994_v41 }
 0x479   :  { %14346 = vst [vmem:[#allocation34_spill] sm:$0xff] %v12020_v32  ;;  %v3047_v32 = vadd.f32 %v3046_v12, %v2997_v61  ;;  %v2834_v12 = vadd.f32 %v2801_v48, %v11797_v1 }
 0x47a   :  { %v12042_v7 = vadd.f32 %v3049_v56, %v11919_v39  ;;  %v12062_v56 = vadd.f32 %v3042_v5, %v2825_v28  ;;  %v14351_v5 = vld [vmem:[#allocation11_spill] sm:$0xff] }
 0x47b   :  { %v12047_v34 = vadd.f32 %v3047_v32, %v2829_v46  ;;  %v14349_v46 = vld [vmem:[#allocation12_spill] sm:$0xff] }
 0x47c   :  { %v3051_v24 = vpop.f32.mrf.mxu3  ;;  %v3269_v39 = vmul.f32 %v12042_v7, %v12042_v7  ;;  %v3263_v26 = vmul.f32 %v12062_v56, %v12062_v56 }
 0x47d   :  { %v3004_v63 = vpop.f32.mrf.mxu1  ;;  %v3052_v19 = vadd.f32 %v3051_v24, %v3002_v57  ;;  %v3044_v57 = vadd.f32 %v3043_v49, %v2994_v38  ;;  %v3267_v27 = vmul.f32 %v12047_v34, %v12047_v34  ;;  %v3187_v38 = vand.u32 127, %v3186_v9 }
 0x47f   :  { %v12022_v25 = vpop.f32.mrf.mxu2  ;;  %v12031_v3 = vadd.f32 %v3052_v19, %v2833_v50  ;;  %v12056_v17 = vadd.f32 %v3044_v57, %v11887_v13  ;;  %v12069_v13 = vadd.f32 %v3039_v11, %v11866_v22  ;;  %v3253_v50 = vmul.f32 %v11980_v35, %v11980_v35 }
 0x480   :  { %14347 = vst [vmem:[#allocation35_spill] sm:$0xff] %v12022_v25  ;;  %v12026_v18 = vpop.f32.mrf.mxu0  ;;  %v2791_v57 = vadd.f32 %v14349_v46, %v14348_v30  ;;  %v14371_v46 = vld [vmem:[#allocation21_spill] sm:$0xff] }
 0x481   :  { %v3271_v53 = vmul.f32 %v12031_v3, %v12031_v3  ;;  %v3261_v22 = vmul.f32 %v12069_v13, %v12069_v13 }
 0x484   :  { %v3053_v23 = vpop.f32.mrf.mxu3 }
 0x485   :  { %v3054_v55 = vadd.f32 %v3053_v23, %v3004_v63  ;;  %v3265_v23 = vmul.f32 %v12056_v17, %v12056_v17 }
 0x487   :  { %v12034_v25 = vadd.f32 %v3054_v55, %v11937_v16  ;;  %v12036_v31 = vpop.f32.mrf.mxu2  ;;  %v3037_v16 = vadd.f32 %v3036_v29, %v11991_v0  ;;  %v3027_v0 = vadd.f32 %v11970_v44, %v11963_v62  ;;  %v3022_v44 = vadd.f32 %v11956_v42, %v11949_v43 }
 0x488   :  { %v3097_v55 = vpop.f32.mrf.mxu0  ;;  %v3255_v62 = vmul.f32 %v12087_v45, %v12087_v45  ;;  %v3145_v47 = vadd.f32 %v12036_v31, %v12026_v18  ;;  %v3245_v31 = vmul.f32 %v14351_v5, %v14351_v5  ;;  %v14352_v18 = vld [vmem:[#allocation34_spill] sm:$0xff] }
 0x489   :  { %v3273_v33 = vmul.f32 %v12034_v25, %v12034_v25  ;;  %3203 = vmatpush.msra.mxu1 %v12034_v25  ;;  %v12076_v29 = vadd.f32 %v3037_v16, %v2821_v36  ;;  %v12098_v14 = vadd.f32 %v3027_v0, %v11818_v59  ;;  %v3017_v59 = vadd.f32 %v11941_v4, %v11934_v60  ;;  %v14357_v16 = vld [vmem:[#allocation32_spill] sm:$0xff] }
 0x48a   :  { %v12111_v43 = vadd.f32 %v3022_v44, %v11800_v6  ;;  %v3249_v6 = vmul.f32 %v11966_v58, %v11966_v58  ;;  %v3192_v60 = vand.u32 15, %v3187_v38  ;;  %v14364_v44 = vld [vmem:[#allocation9_spill] sm:$0xff] }
 0x48b   :  { %3204 = vmatpush.msra.mxu1 %v12031_v3  ;;  %3275 = vmatpush.msra.mxu0 %v3273_v33  ;;  %v3259_v63 = vmul.f32 %v12076_v29, %v12076_v29  ;;  %v3251_v51 = vmul.f32 %v12098_v14, %v12098_v14  ;;  %v12123_v4 = vadd.f32 %v3017_v59, %v11784_v54  ;;  %v14350_v33 = vld [vmem:[#allocation17_spill] sm:$0xff] }
 0x48c   :  { %v3247_v1 = vmul.f32 %v12111_v43, %v12111_v43  ;;  %v2830_v54 = vadd.f32 %v2796_v40, %v14350_v33  ;;  %vm12149_vm1 = vcmp.lt.s32.totalorder %v3192_v60, 2  ;;  %v14366_v38 = vld [vmem:[#allocation29_spill] sm:$0xff]  ;;  %v14368_v40 = vld [vmem:[#allocation7_spill] sm:$0xff] }
 0x48d   :  { %3205 = vmatpush.msra.mxu1 %v12042_v7  ;;  %3276 = vmatpush.msra.mxu0 %v3271_v53 }
 0x48e   :  { %v12158_v36 = vadd.f32 %v3145_v47, %v2830_v54  ;;  %v14373_v54 = vld [vmem:[#allocation3_spill] sm:$0xff] }
 0x48f   :  { %3206 = vmatpush.msra.mxu1 %v12047_v34  ;;  %3277 = vmatpush.msra.mxu0 %v3269_v39  ;;  %v3146_v8 = vpop.f32.mrf.mxu2  ;;  %v3243_v39 = vmul.f32 %v12123_v4, %v12123_v4 }
 0x490   :  { %v3100_v37 = vpop.f32.mrf.mxu0  ;;  %v3147_v32 = vadd.f32 %v3146_v8, %v3097_v55  ;;  %v14353_v55 = vld [vmem:[#allocation35_spill] sm:$0xff]  ;;  %v14358_v8 = vld [vmem:[#allocation33_spill] sm:$0xff] }
 0x491   :  { %3207 = vmatpush.msra.mxu1 %v12056_v17  ;;  %3278 = vmatpush.msra.mxu0 %v3267_v27  ;;  %v3142_v53 = vadd.f32 %v14353_v55, %v14352_v18  ;;  %v3140_v27 = vadd.f32 %v14358_v8, %v14357_v16  ;;  %v14374_v18 = vld [vmem:[#allocation28_spill] sm:$0xff]  ;;  %v14377_v16 = vld [vmem:[#allocation6_spill] sm:$0xff] }
 0x492   :  { %v12146_v28 = vadd.f32 %v3147_v32, %v14354_v2  ;;  %v14369_v32 = vld [vmem:[#allocation24_spill] sm:$0xff]  ;;  %v3258_v55 = vmul.f32 %v14374_v18, %v14374_v18 }
 0x493   :  { %3208 = vmatpush.msra.mxu1 %v12062_v56  ;;  %3279 = vmatpush.msra.mxu0 %v3265_v23  ;;  %v14376_v2 = vld [vmem:[#allocation20_spill] sm:$0xff] }
 0x494   :  { %v3270_v48 = vmul.f32 %v12146_v28, %v12146_v28 }
 0x495   :  { %3209 = vmatpush.msra.mxu1 %v12069_v13  ;;  %3280 = vmatpush.msra.mxu0 %v3263_v26  ;;  %v14360_v26 = vld [vmem:[#allocation5_spill] sm:$0xff] }
 0x497   :  { %3210 = vmatpush.msra.mxu1 %v12076_v29  ;;  %3281 = vmatpush.msra.mxu0 %v3261_v22  ;;  %v3149_v21 = vpop.f32.mrf.mxu2  ;;  %v14361_v22 = vld [vmem:[#allocation16_spill] sm:$0xff] }
 0x498   :  { %v3150_v42 = vadd.f32 %v3149_v21, %v3100_v37  ;;  %v3102_v49 = vpop.f32.mrf.mxu0  ;;  %v2786_v37 = vadd.f32 %v14360_v26, %v14359_v52  ;;  %v2826_v0 = vadd.f32 %v2791_v57, %v14361_v22  ;;  %v9429_v21 = vmov 1.0   ;;  %v14372_v57 = vld [vmem:[#allocation23_spill] sm:$0xff] }
 0x499   :  { %3211 = vmatpush.msra.mxu1 %v11994_v41  ;;  %3282 = vmatpush.msra.mxu0 %v3259_v63  ;;  %v14362_v63 = vld [vmem:[#allocation30_spill] sm:$0xff]  ;;  %v3125_v33 = vadd.f32 %v14372_v57, %v14371_v46  ;;  %v14379_v26 = vld [vmem:[#allocation15_spill] sm:$0xff] }
 0x49a   :  { %v12130_v10 = vadd.f32 %v3150_v42, %v2834_v12  ;;  %v12183_v42 = vadd.f32 %v3140_v27, %v2826_v0  ;;  %v14381_v0 = vld [vmem:[#allocation2_spill] sm:$0xff] }
 0x49b   :  { %3212 = vmatpush.msra.mxu1 %v12087_v45  ;;  %3283 = vmatpush.msra.mxu0 %v3257_v15  ;;  %v14363_v15 = vld [vmem:[#allocation31_spill] sm:$0xff]  ;;  %v12219_v8 = vadd.f32 %v3125_v33, %v14377_v16 }
 0x49c   :  { %v3272_v23 = vmul.f32 %v12130_v10, %v12130_v10  ;;  %v3137_v9 = vadd.f32 %v14363_v15, %v14362_v63 }
 0x49d   :  { %3213 = vmatpush.msra.mxu1 %v11980_v35  ;;  %3284 = vmatpush.msra.mxu0 %v3255_v62  ;;  %v12173_v62 = vadd.f32 %v3142_v53, %v14364_v44  ;;  %v14375_v53 = vld [vmem:[#allocation18_spill] sm:$0xff]  ;;  %v3252_v15 = vmul.f32 %v12219_v8, %v12219_v8 }
 0x49f   :  { %3214 = vmatpush.msra.mxu1 %v12098_v14  ;;  %3285 = vmatpush.msra.mxu0 %v3253_v50  ;;  %v3151_v61 = vpop.f32.mrf.mxu2  ;;  %v14365_v50 = vld [vmem:[#allocation27_spill] sm:$0xff]  ;;  %v3266_v12 = vmul.f32 %v12173_v62, %v12173_v62 }
 0x4a0   :  { %v3152_v19 = vadd.f32 %v3151_v61, %v3102_v49  ;;  %v3135_v59 = vadd.f32 %v14366_v38, %v14365_v50  ;;  %v3268_v49 = vmul.f32 %v12158_v36, %v12158_v36  ;;  %v14367_v61 = vld [vmem:[#allocation42_spill] sm:$0xff] }
 0x4a1   :  { %3215 = vmatpush.msra.mxu1 %v11966_v58  ;;  %3286 = vmatpush.msra.mxu0 %v3251_v51  ;;  %v2822_v51 = vadd.f32 %v2786_v37, %v14367_v61  ;;  %v14380_v37 = vld [vmem:[#allocation13_spill] sm:$0xff] }
 0x4a2   :  { %v12126_v24 = vadd.f32 %v3152_v19, %v11961_v20  ;;  %v12190_v19 = vadd.f32 %v3137_v9, %v14368_v40  ;;  %v3115_v22 = vadd.f32 %v14380_v37, %v14379_v26  ;;  %v14382_v9 = vld [vmem:[#allocation22_spill] sm:$0xff] }
 0x4a3   :  { %3216 = vmatpush.msra.mxu1 %v12111_v43  ;;  %3287 = vmatpush.msra.mxu0 %v3249_v6  ;;  %v14370_v6 = vld [vmem:[#allocation26_spill] sm:$0xff]  ;;  %v12197_v47 = vadd.f32 %v3135_v59, %v2822_v51  ;;  %v3250_v44 = vmul.f32 %v14382_v9, %v14382_v9  ;;  %v14384_v59 = vld [vmem:[#allocation19_spill] sm:$0xff] }
 0x4a4   :  { %v3274_v20 = vmul.f32 %v12126_v24, %v12126_v24  ;;  %3223 = vmatpush.msra.mxu3 %v12126_v24  ;;  %v3130_v60 = vadd.f32 %v14370_v6, %v14369_v32  ;;  %v3262_v30 = vmul.f32 %v12190_v19, %v12190_v19 }
 0x4a5   :  { %3217 = vmatpush.msra.mxu1 %v14351_v5  ;;  %3288 = vmatpush.msra.mxu0 %v3247_v1  ;;  %v3264_v1 = vmul.f32 %v12183_v42, %v12183_v42 }
 0x4a6   :  { %3224 = vmatpush.msra.mxu3 %v12130_v10  ;;  %3295 = vmatpush.msra.mxu2 %v3274_v20  ;;  %v12208_v20 = vadd.f32 %v3130_v60, %v14373_v54 }
 0x4a7   :  { %3218 = vmatpush.msra.mxu1 %v12123_v4  ;;  %3289 = vmatpush.msra.mxu0 %v3245_v31  ;;  %v3260_v31 = vmul.f32 %v12197_v47, %v12197_v47 }
 0x4a8   :  { %7704 = vmatmul.msk.f32.vlgmr.msra.gmra.mxu1 %vm12149_vm1, %v9429_v21  ;;  %3225 = vmatpush.msra.mxu3 %v12146_v28  ;;  %v3256_v27 = vmul.f32 %v12208_v20, %v12208_v20 }
 0x4a9   :  { %3290 = vmatpush.msra.mxu0 %v3243_v39  ;;  %3296 = vmatpush.msra.mxu2 %v3272_v23  ;;  %v3120_v39 = vadd.f32 %v14376_v2, %v14375_v53  ;;  %v14378_v23 = vld [vmem:[#allocation25_spill] sm:$0xff] }
 0x4aa   :  { %3226 = vmatpush.msra.mxu3 %v12158_v36  ;;  %7706 = vmatmul.msk.f32.vlgmr.msra.gmra.mxu0 %vm12149_vm1, %v9429_v21  ;;  %v3254_v52 = vmul.f32 %v14378_v23, %v14378_v23 }
 0x4ab   :  { %3297 = vmatpush.msra.mxu2 %v3270_v48  ;;  %v12230_v63 = vadd.f32 %v3120_v39, %v14381_v0  ;;  %v14383_v48 = vld [vmem:[#allocation4_spill] sm:$0xff] }
 0x4ac   :  { %3227 = vmatpush.msra.mxu3 %v12173_v62  ;;  %v12239_v50 = vadd.f32 %v3115_v22, %v14383_v48 }
 0x4ad   :  { %3298 = vmatpush.msra.mxu2 %v3268_v49  ;;  %v3248_v38 = vmul.f32 %v12230_v63, %v12230_v63  ;;  %v3246_v49 = vmul.f32 %v14384_v59, %v14384_v59 }
 0x4ae   :  { %3228 = vmatpush.msra.mxu3 %v12183_v42  ;;  %v3244_v61 = vmul.f32 %v12239_v50, %v12239_v50 }
 0x4af   :  { %3299 = vmatpush.msra.mxu2 %v3266_v12 }
 0x4b0   :  { %3229 = vmatpush.msra.mxu3 %v12190_v19 }
 0x4b1   :  { %3300 = vmatpush.msra.mxu2 %v3264_v1  ;;  %v9433_v1 = vmov 128.0  }
 0x4b2   :  { %3230 = vmatpush.msra.mxu3 %v12197_v47  ;;  %9417 = vrcp.f32 %v9433_v1 }
 0x4b3   :  { %3301 = vmatpush.msra.mxu2 %v3262_v30 }
 0x4b4   :  { %3231 = vmatpush.msra.mxu3 %v14374_v18 }
 0x4b5   :  { %3302 = vmatpush.msra.mxu2 %v3260_v31 }
 0x4b6   :  { %3232 = vmatpush.msra.mxu3 %v12208_v20 }
 0x4b7   :  { %3303 = vmatpush.msra.mxu2 %v3258_v55 }
 0x4b8   :  { %3233 = vmatpush.msra.mxu3 %v14378_v23  ;;  %v9418_v57 = vpop.eup %9417 }
 0x4b9   :  { %3304 = vmatpush.msra.mxu2 %v3256_v27  ;;  %v3370_v55 = vmul.f32 128.0, %v9418_v57  ;;  %vm3374_vm2 = vweird.f32 %v9418_v57 }
 0x4ba   :  { %3234 = vmatpush.msra.mxu3 %v12219_v8 }
 0x4bb   :  { %3305 = vmatpush.msra.mxu2 %v3254_v52  ;;  %v3371_v39 = vsub.f32 1.0, %v3370_v55 }
 0x4bc   :  { %3235 = vmatpush.msra.mxu3 %v14382_v9 }
 0x4bd   :  { %3306 = vmatpush.msra.mxu2 %v3252_v15  ;;  %v3372_v22 = vmul.f32 %v9418_v57, %v3371_v39 }
 0x4be   :  { %3236 = vmatpush.msra.mxu3 %v12230_v63 }
 0x4bf   :  { %3307 = vmatpush.msra.mxu2 %v3250_v44 }
 0x4c0   :  { %3237 = vmatpush.msra.mxu3 %v14384_v59 }
 0x4c1   :  { %3308 = vmatpush.msra.mxu2 %v3248_v38  ;;  %v3373_v38 = vadd.f32 %v9418_v57, %v3372_v22 }
 0x4c2   :  { %3238 = vmatpush.msra.mxu3 %v12239_v50 }
 0x4c3   :  { %3309 = vmatpush.msra.mxu2 %v3246_v49  ;;  %7705 = vmatmul.msk.f32.vlgmr.msra.gmra.mxu3 %vm12149_vm1, %v9429_v21 }
 0x4c5   :  { %3310 = vmatpush.msra.mxu2 %v3244_v61 }
 0x4c6   :  { %7707 = vmatmul.msk.f32.vlgmr.msra.gmra.mxu2 %vm12149_vm1, %v9429_v21 }
 0x525   :  { %v3220_v51 = vpop.f32.mrf.mxu1 }
 0x526   :  { %3316 = vrot.lane.b32.xlu0 %v3220_v51, %s9430_s0  ;;  %3325 = vrot.lane.b32.xlu1 %v3220_v51, %s9431_s28 }
 0x527   :  { %3333 = vrot.lane.b32.xlu2 %v3220_v51, %s9432_s29  ;;  %v3292_v40 = vpop.f32.mrf.mxu0 }
 0x52e   :  { %3321 = vrot.lane.b32.xlu0 %v3292_v40, %s9430_s0  ;;  %3329 = vrot.lane.b32.xlu1 %v3292_v40, %s9431_s28 }
 0x52f   :  { %3337 = vrot.lane.b32.xlu2 %v3292_v40, %s9432_s29 }
 0x546   :  { %v3240_v12 = vpop.f32.mrf.mxu3 }
 0x547   :  { %3344 = vrot.lane.b32.xlu0 %v3240_v12, %s9430_s0  ;;  %3353 = vrot.lane.b32.xlu2 %v3240_v12, %s9431_s28 }
 0x549   :  { %v3312_v21 = vpop.f32.mrf.mxu2 }
 0x54a   :  { %3349 = vrot.lane.b32.xlu1 %v3312_v21, %s9430_s0 }
 0x54f   :  { %3357 = vrot.lane.b32.xlu0 %v3312_v21, %s9431_s28  ;;  %3365 = vrot.lane.b32.xlu2 %v3312_v21, %s9432_s29 }
 0x552   :  { %3361 = vrot.lane.b32.xlu1 %v3240_v12, %s9432_s29 }
 0x581   :  { %v3334_v6 = vpop.permute.xlu2 %3333 }
 0x589   :  { %v3338_v46 = vpop.permute.xlu2 %3337 }
 0x598   :  { %v3317_v32 = vpop.permute.xlu0 %3316  ;;  %v3326_v60 = vpop.permute.xlu1 %3325 }
 0x599   :  { %v3319_v33 = vadd.f32 %v3317_v32, %v3220_v51 }
 0x59b   :  { %v3328_v53 = vadd.f32 %v3326_v60, %v3319_v33 }
 0x59d   :  { %v3336_v16 = vadd.f32 %v3334_v6, %v3328_v53 }
 0x59f   :  { %v3341_v0 = vadd.f32 %v3336_v16, %v3240_v12 }
 0x5a0   :  { %v3322_v30 = vpop.permute.xlu0 %3321  ;;  %v3330_v31 = vpop.permute.xlu1 %3329 }
 0x5a1   :  { %v3324_v54 = vadd.f32 %v3322_v30, %v3292_v40  ;;  %v3354_v26 = vpop.permute.xlu2 %3353  ;;  %v3375_v40 = vsel %vm3374_vm2, %v9418_v57, %v3373_v38  ;;  %v120_v57 = vld [vmem:[%s14133_s2] sm:$0x1] }
 0x5a3   :  { %v3332_v2 = vadd.f32 %v3330_v31, %v3324_v54 }
 0x5a5   :  { %v3340_v52 = vadd.f32 %v3338_v46, %v3332_v2 }
 0x5a7   :  { %v3342_v15 = vadd.f32 %v3340_v52, %v3312_v21 }
 0x5a9   :  { %v3366_v32 = vpop.permute.xlu2 %3365 }
 0x5b9   :  { %v3345_v27 = vpop.permute.xlu0 %3344 }
 0x5ba   :  { %v3347_v44 = vadd.f32 %v3345_v27, %v3341_v0 }
 0x5bc   :  { %v3350_v37 = vpop.permute.xlu1 %3349  ;;  %v3356_v51 = vadd.f32 %v3354_v26, %v3347_v44  ;;  %v9190_v44 = vld [vmem:[%s14135_s4 + $0x174] sm:$0xf0] }
 0x5bd   :  { %v3352_v48 = vadd.f32 %v3350_v37, %v3342_v15  ;;  %v121_v37 = vld [vmem:[%s14134_s3] sm:$0x1]  ;;  %v7798_v15 = vld [vmem:[%s14135_s4 + $0x170] sm:$0xf] }
 0x5be   :  { %v7799_v38 = vor.u32 %v9190_v44, %v7798_v15  ;;  %v9185_v15 = vld [vmem:[%s14135_s4 + $0x154] sm:$0xf]  ;;  %v7784_v44 = vld [vmem:[%s14135_s4 + $0x158] sm:$0xf0] }
 0x5c0   :  { %3826 = vmatpush.bf16.msrb.mxu1 %v7799_v38  ;;  %v7787_v38 = vor.u32 %v9185_v15, %v7784_v44  ;;  %v7832_v15 = vld [vmem:[%s14135_s4 + $0x1b8] sm:$0xf0] }
 0x5c1   :  { %v3358_v49 = vpop.permute.xlu0 %3357 }
 0x5c2   :  { %v3360_v61 = vadd.f32 %v3358_v49, %v3352_v48  ;;  %v7862_v48 = vld [vmem:[%s14135_s4 + $0x1f0] sm:$0xf]  ;;  %v9206_v49 = vld [vmem:[%s14135_s4 + $0x1f4] sm:$0xf0] }
 0x5c4   :  { %v3362_v60 = vpop.permute.xlu1 %3361  ;;  %v3368_v1 = vadd.f32 %v3366_v32, %v3360_v61  ;;  %v9189_v61 = vld [vmem:[%s14135_s4 + $0x174] sm:$0xf] }
 0x5c5   :  { %v3364_v30 = vadd.f32 %v3362_v60, %v3356_v51  ;;  %v7800_v51 = vld [vmem:[%s14135_s4 + $0x178] sm:$0xf0]  ;;  %v9205_v60 = vld [vmem:[%s14135_s4 + $0x1f4] sm:$0xf] }
 0x5c6   :  { %v3377_v33 = vmul.f32 %v3375_v40, %v3368_v1  ;;  %v7803_v32 = vor.u32 %v9189_v61, %v7800_v51  ;;  %v7864_v1 = vld [vmem:[%s14135_s4 + $0x1f8] sm:$0xf0] }
 0x5c7   :  { %v3376_v6 = vmul.f32 %v3375_v40, %v3364_v30  ;;  %v7863_v40 = vor.u32 %v9206_v49, %v7862_v48  ;;  %v7790_v30 = vld [vmem:[%s14135_s4 + $0x160] sm:$0xf]  ;;  %v9201_v49 = vld [vmem:[%s14135_s4 + $0x1d4] sm:$0xf]  ;;  %v7848_v61 = vld [vmem:[%s14135_s4 + $0x1d8] sm:$0xf0] }
 0x5c8   :  { %3874 = vmatpush.bf16.msrb.mxu0 %v7803_v32  ;;  %v7851_v51 = vor.u32 %v9201_v49, %v7848_v61  ;;  %v9184_v32 = vld [vmem:[%s14135_s4 + $0x144] sm:$0xf0]  ;;  %v7822_v49 = vld [vmem:[%s14135_s4 + $0x1a0] sm:$0xf] }
 0x5c9   :  { %v3378_v46 = vmul.f32 %v3376_v6, %v3376_v6  ;;  %3850 = vmatpush.bf16.msrb.mxu3 %v7863_v40  ;;  %v7774_v40 = vld [vmem:[%s14135_s4 + $0x140] sm:$0xf] }
 0x5cb   :  { %v3379_v54 = vsub.f32 %v3377_v33, %v3378_v46  ;;  %v9188_v33 = vld [vmem:[%s14135_s4 + $0x164] sm:$0xf0]  ;;  %v7854_v46 = vld [vmem:[%s14135_s4 + $0x1e0] sm:$0xf] }
 0x5cd   :  { %v3380_v31 = vadd.f32 1e-05, %v3379_v54  ;;  %v9204_v54 = vld [vmem:[%s14135_s4 + $0x1e4] sm:$0xf0] }
 0x5cf   :  { %9419 = vrsqrt.f32 %v3380_v31  ;;  %vm3387_vm4 = vweird.f32 %v3380_v31 }
 0x5d5   :  { %v9420_v12 = vpop.eup %9419 }
 0x5d6   :  { %v3382_v21 = vmul.f32 %v9420_v12, %v3380_v31  ;;  %vm3388_vm3 = vweird.f32 %v9420_v12  ;;  %v7791_v31 = vor.u32 %v9188_v33, %v7790_v30  ;;  %v9200_v30 = vld [vmem:[%s14135_s4 + $0x1c4] sm:$0xf0]  ;;  %v7776_v33 = vld [vmem:[%s14135_s4 + $0x148] sm:$0xf0] }
 0x5d7   :  { %vm3389_vm5 = vmor %vm3387_vm4, %vm3388_vm3 }
 0x5d8   :  { %v3383_v55 = vmul.f32 %v9420_v12, %v3382_v21  ;;  %v9187_v21 = vld [vmem:[%s14135_s4 + $0x164] sm:$0xf]  ;;  %3827 = vmatpush.bf16.msrb.mxu1 %v7791_v31 }
 0x5d9   :  { %v9199_v31 = vld [vmem:[%s14135_s4 + $0x1c4] sm:$0xf] }
 0x5da   :  { %v3384_v53 = vmul.f32 0.5, %v3383_v55  ;;  %v7792_v55 = vld [vmem:[%s14135_s4 + $0x168] sm:$0xf0] }
 0x5dc   :  { %v3385_v2 = vsub.f32 1.5, %v3384_v53  ;;  %v9203_v53 = vld [vmem:[%s14135_s4 + $0x1e4] sm:$0xf] }
 0x5de   :  { %v3386_v39 = vmul.f32 %v9420_v12, %v3385_v2  ;;  %v7795_v2 = vor.u32 %v9187_v21, %v7792_v55  ;;  %v7766_v55 = vld [vmem:[%s14135_s4 + $0x130] sm:$0xf] }
 0x5e0   :  { %v3390_v16 = vsel %vm3389_vm5, %v9420_v12, %v3386_v39  ;;  %v7855_v12 = vor.u32 %v9204_v54, %v7854_v46  ;;  %3875 = vmatpush.bf16.msrb.mxu0 %v7795_v2  ;;  %v7830_v2 = vld [vmem:[%s14135_s4 + $0x1b0] sm:$0xf] }
 0x5e1   :  { %v12270_v27 = vmul.f32 %v3390_v16, %v120_v57  ;;  %v7856_v57 = vld [vmem:[%s14135_s4 + $0x1e8] sm:$0xf0]  ;;  %v7782_v16 = vld [vmem:[%s14135_s4 + $0x150] sm:$0xf] }
 0x5e2   :  { %v7859_v39 = vor.u32 %v9203_v53, %v7856_v57  ;;  %3851 = vmatpush.bf16.msrb.mxu3 %v7855_v12  ;;  %v7840_v12 = vld [vmem:[%s14135_s4 + $0x1c8] sm:$0xf0]  ;;  %v9182_v53 = vld [vmem:[%s14135_s4 + $0x134] sm:$0xf0] }
 0x5e3   :  { %v3392_v52 = vmul.f32 %v12270_v27, %v3376_v6  ;;  %v3395_v26 = vperm.slane %v12270_v27, 0  ;;  %v7867_v6 = vor.u32 %v9205_v60, %v7864_v1  ;;  %v7838_v60 = vld [vmem:[%s14135_s4 + $0x1c0] sm:$0xf]  ;;  %v7775_v1 = vor.u32 %v9184_v32, %v7774_v40  ;;  %v9179_v40 = vld [vmem:[%s14135_s4 + $0x124] sm:$0xf] }
 0x5e4   :  { %3876 = vmatpush.bf16.msrb.mxu0 %v7787_v38  ;;  %v7839_v46 = vor.u32 %v9200_v30, %v7838_v60  ;;  %v7843_v21 = vor.u32 %v9199_v31, %v7840_v12  ;;  %v7767_v57 = vor.u32 %v9182_v53, %v7766_v55  ;;  %v9180_v38 = vld [vmem:[%s14135_s4 + $0x124] sm:$0xf0]  ;;  %v7760_v32 = vld [vmem:[%s14135_s4 + $0x128] sm:$0xf0]  ;;  %v9195_v30 = vld [vmem:[%s14135_s4 + $0x1a4] sm:$0xf] }
 0x5e5   :  { %3402 = vrot.lane.b32.xlu2 %v3395_v26, %s9430_s0  ;;  %3399 = vrot.lane.b32.xlu1 %v3395_v26, %s9431_s28  ;;  %v12280_v22 = vsub.f32 %v121_v37, %v3392_v52  ;;  %v9186_v52 = vld [vmem:[%s14135_s4 + $0x154] sm:$0xf0]  ;;  %v7814_v31 = vld [vmem:[%s14135_s4 + $0x190] sm:$0xf] }
 0x5e6   :  { %3396 = vrot.lane.b32.xlu0 %v3395_v26, %s9432_s29  ;;  %3898 = vmatpush.bf16.msrb.mxu2 %v7867_v6  ;;  %v7846_v26 = vld [vmem:[%s14135_s4 + $0x1d0] sm:$0xf]  ;;  %v7783_v37 = vor.u32 %v9186_v52, %v7782_v16  ;;  %v9183_v6 = vld [vmem:[%s14135_s4 + $0x144] sm:$0xf]  ;;  %v9181_v16 = vld [vmem:[%s14135_s4 + $0x134] sm:$0xf] }
 0x5e7   :  { %v3412_v0 = vperm.slane %v12280_v22, 0  ;;  %v7779_v54 = vor.u32 %v9183_v6, %v7776_v33  ;;  %v7768_v52 = vld [vmem:[%s14135_s4 + $0x138] sm:$0xf0]  ;;  %v7824_v6 = vld [vmem:[%s14135_s4 + $0x1a8] sm:$0xf0] }
 0x5e8   :  { %3828 = vmatpush.bf16.msrb.mxu1 %v7783_v37  ;;  %v7771_v37 = vor.u32 %v9181_v16, %v7768_v52  ;;  %v7827_v33 = vor.u32 %v9195_v30, %v7824_v6  ;;  %v9194_v55 = vld [vmem:[%s14135_s4 + $0x194] sm:$0xf0]  ;;  %v9177_v53 = vld [vmem:[%s14135_s4 + $0x114] sm:$0xf]  ;;  %v7816_v52 = vld [vmem:[%s14135_s4 + $0x198] sm:$0xf0] }
 0x5e9   :  { %3877 = vmatpush.bf16.msrb.mxu0 %v7779_v54  ;;  %v9178_v54 = vld [vmem:[%s14135_s4 + $0x114] sm:$0xf0]  ;;  %v9193_v16 = vld [vmem:[%s14135_s4 + $0x194] sm:$0xf]  ;;  %v9191_v30 = vld [vmem:[%s14135_s4 + $0x184] sm:$0xf] }
 0x5ea   :  { %3899 = vmatpush.bf16.msrb.mxu2 %v7859_v39  ;;  %v9198_v39 = vld [vmem:[%s14135_s4 + $0x1b4] sm:$0xf0]  ;;  %v7808_v6 = vld [vmem:[%s14135_s4 + $0x188] sm:$0xf0] }
 0x5ec   :  { %3829 = vmatpush.bf16.msrb.mxu1 %v7775_v1  ;;  %v7763_v1 = vor.u32 %v9179_v40, %v7760_v32  ;;  %v9175_v32 = vld [vmem:[%s14135_s4 + $0x104] sm:$0xf] }
 0x5ed   :  { %3419 = vrot.lane.b32.xlu2 %v3412_v0, %s9430_s0  ;;  %3416 = vrot.lane.b32.xlu1 %v3412_v0, %s9431_s28 }
 0x5ee   :  { %3413 = vrot.lane.b32.xlu0 %v3412_v0, %s9432_s29  ;;  %v9202_v0 = vld [vmem:[%s14135_s4 + $0x1d4] sm:$0xf0]  ;;  %3900 = vmatpush.bf16.msrb.mxu2 %v7851_v51  ;;  %v9196_v51 = vld [vmem:[%s14135_s4 + $0x1a4] sm:$0xf0] }
 0x5ef   :  { %v7847_v48 = vor.u32 %v9202_v0, %v7846_v26  ;;  %v7831_v26 = vor.u32 %v9198_v39, %v7830_v2  ;;  %v9197_v0 = vld [vmem:[%s14135_s4 + $0x1b4] sm:$0xf]  ;;  %3878 = vmatpush.bf16.msrb.mxu0 %v7771_v37  ;;  %v7823_v60 = vor.u32 %v9196_v51, %v7822_v49  ;;  %v7752_v2 = vld [vmem:[%s14135_s4 + $0x118] sm:$0xf0]  ;;  %v7819_v37 = vor.u32 %v9193_v16, %v7816_v52 }
 0x5f0   :  { %3830 = vmatpush.bf16.msrb.mxu1 %v7767_v57  ;;  %v7835_v44 = vor.u32 %v9197_v0, %v7832_v15  ;;  %v7815_v57 = vor.u32 %v9194_v55, %v7814_v31  ;;  %v7755_v39 = vor.u32 %v9177_v53, %v7752_v2  ;;  %v7742_v15 = vld [vmem:[%s14135_s4 + $0x100] sm:$0xf] }
 0x5f1   :  { %3852 = vmatpush.bf16.msrb.mxu3 %v7847_v48  ;;  %v7758_v48 = vld [vmem:[%s14135_s4 + $0x120] sm:$0xf] }
 0x5f2   :  { %3901 = vmatpush.bf16.msrb.mxu2 %v7843_v21  ;;  %v7759_v61 = vor.u32 %v9180_v38, %v7758_v48  ;;  %v7806_v48 = vld [vmem:[%s14135_s4 + $0x180] sm:$0xf] }
 0x5f3   :  { %3879 = vmatpush.bf16.msrb.mxu0 %v7763_v1  ;;  %v7744_v1 = vld [vmem:[%s14135_s4 + $0x108] sm:$0xf0] }
 0x5f4   :  { %3831 = vmatpush.bf16.msrb.mxu1 %v7759_v61  ;;  %v7747_v31 = vor.u32 %v9175_v32, %v7744_v1 }
 0x5f5   :  { %3853 = vmatpush.bf16.msrb.mxu3 %v7839_v46  ;;  %v7750_v46 = vld [vmem:[%s14135_s4 + $0x110] sm:$0xf] }
 0x5f6   :  { %3902 = vmatpush.bf16.msrb.mxu2 %v7835_v44  ;;  %v7751_v21 = vor.u32 %v9178_v54, %v7750_v46  ;;  %v9176_v44 = vld [vmem:[%s14135_s4 + $0x104] sm:$0xf0] }
 0x5f7   :  { %3880 = vmatpush.bf16.msrb.mxu0 %v7755_v39  ;;  %v7743_v38 = vor.u32 %v9176_v44, %v7742_v15 }
 0x5f8   :  { %3832 = vmatpush.bf16.msrb.mxu1 %v7751_v21 }
 0x5f9   :  { %3854 = vmatpush.bf16.msrb.mxu3 %v7831_v26 }
 0x5fa   :  { %3903 = vmatpush.bf16.msrb.mxu2 %v7827_v33 }
 0x5fb   :  { %3881 = vmatpush.bf16.msrb.mxu0 %v7747_v31 }
 0x5fc   :  { %3833 = vmatpush.bf16.msrb.mxu1 %v7743_v38 }
 0x5fd   :  { %3855 = vmatpush.bf16.msrb.mxu3 %v7823_v60 }
 0x5fe   :  { %3904 = vmatpush.bf16.msrb.mxu2 %v7819_v37 }
 0x601   :  { %3856 = vmatpush.bf16.msrb.mxu3 %v7815_v57 }
 0x63f   :  { %v3403_v49 = vpop.permute.xlu2 %3402 }
 0x647   :  { %v3420_v21 = vpop.permute.xlu2 %3419 }
 0x657   :  { %v3400_v26 = vpop.permute.xlu1 %3399 }
 0x658   :  { %v3397_v12 = vpop.permute.xlu0 %3396 }
 0x659   :  { %v3406_v0 = vsel %vm3405_vm6, %v12270_v27, %v3397_v12  ;;  %v9192_v27 = vld [vmem:[%s14135_s4 + $0x184] sm:$0xf0]  ;;  %v7811_v12 = vor.u32 %v9191_v30, %v7808_v6 }
 0x65a   :  { %v7807_v61 = vor.u32 %v9192_v27, %v7806_v48  ;;  %v3408_v51 = vsel %vm3407_vm7, %v3406_v0, %v3400_v26 }
 0x65b   :  { %v3410_v40 = vsel %vm3409_vm8, %v3408_v51, %v3403_v49  ;;  %3905 = vmatpush.bf16.msrb.mxu2 %v7811_v12 }
 0x65c   :  { %3857 = vmatpush.bf16.msrb.mxu3 %v7807_v61  ;;  %v12482_v33 = vperm.slane %v3410_v40, 0 }
 0x65e   :  { %v3430_v53 = vmul.f32 %v12482_v33, %v12111_v43  ;;  %v3431_v57 = vmul.f32 %v12482_v33, %v12230_v63  ;;  %v3432_v39 = vmul.f32 %v12482_v33, %v11966_v58  ;;  %v3434_v52 = vmul.f32 %v12482_v33, %v12098_v14 }
 0x65f   :  { %v3417_v46 = vpop.permute.xlu1 %3416  ;;  %v3435_v43 = vmul.f32 %v12482_v33, %v12219_v8  ;;  %v3436_v26 = vmul.f32 %v12482_v33, %v11980_v35  ;;  %v3437_v63 = vmul.f32 %v12482_v33, %v14378_v23  ;;  %v3442_v58 = vmul.f32 %v12482_v33, %v12076_v29 }
 0x660   :  { %v3414_v60 = vpop.permute.xlu0 %3413  ;;  %v3444_v37 = vmul.f32 %v12482_v33, %v12069_v13  ;;  %v3445_v14 = vmul.f32 %v12482_v33, %v12190_v19  ;;  %v3450_v8 = vmul.f32 %v12482_v33, %v12047_v34  ;;  %v3451_v35 = vmul.f32 %v12482_v33, %v12158_v36 }
 0x661   :  { %v3422_v54 = vsel %vm3405_vm6, %v12280_v22, %v3414_v60  ;;  %v3433_v22 = vmul.f32 %v12482_v33, %v14382_v9  ;;  %v3443_v9 = vmul.f32 %v12482_v33, %v12197_v47  ;;  %v3452_v23 = vmul.f32 %v12482_v33, %v12042_v7 }
 0x662   :  { %v3423_v55 = vsel %vm3407_vm7, %v3422_v54, %v3417_v46  ;;  %v3453_v29 = vmul.f32 %v12482_v33, %v12146_v28  ;;  %v3454_v36 = vmul.f32 %v12482_v33, %v12031_v3  ;;  %v3455_v7 = vmul.f32 %v12482_v33, %v12130_v10 }
 0x663   :  { %v3424_v2 = vsel %vm3409_vm8, %v3423_v55, %v3420_v21  ;;  %v3456_v28 = vmul.f32 %v12482_v33, %v12034_v25  ;;  %v3457_v0 = vmul.f32 %v12482_v33, %v12126_v24  ;;  %v3438_v30 = vmul.f32 %v12482_v33, %v12087_v45 }
 0x664   :  { %v12496_v16 = vperm.slane %v3424_v2, 0  ;;  %v3439_v6 = vmul.f32 %v12482_v33, %v12208_v20  ;;  %v3440_v46 = vmul.f32 %v12482_v33, %v11994_v41  ;;  %v3441_v54 = vmul.f32 %v12482_v33, %v14374_v18  ;;  %v7926_v18 = vld [vmem:[%s14135_s4 + $0x70] sm:$0xf] }
 0x665   :  { %v3446_v31 = vmul.f32 %v12482_v33, %v12062_v56  ;;  %v3447_v2 = vmul.f32 %v12482_v33, %v12183_v42  ;;  %v3448_v45 = vmul.f32 %v12482_v33, %v12056_v17  ;;  %v9158_v17 = vld [vmem:[%s14135_s4 + $0x74] sm:$0xf0]  ;;  %v7990_v42 = vld [vmem:[%s14135_s4 + $0xf0] sm:$0xf] }
 0x666   :  { %v12523_v47 = vadd.f32 %v12496_v16, %v3434_v52  ;;  %v12526_v13 = vadd.f32 %v12496_v16, %v3435_v43  ;;  %v12529_v19 = vadd.f32 %v12496_v16, %v3436_v26  ;;  %v12532_v34 = vadd.f32 %v12496_v16, %v3437_v63 }
 0x667   :  { %v12543_v15 = vadd.f32 %v12496_v16, %v3442_v58  ;;  %v12546_v44 = vadd.f32 %v12496_v16, %v3443_v9  ;;  %v12549_v48 = vadd.f32 %v12496_v16, %v3444_v37  ;;  %v12552_v3 = vadd.f32 %v12496_v16, %v3445_v14  ;;  %v9157_v58 = vld [vmem:[%s14135_s4 + $0x74] sm:$0xf]  ;;  %v7928_v9 = vld [vmem:[%s14135_s4 + $0x78] sm:$0xf0] }
 0x668   :  { %v3463_v10 = vadd.f32 %v12496_v16, %v3430_v53  ;;  %v3464_v38 = vadd.f32 %v12496_v16, %v3431_v57  ;;  %v3465_v25 = vadd.f32 %v12496_v16, %v3432_v39  ;;  %v3466_v24 = vadd.f32 %v12496_v16, %v3433_v22  ;;  %v9174_v22 = vld [vmem:[%s14135_s4 + $0xf4] sm:$0xf0] }
 0x669   :  { %v12559_v27 = vadd.f32 %v12496_v16, %v3450_v8  ;;  %v12562_v49 = vadd.f32 %v12496_v16, %v3451_v35  ;;  %v12565_v61 = vadd.f32 %v12496_v16, %v3452_v23  ;;  %v12568_v51 = vadd.f32 %v12496_v16, %v3453_v29  ;;  %v9173_v23 = vld [vmem:[%s14135_s4 + $0xf4] sm:$0xf]  ;;  %v7992_v29 = vld [vmem:[%s14135_s4 + $0xf8] sm:$0xf0] }
 0x66a   :  { %v12571_v40 = vadd.f32 %v12496_v16, %v3454_v36  ;;  %v12574_v32 = vadd.f32 %v12496_v16, %v3455_v7  ;;  %v12577_v60 = vadd.f32 %v12496_v16, %v3456_v28  ;;  %v12580_v1 = vadd.f32 %v12496_v16, %v3457_v0 }
 0x66b   :  { %v3495_v12 = vmax.f32 %v3463_v10, 0.0  ;;  %v3496_v21 = vmax.f32 %v3464_v38, 0.0  ;;  %v3497_v55 = vmax.f32 %v3465_v25, 0.0  ;;  %v3498_v53 = vmax.f32 %v3466_v24, 0.0  ;;  %v7918_v10 = vld [vmem:[%s14135_s4 + $0x60] sm:$0xf] }
 0x66c   :  { %v12597_v20 = vadd.f32 %v12496_v16, %v3438_v30  ;;  %v3472_v41 = vadd.f32 %v12496_v16, %v3439_v6  ;;  %v3473_v56 = vadd.f32 %v12496_v16, %v3440_v46  ;;  %v3474_v57 = vadd.f32 %v12496_v16, %v3441_v54  ;;  %v9156_v38 = vld [vmem:[%s14135_s4 + $0x64] sm:$0xf0]  ;;  %v7982_v46 = vld [vmem:[%s14135_s4 + $0xe0] sm:$0xf] }
 0x66d   :  { %v12606_v39 = vadd.f32 %v12496_v16, %v3446_v31  ;;  %v12618_v52 = vadd.f32 %v12496_v16, %v3447_v2  ;;  %v12621_v43 = vadd.f32 %v12496_v16, %v3448_v45  ;;  %v3499_v26 = vmax.f32 %v12523_v47, 0.0  ;;  %v9172_v54 = vld [vmem:[%s14135_s4 + $0xe4] sm:$0xf0]  ;;  %v7920_v2 = vld [vmem:[%s14135_s4 + $0x68] sm:$0xf0] }
 0x66e   :  { %v3500_v63 = vmax.f32 %v12526_v13, 0.0  ;;  %v3501_v37 = vmax.f32 %v12529_v19, 0.0  ;;  %v3502_v14 = vmax.f32 %v12532_v34, 0.0  ;;  %v3525_v8 = vpack.c.bf16 %v3496_v21, %v3495_v12 }
 0x66f   :  { %v3526_v35 = vpack.c.bf16 %v3498_v53, %v3497_v55  ;;  %v3503_v36 = vmax.f32 %v12597_v20, 0.0  ;;  %v3504_v7 = vmax.f32 %v3472_v41, 0.0  ;;  %v7927_v28 = vor.u32 %v9158_v17, %v7926_v18  ;;  %v9155_v53 = vld [vmem:[%s14135_s4 + $0x64] sm:$0xf] }
 0x670   :  { %v7991_v0 = vor.u32 %v9174_v22, %v7990_v42  ;;  %v3505_v25 = vmax.f32 %v3473_v56, 0.0  ;;  %v3506_v24 = vmax.f32 %v3474_v57, 0.0  ;;  %v3507_v31 = vmax.f32 %v12543_v15, 0.0  ;;  %v9171_v56 = vld [vmem:[%s14135_s4 + $0xe4] sm:$0xf] }
 0x671   :  { %v3607_v30 = vunpack.c.l.b16 %v3526_v35  ;;  %v3608_v6 = vunpack.c.h.b16 %v3526_v35  ;;  %v3508_v12 = vmax.f32 %v12546_v44, 0.0  ;;  %v3605_v21 = vunpack.c.l.b16 %v3525_v8  ;;  %4082 = vmatpush.bf16.msra.mxu1 %v7927_v28  ;;  %v7984_v57 = vld [vmem:[%s14135_s4 + $0xe8] sm:$0xf0]  ;;  %v7910_v35 = vld [vmem:[%s14135_s4 + $0x50] sm:$0xf] }
 0x672   :  { %v3606_v55 = vunpack.c.h.b16 %v3525_v8  ;;  %4106 = vmatpush.bf16.msra.mxu3 %v7991_v0  ;;  %v3509_v45 = vmax.f32 %v12549_v48, 0.0  ;;  %v3510_v20 = vmax.f32 %v12552_v3, 0.0  ;;  %v7931_v41 = vor.u32 %v9157_v58, %v7928_v9  ;;  %v9154_v58 = vld [vmem:[%s14135_s4 + $0x54] sm:$0xf0]  ;;  %v9153_v0 = vld [vmem:[%s14135_s4 + $0x54] sm:$0xf] }
 0x673   :  { %v7995_v18 = vor.u32 %v9173_v23, %v7992_v29  ;;  %v3609_v42 = vpack.c.b16 %v3607_v30, %v3605_v21  ;;  %v7919_v8 = vor.u32 %v9156_v38, %v7918_v10  ;;  %v7983_v9 = vor.u32 %v9172_v54, %v7982_v46  ;;  %v7974_v29 = vld [vmem:[%s14135_s4 + $0xd0] sm:$0xf]  ;;  %v9170_v28 = vld [vmem:[%s14135_s4 + $0xd4] sm:$0xf0]  ;;  %v9169_v46 = vld [vmem:[%s14135_s4 + $0xd4] sm:$0xf] }
 0x674   :  { %v3610_v22 = vpack.c.b16 %v3608_v6, %v3606_v55  ;;  %4130 = vmatpush.bf16.msra.mxu0 %v7931_v41  ;;  %v7923_v23 = vor.u32 %v9155_v53, %v7920_v2  ;;  %v3529_v10 = vpack.c.bf16 %v3504_v7, %v3503_v36  ;;  %v3530_v38 = vpack.c.bf16 %v3506_v24, %v3505_v25  ;;  %v7912_v6 = vld [vmem:[%s14135_s4 + $0x58] sm:$0xf0]  ;;  %v7902_v41 = vld [vmem:[%s14135_s4 + $0x40] sm:$0xf]  ;;  %v9149_v55 = vld [vmem:[%s14135_s4 + $0x34] sm:$0xf] }
 0x675   :  { %4154 = vmatpush.bf16.msra.mxu2 %v7995_v18  ;;  %3834 = vmatmul.bf16.vlgmr.msrb.gmra.mxu1 %v3609_v42  ;;  %v7987_v30 = vor.u32 %v9171_v56, %v7984_v57  ;;  %v7976_v54 = vld [vmem:[%s14135_s4 + $0xd8] sm:$0xf0]  ;;  %v3517_v36 = vmax.f32 %v12565_v61, 0.0  ;;  %v3518_v7 = vmax.f32 %v12568_v51, 0.0  ;;  %v3521_v25 = vmax.f32 %v12577_v60, 0.0 }
 0x676   :  { %3858 = vmatmul.bf16.vlgmr.msrb.gmra.mxu3 %v3610_v22  ;;  %3882 = vmatmul.bf16.vlgmr.msrb.gmra.mxu0 %v3609_v42  ;;  %v3522_v24 = vmax.f32 %v12580_v1, 0.0  ;;  %v7911_v53 = vor.u32 %v9154_v58, %v7910_v35  ;;  %v7975_v2 = vor.u32 %v9170_v28, %v7974_v29  ;;  %v9152_v18 = vld [vmem:[%s14135_s4 + $0x44] sm:$0xf0]  ;;  %v7915_v56 = vor.u32 %v9153_v0, %v7912_v6  ;;  %v7966_v42 = vld [vmem:[%s14135_s4 + $0xc0] sm:$0xf] }
 0x677   :  { %3906 = vmatmul.bf16.vlgmr.msrb.gmra.mxu2 %v3610_v22  ;;  %4083 = vmatpush.bf16.msra.mxu1 %v7919_v8  ;;  %v7979_v57 = vor.u32 %v9169_v46, %v7976_v54  ;;  %v9168_v22 = vld [vmem:[%s14135_s4 + $0xc4] sm:$0xf0]  ;;  %v9151_v8 = vld [vmem:[%s14135_s4 + $0x44] sm:$0xf]  ;;  %v3615_v35 = vunpack.c.l.b16 %v3529_v10  ;;  %v3617_v58 = vunpack.c.l.b16 %v3530_v38  ;;  %v3618_v29 = vunpack.c.h.b16 %v3530_v38  ;;  %v7968_v0 = vld [vmem:[%s14135_s4 + $0xc8] sm:$0xf0] }
 0x678   :  { %4107 = vmatpush.bf16.msra.mxu3 %v7983_v9  ;;  %4131 = vmatpush.bf16.msra.mxu0 %v7923_v23  ;;  %v3616_v9 = vunpack.c.h.b16 %v3529_v10  ;;  %v7904_v23 = vld [vmem:[%s14135_s4 + $0x48] sm:$0xf0]  ;;  %v9167_v28 = vld [vmem:[%s14135_s4 + $0xc4] sm:$0xf]  ;;  %v7894_v10 = vld [vmem:[%s14135_s4 + $0x30] sm:$0xf]  ;;  %v7903_v46 = vor.u32 %v9152_v18, %v7902_v41  ;;  %v7967_v54 = vor.u32 %v9168_v22, %v7966_v42  ;;  %v3528_v47 = vpack.c.bf16 %v3502_v14, %v3501_v37 }
 0x679   :  { %4155 = vmatpush.bf16.msra.mxu2 %v7987_v30  ;;  %v3449_v30 = vmul.f32 %v12482_v33, %v12173_v62  ;;  %v9150_v38 = vld [vmem:[%s14135_s4 + $0x34] sm:$0xf0]  ;;  %v7958_v6 = vld [vmem:[%s14135_s4 + $0xb0] sm:$0xf]  ;;  %v7896_v21 = vld [vmem:[%s14135_s4 + $0x38] sm:$0xf0]  ;;  %v12757_v22 = vpack.c.b16 %v3617_v58, %v3615_v35  ;;  %v3527_v35 = vpack.c.bf16 %v3500_v63, %v3499_v26  ;;  %v3531_v13 = vpack.c.bf16 %v3508_v12, %v3507_v31 }
 0x67a   :  { %v9166_v62 = vld [vmem:[%s14135_s4 + $0xb4] sm:$0xf0]  ;;  %v9165_v41 = vld [vmem:[%s14135_s4 + $0xb4] sm:$0xf]  ;;  %v7960_v18 = vld [vmem:[%s14135_s4 + $0xb8] sm:$0xf0]  ;;  %v3555_v15 = vunpack.c.l.b16 %v3528_v47  ;;  %v3556_v44 = vunpack.c.h.b16 %v3528_v47  ;;  %v3538_v61 = vpack.c.bf16 %v3522_v24, %v3521_v25 }
 0x67b   :  { %4084 = vmatpush.bf16.msra.mxu1 %v7911_v53  ;;  %v12744_v17 = vadd.f32 %v12496_v16, %v3449_v30  ;;  %v7907_v53 = vor.u32 %v9151_v8, %v7904_v23  ;;  %v12755_v42 = vld [vmem:[%s14135_s4 + $0x20] sm:$0xf]  ;;  %v12759_v30 = vpack.c.b16 %v3618_v29, %v3616_v9  ;;  %v9164_v23 = vld [vmem:[%s14135_s4 + $0xa4] sm:$0xf0]  ;;  %v7959_v58 = vor.u32 %v9166_v62, %v7958_v6  ;;  %v12781_v29 = vld [vmem:[%s14135_s4 + $0x24] sm:$0xf] }
 0x67c   :  { %4108 = vmatpush.bf16.msra.mxu3 %v7975_v2  ;;  %4132 = vmatpush.bf16.msra.mxu0 %v7915_v56  ;;  %v7971_v2 = vor.u32 %v9167_v28, %v7968_v0  ;;  %v7895_v56 = vor.u32 %v9150_v38, %v7894_v10  ;;  %v12769_v8 = vld [vmem:[%s14135_s4 + $0xa0] sm:$0xf]  ;;  %v7899_v9 = vor.u32 %v9149_v55, %v7896_v21  ;;  %v12786_v28 = vld [vmem:[%s14135_s4 + $0x28] sm:$0xf0]  ;;  %v3553_v63 = vunpack.c.l.b16 %v3527_v35  ;;  %v9163_v14 = vld [vmem:[%s14135_s4 + $0xa4] sm:$0xf] }
 0x67d   :  { %4156 = vmatpush.bf16.msra.mxu2 %v7979_v57  ;;  %v12764_v57 = vld [vmem:[%s14135_s4 + $0x24] sm:$0xf0]  ;;  %v7963_v26 = vor.u32 %v9165_v41, %v7960_v18  ;;  %v3554_v21 = vunpack.c.h.b16 %v3527_v35  ;;  %v3532_v55 = vpack.c.bf16 %v3510_v20, %v3509_v45  ;;  %v7951_v34 = vor.u32 %v9164_v23, %v12769_v8  ;;  %v7952_v48 = vld [vmem:[%s14135_s4 + $0xa8] sm:$0xf0]  ;;  %v7878_v45 = vld [vmem:[%s14135_s4 + $0x10] sm:$0xf] }
 0x67e   :  { %v7887_v19 = vor.u32 %v12764_v57, %v12755_v42  ;;  %v7891_v37 = vor.u32 %v12781_v29, %v12786_v28  ;;  %v3563_v3 = vunpack.c.l.b16 %v3531_v13  ;;  %v3564_v12 = vunpack.c.h.b16 %v3531_v13  ;;  %v9146_v6 = vld [vmem:[%s14135_s4 + $0x14] sm:$0xf0]  ;;  %v9145_v18 = vld [vmem:[%s14135_s4 + $0x14] sm:$0xf]  ;;  %v7880_v51 = vld [vmem:[%s14135_s4 + $0x18] sm:$0xf0] }
 0x67f   :  { %4085 = vmatpush.bf16.msra.mxu1 %v7903_v46  ;;  %v3565_v31 = vunpack.c.l.b16 %v3532_v55  ;;  %v12814_v20 = vpack.c.b16 %v3555_v15, %v3553_v63  ;;  %v12816_v0 = vpack.c.b16 %v3556_v44, %v3554_v21  ;;  %v3566_v10 = vunpack.c.h.b16 %v3532_v55  ;;  %v7942_v46 = vld [vmem:[%s14135_s4 + $0x90] sm:$0xf]  ;;  %v9162_v41 = vld [vmem:[%s14135_s4 + $0x94] sm:$0xf0]  ;;  %v7870_v23 = vld [vmem:[%s14135_s4] sm:$0xf] }
 0x680   :  { %4109 = vmatpush.bf16.msra.mxu3 %v7967_v54  ;;  %4133 = vmatpush.bf16.msra.mxu0 %v7907_v53  ;;  %v3515_v38 = vmax.f32 %v12559_v27, 0.0  ;;  %v3516_v62 = vmax.f32 %v12562_v49, 0.0  ;;  %v3536_v53 = vpack.c.bf16 %v3518_v7, %v3517_v36  ;;  %v3519_v27 = vmax.f32 %v12571_v40, 0.0  ;;  %v9161_v40 = vld [vmem:[%s14135_s4 + $0x94] sm:$0xf] }
 0x681   :  { %4157 = vmatpush.bf16.msra.mxu2 %v7971_v2  ;;  %v12825_v54 = vpack.c.b16 %v3565_v31, %v3563_v3  ;;  %v7955_v2 = vor.u32 %v9163_v14, %v7952_v48  ;;  %v12839_v42 = vpack.c.b16 %v3566_v10, %v3564_v12  ;;  %v3520_v49 = vmax.f32 %v12574_v32, 0.0  ;;  %v7944_v32 = vld [vmem:[%s14135_s4 + $0x98] sm:$0xf0]  ;;  %v9144_v35 = vld [vmem:[%s14135_s4 + $0x4] sm:$0xf0] }
 0x682   :  { %v3535_v60 = vpack.c.bf16 %v3516_v62, %v3515_v38  ;;  %v4182_v36 = vunpack.c.l.b16 %v3536_v53  ;;  %v4183_v1 = vunpack.c.h.b16 %v3536_v53  ;;  %v3514_v7 = vmax.f32 %v12744_v17, 0.0  ;;  %v7934_v28 = vld [vmem:[%s14135_s4 + $0x80] sm:$0xf]  ;;  %v9160_v47 = vld [vmem:[%s14135_s4 + $0x84] sm:$0xf0] }
 0x683   :  { %4086 = vmatpush.bf16.msra.mxu1 %v7895_v56  ;;  %v3537_v25 = vpack.c.bf16 %v3520_v49, %v3519_v27  ;;  %v4493_v24 = vunpack.c.l.b16 %v3538_v61  ;;  %v4494_v56 = vunpack.c.h.b16 %v3538_v61  ;;  %v7879_v57 = vor.u32 %v9146_v6, %v7878_v45  ;;  %v9143_v13 = vld [vmem:[%s14135_s4 + $0x4] sm:$0xf]  ;;  %v7872_v21 = vld [vmem:[%s14135_s4 + $0x8] sm:$0xf0] }
 0x684   :  { %4110 = vmatpush.bf16.msra.mxu3 %v7959_v58  ;;  %4134 = vmatpush.bf16.msra.mxu0 %v7899_v9  ;;  %v7943_v8 = vor.u32 %v9162_v41, %v7942_v46  ;;  %v4180_v17 = vunpack.c.l.b16 %v3535_v60  ;;  %v4181_v58 = vunpack.c.h.b16 %v3535_v60  ;;  %v7883_v9 = vor.u32 %v9145_v18, %v7880_v51  ;;  %v9159_v55 = vld [vmem:[%s14135_s4 + $0x84] sm:$0xf] }
 0x685   :  { %4158 = vmatpush.bf16.msra.mxu2 %v7963_v26  ;;  %3839 = vmatmul.bf16.gmra.mxu1 %v12757_v22  ;;  %v7947_v29 = vor.u32 %v9161_v40, %v7944_v32  ;;  %v4491_v26 = vunpack.c.l.b16 %v3537_v25  ;;  %v4492_v63 = vunpack.c.h.b16 %v3537_v25  ;;  %v14385_v44 = vmax.f32 %v12606_v39, 0.0  ;;  %v9222_v40 = vld [vmem:[%s14135_s4 + $0x274] sm:$0xf0]  ;;  %v8150_v32 = vld [vmem:[%s14135_s4 + $0x2f0] sm:$0xf] }
 0x686   :  { %3863 = vmatmul.bf16.gmra.mxu3 %v12759_v30  ;;  %3887 = vmatmul.bf16.gmra.mxu0 %v12757_v22  ;;  %v12886_v15 = vpack.c.b16 %v4183_v1, %v4181_v58  ;;  %v14387_v31 = vmax.f32 %v12621_v43, 0.0  ;;  %v7871_v45 = vor.u32 %v9144_v35, %v7870_v23  ;;  %v7935_v10 = vor.u32 %v9160_v47, %v7934_v28  ;;  %v9221_v1 = vld [vmem:[%s14135_s4 + $0x274] sm:$0xf]  ;;  %v9220_v35 = vld [vmem:[%s14135_s4 + $0x264] sm:$0xf0] }
 0x687   :  { %3911 = vmatmul.bf16.gmra.mxu2 %v12759_v30  ;;  %4087 = vmatpush.bf16.msra.mxu1 %v7887_v19  ;;  %v7936_v19 = vld [vmem:[%s14135_s4 + $0x88] sm:$0xf0]  ;;  %v12892_v48 = vpack.c.b16 %v4493_v24, %v4491_v26  ;;  %v12894_v3 = vpack.c.b16 %v4494_v56, %v4492_v63  ;;  %v7875_v38 = vor.u32 %v9143_v13, %v7872_v21  ;;  %v9237_v56 = vld [vmem:[%s14135_s4 + $0x2f4] sm:$0xf]  ;;  %v9236_v58 = vld [vmem:[%s14135_s4 + $0x2e4] sm:$0xf0] }
 0x688   :  { %4111 = vmatpush.bf16.msra.mxu3 %v7951_v34  ;;  %4135 = vmatpush.bf16.msra.mxu0 %v7891_v37  ;;  %v12884_v34 = vpack.c.b16 %v4182_v36, %v4180_v17  ;;  %v14386_v37 = vmax.f32 %v12618_v52, 0.0  ;;  %v3534_v12 = vpack.c.bf16 %v3514_v7, %v14387_v31  ;;  %v7939_v6 = vor.u32 %v9159_v55, %v7936_v19  ;;  %v9238_v36 = vld [vmem:[%s14135_s4 + $0x2f4] sm:$0xf0]  ;;  %v8088_v7 = vld [vmem:[%s14135_s4 + $0x278] sm:$0xf0] }
 0x689   :  { %4159 = vmatpush.bf16.msra.mxu2 %v7955_v2  ;;  %v3426_v39 = vmul.f32 %v12482_v33, %v12123_v4  ;;  %v3427_v52 = vmul.f32 %v12482_v33, %v12239_v50  ;;  %v3428_v46 = vmul.f32 %v12482_v33, %v14351_v5  ;;  %v3429_v43 = vmul.f32 %v12482_v33, %v14384_v59  ;;  %v8142_v17 = vld [vmem:[%s14135_s4 + $0x2e0] sm:$0xf]  ;;  %v9219_v47 = vld [vmem:[%s14135_s4 + $0x264] sm:$0xf]  ;;  %v8080_v13 = vld [vmem:[%s14135_s4 + $0x268] sm:$0xf0] }
 0x68a   :  { %v3533_v14 = vpack.c.bf16 %v14386_v37, %v14385_v44  ;;  %v3627_v53 = vunpack.c.l.b16 %v3534_v12  ;;  %v3628_v2 = vunpack.c.h.b16 %v3534_v12  ;;  %v8151_v25 = vor.u32 %v9238_v36, %v8150_v32  ;;  %v9235_v26 = vld [vmem:[%s14135_s4 + $0x2e4] sm:$0xf]  ;;  %v8144_v55 = vld [vmem:[%s14135_s4 + $0x2e8] sm:$0xf0]  ;;  %v8070_v19 = vld [vmem:[%s14135_s4 + $0x250] sm:$0xf] }
 0x68b   :  { %4088 = vmatpush.bf16.msra.mxu1 %v7879_v57  ;;  %v3459_v41 = vadd.f32 %v12496_v16, %v3426_v39  ;;  %v3460_v4 = vadd.f32 %v12496_v16, %v3427_v52  ;;  %v3461_v50 = vadd.f32 %v12496_v16, %v3428_v46  ;;  %v3462_v18 = vadd.f32 %v12496_v16, %v3429_v43  ;;  %v8086_v16 = vld [vmem:[%s14135_s4 + $0x270] sm:$0xf]  ;;  %v8152_v57 = vld [vmem:[%s14135_s4 + $0x2f8] sm:$0xf0]  ;;  %v9218_v44 = vld [vmem:[%s14135_s4 + $0x254] sm:$0xf0] }
 0x68c   :  { %4112 = vmatpush.bf16.msra.mxu3 %v7943_v8  ;;  %4136 = vmatpush.bf16.msra.mxu0 %v7883_v9  ;;  %v3625_v62 = vunpack.c.l.b16 %v3533_v14  ;;  %v3626_v27 = vunpack.c.h.b16 %v3533_v14  ;;  %v8087_v60 = vor.u32 %v9222_v40, %v8086_v16  ;;  %v8091_v24 = vor.u32 %v9221_v1, %v8088_v7  ;;  %v8078_v8 = vld [vmem:[%s14135_s4 + $0x260] sm:$0xf]  ;;  %v8134_v14 = vld [vmem:[%s14135_s4 + $0x2d0] sm:$0xf]  ;;  %v9234_v31 = vld [vmem:[%s14135_s4 + $0x2d4] sm:$0xf0] }
 0x68d   :  { %4160 = vmatpush.bf16.msra.mxu2 %v7947_v29  ;;  %v3491_v59 = vmax.f32 %v3459_v41, 0.0  ;;  %v3492_v33 = vmax.f32 %v3460_v4, 0.0  ;;  %v3493_v61 = vmax.f32 %v3461_v50, 0.0  ;;  %v3494_v51 = vmax.f32 %v3462_v18, 0.0  ;;  %v9217_v12 = vld [vmem:[%s14135_s4 + $0x254] sm:$0xf] }
 0x68e   :  { %v12910_v5 = vpack.c.b16 %v3627_v53, %v3625_v62  ;;  %v12912_v49 = vpack.c.b16 %v3628_v2, %v3626_v27  ;;  %v8155_v23 = vor.u32 %v9237_v56, %v8152_v57  ;;  %v8079_v29 = vor.u32 %v9220_v35, %v8078_v8  ;;  %v8062_v2 = vld [vmem:[%s14135_s4 + $0x240] sm:$0xf]  ;;  %v9216_v41 = vld [vmem:[%s14135_s4 + $0x244] sm:$0xf0]  ;;  %v9215_v18 = vld [vmem:[%s14135_s4 + $0x244] sm:$0xf] }
 0x68f   :  { %4089 = vmatpush.bf16.msra.mxu1 %v7871_v45  ;;  %v3524_v9 = vpack.c.bf16 %v3494_v51, %v3493_v61  ;;  %v8143_v28 = vor.u32 %v9236_v58, %v8142_v17  ;;  %v3523_v63 = vpack.c.bf16 %v3492_v33, %v3491_v59  ;;  %v8083_v21 = vor.u32 %v9219_v47, %v8080_v13  ;;  %v8126_v4 = vld [vmem:[%s14135_s4 + $0x2c0] sm:$0xf]  ;;  %v9232_v50 = vld [vmem:[%s14135_s4 + $0x2c4] sm:$0xf0]  ;;  %v8064_v59 = vld [vmem:[%s14135_s4 + $0x248] sm:$0xf0] }
 0x690   :  { %4113 = vmatpush.bf16.msra.mxu3 %v7935_v10  ;;  %4137 = vmatpush.bf16.msra.mxu0 %v7875_v38  ;;  %v8147_v37 = vor.u32 %v9235_v26, %v8144_v55  ;;  %v8071_v45 = vor.u32 %v9218_v44, %v8070_v19  ;;  %v8072_v10 = vld [vmem:[%s14135_s4 + $0x258] sm:$0xf0]  ;;  %v9233_v38 = vld [vmem:[%s14135_s4 + $0x2d4] sm:$0xf]  ;;  %v8135_v52 = vor.u32 %v9234_v31, %v8134_v14  ;;  %v9231_v33 = vld [vmem:[%s14135_s4 + $0x2c4] sm:$0xf] }
 0x691   :  { %4161 = vmatpush.bf16.msra.mxu2 %v7939_v6  ;;  %v8136_v6 = vld [vmem:[%s14135_s4 + $0x2d8] sm:$0xf0]  ;;  %v3545_v39 = vunpack.c.l.b16 %v3524_v9  ;;  %v8075_v46 = vor.u32 %v9217_v12, %v8072_v10  ;;  %v3546_v43 = vunpack.c.h.b16 %v3524_v9  ;;  %v3543_v62 = vunpack.c.l.b16 %v3523_v63  ;;  %v8128_v61 = vld [vmem:[%s14135_s4 + $0x2c8] sm:$0xf0]  ;;  %v8054_v1 = vld [vmem:[%s14135_s4 + $0x230] sm:$0xf] }
 0x692   :  { %v3544_v53 = vunpack.c.h.b16 %v3523_v63  ;;  %v8139_v27 = vor.u32 %v9233_v38, %v8136_v6  ;;  %v8063_v40 = vor.u32 %v9216_v41, %v8062_v2  ;;  %v8127_v32 = vor.u32 %v9232_v50, %v8126_v4  ;;  %v9214_v7 = vld [vmem:[%s14135_s4 + $0x234] sm:$0xf0]  ;;  %v9213_v57 = vld [vmem:[%s14135_s4 + $0x234] sm:$0xf]  ;;  %v8056_v8 = vld [vmem:[%s14135_s4 + $0x238] sm:$0xf0] }
 0x693   :  { %4381 = vmatpush.bf16.msrb.mxu1 %v8087_v60  ;;  %v3547_v51 = vpack.c.b16 %v3545_v39, %v3543_v62  ;;  %v8067_v60 = vor.u32 %v9215_v18, %v8064_v59  ;;  %v8131_v36 = vor.u32 %v9231_v33, %v8128_v61  ;;  %v9230_v56 = vld [vmem:[%s14135_s4 + $0x2b4] sm:$0xf0]  ;;  %v8059_v35 = vor.u32 %v9213_v57, %v8056_v8  ;;  %v9229_v17 = vld [vmem:[%s14135_s4 + $0x2b4] sm:$0xf]  ;;  %v8120_v58 = vld [vmem:[%s14135_s4 + $0x2b8] sm:$0xf0] }
 0x694   :  { %4405 = vmatpush.bf16.msrb.mxu3 %v8151_v25  ;;  %4429 = vmatpush.bf16.msrb.mxu0 %v8091_v24  ;;  %v3548_v16 = vpack.c.b16 %v3546_v43, %v3544_v53  ;;  %v8118_v25 = vld [vmem:[%s14135_s4 + $0x2b0] sm:$0xf]  ;;  %v8055_v24 = vor.u32 %v9214_v7, %v8054_v1  ;;  %v8046_v9 = vld [vmem:[%s14135_s4 + $0x220] sm:$0xf]  ;;  %v9228_v13 = vld [vmem:[%s14135_s4 + $0x2a4] sm:$0xf0] }
 0x695   :  { %3844 = vmatmul.bf16.gmra.mxu1 %v12910_v5  ;;  %4453 = vmatpush.bf16.msrb.mxu2 %v8155_v23  ;;  %v8119_v23 = vor.u32 %v9230_v56, %v8118_v25  ;;  %v8110_v47 = vld [vmem:[%s14135_s4 + $0x2a0] sm:$0xf]  ;;  %v9211_v26 = vld [vmem:[%s14135_s4 + $0x224] sm:$0xf]  ;;  %v8048_v63 = vld [vmem:[%s14135_s4 + $0x228] sm:$0xf0] }
 0x696   :  { %3868 = vmatmul.bf16.gmra.mxu3 %v12912_v49  ;;  %3892 = vmatmul.bf16.gmra.mxu0 %v12910_v5  ;;  %v8111_v19 = vor.u32 %v9228_v13, %v8110_v47  ;;  %v8112_v44 = vld [vmem:[%s14135_s4 + $0x2a8] sm:$0xf0]  ;;  %v9210_v14 = vld [vmem:[%s14135_s4 + $0x214] sm:$0xf0]  ;;  %v8051_v31 = vor.u32 %v9211_v26, %v8048_v63  ;;  %v9209_v38 = vld [vmem:[%s14135_s4 + $0x214] sm:$0xf] }
 0x697   :  { %3916 = vmatmul.bf16.gmra.mxu2 %v12912_v49  ;;  %4382 = vmatpush.bf16.msrb.mxu1 %v8079_v29  ;;  %v8123_v29 = vor.u32 %v9229_v17, %v8120_v58  ;;  %v9226_v10 = vld [vmem:[%s14135_s4 + $0x294] sm:$0xf0]  ;;  %v8040_v6 = vld [vmem:[%s14135_s4 + $0x218] sm:$0xf0]  ;;  %v9225_v39 = vld [vmem:[%s14135_s4 + $0x294] sm:$0xf] }
 0x698   :  { %4406 = vmatpush.bf16.msrb.mxu3 %v8143_v28  ;;  %4430 = vmatpush.bf16.msrb.mxu0 %v8083_v21  ;;  %v9212_v28 = vld [vmem:[%s14135_s4 + $0x224] sm:$0xf0]  ;;  %v9227_v21 = vld [vmem:[%s14135_s4 + $0x2a4] sm:$0xf]  ;;  %v8030_v62 = vld [vmem:[%s14135_s4 + $0x200] sm:$0xf] }
 0x699   :  { %4454 = vmatpush.bf16.msrb.mxu2 %v8147_v37  ;;  %v8047_v55 = vor.u32 %v9212_v28, %v8046_v9  ;;  %v8038_v37 = vld [vmem:[%s14135_s4 + $0x210] sm:$0xf]  ;;  %v8115_v12 = vor.u32 %v9227_v21, %v8112_v44  ;;  %v9208_v53 = vld [vmem:[%s14135_s4 + $0x204] sm:$0xf0]  ;;  %v8094_v41 = vld [vmem:[%s14135_s4 + $0x280] sm:$0xf] }
 0x69a   :  { %v9224_v4 = vld [vmem:[%s14135_s4 + $0x284] sm:$0xf0]  ;;  %v9207_v50 = vld [vmem:[%s14135_s4 + $0x204] sm:$0xf]  ;;  %v8032_v18 = vld [vmem:[%s14135_s4 + $0x208] sm:$0xf0]  ;;  %v8031_v61 = vor.u32 %v9208_v53, %v8030_v62 }
 0x69b   :  { %4383 = vmatpush.bf16.msrb.mxu1 %v8071_v45  ;;  %v8102_v45 = vld [vmem:[%s14135_s4 + $0x290] sm:$0xf]  ;;  %v9223_v59 = vld [vmem:[%s14135_s4 + $0x284] sm:$0xf]  ;;  %v8096_v33 = vld [vmem:[%s14135_s4 + $0x288] sm:$0xf0] }
 0x69c   :  { %4407 = vmatpush.bf16.msrb.mxu3 %v8135_v52  ;;  %4431 = vmatpush.bf16.msrb.mxu0 %v8075_v46  ;;  %v8104_v52 = vld [vmem:[%s14135_s4 + $0x298] sm:$0xf0]  ;;  %v8039_v46 = vor.u32 %v9210_v14, %v8038_v37  ;;  %v8103_v43 = vor.u32 %v9226_v10, %v8102_v45  ;;  %v9270_v7 = vld [vmem:[%s14135_s4 + $0x3f4] sm:$0xf0]  ;;  %v9253_v25 = vld [vmem:[%s14135_s4 + $0x374] sm:$0xf] }
 0x69d   :  { %4455 = vmatpush.bf16.msrb.mxu2 %v8139_v27  ;;  %v8043_v27 = vor.u32 %v9209_v38, %v8040_v6  ;;  %v8107_v2 = vor.u32 %v9225_v39, %v8104_v52  ;;  %v9269_v8 = vld [vmem:[%s14135_s4 + $0x3f4] sm:$0xf]  ;;  %v9252_v58 = vld [vmem:[%s14135_s4 + $0x364] sm:$0xf0]  ;;  %v8302_v9 = vld [vmem:[%s14135_s4 + $0x3e0] sm:$0xf] }
 0x69e   :  { %v9251_v13 = vld [vmem:[%s14135_s4 + $0x364] sm:$0xf]  ;;  %v8240_v26 = vld [vmem:[%s14135_s4 + $0x368] sm:$0xf0]  ;;  %v9250_v44 = vld [vmem:[%s14135_s4 + $0x354] sm:$0xf0] }
 0x69f   :  { %4384 = vmatpush.bf16.msrb.mxu1 %v8063_v40  ;;  %v8099_v40 = vor.u32 %v9223_v59, %v8096_v33  ;;  %v9267_v63 = vld [vmem:[%s14135_s4 + $0x3e4] sm:$0xf]  ;;  %v8243_v21 = vor.u32 %v9251_v13, %v8240_v26  ;;  %v8294_v14 = vld [vmem:[%s14135_s4 + $0x3d0] sm:$0xf]  ;;  %v8232_v10 = vld [vmem:[%s14135_s4 + $0x358] sm:$0xf0] }
 0x6a0   :  { %4408 = vmatpush.bf16.msrb.mxu3 %v8127_v32  ;;  %4432 = vmatpush.bf16.msrb.mxu0 %v8067_v60  ;;  %v8246_v32 = vld [vmem:[%s14135_s4 + $0x370] sm:$0xf]  ;;  %v9254_v60 = vld [vmem:[%s14135_s4 + $0x374] sm:$0xf0]  ;;  %v9265_v38 = vld [vmem:[%s14135_s4 + $0x3d4] sm:$0xf] }
 0x6a1   :  { %4456 = vmatpush.bf16.msrb.mxu2 %v8131_v36  ;;  %v8310_v36 = vld [vmem:[%s14135_s4 + $0x3f0] sm:$0xf]  ;;  %v8247_v1 = vor.u32 %v9254_v60, %v8246_v32  ;;  %v8296_v6 = vld [vmem:[%s14135_s4 + $0x3d8] sm:$0xf0]  ;;  %v9248_v62 = vld [vmem:[%s14135_s4 + $0x344] sm:$0xf0] }
 0x6a2   :  { %v8311_v56 = vor.u32 %v9270_v7, %v8310_v36  ;;  %v8286_v53 = vld [vmem:[%s14135_s4 + $0x3c0] sm:$0xf]  ;;  %v9263_v59 = vld [vmem:[%s14135_s4 + $0x3c4] sm:$0xf]  ;;  %v8288_v33 = vld [vmem:[%s14135_s4 + $0x3c8] sm:$0xf0] }
 0x6a3   :  { %4385 = vmatpush.bf16.msrb.mxu1 %v8055_v24  ;;  %v8248_v24 = vld [vmem:[%s14135_s4 + $0x378] sm:$0xf0]  ;;  %v9261_v7 = vld [vmem:[%s14135_s4 + $0x3b4] sm:$0xf]  ;;  %v8198_v13 = vld [vmem:[%s14135_s4 + $0x310] sm:$0xf] }
 0x6a4   :  { %4409 = vmatpush.bf16.msrb.mxu3 %v8119_v23  ;;  %4433 = vmatpush.bf16.msrb.mxu0 %v8059_v35  ;;  %v8251_v57 = vor.u32 %v9253_v25, %v8248_v24  ;;  %v8312_v23 = vld [vmem:[%s14135_s4 + $0x3f8] sm:$0xf0]  ;;  %v8238_v35 = vld [vmem:[%s14135_s4 + $0x360] sm:$0xf] }
 0x6a5   :  { %4090 = vmatmul.bf16.vlgmr.msra.gmra.mxu1 %v3547_v51  ;;  %4457 = vmatpush.bf16.msrb.mxu2 %v8123_v29  ;;  %v8315_v17 = vor.u32 %v9269_v8, %v8312_v23  ;;  %v9268_v29 = vld [vmem:[%s14135_s4 + $0x3e4] sm:$0xf0]  ;;  %v8239_v28 = vor.u32 %v9252_v58, %v8238_v35  ;;  %v8216_v60 = vld [vmem:[%s14135_s4 + $0x338] sm:$0xf0]  ;;  %v8270_v8 = vld [vmem:[%s14135_s4 + $0x3a0] sm:$0xf] }
 0x6a6   :  { %4114 = vmatmul.bf16.vlgmr.msra.gmra.mxu3 %v3548_v16  ;;  %4138 = vmatmul.bf16.vlgmr.msra.gmra.mxu0 %v3547_v51  ;;  %v8095_v51 = vor.u32 %v9224_v4, %v8094_v41  ;;  %v8303_v47 = vor.u32 %v9268_v29, %v8302_v9  ;;  %v9247_v41 = vld [vmem:[%s14135_s4 + $0x344] sm:$0xf]  ;;  %v8224_v4 = vld [vmem:[%s14135_s4 + $0x348] sm:$0xf0]  ;;  %v8280_v25 = vld [vmem:[%s14135_s4 + $0x3b8] sm:$0xf0] }
 0x6a7   :  { %4162 = vmatmul.bf16.vlgmr.msra.gmra.mxu2 %v3548_v16  ;;  %4386 = vmatpush.bf16.msrb.mxu1 %v8047_v55  ;;  %v8035_v16 = vor.u32 %v9207_v50, %v8032_v18  ;;  %v8304_v55 = vld [vmem:[%s14135_s4 + $0x3e8] sm:$0xf0]  ;;  %v8227_v18 = vor.u32 %v9247_v41, %v8224_v4  ;;  %v8283_v24 = vor.u32 %v9261_v7, %v8280_v25  ;;  %v9260_v35 = vld [vmem:[%s14135_s4 + $0x3a4] sm:$0xf0] }
 0x6a8   :  { %4410 = vmatpush.bf16.msrb.mxu3 %v8111_v19  ;;  %4434 = vmatpush.bf16.msrb.mxu0 %v8051_v31  ;;  %v8230_v19 = vld [vmem:[%s14135_s4 + $0x350] sm:$0xf]  ;;  %v8307_v37 = vor.u32 %v9267_v63, %v8304_v55  ;;  %v9266_v31 = vld [vmem:[%s14135_s4 + $0x3d4] sm:$0xf0]  ;;  %v8208_v58 = vld [vmem:[%s14135_s4 + $0x328] sm:$0xf0]  ;;  %v8271_v9 = vor.u32 %v9260_v35, %v8270_v8 }
 0x6a9   :  { %4458 = vmatpush.bf16.msrb.mxu2 %v8115_v12  ;;  %v9249_v12 = vld [vmem:[%s14135_s4 + $0x354] sm:$0xf]  ;;  %v8231_v45 = vor.u32 %v9250_v44, %v8230_v19  ;;  %v8295_v39 = vor.u32 %v9266_v31, %v8294_v14  ;;  %v9242_v63 = vld [vmem:[%s14135_s4 + $0x314] sm:$0xf0]  ;;  %v8200_v14 = vld [vmem:[%s14135_s4 + $0x318] sm:$0xf0] }
 0x6aa   :  { %v8235_v52 = vor.u32 %v9249_v12, %v8232_v10  ;;  %v9258_v55 = vld [vmem:[%s14135_s4 + $0x394] sm:$0xf0]  ;;  %v8199_v19 = vor.u32 %v9242_v63, %v8198_v13  ;;  %v9257_v31 = vld [vmem:[%s14135_s4 + $0x394] sm:$0xf]  ;;  %v8256_v41 = vld [vmem:[%s14135_s4 + $0x388] sm:$0xf0] }
 0x6ab   :  { %4387 = vmatpush.bf16.msrb.mxu1 %v8039_v46  ;;  %v8299_v46 = vor.u32 %v9265_v38, %v8296_v6  ;;  %v8190_v38 = vld [vmem:[%s14135_s4 + $0x300] sm:$0xf]  ;;  %v9240_v6 = vld [vmem:[%s14135_s4 + $0x304] sm:$0xf0] }
 0x6ac   :  { %4411 = vmatpush.bf16.msrb.mxu3 %v8103_v43  ;;  %4435 = vmatpush.bf16.msrb.mxu0 %v8043_v27  ;;  %v8222_v43 = vld [vmem:[%s14135_s4 + $0x340] sm:$0xf] }
 0x6ad   :  { %4459 = vmatpush.bf16.msrb.mxu2 %v8107_v2  ;;  %v8223_v27 = vor.u32 %v9248_v62, %v8222_v43  ;;  %v9264_v2 = vld [vmem:[%s14135_s4 + $0x3c4] sm:$0xf0]  ;;  %v9239_v43 = vld [vmem:[%s14135_s4 + $0x304] sm:$0xf]  ;;  %v8192_v62 = vld [vmem:[%s14135_s4 + $0x308] sm:$0xf0] }
 0x6ae   :  { %v8287_v50 = vor.u32 %v9264_v2, %v8286_v53  ;;  %v9255_v2 = vld [vmem:[%s14135_s4 + $0x384] sm:$0xf] }
 0x6af   :  { %4388 = vmatpush.bf16.msrb.mxu1 %v8031_v61  ;;  %v8291_v61 = vor.u32 %v9263_v59, %v8288_v33  ;;  %v8259_v4 = vor.u32 %v9255_v2, %v8256_v41 }
 0x6b0   :  { %4412 = vmatpush.bf16.msrb.mxu3 %v8095_v51  ;;  %4436 = vmatpush.bf16.msrb.mxu0 %v8035_v16  ;;  %v8214_v51 = vld [vmem:[%s14135_s4 + $0x330] sm:$0xf]  ;;  %v9246_v16 = vld [vmem:[%s14135_s4 + $0x334] sm:$0xf0] }
 0x6b1   :  { %4460 = vmatpush.bf16.msrb.mxu2 %v8099_v40  ;;  %v8278_v40 = vld [vmem:[%s14135_s4 + $0x3b0] sm:$0xf]  ;;  %v8215_v32 = vor.u32 %v9246_v16, %v8214_v51 }
 0x6b3   :  { %4692 = vmatpush.bf16.msra.mxu1 %v8247_v1 }
 0x6b4   :  { %4716 = vmatpush.bf16.msra.mxu3 %v8311_v56  ;;  %4740 = vmatpush.bf16.msra.mxu0 %v8251_v57  ;;  %v8206_v56 = vld [vmem:[%s14135_s4 + $0x320] sm:$0xf]  ;;  %v9244_v57 = vld [vmem:[%s14135_s4 + $0x324] sm:$0xf0] }
 0x6b5   :  { %4095 = vmatmul.bf16.gmra.mxu1 %v12814_v20  ;;  %4764 = vmatpush.bf16.msra.mxu2 %v8315_v17  ;;  %v8207_v23 = vor.u32 %v9244_v57, %v8206_v56  ;;  %v9243_v17 = vld [vmem:[%s14135_s4 + $0x324] sm:$0xf] }
 0x6b6   :  { %4119 = vmatmul.bf16.gmra.mxu3 %v12816_v0  ;;  %4143 = vmatmul.bf16.gmra.mxu0 %v12814_v20  ;;  %v8211_v29 = vor.u32 %v9243_v17, %v8208_v58 }
 0x6b7   :  { %4167 = vmatmul.bf16.gmra.mxu2 %v12816_v0  ;;  %4693 = vmatpush.bf16.msra.mxu1 %v8239_v28  ;;  %v9259_v28 = vld [vmem:[%s14135_s4 + $0x3a4] sm:$0xf] }
 0x6b8   :  { %4717 = vmatpush.bf16.msra.mxu3 %v8303_v47  ;;  %4741 = vmatpush.bf16.msra.mxu0 %v8243_v21  ;;  %v8272_v47 = vld [vmem:[%s14135_s4 + $0x3a8] sm:$0xf0]  ;;  %v8262_v21 = vld [vmem:[%s14135_s4 + $0x390] sm:$0xf] }
 0x6b9   :  { %4765 = vmatpush.bf16.msra.mxu2 %v8307_v37  ;;  %v8275_v26 = vor.u32 %v9259_v28, %v8272_v47  ;;  %v8263_v44 = vor.u32 %v9258_v55, %v8262_v21  ;;  %v9241_v37 = vld [vmem:[%s14135_s4 + $0x314] sm:$0xf] }
 0x6ba   :  { %v8203_v12 = vor.u32 %v9241_v37, %v8200_v14 }
 0x6bb   :  { %4694 = vmatpush.bf16.msra.mxu1 %v8231_v45  ;;  %v8264_v45 = vld [vmem:[%s14135_s4 + $0x398] sm:$0xf0] }
 0x6bc   :  { %4718 = vmatpush.bf16.msra.mxu3 %v8295_v39  ;;  %4742 = vmatpush.bf16.msra.mxu0 %v8235_v52  ;;  %v8267_v10 = vor.u32 %v9257_v31, %v8264_v45  ;;  %v8254_v39 = vld [vmem:[%s14135_s4 + $0x380] sm:$0xf]  ;;  %v8191_v52 = vor.u32 %v9240_v6, %v8190_v38 }
 0x6bd   :  { %4766 = vmatpush.bf16.msra.mxu2 %v8299_v46  ;;  %v9256_v46 = vld [vmem:[%s14135_s4 + $0x384] sm:$0xf0] }
 0x6be   :  { %v8255_v53 = vor.u32 %v9256_v46, %v8254_v39 }
 0x6bf   :  { %4695 = vmatpush.bf16.msra.mxu1 %v8223_v27  ;;  %v8195_v27 = vor.u32 %v9239_v43, %v8192_v62 }
 0x6c0   :  { %4719 = vmatpush.bf16.msra.mxu3 %v8287_v50  ;;  %4743 = vmatpush.bf16.msra.mxu0 %v8227_v18 }
 0x6c1   :  { %4767 = vmatpush.bf16.msra.mxu2 %v8291_v61 }
 0x6c3   :  { %4696 = vmatpush.bf16.msra.mxu1 %v8215_v32 }
 0x6c5   :  { %4100 = vmatmul.bf16.gmra.mxu1 %v12825_v54  ;;  %4768 = vmatpush.bf16.msra.mxu2 %v8283_v24 }
 0x6c6   :  { %4124 = vmatmul.bf16.gmra.mxu3 %v12839_v42  ;;  %4148 = vmatmul.bf16.gmra.mxu0 %v12825_v54 }
 0x6c7   :  { %4172 = vmatmul.bf16.gmra.mxu2 %v12839_v42  ;;  %4697 = vmatpush.bf16.msra.mxu1 %v8207_v23 }
 0x6c9   :  { %4769 = vmatpush.bf16.msra.mxu2 %v8275_v26 }
 0x6cb   :  { %4698 = vmatpush.bf16.msra.mxu1 %v8199_v19 }
 0x6cd   :  { %4770 = vmatpush.bf16.msra.mxu2 %v8267_v10 }
 0x6cf   :  { %4699 = vmatpush.bf16.msra.mxu1 %v8191_v52 }
 0x6d1   :  { %4771 = vmatpush.bf16.msra.mxu2 %v8259_v4 }
 0x6d5   :  { %4389 = vmatmul.bf16.vlgmr.msrb.gmra.mxu1 %v12814_v20 }
 0x6d6   :  { %4413 = vmatmul.bf16.vlgmr.msrb.gmra.mxu3 %v12816_v0  ;;  %4437 = vmatmul.bf16.vlgmr.msrb.gmra.mxu0 %v12814_v20  ;;  %v9262_v20 = vld [vmem:[%s14135_s4 + $0x3b4] sm:$0xf0] }
 0x6d7   :  { %4461 = vmatmul.bf16.vlgmr.msrb.gmra.mxu2 %v12816_v0  ;;  %v9245_v0 = vld [vmem:[%s14135_s4 + $0x334] sm:$0xf]  ;;  %v8279_v36 = vor.u32 %v9262_v20, %v8278_v40 }
 0x6d8   :  { %v8219_v1 = vor.u32 %v9245_v0, %v8216_v60 }
 0x6d9   :  { %4720 = vmatpush.bf16.msra.mxu3 %v8279_v36 }
 0x6da   :  { %4744 = vmatpush.bf16.msra.mxu0 %v8219_v1 }
 0x6dd   :  { %4721 = vmatpush.bf16.msra.mxu3 %v8271_v9 }
 0x6de   :  { %4745 = vmatpush.bf16.msra.mxu0 %v8211_v29 }
 0x6e1   :  { %4722 = vmatpush.bf16.msra.mxu3 %v8263_v44 }
 0x6e2   :  { %4746 = vmatpush.bf16.msra.mxu0 %v8203_v12 }
 0x6e5   :  { %4394 = vmatmul.bf16.gmra.mxu1 %v12825_v54  ;;  %4723 = vmatpush.bf16.msra.mxu3 %v8255_v53 }
 0x6e6   :  { %4418 = vmatmul.bf16.gmra.mxu3 %v12839_v42  ;;  %4442 = vmatmul.bf16.gmra.mxu0 %v12825_v54 }
 0x6e7   :  { %4466 = vmatmul.bf16.gmra.mxu2 %v12839_v42  ;;  %4747 = vmatpush.bf16.msra.mxu0 %v8195_v27 }
 0x6f2   :  { %v13318_v50 = vpop.f32.mrf.mxu1 }
 0x6f3   :  { %v3883_v18 = vpop.f32.mrf.mxu0 }
 0x6f5   :  { %4399 = vmatmul.bf16.gmra.mxu1 %v12884_v34 }
 0x6f6   :  { %4423 = vmatmul.bf16.gmra.mxu3 %v12886_v15  ;;  %4447 = vmatmul.bf16.gmra.mxu0 %v12884_v34 }
 0x6f7   :  { %4471 = vmatmul.bf16.gmra.mxu2 %v12886_v15 }
 0x6f9   :  { %v13324_v59 = vpop.f32.mrf.mxu3 }
 0x6fa   :  { %v3907_v54 = vpop.f32.mrf.mxu2  ;;  %v13326_v33 = vpop.f32.mrf.mxu1 }
 0x6fb   :  { %v3908_v42 = vadd.f32 %v3907_v54, %v3883_v18  ;;  %v13328_v61 = vpop.f32.mrf.mxu0 }
 0x701   :  { %v13330_v51 = vpop.f32.mrf.mxu3 }
 0x702   :  { %v13332_v16 = vpop.f32.mrf.mxu2  ;;  %v3840_v40 = vpop.f32.mrf.mxu1 }
 0x703   :  { %v3888_v32 = vpop.f32.mrf.mxu0 }
 0x705   :  { %4700 = vmatmul.bf16.vlgmr.msra.gmra.mxu1 %v12757_v22 }
 0x706   :  { %4724 = vmatmul.bf16.vlgmr.msra.gmra.mxu3 %v12759_v30  ;;  %4748 = vmatmul.bf16.vlgmr.msra.gmra.mxu0 %v12757_v22 }
 0x707   :  { %4772 = vmatmul.bf16.vlgmr.msra.gmra.mxu2 %v12759_v30 }
 0x709   :  { %v3864_v34 = vpop.f32.mrf.mxu3 }
 0x70a   :  { %v3865_v15 = vadd.f32 %v3864_v34, %v3840_v40  ;;  %v3912_v20 = vpop.f32.mrf.mxu2  ;;  %v13338_v0 = vpop.f32.mrf.mxu1 }
 0x70b   :  { %v3890_v60 = vpop.f32.mrf.mxu0  ;;  %v3913_v47 = vadd.f32 %v3912_v20, %v3888_v32 }
 0x711   :  { %v13340_v36 = vpop.f32.mrf.mxu3 }
 0x712   :  { %v3914_v1 = vpop.f32.mrf.mxu2  ;;  %v3845_v7 = vpop.f32.mrf.mxu1 }
 0x713   :  { %v3893_v25 = vpop.f32.mrf.mxu0  ;;  %v3915_v14 = vadd.f32 %v3914_v1, %v3890_v60 }
 0x715   :  { %4705 = vmatmul.bf16.gmra.mxu1 %v12910_v5 }
 0x716   :  { %4729 = vmatmul.bf16.gmra.mxu3 %v12912_v49  ;;  %4753 = vmatmul.bf16.gmra.mxu0 %v12910_v5 }
 0x717   :  { %4777 = vmatmul.bf16.gmra.mxu2 %v12912_v49 }
 0x719   :  { %v3869_v22 = vpop.f32.mrf.mxu3 }
 0x71a   :  { %v3917_v30 = vpop.f32.mrf.mxu2  ;;  %v3847_v24 = vpop.f32.mrf.mxu1 }
 0x71b   :  { %v3895_v56 = vpop.f32.mrf.mxu0  ;;  %v3918_v45 = vadd.f32 %v3917_v30, %v3893_v25 }
 0x721   :  { %v3871_v57 = vpop.f32.mrf.mxu3 }
 0x722   :  { %v3919_v8 = vpop.f32.mrf.mxu2  ;;  %v4091_v23 = vpop.f32.mrf.mxu1  ;;  %v3872_v27 = vadd.f32 %v3871_v57, %v3847_v24 }
 0x723   :  { %v4139_v35 = vpop.f32.mrf.mxu0  ;;  %v3920_v2 = vadd.f32 %v3919_v8, %v3895_v56 }
 0x724   :  { %v4140_v17 = vadd.f32 %v4139_v35, %v3908_v42  ;;  %v3862_v35 = vadd.f32 %v13330_v51, %v13326_v33 }
 0x725   :  { %4710 = vmatmul.bf16.gmra.mxu1 %v12892_v48 }
 0x726   :  { %4734 = vmatmul.bf16.gmra.mxu3 %v12894_v3  ;;  %4758 = vmatmul.bf16.gmra.mxu0 %v12892_v48 }
 0x727   :  { %4782 = vmatmul.bf16.gmra.mxu2 %v12894_v3  ;;  %v3870_v3 = vadd.f32 %v3869_v22, %v3845_v7 }
 0x729   :  { %v4115_v5 = vpop.f32.mrf.mxu3 }
 0x72a   :  { %v4163_v58 = vpop.f32.mrf.mxu2  ;;  %v4093_v49 = vpop.f32.mrf.mxu1 }
 0x72b   :  { %v4141_v9 = vpop.f32.mrf.mxu0  ;;  %v4164_v22 = vadd.f32 %v4163_v58, %v4140_v17 }
 0x731   :  { %v4117_v29 = vpop.f32.mrf.mxu3 }
 0x732   :  { %v4165_v28 = vpop.f32.mrf.mxu2  ;;  %v4096_v13 = vpop.f32.mrf.mxu1 }
 0x733   :  { %v4097_v26 = vadd.f32 %v4096_v13, %v3865_v15  ;;  %v4144_v63 = vpop.f32.mrf.mxu0  ;;  %v3860_v15 = vadd.f32 %v13324_v59, %v13318_v50  ;;  %v4094_v50 = vadd.f32 %v4093_v49, %v3862_v35 }
 0x734   :  { %v4145_v21 = vadd.f32 %v4144_v63, %v3913_v47  ;;  %v3910_v47 = vadd.f32 %v13332_v16, %v13328_v61 }
 0x735   :  { %v4092_v20 = vadd.f32 %v4091_v23, %v3860_v15 }
 0x736   :  { %v4142_v59 = vadd.f32 %v4141_v9, %v3910_v47 }
 0x737   :  { %v4116_v1 = vadd.f32 %v4115_v5, %v4092_v20  ;;  %v4118_v5 = vadd.f32 %v4117_v29, %v4094_v50 }
 0x738   :  { %v4166_v17 = vadd.f32 %v4165_v28, %v4142_v59  ;;  %v3867_v28 = vadd.f32 %v13340_v36, %v13338_v0 }
 0x739   :  { %v4120_v55 = vpop.f32.mrf.mxu3 }
 0x73a   :  { %v4168_v19 = vpop.f32.mrf.mxu2  ;;  %v13350_v44 = vpop.f32.mrf.mxu1 }
 0x73b   :  { %v4146_v37 = vpop.f32.mrf.mxu0 }
 0x73c   :  { %v4147_v48 = vadd.f32 %v4146_v37, %v3915_v14 }
 0x741   :  { %v4122_v31 = vpop.f32.mrf.mxu3 }
 0x742   :  { %v4170_v12 = vpop.f32.mrf.mxu2  ;;  %v4101_v38 = vpop.f32.mrf.mxu1 }
 0x743   :  { %v13352_v10 = vadd.f32 %v4170_v12, %v4147_v48  ;;  %v13354_v6 = vadd.f32 %v4101_v38, %v3870_v3  ;;  %v4149_v39 = vpop.f32.mrf.mxu0  ;;  %v4169_v38 = vadd.f32 %v4168_v19, %v4145_v21 }
 0x744   :  { %v13356_v52 = vadd.f32 %v4149_v39, %v3918_v45  ;;  %v4121_v45 = vadd.f32 %v4120_v55, %v4097_v26  ;;  %v4099_v39 = vadd.f32 %v13350_v44, %v3867_v28 }
 0x749   :  { %v13358_v46 = vpop.f32.mrf.mxu3 }
 0x74a   :  { %v13360_v43 = vpop.f32.mrf.mxu2  ;;  %v4103_v62 = vpop.f32.mrf.mxu1 }
 0x74b   :  { %v4151_v53 = vpop.f32.mrf.mxu0  ;;  %v4104_v41 = vadd.f32 %v4103_v62, %v3872_v27 }
 0x74c   :  { %v4152_v4 = vadd.f32 %v4151_v53, %v3920_v2  ;;  %v4123_v53 = vadd.f32 %v4122_v31, %v4099_v39 }
 0x751   :  { %v4127_v18 = vpop.f32.mrf.mxu3 }
 0x752   :  { %v13362_v54 = vadd.f32 %v4127_v18, %v4104_v41  ;;  %v4175_v42 = vpop.f32.mrf.mxu2  ;;  %v4390_v32 = vpop.f32.mrf.mxu1 }
 0x753   :  { %v13364_v40 = vadd.f32 %v4175_v42, %v4152_v4  ;;  %v4438_v34 = vpop.f32.mrf.mxu0 }
 0x759   :  { %v4414_v60 = vpop.f32.mrf.mxu3 }
 0x75a   :  { %v4415_v7 = vadd.f32 %v4414_v60, %v4390_v32  ;;  %v4462_v25 = vpop.f32.mrf.mxu2  ;;  %v4392_v24 = vpop.f32.mrf.mxu1 }
 0x75b   :  { %v4463_v30 = vadd.f32 %v4462_v25, %v4438_v34  ;;  %v4440_v57 = vpop.f32.mrf.mxu0 }
 0x75c   :  { %v13368_v56 = vadd.f32 %v4415_v7, %v4116_v1 }
 0x75d   :  { %v13370_v8 = vadd.f32 %v4463_v30, %v4164_v22 }
 0x761   :  { %v4416_v23 = vpop.f32.mrf.mxu3 }
 0x762   :  { %v4417_v13 = vadd.f32 %v4416_v23, %v4392_v24  ;;  %v4464_v63 = vpop.f32.mrf.mxu2  ;;  %v4395_v37 = vpop.f32.mrf.mxu1 }
 0x763   :  { %v4465_v58 = vadd.f32 %v4464_v63, %v4440_v57  ;;  %v4443_v48 = vpop.f32.mrf.mxu0 }
 0x764   :  { %v13376_v14 = vadd.f32 %v4417_v13, %v4118_v5 }
 0x765   :  { %v13378_v3 = vadd.f32 %v4465_v58, %v4166_v17 }
 0x769   :  { %v4419_v12 = vpop.f32.mrf.mxu3 }
 0x76a   :  { %v4420_v33 = vadd.f32 %v4419_v12, %v4395_v37  ;;  %v4467_v51 = vpop.f32.mrf.mxu2  ;;  %v4397_v16 = vpop.f32.mrf.mxu1  ;;  %v4126_v12 = vadd.f32 %v13358_v46, %v13354_v6 }
 0x76b   :  { %v4468_v61 = vadd.f32 %v4467_v51, %v4443_v48  ;;  %v4445_v9 = vpop.f32.mrf.mxu0 }
 0x76c   :  { %v13380_v49 = vadd.f32 %v4420_v33, %v4121_v45 }
 0x76d   :  { %v13382_v29 = vadd.f32 %v4468_v61, %v4169_v38 }
 0x771   :  { %v4421_v62 = vpop.f32.mrf.mxu3 }
 0x772   :  { %v4422_v27 = vadd.f32 %v4421_v62, %v4397_v16  ;;  %v4469_v2 = vpop.f32.mrf.mxu2  ;;  %v4400_v55 = vpop.f32.mrf.mxu1  ;;  %v4174_v16 = vadd.f32 %v13360_v43, %v13356_v52 }
 0x773   :  { %v4470_v26 = vadd.f32 %v4469_v2, %v4445_v9  ;;  %v4448_v21 = vpop.f32.mrf.mxu0 }
 0x774   :  { %v4483_v41 = vadd.f32 %v4422_v27, %v4123_v53 }
 0x775   :  { %v4484_v19 = vadd.f32 %v4470_v26, %v13352_v10 }
 0x779   :  { %v4424_v4 = vpop.f32.mrf.mxu3 }
 0x77a   :  { %v4472_v18 = vpop.f32.mrf.mxu2  ;;  %v4402_v42 = vpop.f32.mrf.mxu1  ;;  %v4425_v17 = vadd.f32 %v4424_v4, %v4400_v55 }
 0x77b   :  { %v4450_v32 = vpop.f32.mrf.mxu0  ;;  %v4473_v58 = vadd.f32 %v4472_v18, %v4448_v21 }
 0x77c   :  { %v4485_v62 = vadd.f32 %v4425_v17, %v4126_v12 }
 0x77d   :  { %v4486_v2 = vadd.f32 %v4473_v58, %v4174_v16 }
 0x781   :  { %v4426_v34 = vpop.f32.mrf.mxu3 }
 0x782   :  { %v4474_v15 = vpop.f32.mrf.mxu2  ;;  %v4701_v20 = vpop.f32.mrf.mxu1  ;;  %v4427_v13 = vadd.f32 %v4426_v34, %v4402_v42 }
 0x783   :  { %v4749_v0 = vpop.f32.mrf.mxu0  ;;  %v4475_v63 = vadd.f32 %v4474_v15, %v4450_v32  ;;  %v9434_v15 = vmov 0.0  }
 0x784   :  { %v4487_v45 = vadd.f32 %v4427_v13, %v13362_v54 }
 0x785   :  { %v4488_v9 = vadd.f32 %v4475_v63, %v13364_v40 }
 0x789   :  { %v4725_v36 = vpop.f32.mrf.mxu3 }
 0x78a   :  { %v4773_v44 = vpop.f32.mrf.mxu2  ;;  %v4703_v60 = vpop.f32.mrf.mxu1  ;;  %v4726_v18 = vadd.f32 %v4725_v36, %v4701_v20 }
 0x78b   :  { %v4751_v31 = vpop.f32.mrf.mxu0  ;;  %v4774_v32 = vadd.f32 %v4773_v44, %v4749_v0 }
 0x791   :  { %v4727_v1 = vpop.f32.mrf.mxu3 }
 0x792   :  { %v4775_v7 = vpop.f32.mrf.mxu2  ;;  %v4706_v25 = vpop.f32.mrf.mxu1  ;;  %v4728_v52 = vadd.f32 %v4727_v1, %v4703_v60 }
 0x793   :  { %v4754_v22 = vpop.f32.mrf.mxu0  ;;  %v4776_v40 = vadd.f32 %v4775_v7, %v4751_v31 }
 0x799   :  { %v4730_v30 = vpop.f32.mrf.mxu3 }
 0x79a   :  { %v4778_v24 = vpop.f32.mrf.mxu2  ;;  %v4708_v57 = vpop.f32.mrf.mxu1  ;;  %v4731_v46 = vadd.f32 %v4730_v30, %v4706_v25  ;;  %v9435_v30 = vmov 18.0  }
 0x79b   :  { %v4756_v10 = vpop.f32.mrf.mxu0  ;;  %v4779_v55 = vadd.f32 %v4778_v24, %v4754_v22  ;;  %9421 = vrcp.f32 %v9435_v30  ;;  %v9285_v30 = vld [vmem:[%s14136_s7 + $0x70] sm:$0xff] }
 0x79c   :  { %v13411_v42 = vadd.f32 %v4731_v46, %v13380_v49  ;;  %v13427_v49 = vadd.f32 %v4726_v18, %v13368_v56  ;;  %v3540_v46 = vld [vmem:[%s14138_s6] sm:$0x1] }
 0x79d   :  { %v13415_v34 = vadd.f32 %v4779_v55, %v13382_v29  ;;  %v13432_v29 = vsel %vm12149_vm1, 1.0, %v9434_v15 }
 0x79e   :  { %v4848_v36 = vmul.f32 %v13411_v42, %v13411_v42  ;;  %v4844_v1 = vmul.f32 %v13427_v49, %v13427_v49 }
 0x79f   :  { %v4849_v44 = vmul.f32 %v13415_v34, %v13415_v34 }
 0x7a1   :  { %v4732_v35 = vpop.f32.mrf.mxu3  ;;  %v9422_v24 = vpop.eup %9421 }
 0x7a2   :  { %v4780_v47 = vpop.f32.mrf.mxu2  ;;  %v4711_v50 = vpop.f32.mrf.mxu1  ;;  %v4733_v53 = vadd.f32 %v4732_v35, %v4708_v57  ;;  %v4909_v57 = vmul.f32 18.0, %v9422_v24  ;;  %vm4913_vm10 = vweird.f32 %v9422_v24 }
 0x7a3   :  { %v4759_v59 = vpop.f32.mrf.mxu0  ;;  %v4781_v26 = vadd.f32 %v4780_v47, %v4756_v10 }
 0x7a4   :  { %v13404_v43 = vadd.f32 %v4733_v53, %v4483_v41  ;;  %v13419_v41 = vadd.f32 %v4728_v52, %v13376_v14  ;;  %v13435_v14 = vadd.f32 %v4774_v32, %v13370_v8  ;;  %v4910_v10 = vsub.f32 1.0, %v4909_v57  ;;  %v9284_v57 = vld [vmem:[%s14136_s7 + $0x68] sm:$0xff] }
 0x7a5   :  { %v13407_v4 = vadd.f32 %v4781_v26, %v4484_v19  ;;  %v13423_v19 = vadd.f32 %v4776_v40, %v13378_v3 }
 0x7a6   :  { %v4850_v20 = vmul.f32 %v13404_v43, %v13404_v43  ;;  %v4846_v60 = vmul.f32 %v13419_v41, %v13419_v41  ;;  %v4845_v7 = vmul.f32 %v13435_v14, %v13435_v14  ;;  %v4911_v47 = vmul.f32 %v9422_v24, %v4910_v10  ;;  %v9283_v10 = vld [vmem:[%s14136_s7 + $0x60] sm:$0xff] }
 0x7a7   :  { %v4851_v0 = vmul.f32 %v13407_v4, %v13407_v4  ;;  %v4847_v31 = vmul.f32 %v13423_v19, %v13423_v19 }
 0x7a9   :  { %v4735_v23 = vpop.f32.mrf.mxu3 }
 0x7aa   :  { %v4783_v5 = vpop.f32.mrf.mxu2  ;;  %v4713_v37 = vpop.f32.mrf.mxu1  ;;  %v4736_v33 = vadd.f32 %v4735_v23, %v4711_v50  ;;  %v4912_v23 = vadd.f32 %v9422_v24, %v4911_v47  ;;  %v9293_v47 = vld [vmem:[%s14136_s7 + $0xb0] sm:$0xff] }
 0x7ab   :  { %v4761_v51 = vpop.f32.mrf.mxu0  ;;  %v4784_v28 = vadd.f32 %v4783_v5, %v4759_v59 }
 0x7ac   :  { %v13398_v54 = vadd.f32 %v4736_v33, %v4485_v62  ;;  %v4914_v13 = vsel %vm4913_vm10, %v9422_v24, %v4912_v23  ;;  %v9290_v33 = vld [vmem:[%s14136_s7 + $0x98] sm:$0xff]  ;;  %v3539_v62 = vld [vmem:[%s14137_s5] sm:$0x1]  ;;  %v9301_v23 = vld [vmem:[%s14136_s7 + $0xf0] sm:$0xff] }
 0x7ad   :  { %v13401_v21 = vadd.f32 %v4784_v28, %v4486_v2  ;;  %5126 = vmatpush.bf16.msrb.mxu0 %v9290_v33  ;;  %v9274_v24 = vld [vmem:[%s14136_s7 + $0x18] sm:$0xff] }
 0x7ae   :  { %v4852_v11 = vmul.f32 %v13398_v54, %v13398_v54  ;;  %v9298_v33 = vld [vmem:[%s14136_s7 + $0xd8] sm:$0xff] }
 0x7af   :  { %v4853_v8 = vmul.f32 %v13401_v21, %v13401_v21 }
 0x7b1   :  { %v4737_v48 = vpop.f32.mrf.mxu3 }
 0x7b2   :  { %v4738_v38 = vadd.f32 %v4737_v48, %v4713_v37  ;;  %v4785_v61 = vpop.f32.mrf.mxu2 }
 0x7b3   :  { %v4786_v39 = vadd.f32 %v4785_v61, %v4761_v51 }
 0x7b4   :  { %v13394_v27 = vadd.f32 %v4738_v38, %v4487_v45 }
 0x7b5   :  { %v13396_v6 = vadd.f32 %v4786_v39, %v4488_v9 }
 0x7b6   :  { %4814 = vmatpush.msrb.mxu1 %v13394_v27  ;;  %v4854_v3 = vmul.f32 %v13394_v27, %v13394_v27 }
 0x7b7   :  { %4834 = vmatpush.msrb.mxu3 %v13396_v6  ;;  %v4855_v56 = vmul.f32 %v13396_v6, %v13396_v6 }
 0x7b8   :  { %4815 = vmatpush.msrb.mxu1 %v13398_v54 }
 0x7b9   :  { %4835 = vmatpush.msrb.mxu3 %v13401_v21 }
 0x7ba   :  { %4816 = vmatpush.msrb.mxu1 %v13404_v43 }
 0x7bb   :  { %4836 = vmatpush.msrb.mxu3 %v13407_v4 }
 0x7bc   :  { %4817 = vmatpush.msrb.mxu1 %v13411_v42 }
 0x7bd   :  { %4837 = vmatpush.msrb.mxu3 %v13415_v34 }
 0x7be   :  { %4818 = vmatpush.msrb.mxu1 %v13419_v41 }
 0x7bf   :  { %4838 = vmatpush.msrb.mxu3 %v13423_v19 }
 0x7c0   :  { %4819 = vmatpush.msrb.mxu1 %v13427_v49 }
 0x7c1   :  { %4839 = vmatpush.msrb.mxu3 %v13435_v14  ;;  %8316 = vmatmul.msk.f32.vlgmr.msrb.gmra.mxu1 %vm4800_vm9, %v13432_v29 }
 0x7c2   :  { %4866 = vmatpush.msra.mxu1 %v4854_v3  ;;  %8317 = vmatmul.msk.f32.vlgmr.msrb.gmra.mxu3 %vm4800_vm9, %v13432_v29 }
 0x7c3   :  { %4886 = vmatpush.msra.mxu3 %v4855_v56 }
 0x7c4   :  { %4867 = vmatpush.msra.mxu1 %v4852_v11 }
 0x7c5   :  { %4887 = vmatpush.msra.mxu3 %v4853_v8 }
 0x7c6   :  { %4868 = vmatpush.msra.mxu1 %v4850_v20 }
 0x7c7   :  { %4888 = vmatpush.msra.mxu3 %v4851_v0 }
 0x7c8   :  { %4869 = vmatpush.msra.mxu1 %v4848_v36 }
 0x7c9   :  { %4889 = vmatpush.msra.mxu3 %v4849_v44 }
 0x7ca   :  { %4870 = vmatpush.msra.mxu1 %v4846_v60  ;;  %v9294_v60 = vld [vmem:[%s14136_s7 + $0xb8] sm:$0xff] }
 0x7cb   :  { %4890 = vmatpush.msra.mxu3 %v4847_v31  ;;  %v9282_v31 = vld [vmem:[%s14136_s7 + $0x58] sm:$0xff] }
 0x7cc   :  { %4871 = vmatpush.msra.mxu1 %v4844_v1  ;;  %v9287_v1 = vld [vmem:[%s14136_s7 + $0x80] sm:$0xff] }
 0x7cd   :  { %4891 = vmatpush.msra.mxu3 %v4845_v7  ;;  %8318 = vmatmul.msk.f32.vlgmr.msra.gmra.mxu1 %vm4800_vm9, %v13432_v29  ;;  %v9276_v7 = vld [vmem:[%s14136_s7 + $0x28] sm:$0xff] }
 0x7ce   :  { %8319 = vmatmul.msk.f32.vlgmr.msra.gmra.mxu3 %vm4800_vm9, %v13432_v29  ;;  %5144 = vmatpush.bf16.msrb.mxu1 %v9294_v60 }
 0x7cf   :  { %5256 = vmatpush.bf16.msrb.mxu3 %v9282_v31 }
 0x7d2   :  { %5145 = vmatpush.bf16.msrb.mxu1 %v9293_v47 }
 0x83e   :  { %v4821_v25 = vpop.f32.mrf.mxu1 }
 0x83f   :  { %4897 = vrot.lane.b32.xlu0 %v4821_v25, %s9431_s28 }
 0x845   :  { %v4841_v50 = vpop.f32.mrf.mxu3 }
 0x84a   :  { %v4873_v22 = vpop.f32.mrf.mxu1 }
 0x84b   :  { %4902 = vrot.lane.b32.xlu1 %v4873_v22, %s9431_s28 }
 0x851   :  { %v4893_v17 = vpop.f32.mrf.mxu3 }
 0x8b1   :  { %v4898_v35 = vpop.permute.xlu0 %4897 }
 0x8b2   :  { %v4900_v59 = vadd.f32 %v4898_v35, %v4821_v25  ;;  %v9286_v25 = vld [vmem:[%s14136_s7 + $0x78] sm:$0xff] }
 0x8b3   :  { %v9302_v35 = vld [vmem:[%s14136_s7 + $0xf8] sm:$0xff] }
 0x8b4   :  { %v4906_v5 = vadd.f32 %v4900_v59, %v4841_v50  ;;  %v9273_v50 = vld [vmem:[%s14136_s7 + $0x10] sm:$0xff] }
 0x8b5   :  { %v9281_v59 = vld [vmem:[%s14136_s7 + $0x50] sm:$0xff] }
 0x8b6   :  { %v4915_v58 = vmul.f32 %v4914_v13, %v4906_v5  ;;  %5257 = vmatpush.bf16.msrb.mxu3 %v9281_v59  ;;  %v9292_v5 = vld [vmem:[%s14136_s7 + $0xa8] sm:$0xff] }
 0x8b7   :  { %5146 = vmatpush.bf16.msrb.mxu1 %v9292_v5 }
 0x8b8   :  { %v4917_v12 = vmul.f32 %v4915_v58, %v4915_v58 }
 0x8bd   :  { %v4903_v63 = vpop.permute.xlu1 %4902 }
 0x8be   :  { %v4905_v37 = vadd.f32 %v4903_v63, %v4873_v22  ;;  %v9275_v22 = vld [vmem:[%s14136_s7 + $0x20] sm:$0xff]  ;;  %v9280_v63 = vld [vmem:[%s14136_s7 + $0x48] sm:$0xff] }
 0x8bf   :  { %5258 = vmatpush.bf16.msrb.mxu3 %v9280_v63 }
 0x8c0   :  { %v4907_v48 = vadd.f32 %v4905_v37, %v4893_v17  ;;  %v9300_v17 = vld [vmem:[%s14136_s7 + $0xe8] sm:$0xff]  ;;  %v9271_v37 = vld [vmem:[%s14136_s7] sm:$0xff] }
 0x8c2   :  { %v4916_v45 = vmul.f32 %v4914_v13, %v4907_v48  ;;  %v9272_v13 = vld [vmem:[%s14136_s7 + $0x8] sm:$0xff]  ;;  %v9279_v48 = vld [vmem:[%s14136_s7 + $0x40] sm:$0xff] }
 0x8c3   :  { %5259 = vmatpush.bf16.msrb.mxu3 %v9279_v48 }
 0x8c4   :  { %v4918_v51 = vsub.f32 %v4916_v45, %v4917_v12  ;;  %v9299_v12 = vld [vmem:[%s14136_s7 + $0xe0] sm:$0xff]  ;;  %v9306_v45 = vld [vmem:[%s14136_s7 + $0x118] sm:$0xff] }
 0x8c6   :  { %v4919_v38 = vadd.f32 1e-05, %v4918_v51  ;;  %v9305_v51 = vld [vmem:[%s14136_s7 + $0x110] sm:$0xff] }
 0x8c8   :  { %9423 = vrsqrt.f32 %v4919_v38  ;;  %vm4926_vm12 = vweird.f32 %v4919_v38 }
 0x8ce   :  { %v9424_v61 = vpop.eup %9423 }
 0x8cf   :  { %v4921_v16 = vmul.f32 %v9424_v61, %v4919_v38  ;;  %vm4927_vm11 = vweird.f32 %v9424_v61  ;;  %v9297_v38 = vld [vmem:[%s14136_s7 + $0xd0] sm:$0xff] }
 0x8d0   :  { %vm4928_vm13 = vmor %vm4926_vm12, %vm4927_vm11 }
 0x8d1   :  { %v4922_v9 = vmul.f32 %v9424_v61, %v4921_v16 }
 0x8d3   :  { %v4923_v28 = vmul.f32 0.5, %v4922_v9  ;;  %v9296_v9 = vld [vmem:[%s14136_s7 + $0xc8] sm:$0xff] }
 0x8d5   :  { %v4924_v39 = vsub.f32 1.5, %v4923_v28  ;;  %v9303_v28 = vld [vmem:[%s14136_s7 + $0x100] sm:$0xff] }
 0x8d7   :  { %v4925_v53 = vmul.f32 %v9424_v61, %v4924_v39 }
 0x8d9   :  { %v4929_v2 = vsel %vm4928_vm13, %v9424_v61, %v4925_v53  ;;  %v9304_v61 = vld [vmem:[%s14136_s7 + $0x108] sm:$0xff] }
 0x8da   :  { %v13480_v26 = vmul.f32 %v4929_v2, %v3539_v62  ;;  %v9295_v62 = vld [vmem:[%s14136_s7 + $0xc0] sm:$0xff] }
 0x8dc   :  { %v4931_v55 = vmul.f32 %v13480_v26, %v4915_v58  ;;  %v4934_v52 = vperm.slane %v13480_v26, 0  ;;  %v9291_v58 = vld [vmem:[%s14136_s7 + $0xa0] sm:$0xff] }
 0x8dd   :  { %5147 = vmatpush.bf16.msrb.mxu1 %v9291_v58 }
 0x8de   :  { %v13487_v40 = vsub.f32 %v3540_v46, %v4931_v55  ;;  %4935 = vrot.lane.b32.xlu2 %v4934_v52, %s9431_s28  ;;  %v4952_v18 = vmul.f32 %v4934_v52, %v13415_v34  ;;  %v4954_v15 = vmul.f32 %v4934_v52, %v13407_v4  ;;  %v4948_v3 = vmul.f32 %v4934_v52, %v13435_v14  ;;  %v9277_v14 = vld [vmem:[%s14136_s7 + $0x30] sm:$0xff] }
 0x8df   :  { %v4950_v56 = vmul.f32 %v4934_v52, %v13423_v19  ;;  %v4956_v11 = vmul.f32 %v4934_v52, %v13401_v21  ;;  %v4958_v8 = vmul.f32 %v4934_v52, %v13396_v6  ;;  %v9289_v21 = vld [vmem:[%s14136_s7 + $0x90] sm:$0xff]  ;;  %v9278_v6 = vld [vmem:[%s14136_s7 + $0x38] sm:$0xff]  ;;  %v9288_v19 = vld [vmem:[%s14136_s7 + $0x88] sm:$0xff] }
 0x8e0   :  { %v4940_v32 = vperm.slane %v13487_v40, 0  ;;  %5127 = vmatpush.bf16.msrb.mxu0 %v9289_v21  ;;  %5238 = vmatpush.bf16.msrb.mxu2 %v9278_v6 }
 0x8e1   :  { %5393 = vmatpush.bf16.msra.mxu1 %v9306_v45 }
 0x8e2   :  { %4941 = vrot.lane.b32.xlu0 %v4940_v32, %s9431_s28  ;;  %v13498_v20 = vadd.f32 %v4952_v18, %v4940_v32  ;;  %v13500_v0 = vadd.f32 %v4954_v15, %v4940_v32  ;;  %v13502_v36 = vadd.f32 %v4948_v3, %v4940_v32  ;;  %v13504_v34 = vadd.f32 %v4950_v56, %v4940_v32 }
 0x8e3   :  { %v13506_v44 = vadd.f32 %v4956_v11, %v4940_v32  ;;  %v13508_v4 = vadd.f32 %v4958_v8, %v4940_v32 }
 0x8e4   :  { %5128 = vmatpush.bf16.msrb.mxu0 %v9288_v19  ;;  %5239 = vmatpush.bf16.msrb.mxu2 %v9277_v14  ;;  %v4978_v56 = vmax.f32 %v13498_v20, 0.0  ;;  %v4980_v11 = vmax.f32 %v13500_v0, 0.0 }
 0x8e5   :  { %5394 = vmatpush.bf16.msra.mxu1 %v9305_v51  ;;  %v4984_v0 = vmax.f32 %v13508_v4, 0.0 }
 0x8e8   :  { %5129 = vmatpush.bf16.msrb.mxu0 %v9287_v1  ;;  %5240 = vmatpush.bf16.msrb.mxu2 %v9276_v7 }
 0x8e9   :  { %5395 = vmatpush.bf16.msra.mxu1 %v9304_v61 }
 0x8ec   :  { %5130 = vmatpush.bf16.msrb.mxu0 %v9286_v25  ;;  %5241 = vmatpush.bf16.msrb.mxu2 %v9275_v22 }
 0x8ed   :  { %5396 = vmatpush.bf16.msra.mxu1 %v9303_v28 }
 0x8f0   :  { %5131 = vmatpush.bf16.msrb.mxu0 %v9285_v30  ;;  %5242 = vmatpush.bf16.msrb.mxu2 %v9274_v24 }
 0x8f4   :  { %5132 = vmatpush.bf16.msrb.mxu0 %v9284_v57  ;;  %5243 = vmatpush.bf16.msrb.mxu2 %v9273_v50 }
 0x8f8   :  { %5133 = vmatpush.bf16.msrb.mxu0 %v9283_v10  ;;  %5244 = vmatpush.bf16.msrb.mxu2 %v9272_v13 }
 0x8fc   :  { %5375 = vmatpush.bf16.msra.mxu0 %v9302_v35  ;;  %5245 = vmatpush.bf16.msrb.mxu2 %v9271_v37 }
 0x900   :  { %5376 = vmatpush.bf16.msra.mxu0 %v9301_v23 }
 0x904   :  { %5377 = vmatpush.bf16.msra.mxu0 %v9300_v17 }
 0x908   :  { %5378 = vmatpush.bf16.msra.mxu0 %v9299_v12 }
 0x90c   :  { %5379 = vmatpush.bf16.msra.mxu0 %v9298_v33 }
 0x910   :  { %5380 = vmatpush.bf16.msra.mxu0 %v9297_v38 }
 0x914   :  { %5381 = vmatpush.bf16.msra.mxu0 %v9296_v9 }
 0x918   :  { %5382 = vmatpush.bf16.msra.mxu0 %v9295_v62 }
 0x938   :  { %v4936_v16 = vpop.permute.xlu2 %4935 }
 0x939   :  { %v4938_v39 = vsel %vm3407_vm7, %v13480_v26, %v4936_v16 }
 0x93a   :  { %v4945_v53 = vperm.slane %v4938_v39, 0 }
 0x93c   :  { %v4947_v46 = vmul.f32 %v4945_v53, %v13427_v49  ;;  %v4949_v52 = vmul.f32 %v4945_v53, %v13419_v41  ;;  %v4951_v18 = vmul.f32 %v4945_v53, %v13411_v42  ;;  %v4953_v26 = vmul.f32 %v4945_v53, %v13404_v43 }
 0x93d   :  { %v4955_v15 = vmul.f32 %v4945_v53, %v13398_v54  ;;  %v4957_v3 = vmul.f32 %v4945_v53, %v13394_v27  ;;  %v4976_v41 = vmax.f32 %v13504_v34, 0.0  ;;  %v4982_v27 = vmax.f32 %v13506_v44, 0.0 }
 0x954   :  { %v4942_v2 = vpop.permute.xlu0 %4941 }
 0x955   :  { %v4944_v55 = vsel %vm3407_vm7, %v13487_v40, %v4942_v2  ;;  %v4974_v40 = vmax.f32 %v13502_v36, 0.0 }
 0x956   :  { %v4959_v32 = vperm.slane %v4944_v55, 0 }
 0x958   :  { %v4965_v8 = vadd.f32 %v4959_v32, %v4951_v18  ;;  %v4967_v49 = vadd.f32 %v4959_v32, %v4953_v26  ;;  %v4961_v21 = vadd.f32 %v4959_v32, %v4947_v46  ;;  %v4963_v6 = vadd.f32 %v4959_v32, %v4949_v52 }
 0x959   :  { %v4969_v42 = vadd.f32 %v4959_v32, %v4955_v15  ;;  %v4971_v19 = vadd.f32 %v4959_v32, %v4957_v3 }
 0x95a   :  { %v4977_v43 = vmax.f32 %v4965_v8, 0.0  ;;  %v4979_v14 = vmax.f32 %v4967_v49, 0.0  ;;  %v4973_v60 = vmax.f32 %v4961_v21, 0.0  ;;  %v4975_v54 = vmax.f32 %v4963_v6, 0.0 }
 0x95b   :  { %v4981_v31 = vmax.f32 %v4969_v42, 0.0  ;;  %v4983_v20 = vmax.f32 %v4971_v19, 0.0  ;;  %v9436_v49 = vmov 2.0  }
 0x95c   :  { %v4987_v1 = vpack.c.bf16 %v4978_v56, %v4977_v43  ;;  %v4988_v7 = vpack.c.bf16 %v4980_v11, %v4979_v14  ;;  %v4985_v25 = vpack.c.bf16 %v4974_v40, %v4973_v60  ;;  %v4986_v22 = vpack.c.bf16 %v4976_v41, %v4975_v54 }
 0x95d   :  { %v4989_v30 = vpack.c.bf16 %v4982_v27, %v4981_v31  ;;  %v4990_v36 = vpack.c.bf16 %v4984_v0, %v4983_v20  ;;  %9425 = vrcp.f32 %v9436_v49  ;;  %v9338_v0 = vld [vmem:[%s14140_s10 + $0xf8] sm:$0xf0]  ;;  %v8643_v49 = vld [vmem:[%s14140_s10 + $0xe8] sm:$0xf] }
 0x95e   :  { %v5044_v24 = vunpack.c.l.b16 %v4987_v1  ;;  %v5045_v34 = vunpack.c.h.b16 %v4987_v1  ;;  %v5046_v57 = vunpack.c.l.b16 %v4988_v7  ;;  %v5047_v10 = vunpack.c.h.b16 %v4988_v7  ;;  %v9334_v7 = vld [vmem:[%s14140_s10 + $0xdc] sm:$0xf] }
 0x95f   :  { %v5156_v35 = vunpack.c.l.b16 %v4985_v25  ;;  %v5157_v47 = vunpack.c.h.b16 %v4985_v25  ;;  %v5158_v50 = vunpack.c.l.b16 %v4986_v22  ;;  %v5159_v59 = vunpack.c.h.b16 %v4986_v22  ;;  %v8629_v25 = vld [vmem:[%s14140_s10 + $0xfc] sm:$0xf0] }
 0x960   :  { %v5048_v23 = vpack.c.b16 %v5046_v57, %v5044_v24  ;;  %v5049_v5 = vpack.c.b16 %v5047_v10, %v5045_v34  ;;  %v5293_v44 = vunpack.c.l.b16 %v4989_v30  ;;  %v5294_v13 = vunpack.c.h.b16 %v4989_v30  ;;  %v8635_v22 = vld [vmem:[%s14140_s10 + $0xe0] sm:$0xf]  ;;  %v9335_v24 = vld [vmem:[%s14140_s10 + $0xe4] sm:$0xf]  ;;  %v8637_v34 = vld [vmem:[%s14140_s10 + $0x104] sm:$0xf0] }
 0x961   :  { %v5160_v63 = vpack.c.b16 %v5158_v50, %v5156_v35  ;;  %v5161_v4 = vpack.c.b16 %v5159_v59, %v5157_v47  ;;  %v5295_v17 = vunpack.c.l.b16 %v4990_v36  ;;  %v5296_v58 = vunpack.c.h.b16 %v4990_v36  ;;  %v9339_v36 = vld [vmem:[%s14140_s10 + $0x100] sm:$0xf0]  ;;  %v8591_v35 = vld [vmem:[%s14140_s10 + $0x90] sm:$0xf]  ;;  %v9329_v47 = vld [vmem:[%s14140_s10 + $0xb0] sm:$0xf0] }
 0x962   :  { %5134 = vmatmul.bf16.vlgmr.msrb.gmra.mxu0 %v5048_v23  ;;  %8392 = vmatmul.msk.bf16.vlgmr.msrb.gmra.mxu1 %vm3407_vm7, %v5049_v5  ;;  %v8632_v30 = vor.u32 %v9334_v7, %v8629_v25  ;;  %v8636_v57 = vor.u32 %v9339_v36, %v8635_v22  ;;  %v8640_v10 = vor.u32 %v9335_v24, %v8637_v34  ;;  %v9325_v50 = vld [vmem:[%s14140_s10 + $0x94] sm:$0xf]  ;;  %v8593_v23 = vld [vmem:[%s14140_s10 + $0xb4] sm:$0xf0]  ;;  %v8607_v7 = vld [vmem:[%s14140_s10 + $0xa0] sm:$0xf] }
 0x963   :  { %5246 = vmatmul.bf16.vlgmr.msrb.gmra.mxu2 %v5160_v63  ;;  %8441 = vmatmul.msk.bf16.vlgmr.msrb.gmra.mxu3 %vm3407_vm7, %v5161_v4  ;;  %v5297_v37 = vpack.c.b16 %v5295_v17, %v5293_v44  ;;  %v5298_v48 = vpack.c.b16 %v5296_v58, %v5294_v13  ;;  %v9426_v21 = vpop.eup %9425  ;;  %v8592_v59 = vor.u32 %v9329_v47, %v8591_v35  ;;  %v8599_v5 = vld [vmem:[%s14140_s10 + $0x98] sm:$0xf]  ;;  %v9330_v44 = vld [vmem:[%s14140_s10 + $0xb8] sm:$0xf0]  ;;  %v8601_v17 = vld [vmem:[%s14140_s10 + $0xbc] sm:$0xf0] }
 0x964   :  { %v5450_v6 = vmul.f32 2.0, %v9426_v21  ;;  %vm5454_vm14 = vweird.f32 %v9426_v21  ;;  %5782 = vmatpush.bf16.msrb.mxu0 %v8640_v10  ;;  %v8596_v13 = vor.u32 %v9325_v50, %v8593_v23  ;;  %v8600_v63 = vor.u32 %v9330_v44, %v8599_v5  ;;  %v9326_v4 = vld [vmem:[%s14140_s10 + $0x9c] sm:$0xf]  ;;  %v8555_v58 = vld [vmem:[%s14140_s10 + $0x48] sm:$0xf] }
 0x965   :  { %v9331_v25 = vld [vmem:[%s14140_s10 + $0xc0] sm:$0xf0]  ;;  %v4991_v22 = vld [vmem:[%s14141_s8] sm:$0x1]  ;;  %v8609_v34 = vld [vmem:[%s14140_s10 + $0xc4] sm:$0xf0] }
 0x966   :  { %v5451_v40 = vsub.f32 1.0, %v5450_v6  ;;  %v9327_v24 = vld [vmem:[%s14140_s10 + $0xa4] sm:$0xf]  ;;  %v8615_v10 = vld [vmem:[%s14140_s10 + $0xa8] sm:$0xf] }
 0x967   :  { %v9332_v35 = vld [vmem:[%s14140_s10 + $0xc8] sm:$0xf0]  ;;  %v8571_v23 = vld [vmem:[%s14140_s10 + $0x58] sm:$0xf]  ;;  %v9322_v5 = vld [vmem:[%s14140_s10 + $0x78] sm:$0xf0] }
 0x968   :  { %v5452_v41 = vmul.f32 %v9426_v21, %v5451_v40  ;;  %v9328_v47 = vld [vmem:[%s14140_s10 + $0xac] sm:$0xf]  ;;  %v8616_v44 = vor.u32 %v9332_v35, %v8615_v10 }
 0x969   :  { %v9356_v10 = vld [vmem:[%s14143_s12 + $0x68] sm:$0xff] }
 0x96a   :  { %v5453_v42 = vadd.f32 %v9426_v21, %v5452_v41  ;;  %v9336_v41 = vld [vmem:[%s14140_s10 + $0xec] sm:$0xf] }
 0x96b   :  { %v9364_v35 = vld [vmem:[%s14143_s12 + $0xa8] sm:$0xff] }
 0x96c   :  { %v5455_v19 = vsel %vm5454_vm14, %v9426_v21, %v5453_v42  ;;  %v9340_v21 = vld [vmem:[%s14140_s10 + $0x108] sm:$0xf0]  ;;  %v8645_v42 = vld [vmem:[%s14140_s10 + $0x10c] sm:$0xf0] }
 0x96d   :  { %v8644_v40 = vor.u32 %v9340_v21, %v8643_v49 }
 0x972   :  { %5383 = vmatmul.bf16.vlgmr.msra.gmra.mxu0 %v5297_v37  ;;  %8514 = vmatmul.msk.bf16.vlgmr.msra.gmra.mxu1 %vm3407_vm7, %v5298_v48  ;;  %v8604_v37 = vor.u32 %v9326_v4, %v8601_v17  ;;  %v9320_v48 = vld [vmem:[%s14140_s10 + $0x68] sm:$0xf0]  ;;  %v8573_v17 = vld [vmem:[%s14140_s10 + $0x7c] sm:$0xf0] }
 0x974   :  { %5783 = vmatpush.bf16.msrb.mxu0 %v8604_v37  ;;  %v9323_v37 = vld [vmem:[%s14140_s10 + $0x80] sm:$0xf0] }
 0x9df   :  { %v5135_v12 = vpop.f32.mrf.mxu0  ;;  %v5149_v45 = vpop.f32.mrf.mxu1 }
 0x9e0   :  { %v5150_v39 = vadd.f32 %v5149_v45, %v5135_v12  ;;  %v9316_v12 = vld [vmem:[%s14140_s10 + $0x4c] sm:$0xf]  ;;  %v8557_v45 = vld [vmem:[%s14140_s10 + $0x6c] sm:$0xf0] }
 0x9e6   :  { %v5247_v33 = vpop.f32.mrf.mxu2  ;;  %v5261_v61 = vpop.f32.mrf.mxu3 }
 0x9e7   :  { %v5137_v51 = vpop.f32.mrf.mxu0  ;;  %v5151_v38 = vpop.f32.mrf.mxu1  ;;  %v5248_v53 = vadd.f32 %v5247_v33, %v5150_v39  ;;  %v8556_v33 = vor.u32 %v9320_v48, %v8555_v58  ;;  %v8519_v39 = vld [vmem:[%s14140_s10] sm:$0xf] }
 0x9e8   :  { %v5152_v62 = vadd.f32 %v5151_v38, %v5137_v51  ;;  %v8563_v51 = vld [vmem:[%s14140_s10 + $0x50] sm:$0xf]  ;;  %v9321_v38 = vld [vmem:[%s14140_s10 + $0x70] sm:$0xf0]  ;;  %v8579_v58 = vld [vmem:[%s14140_s10 + $0x60] sm:$0xf] }
 0x9e9   :  { %v5262_v26 = vadd.f32 %v5261_v61, %v5248_v53  ;;  %v9317_v61 = vld [vmem:[%s14140_s10 + $0x54] sm:$0xf] }
 0x9ee   :  { %v5249_v28 = vpop.f32.mrf.mxu2  ;;  %v5263_v46 = vpop.f32.mrf.mxu3 }
 0x9ef   :  { %v5384_v16 = vpop.f32.mrf.mxu0  ;;  %v5398_v9 = vpop.f32.mrf.mxu1  ;;  %v5250_v2 = vadd.f32 %v5249_v28, %v5152_v62  ;;  %v8565_v28 = vld [vmem:[%s14140_s10 + $0x74] sm:$0xf0]  ;;  %v9311_v62 = vld [vmem:[%s14140_s10 + $0x20] sm:$0xf0] }
 0x9f0   :  { %v5399_v55 = vadd.f32 %v5398_v9, %v5384_v16  ;;  %v8560_v9 = vor.u32 %v9316_v12, %v8557_v45  ;;  %v8572_v12 = vor.u32 %v9322_v5, %v8571_v23  ;;  %v9319_v45 = vld [vmem:[%s14140_s10 + $0x64] sm:$0xf]  ;;  %v9374_v5 = vld [vmem:[%s14143_s12 + $0xf8] sm:$0xff] }
 0x9f1   :  { %v5264_v32 = vadd.f32 %v5263_v46, %v5250_v2  ;;  %v8564_v2 = vor.u32 %v9321_v38, %v8563_v51  ;;  %v8568_v46 = vor.u32 %v9317_v61, %v8565_v28  ;;  %v4992_v51 = vld [vmem:[%s14142_s9] sm:$0x1]  ;;  %v8535_v38 = vld [vmem:[%s14140_s10 + $0x10] sm:$0xf]  ;;  %v9313_v61 = vld [vmem:[%s14140_s10 + $0x30] sm:$0xf0] }
 0x9f2   :  { %v13634_v3 = vadd.f32 %v5399_v55, %v5262_v26  ;;  %v9307_v55 = vld [vmem:[%s14140_s10 + $0x4] sm:$0xf]  ;;  %v9312_v26 = vld [vmem:[%s14140_s10 + $0x28] sm:$0xf0] }
 0x9f3   :  { %5784 = vmatpush.bf16.msrb.mxu0 %v8568_v46  ;;  %v8543_v46 = vld [vmem:[%s14140_s10 + $0x18] sm:$0xf]  ;;  %v9363_v23 = vld [vmem:[%s14143_s12 + $0xa0] sm:$0xff] }
 0x9f4   :  { %v5427_v8 = vmul.f32 %v13634_v3, %v13634_v3 }
 0x9f7   :  { %v5386_v52 = vpop.f32.mrf.mxu0  ;;  %v5400_v18 = vpop.f32.mrf.mxu1 }
 0x9f8   :  { %v5401_v15 = vadd.f32 %v5400_v18, %v5386_v52  ;;  %v8521_v52 = vld [vmem:[%s14140_s10 + $0x24] sm:$0xf0] }
 0x9f9   :  { %v8527_v18 = vld [vmem:[%s14140_s10 + $0x8] sm:$0xf]  ;;  %v8524_v6 = vor.u32 %v9307_v55, %v8521_v52  ;;  %v8536_v52 = vor.u32 %v9313_v61, %v8535_v38  ;;  %v9343_v38 = vld [vmem:[%s14143_s12] sm:$0xff] }
 0x9fa   :  { %v13636_v56 = vadd.f32 %v5401_v15, %v5264_v32  ;;  %v9308_v32 = vld [vmem:[%s14140_s10 + $0xc] sm:$0xf]  ;;  %v9367_v61 = vld [vmem:[%s14143_s12 + $0xc0] sm:$0xff] }
 0x9fc   :  { %v5428_v11 = vmul.f32 %v13636_v56, %v13636_v56  ;;  %5421 = vmatpush.msra.mxu2 %v13636_v56 }
 0x9fe   :  { %5422 = vmatpush.msra.mxu2 %v13634_v3  ;;  %5443 = vmatpush.msra.mxu3 %v5428_v11  ;;  %v8520_v11 = vor.u32 %v9311_v62, %v8519_v39  ;;  %v8580_v39 = vor.u32 %v9323_v37, %v8579_v58  ;;  %v9309_v62 = vld [vmem:[%s14140_s10 + $0x14] sm:$0xf]  ;;  %v9372_v37 = vld [vmem:[%s14143_s12 + $0xe8] sm:$0xff] }
 0x9ff   :  { %8515 = vmatmul.msk.f32.vlgmr.msra.gmra.mxu2 %vm393_vm0, %v13432_v29  ;;  %v9361_v58 = vld [vmem:[%s14143_s12 + $0x90] sm:$0xff] }
 0xa00   :  { %5444 = vmatpush.msra.mxu3 %v5427_v8  ;;  %5754 = vmatpush.bf16.msrb.mxu2 %v8632_v30  ;;  %v8529_v8 = vld [vmem:[%s14140_s10 + $0x2c] sm:$0xf0] }
 0xa01   :  { %8516 = vmatmul.msk.f32.vlgmr.msra.gmra.mxu3 %vm393_vm0, %v13432_v29  ;;  %v8627_v29 = vld [vmem:[%s14140_s10 + $0xd8] sm:$0xf] }
 0xa02   :  { %v8628_v1 = vor.u32 %v9338_v0, %v8627_v29  ;;  %5768 = vmatpush.bf16.msrb.mxu3 %v8636_v57  ;;  %v8648_v29 = vor.u32 %v9336_v41, %v8645_v42  ;;  %v8608_v57 = vor.u32 %v9331_v25, %v8607_v7  ;;  %v8659_v41 = vld [vmem:[%s14140_s10 + $0xf8] sm:$0xf]  ;;  %v9342_v42 = vld [vmem:[%s14140_s10 + $0x118] sm:$0xf0]  ;;  %v9349_v7 = vld [vmem:[%s14143_s12 + $0x30] sm:$0xff] }
 0xa03   :  { %v9324_v25 = vld [vmem:[%s14140_s10 + $0x88] sm:$0xf0] }
 0xa04   :  { %5740 = vmatpush.bf16.msrb.mxu1 %v8628_v1  ;;  %5755 = vmatpush.bf16.msrb.mxu2 %v8596_v13  ;;  %v8653_v1 = vld [vmem:[%s14140_s10 + $0x114] sm:$0xf0]  ;;  %v9318_v13 = vld [vmem:[%s14140_s10 + $0x5c] sm:$0xf] }
 0xa05   :  { %v8576_v28 = vor.u32 %v9318_v13, %v8573_v17  ;;  %v9362_v13 = vld [vmem:[%s14143_s12 + $0x98] sm:$0xff]  ;;  %v9353_v17 = vld [vmem:[%s14143_s12 + $0x50] sm:$0xff] }
 0xa06   :  { %5769 = vmatpush.bf16.msrb.mxu3 %v8600_v63 }
 0xa08   :  { %5741 = vmatpush.bf16.msrb.mxu1 %v8592_v59  ;;  %5756 = vmatpush.bf16.msrb.mxu2 %v8560_v9  ;;  %v8617_v59 = vld [vmem:[%s14140_s10 + $0xcc] sm:$0xf0] }
 0xa09   :  { %v8620_v4 = vor.u32 %v9328_v47, %v8617_v59  ;;  %v9355_v59 = vld [vmem:[%s14143_s12 + $0x60] sm:$0xff] }
 0xa0a   :  { %5770 = vmatpush.bf16.msrb.mxu3 %v8564_v2 }
 0xa0c   :  { %5742 = vmatpush.bf16.msrb.mxu1 %v8556_v33  ;;  %5757 = vmatpush.bf16.msrb.mxu2 %v8524_v6  ;;  %v8581_v33 = vld [vmem:[%s14140_s10 + $0x84] sm:$0xf0] }
 0xa0d   :  { %v8584_v2 = vor.u32 %v9319_v45, %v8581_v33  ;;  %v9370_v45 = vld [vmem:[%s14143_s12 + $0xd8] sm:$0xff]  ;;  %v9369_v33 = vld [vmem:[%s14143_s12 + $0xd0] sm:$0xff] }
 0xa10   :  { %5743 = vmatpush.bf16.msrb.mxu1 %v8520_v11  ;;  %5810 = vmatpush.bf16.msra.mxu2 %v8648_v29  ;;  %v9366_v29 = vld [vmem:[%s14143_s12 + $0xb8] sm:$0xff] }
 0xa14   :  { %5796 = vmatpush.bf16.msra.mxu1 %v8644_v40 }
 0xa18   :  { %5797 = vmatpush.bf16.msra.mxu1 %v8608_v57  ;;  %v9315_v57 = vld [vmem:[%s14140_s10 + $0x40] sm:$0xf0] }
 0xa1c   :  { %5798 = vmatpush.bf16.msra.mxu1 %v8572_v12  ;;  %v9371_v12 = vld [vmem:[%s14143_s12 + $0xe0] sm:$0xff] }
 0xa20   :  { %5799 = vmatpush.bf16.msra.mxu1 %v8536_v52  ;;  %v9380_v52 = vld [vmem:[%s14143_s12 + $0x128] sm:$0xff] }
 0xa82   :  { %v5424_v43 = vpop.f32.mrf.mxu2 }
 0xa83   :  { %v13648_v14 = vmul.f32 %v5455_v19, %v5424_v43 }
 0xa84   :  { %v5446_v60 = vpop.f32.mrf.mxu3 }
 0xa85   :  { %v5458_v54 = vmul.f32 %v13648_v14, %v13648_v14  ;;  %v5457_v31 = vmul.f32 %v5455_v19, %v5446_v60  ;;  %v8651_v19 = vld [vmem:[%s14140_s10 + $0xf0] sm:$0xf]  ;;  %v8528_v60 = vor.u32 %v9312_v26, %v8527_v18  ;;  %v9310_v18 = vld [vmem:[%s14140_s10 + $0x1c] sm:$0xf]  ;;  %v8545_v26 = vld [vmem:[%s14140_s10 + $0x3c] sm:$0xf0] }
 0xa86   :  { %v8548_v21 = vor.u32 %v9310_v18, %v8545_v26  ;;  %v9404_v18 = vld [vmem:[%s14143_s12 + $0x1e8] sm:$0xff]  ;;  %v9389_v26 = vld [vmem:[%s14143_s12 + $0x170] sm:$0xff] }
 0xa87   :  { %v5459_v27 = vsub.f32 %v5457_v31, %v5458_v54  ;;  %v8532_v54 = vor.u32 %v9308_v32, %v8529_v8  ;;  %v9341_v31 = vld [vmem:[%s14140_s10 + $0x110] sm:$0xf0]  ;;  %5771 = vmatpush.bf16.msrb.mxu3 %v8528_v60  ;;  %v8623_v60 = vld [vmem:[%s14140_s10 + $0xb0] sm:$0xf] }
 0xa88   :  { %v8652_v0 = vor.u32 %v9341_v31, %v8651_v19  ;;  %v9350_v31 = vld [vmem:[%s14143_s12 + $0x38] sm:$0xff] }
 0xa89   :  { %v13652_v20 = vadd.f32 1e-05, %v5459_v27  ;;  %v9337_v27 = vld [vmem:[%s14140_s10 + $0xf4] sm:$0xf]  ;;  %5785 = vmatpush.bf16.msrb.mxu0 %v8532_v54 }
 0xa8a   :  { %v8656_v36 = vor.u32 %v9337_v27, %v8653_v1  ;;  %v9333_v54 = vld [vmem:[%s14140_s10 + $0xd0] sm:$0xf0]  ;;  %v9358_v27 = vld [vmem:[%s14143_s12 + $0x78] sm:$0xff]  ;;  %v8587_v1 = vld [vmem:[%s14140_s10 + $0x68] sm:$0xf] }
 0xa8b   :  { %9427 = vrsqrt.f32 %v13652_v20  ;;  %vm5467_vm0 = vweird.f32 %v13652_v20  ;;  %5824 = vmatpush.bf16.msra.mxu3 %v8652_v0  ;;  %v8624_v0 = vor.u32 %v9333_v54, %v8623_v60  ;;  %v9376_v60 = vld [vmem:[%s14143_s12 + $0x108] sm:$0xff] }
 0xa8c   :  { %v9400_v54 = vld [vmem:[%s14143_s12 + $0x1c8] sm:$0xff] }
 0xa8d   :  { %5838 = vmatpush.bf16.msra.mxu0 %v8656_v36  ;;  %v8588_v36 = vor.u32 %v9324_v25, %v8587_v1  ;;  %v9399_v25 = vld [vmem:[%s14143_s12 + $0x1c0] sm:$0xff] }
 0xa8f   :  { %5825 = vmatpush.bf16.msra.mxu3 %v8616_v44  ;;  %v9354_v44 = vld [vmem:[%s14143_s12 + $0x58] sm:$0xff] }
 0xa91   :  { %v13724_v16 = vpop.eup %9427  ;;  %5839 = vmatpush.bf16.msra.mxu0 %v8620_v4  ;;  %v9345_v4 = vld [vmem:[%s14143_s12 + $0x10] sm:$0xff] }
 0xa92   :  { %v5462_v53 = vmul.f32 %v13724_v16, %v13652_v20  ;;  %vm5468_vm15 = vweird.f32 %v13724_v16  ;;  %v8612_v20 = vor.u32 %v9327_v24, %v8609_v34  ;;  %v8551_v24 = vld [vmem:[%s14140_s10 + $0x20] sm:$0xf]  ;;  %v9348_v34 = vld [vmem:[%s14143_s12 + $0x28] sm:$0xff] }
 0xa93   :  { %vm5469_vm1 = vmor %vm5467_vm0, %vm5468_vm15  ;;  %5826 = vmatpush.bf16.msra.mxu3 %v8580_v39  ;;  %v8552_v47 = vor.u32 %v9315_v57, %v8551_v24  ;;  %v9360_v39 = vld [vmem:[%s14143_s12 + $0x88] sm:$0xff] }
 0xa94   :  { %v5463_v15 = vmul.f32 %v13724_v16, %v5462_v53  ;;  %5811 = vmatpush.bf16.msra.mxu2 %v8612_v20  ;;  %v8537_v53 = vld [vmem:[%s14140_s10 + $0x34] sm:$0xf0]  ;;  %v9392_v24 = vld [vmem:[%s14143_s12 + $0x188] sm:$0xff] }
 0xa95   :  { %v8540_v32 = vor.u32 %v9309_v62, %v8537_v53  ;;  %5840 = vmatpush.bf16.msra.mxu0 %v8584_v2  ;;  %v9346_v20 = vld [vmem:[%s14143_s12 + $0x18] sm:$0xff]  ;;  %v9381_v62 = vld [vmem:[%s14143_s12 + $0x130] sm:$0xff]  ;;  %v9351_v2 = vld [vmem:[%s14143_s12 + $0x40] sm:$0xff] }
 0xa96   :  { %v5464_v43 = vmul.f32 0.5, %v5463_v15  ;;  %v9405_v53 = vld [vmem:[%s14143_s12 + $0x1f0] sm:$0xff] }
 0xa98   :  { %v5465_v30 = vsub.f32 1.5, %v5464_v43  ;;  %5812 = vmatpush.bf16.msra.mxu2 %v8576_v28  ;;  %v8660_v43 = vor.u32 %v9342_v42, %v8659_v41  ;;  %v9352_v28 = vld [vmem:[%s14143_s12 + $0x48] sm:$0xff]  ;;  %v9395_v41 = vld [vmem:[%s14143_s12 + $0x1a0] sm:$0xff]  ;;  %v9377_v42 = vld [vmem:[%s14143_s12 + $0x110] sm:$0xff] }
 0xa99   :  { %5841 = vmatpush.bf16.msra.mxu0 %v8548_v21  ;;  %v9378_v21 = vld [vmem:[%s14143_s12 + $0x118] sm:$0xff] }
 0xa9a   :  { %v5466_v50 = vmul.f32 %v13724_v16, %v5465_v30  ;;  %v9365_v30 = vld [vmem:[%s14143_s12 + $0xb0] sm:$0xff] }
 0xa9c   :  { %v5470_v63 = vsel %vm5469_vm1, %v13724_v16, %v5466_v50  ;;  %5813 = vmatpush.bf16.msra.mxu2 %v8540_v32  ;;  %v9347_v50 = vld [vmem:[%s14143_s12 + $0x20] sm:$0xff]  ;;  %v9397_v32 = vld [vmem:[%s14143_s12 + $0x1b0] sm:$0xff] }
 0xa9d   :  { %v5471_v48 = vmul.f32 %v5470_v63, %v4991_v22  ;;  %v9357_v22 = vld [vmem:[%s14143_s12 + $0x70] sm:$0xff] }
 0xa9e   :  { %v9373_v63 = vld [vmem:[%s14143_s12 + $0xf0] sm:$0xff] }
 0xa9f   :  { %v5472_v16 = vmul.f32 %v5471_v48, %v13648_v14  ;;  %v5475_v9 = vperm.slane %v5471_v48, 0  ;;  %v9314_v14 = vld [vmem:[%s14140_s10 + $0x38] sm:$0xf0]  ;;  %v9344_v48 = vld [vmem:[%s14143_s12 + $0x8] sm:$0xff] }
 0xaa0   :  { %v8544_v49 = vor.u32 %v9314_v14, %v8543_v46  ;;  %v9359_v46 = vld [vmem:[%s14143_s12 + $0x80] sm:$0xff]  ;;  %v9390_v14 = vld [vmem:[%s14143_s12 + $0x178] sm:$0xff] }
 0xaa1   :  { %v5473_v55 = vsub.f32 %v4992_v51, %v5472_v16  ;;  %v5477_v15 = vmul.f32 %v5475_v9, %v13634_v3  ;;  %v5478_v11 = vmul.f32 %v5475_v9, %v13636_v56  ;;  %v9368_v51 = vld [vmem:[%s14143_s12 + $0xc8] sm:$0xff]  ;;  %v9382_v16 = vld [vmem:[%s14143_s12 + $0x138] sm:$0xff] }
 0xaa2   :  { %5827 = vmatpush.bf16.msra.mxu3 %v8544_v49  ;;  %v9406_v9 = vld [vmem:[%s14143_s12 + $0x1f8] sm:$0xff]  ;;  %v9396_v49 = vld [vmem:[%s14143_s12 + $0x1a8] sm:$0xff] }
 0xaa3   :  { %v5480_v8 = vperm.slane %v5473_v55, 0  ;;  %v9398_v55 = vld [vmem:[%s14143_s12 + $0x1b8] sm:$0xff] }
 0xaa5   :  { %v5482_v6 = vadd.f32 %v5480_v8, %v5477_v15  ;;  %v5483_v40 = vadd.f32 %v5480_v8, %v5478_v11  ;;  %v9379_v15 = vld [vmem:[%s14143_s12 + $0x120] sm:$0xff]  ;;  %v9388_v8 = vld [vmem:[%s14143_s12 + $0x168] sm:$0xff] }
 0xaa6   :  { %v9403_v11 = vld [vmem:[%s14143_s12 + $0x1e0] sm:$0xff] }
 0xaa7   :  { %v5484_v3 = vmax.f32 %v5482_v6, 0.0  ;;  %v5485_v19 = vmax.f32 %v5483_v40, 0.0  ;;  %v9402_v6 = vld [vmem:[%s14143_s12 + $0x1d8] sm:$0xff]  ;;  %v9387_v40 = vld [vmem:[%s14143_s12 + $0x160] sm:$0xff] }
 0xaa9   :  { %v13873_v56 = vpack.c.bf16 %v5485_v19, %v5484_v3  ;;  %v9401_v3 = vld [vmem:[%s14143_s12 + $0x1d0] sm:$0xff]  ;;  %v9386_v19 = vld [vmem:[%s14143_s12 + $0x158] sm:$0xff] }
 0xaab   :  { %8661 = vmatmul.msk.bf16.vlgmr.msrb.gmra.mxu1 %vm3407_vm7, %v13873_v56  ;;  %8662 = vmatmul.msk.bf16.vlgmr.msrb.gmra.mxu2 %vm3407_vm7, %v13873_v56 }
 0xaac   :  { %8663 = vmatmul.msk.bf16.vlgmr.msrb.gmra.mxu3 %vm3407_vm7, %v13873_v56  ;;  %8664 = vmatmul.msk.bf16.vlgmr.msrb.gmra.mxu0 %vm3407_vm7, %v13873_v56 }
 0xaad   :  { %5852 = vmatpush.bf16.msrb.mxu1 %v8660_v43  ;;  %6453 = vmatpush.bf16.msrb.mxu2 %v9350_v31  ;;  %v14076_v43 = vld [vmem:[%s14139_s11] sm:$0xff]  ;;  %v9385_v31 = vld [vmem:[%s14143_s12 + $0x150] sm:$0xff] }
 0xaae   :  { %6467 = vmatpush.bf16.msrb.mxu3 %v9358_v27  ;;  %6481 = vmatpush.bf16.msrb.mxu0 %v9366_v29  ;;  %v9393_v29 = vld [vmem:[%s14143_s12 + $0x190] sm:$0xff] }
 0xab1   :  { %5853 = vmatpush.bf16.msrb.mxu1 %v8624_v0  ;;  %6454 = vmatpush.bf16.msrb.mxu2 %v9349_v7  ;;  %v5531_v0 = vperm.slane %v14076_v43, 0  ;;  %v9375_v7 = vld [vmem:[%s14143_s12 + $0x100] sm:$0xff] }
 0xab2   :  { %6468 = vmatpush.bf16.msrb.mxu3 %v9357_v22  ;;  %6482 = vmatpush.bf16.msrb.mxu0 %v9365_v30  ;;  %v5534_v22 = vperm.slane %v14076_v43, 3 }
 0xab5   :  { %5854 = vmatpush.bf16.msrb.mxu1 %v8588_v36  ;;  %6455 = vmatpush.bf16.msrb.mxu2 %v9348_v34  ;;  %v9384_v36 = vld [vmem:[%s14143_s12 + $0x148] sm:$0xff] }
 0xab6   :  { %6469 = vmatpush.bf16.msrb.mxu3 %v9356_v10  ;;  %6483 = vmatpush.bf16.msrb.mxu0 %v9364_v35  ;;  %v5532_v10 = vperm.slane %v14076_v43, 1 }
 0xab9   :  { %5855 = vmatpush.bf16.msrb.mxu1 %v8552_v47  ;;  %6456 = vmatpush.bf16.msrb.mxu2 %v9347_v50  ;;  %v9383_v47 = vld [vmem:[%s14143_s12 + $0x140] sm:$0xff] }
 0xaba   :  { %6470 = vmatpush.bf16.msrb.mxu3 %v9355_v59  ;;  %6484 = vmatpush.bf16.msrb.mxu0 %v9363_v23  ;;  %v9391_v50 = vld [vmem:[%s14143_s12 + $0x180] sm:$0xff]  ;;  %v5533_v59 = vperm.slane %v14076_v43, 2 }
 0xabb   :  { %8665 = vmatmul.msk.bf16.vlgmr.msra.gmra.mxu1 %vm3407_vm7, %v13873_v56  ;;  %8666 = vmatmul.msk.bf16.vlgmr.msra.gmra.mxu2 %vm3407_vm7, %v13873_v56 }
 0xabc   :  { %8667 = vmatmul.msk.bf16.vlgmr.msra.gmra.mxu3 %vm3407_vm7, %v13873_v56  ;;  %8668 = vmatmul.msk.bf16.vlgmr.msra.gmra.mxu0 %vm3407_vm7, %v13873_v56 }
 0xabd   :  { %6495 = vmatpush.bf16.msra.mxu1 %v9374_v5  ;;  %6457 = vmatpush.bf16.msrb.mxu2 %v9346_v20 }
 0xabe   :  { %6471 = vmatpush.bf16.msrb.mxu3 %v9354_v44  ;;  %6485 = vmatpush.bf16.msrb.mxu0 %v9362_v13 }
 0xac1   :  { %6496 = vmatpush.bf16.msra.mxu1 %v9373_v63  ;;  %6458 = vmatpush.bf16.msrb.mxu2 %v9345_v4 }
 0xac2   :  { %6472 = vmatpush.bf16.msrb.mxu3 %v9353_v17  ;;  %6486 = vmatpush.bf16.msrb.mxu0 %v9361_v58 }
 0xac5   :  { %6497 = vmatpush.bf16.msra.mxu1 %v9372_v37  ;;  %6459 = vmatpush.bf16.msrb.mxu2 %v9344_v48 }
 0xac6   :  { %6473 = vmatpush.bf16.msrb.mxu3 %v9352_v28  ;;  %6487 = vmatpush.bf16.msrb.mxu0 %v9360_v39 }
 0xac9   :  { %6498 = vmatpush.bf16.msra.mxu1 %v9371_v12  ;;  %6460 = vmatpush.bf16.msrb.mxu2 %v9343_v38 }
 0xaca   :  { %6474 = vmatpush.bf16.msrb.mxu3 %v9351_v2  ;;  %6488 = vmatpush.bf16.msrb.mxu0 %v9359_v46 }
 0xacb   :  { %8669 = vmatmul.msk.bf16.vlgmr.msrb.gmra.mxu1 %vm3407_vm7, %v13873_v56  ;;  %v9394_v56 = vld [vmem:[%s14143_s12 + $0x198] sm:$0xff]  ;;  %vm6449_vm7 = vcmask 1043456  }
 0xacd   :  { %6499 = vmatpush.bf16.msra.mxu1 %v9370_v45  ;;  %6509 = vmatpush.bf16.msra.mxu2 %v9382_v16  ;;  %v6053_v16 = vld [vmem:[%s14143_s12 + $0x200] sm:$0xf] }
 0xace   :  { %6523 = vmatpush.bf16.msra.mxu3 %v9390_v14  ;;  %6537 = vmatpush.bf16.msra.mxu0 %v9398_v55 }
 0xad1   :  { %6500 = vmatpush.bf16.msra.mxu1 %v9369_v33  ;;  %6510 = vmatpush.bf16.msra.mxu2 %v9381_v62 }
 0xad2   :  { %6524 = vmatpush.bf16.msra.mxu3 %v9389_v26  ;;  %6538 = vmatpush.bf16.msra.mxu0 %v9397_v32  ;;  %v5538_v32 = vperm.slane %v14076_v43, 7 }
 0xad5   :  { %6501 = vmatpush.bf16.msra.mxu1 %v9368_v51  ;;  %6511 = vmatpush.bf16.msra.mxu2 %v9380_v52 }
 0xad6   :  { %6525 = vmatpush.bf16.msra.mxu3 %v9388_v8  ;;  %6539 = vmatpush.bf16.msra.mxu0 %v9396_v49 }
 0xad9   :  { %6502 = vmatpush.bf16.msra.mxu1 %v9367_v61  ;;  %6512 = vmatpush.bf16.msra.mxu2 %v9379_v15  ;;  %v5535_v61 = vperm.slane %v14076_v43, 4 }
 0xada   :  { %6526 = vmatpush.bf16.msra.mxu3 %v9387_v40  ;;  %6540 = vmatpush.bf16.msra.mxu0 %v9395_v41 }
 0xadd   :  { %6551 = vmatpush.bf16.msrb.mxu1 %v9406_v9  ;;  %6513 = vmatpush.bf16.msra.mxu2 %v9378_v21 }
 0xade   :  { %6527 = vmatpush.bf16.msra.mxu3 %v9386_v19  ;;  %6541 = vmatpush.bf16.msra.mxu0 %v9394_v56  ;;  %v5536_v19 = vperm.slane %v14076_v43, 5 }
 0xae1   :  { %6552 = vmatpush.bf16.msrb.mxu1 %v9405_v53  ;;  %6514 = vmatpush.bf16.msra.mxu2 %v9377_v42  ;;  %v6315_v53 = vunpack.c.l.b16 %v6053_v16 }
 0xae2   :  { %6528 = vmatpush.bf16.msra.mxu3 %v9385_v31  ;;  %6542 = vmatpush.bf16.msra.mxu0 %v9393_v29 }
 0xae5   :  { %6553 = vmatpush.bf16.msrb.mxu1 %v9404_v18  ;;  %6515 = vmatpush.bf16.msra.mxu2 %v9376_v60  ;;  %v6380_v18 = vpack.c.b16 %v6315_v53, %v6315_v53  ;;  %v5537_v60 = vperm.slane %v14076_v43, 6  ;;  %v9416_v53 = vld [vmem:[%s14144_s13] ss:$0 sm:$0xff] }
 0xae6   :  { %6529 = vmatpush.bf16.msra.mxu3 %v9384_v36  ;;  %6543 = vmatpush.bf16.msra.mxu0 %v9392_v24 }
 0xae7   :  { %v6451_v8 = vsel %vm6449_vm7, %v6380_v18, 0 }
 0xae9   :  { %6554 = vmatpush.bf16.msrb.mxu1 %v9403_v11  ;;  %6516 = vmatpush.bf16.msra.mxu2 %v9375_v7 }
 0xaea   :  { %6530 = vmatpush.bf16.msra.mxu3 %v9383_v47  ;;  %6544 = vmatpush.bf16.msra.mxu0 %v9391_v50 }
 0xaed   :  { %6555 = vmatpush.bf16.msrb.mxu1 %v9402_v6 }
 0xaf1   :  { %6556 = vmatpush.bf16.msrb.mxu1 %v9401_v3 }
 0xaf5   :  { %6557 = vmatpush.bf16.msrb.mxu1 %v9400_v54 }
 0xaf9   :  { %6558 = vmatpush.bf16.msrb.mxu1 %v9399_v25 }
 0xb28   :  { %v5745_v27 = vpop.f32.mrf.mxu1 }
 0xb29   :  { %v5787_v1 = vpop.f32.mrf.mxu0  ;;  %v5746_v30 = vadd.f32 %v5745_v27, %v5531_v0 }
 0xb2a   :  { %v5788_v34 = vadd.f32 %v5787_v1, %v5534_v22 }
 0xb2b   :  { %v5880_v5 = vmul.f32 0.01, %v5746_v30  ;;  %vm5862_vm2 = vcmp.ge.f32.partialorder %v5746_v30, 0.0 }
 0xb2c   :  { %v5883_v13 = vmul.f32 0.01, %v5788_v34  ;;  %vm5865_vm3 = vcmp.ge.f32.partialorder %v5788_v34, 0.0 }
 0xb2d   :  { %v5898_v48 = vsel %vm5862_vm2, %v5746_v30, %v5880_v5 }
 0xb2e   :  { %v5759_v57 = vpop.f32.mrf.mxu2  ;;  %v5901_v45 = vsel %vm5865_vm3, %v5788_v34, %v5883_v13  ;;  %v9415_v13 = vld [vmem:[%s14139_s11 + $0x8] ss:$0 sm:$0xff] }
 0xb2f   :  { %v5773_v35 = vpop.f32.mrf.mxu3  ;;  %v5760_v4 = vadd.f32 %v5759_v57, %v5532_v10 }
 0xb30   :  { %v5747_v23 = vpop.f32.mrf.mxu1  ;;  %v5774_v58 = vadd.f32 %v5773_v35, %v5533_v59 }
 0xb31   :  { %v5748_v20 = vadd.f32 %v5747_v23, %v5531_v0  ;;  %v5789_v44 = vpop.f32.mrf.mxu0  ;;  %v5881_v9 = vmul.f32 0.01, %v5760_v4  ;;  %vm5863_vm6 = vcmp.ge.f32.partialorder %v5760_v4, 0.0 }
 0xb32   :  { %v5790_v63 = vadd.f32 %v5789_v44, %v5534_v22  ;;  %v5882_v2 = vmul.f32 0.01, %v5774_v58  ;;  %vm5864_vm8 = vcmp.ge.f32.partialorder %v5774_v58, 0.0 }
 0xb33   :  { %vm5871_vm4 = vcmp.ge.f32.partialorder %v5748_v20, 0.0  ;;  %v5889_v17 = vmul.f32 0.01, %v5748_v20  ;;  %v5899_v15 = vsel %vm5863_vm6, %v5760_v4, %v5881_v9 }
 0xb34   :  { %vm5874_vm5 = vcmp.ge.f32.partialorder %v5790_v63, 0.0  ;;  %v5892_v37 = vmul.f32 0.01, %v5790_v63  ;;  %v5900_v49 = vsel %vm5864_vm8, %v5774_v58, %v5882_v2 }
 0xb35   :  { %v5907_v12 = vsel %vm5871_vm4, %v5748_v20, %v5889_v17 }
 0xb36   :  { %v5916_v33 = vpack.c.bf16 %v5907_v12, %v5898_v48  ;;  %v5910_v51 = vsel %vm5874_vm5, %v5790_v63, %v5892_v37  ;;  %v5761_v38 = vpop.f32.mrf.mxu2  ;;  %vm6445_vm5 = vcmask 64512  }
 0xb37   :  { %v5919_v28 = vpack.c.bf16 %v5910_v51, %v5901_v45  ;;  %v5762_v39 = vadd.f32 %v5761_v38, %v5532_v10  ;;  %v5775_v62 = vpop.f32.mrf.mxu3 }
 0xb38   :  { %v5776_v46 = vadd.f32 %v5775_v62, %v5533_v59  ;;  %v5801_v14 = vpop.f32.mrf.mxu1  ;;  %6461 = vmatmul.bf16.vlgmr.msrb.gmra.mxu2 %v5916_v33 }
 0xb39   :  { %vm5872_vm9 = vcmp.ge.f32.partialorder %v5762_v39, 0.0  ;;  %v5890_v55 = vmul.f32 0.01, %v5762_v39  ;;  %v5843_v52 = vpop.f32.mrf.mxu0  ;;  %6503 = vmatmul.bf16.vlgmr.msra.gmra.mxu1 %v5919_v28  ;;  %6572 = vmatpush.bf16.msrb.mxu2 %v6451_v8  ;;  %v5802_v41 = vadd.f32 %v5801_v14, %v5535_v61 }
 0xb3a   :  { %vm5873_vm10 = vcmp.ge.f32.partialorder %v5776_v46, 0.0  ;;  %v5891_v26 = vmul.f32 0.01, %v5776_v46  ;;  %v5844_v42 = vadd.f32 %v5843_v52, %v5538_v32 }
 0xb3b   :  { %v5908_v11 = vsel %vm5872_vm9, %v5762_v39, %v5890_v55  ;;  %v5884_v31 = vmul.f32 0.01, %v5802_v41  ;;  %vm5866_vm11 = vcmp.ge.f32.partialorder %v5802_v41, 0.0 }
 0xb3c   :  { %v5917_v21 = vpack.c.bf16 %v5908_v11, %v5899_v15  ;;  %v5909_v6 = vsel %vm5873_vm10, %v5776_v46, %v5891_v26  ;;  %v5887_v0 = vmul.f32 0.01, %v5844_v42  ;;  %vm5869_vm12 = vcmp.ge.f32.partialorder %v5844_v42, 0.0 }
 0xb3d   :  { %v5918_v40 = vpack.c.bf16 %v5909_v6, %v5900_v49  ;;  %v5902_v36 = vsel %vm5866_vm11, %v5802_v41, %v5884_v31 }
 0xb3e   :  { %v5815_v3 = vpop.f32.mrf.mxu2  ;;  %6475 = vmatmul.bf16.vlgmr.msrb.gmra.mxu3 %v5917_v21  ;;  %v5905_v34 = vsel %vm5869_vm12, %v5844_v42, %v5887_v0 }
 0xb3f   :  { %v5829_v56 = vpop.f32.mrf.mxu3  ;;  %6489 = vmatmul.bf16.vlgmr.msrb.gmra.mxu0 %v5918_v40  ;;  %v5816_v7 = vadd.f32 %v5815_v3, %v5536_v19 }
 0xb40   :  { %v5803_v54 = vpop.f32.mrf.mxu1  ;;  %v5830_v22 = vadd.f32 %v5829_v56, %v5537_v60 }
 0xb41   :  { %v5804_v27 = vadd.f32 %v5803_v54, %v5535_v61  ;;  %v5845_v29 = vpop.f32.mrf.mxu0  ;;  %v5885_v35 = vmul.f32 0.01, %v5816_v7  ;;  %vm5867_vm15 = vcmp.ge.f32.partialorder %v5816_v7, 0.0 }
 0xb42   :  { %v5846_v1 = vadd.f32 %v5845_v29, %v5538_v32  ;;  %v5886_v23 = vmul.f32 0.01, %v5830_v22  ;;  %vm5868_vm0 = vcmp.ge.f32.partialorder %v5830_v22, 0.0 }
 0xb43   :  { %vm5875_vm13 = vcmp.ge.f32.partialorder %v5804_v27, 0.0  ;;  %v5893_v25 = vmul.f32 0.01, %v5804_v27  ;;  %v5903_v4 = vsel %vm5867_vm15, %v5816_v7, %v5885_v35 }
 0xb44   :  { %vm5878_vm14 = vcmp.ge.f32.partialorder %v5846_v1, 0.0  ;;  %v5896_v30 = vmul.f32 0.01, %v5846_v1  ;;  %v5904_v58 = vsel %vm5868_vm0, %v5830_v22, %v5886_v23 }
 0xb45   :  { %v5911_v24 = vsel %vm5875_vm13, %v5804_v27, %v5893_v25 }
 0xb46   :  { %v5920_v57 = vpack.c.bf16 %v5911_v24, %v5902_v36  ;;  %v5914_v10 = vsel %vm5878_vm14, %v5846_v1, %v5896_v30  ;;  %v5817_v43 = vpop.f32.mrf.mxu2 }
 0xb47   :  { %v5923_v47 = vpack.c.bf16 %v5914_v10, %v5905_v34  ;;  %v5818_v50 = vadd.f32 %v5817_v43, %v5536_v19  ;;  %v5831_v59 = vpop.f32.mrf.mxu3 }
 0xb48   :  { %v5832_v5 = vadd.f32 %v5831_v59, %v5537_v60  ;;  %v5857_v20 = vpop.f32.mrf.mxu1  ;;  %6517 = vmatmul.bf16.vlgmr.msra.gmra.mxu2 %v5920_v57 }
 0xb49   :  { %vm5876_vm1 = vcmp.ge.f32.partialorder %v5818_v50, 0.0  ;;  %v5894_v44 = vmul.f32 0.01, %v5818_v50  ;;  %6559 = vmatmul.bf16.vlgmr.msrb.gmra.mxu1 %v5923_v47  ;;  %v5858_v45 = vadd.f32 %v9415_v13, %v5857_v20 }
 0xb4a   :  { %vm5877_vm2 = vcmp.ge.f32.partialorder %v5832_v5, 0.0  ;;  %v5895_v63 = vmul.f32 0.01, %v5832_v5 }
 0xb4b   :  { %v5912_v17 = vsel %vm5876_vm1, %v5818_v50, %v5894_v44  ;;  %v5888_v51 = vmul.f32 0.01, %v5858_v45  ;;  %vm5870_vm3 = vcmp.ge.f32.partialorder %v5858_v45, 0.0 }
 0xb4c   :  { %v5921_v37 = vpack.c.bf16 %v5912_v17, %v5903_v4  ;;  %v5913_v48 = vsel %vm5877_vm2, %v5832_v5, %v5895_v63 }
 0xb4d   :  { %v5922_v12 = vpack.c.bf16 %v5913_v48, %v5904_v58  ;;  %v5906_v16 = vsel %vm5870_vm3, %v5858_v45, %v5888_v51 }
 0xb4e   :  { %6531 = vmatmul.bf16.vlgmr.msra.gmra.mxu3 %v5921_v37 }
 0xb4f   :  { %6545 = vmatmul.bf16.vlgmr.msra.gmra.mxu0 %v5922_v12 }
 0xb50   :  { %v5859_v33 = vpop.f32.mrf.mxu1 }
 0xb51   :  { %v5860_v38 = vadd.f32 %v9415_v13, %v5859_v33 }
 0xb53   :  { %vm5879_vm4 = vcmp.ge.f32.partialorder %v5860_v38, 0.0  ;;  %v5897_v61 = vmul.f32 0.01, %v5860_v38 }
 0xb55   :  { %v5915_v9 = vsel %vm5879_vm4, %v5860_v38, %v5897_v61 }
 0xb56   :  { %v5924_v28 = vpack.c.bf16 %v5915_v9, %v5906_v16 }
 0xb58   :  { %8926 = vmatmul.msk.bf16.vlgmr.msrb.gmra.mxu2 %vm6445_vm5, %v5924_v28 }
 0xbb6   :  { %v6504_v46 = vpop.f32.mrf.mxu1 }
 0xbbb   :  { %v6462_v39 = vpop.f32.mrf.mxu2 }
 0xbbc   :  { %v6490_v62 = vpop.f32.mrf.mxu0  ;;  %v6463_v55 = vadd.f32 %v9416_v53, %v6462_v39 }
 0xbbe   :  { %v6506_v8 = vpop.f32.mrf.mxu1 }
 0xbc1   :  { %v6476_v2 = vpop.f32.mrf.mxu3 }
 0xbc2   :  { %v6477_v52 = vadd.f32 %v6476_v2, %v6463_v55 }
 0xbc3   :  { %v6464_v14 = vpop.f32.mrf.mxu2 }
 0xbc4   :  { %v6492_v18 = vpop.f32.mrf.mxu0  ;;  %v6491_v32 = vadd.f32 %v6490_v62, %v6477_v52  ;;  %v6465_v11 = vadd.f32 %v9416_v53, %v6464_v14 }
 0xbc6   :  { %v6505_v21 = vadd.f32 %v6504_v46, %v6491_v32  ;;  %v6560_v54 = vpop.f32.mrf.mxu1 }
 0xbc9   :  { %v6478_v26 = vpop.f32.mrf.mxu3 }
 0xbca   :  { %v6479_v49 = vadd.f32 %v6478_v26, %v6465_v11 }
 0xbcb   :  { %v6518_v15 = vpop.f32.mrf.mxu2 }
 0xbcc   :  { %v6519_v6 = vadd.f32 %v6518_v15, %v6505_v21  ;;  %v6493_v41 = vadd.f32 %v6492_v18, %v6479_v49  ;;  %v6546_v3 = vpop.f32.mrf.mxu0 }
 0xbce   :  { %v6507_v60 = vadd.f32 %v6506_v8, %v6493_v41  ;;  %v6562_v30 = vpop.f32.mrf.mxu1 }
 0xbd1   :  { %v6532_v40 = vpop.f32.mrf.mxu3 }
 0xbd2   :  { %v6533_v42 = vadd.f32 %v6532_v40, %v6519_v6 }
 0xbd3   :  { %v6520_v19 = vpop.f32.mrf.mxu2 }
 0xbd4   :  { %v6547_v56 = vadd.f32 %v6546_v3, %v6533_v42  ;;  %v6521_v31 = vadd.f32 %v6520_v19, %v6507_v60  ;;  %v6548_v25 = vpop.f32.mrf.mxu0 }
 0xbd6   :  { %v6561_v0 = vadd.f32 %v6560_v54, %v6547_v56 }
 0xbd9   :  { %v6534_v27 = vpop.f32.mrf.mxu3 }
 0xbda   :  { %v6535_v29 = vadd.f32 %v6534_v27, %v6521_v31 }
 0xbdb   :  { %v6574_v1 = vpop.f32.mrf.mxu2 }
 0xbdc   :  { %v6575_v7 = vadd.f32 %v6574_v1, %v6561_v0  ;;  %v6549_v22 = vadd.f32 %v6548_v25, %v6535_v29 }
 0xbde   :  { %6579 = vst [vmem:[%s14145_s14] sm:$0xff] %v6575_v7  ;;  %v6563_v36 = vadd.f32 %v6562_v30, %v6549_v22 }
 0xbe3   :  { %v6576_v24 = vpop.f32.mrf.mxu2 }
 0xbe4   :  { %v6577_v34 = vadd.f32 %v6576_v24, %v6563_v36 }
 0xbe6   :  { %6580 = vst [vmem:[%s14145_s14 + $0x8] sm:$0xff] %v6577_v34 }

</bundles_post_ra>
